<compile_context>
chip_gen: v7x
topology: tpu7x:2x2x1
jax: 0.10.0
libtpu: 0.0.40
codegen_flags: <defaults>
</compile_context>

<pallas_src>
import jax
import jax.numpy as jnp
from jax import lax
from jax.experimental import pallas as pl
from jax.experimental.pallas import tpu as pltpu

# Rows of the packed (NUM_VEC, Cp) per-channel vector table handed to the kernel.
_B_DW, _A_DW, _B_PW = 0, 1, 2   # per-stage offsets (depthwise bias / PReLU / 1x1 bias)
_A_BLOCK = 9                    # shared block-level PReLU (gc params, "placed" twice)
_NUM_VEC = 10


def _round_up(v, m):
    return (v + m - 1) // m * m


def _make_block_kernel(*, H, W, TH, Cp, K, m1, m2):
    p = K // 2
    PADH = 3 * p              # row halo: three chained KxK convs
    WPAD = m1 + p             # column zero-padding added by the wrapper
    dm = m1 - m2
    h1, w1 = TH + 4 * p, W + 2 * m1   # region over which x1 is produced
    h2, w2 = TH + 2 * p, W + 2 * m2   # region over which x2 is produced
    RH = TH + 2 * PADH                # slab rows fetched per grid step

    def kernel(x_hbm, wdw_ref, wpw_ref, vec_ref, o_ref, slab, sem):
        n = pl.program_id(0)
        t = pl.program_id(1)
        row0 = t * TH   # first slab row, in padded-image row coordinates

        # Manually DMA the overlapping input slab (tile rows + halo) HBM -> VMEM.
        copy_in = pltpu.make_async_copy(
            x_hbm.at[n, pl.ds(row0, RH)], slab, sem.at[0])
        copy_in.start()
        copy_in.wait()

        xv = slab[...].astype(jnp.float32)        # (RH, W+2*WPAD, Cp)
        vec = vec_ref[...].astype(jnp.float32)    # (_NUM_VEC, Cp), hoisted
        a_blk = vec[_A_BLOCK]

        def convdw(field, idx, r0, c0, h, w):
            """One Convdw stage: depthwise KxK + bias + PReLU + placed 1x1 + bias.

            Output region = field[r0:r0+h, c0:c0+w, :]; taps read +/- p around it.
            """
            wk = wdw_ref[idx].astype(jnp.float32)             # (K, K, Cp), hoisted
            acc = jnp.zeros((h, w, Cp), jnp.float32)
            for ky in range(K):
                for kx in range(K):
                    acc = acc + (
                        field[r0 - p + ky:r0 - p + ky + h,
                              c0 - p + kx:c0 - p + kx + w, :] * wk[ky, kx, :])
            acc = acc + vec[3 * idx + _B_DW]
            a_dw = vec[3 * idx + _A_DW]
            acc = jnp.where(acc > 0, acc, a_dw * acc)         # Convdw-internal PReLU
            wm = wpw_ref[idx]                                 # (Cp, Cp), MXU dtype
            y = jnp.dot(acc.reshape(h * w, Cp).astype(wm.dtype), wm,
                        preferred_element_type=jnp.float32)
            return y.reshape(h, w, Cp) + vec[3 * idx + _B_PW]

        def inside_image(sr, sc, h, w):
            """Mask of positions (region starting at slab (sr, sc)) inside the image."""
            ri = lax.broadcasted_iota(jnp.int32, (h, w, 1), 0)
            ci = lax.broadcasted_iota(jnp.int32, (h, w, 1), 1)
            gr = row0 + sr - PADH + ri
            gcl = sc - WPAD + ci
            return (gr >= 0) & (gr < H) & (gcl >= 0) & (gcl < W)

        # stage 1: x1 = block_prelu(conv1(x)); lives in channels [nf, nf+gc).
        y1 = convdw(xv, 0, p, p, h1, w1)
        y1 = jnp.where(y1 > 0, y1, a_blk * y1)
        y1 = jnp.where(inside_image(p, p, h1, w1), y1, 0.0)
        cat2 = xv[p:p + h1, p:p + w1, :] + y1        # [x | x1 | 0 ...]

        # stage 2: x2 = block_prelu(conv2(cat(x, x1))); channels [nf+gc, nf+2gc).
        y2 = convdw(cat2, 1, p, dm, h2, w2)
        y2 = jnp.where(y2 > 0, y2, a_blk * y2)
        y2 = jnp.where(inside_image(2 * p, p + dm, h2, w2), y2, 0.0)
        cat3 = cat2[p:p + h2, dm:dm + w2, :] + y2    # [x | x1 | x2 | 0 ...]

        # stage 3: x3 = conv3(cat(x, x1, x2)); channels [0, nf).
        y3 = convdw(cat3, 2, p, m2, TH, W)

        out = y3 * 0.2 + xv[PADH:PADH + TH, WPAD:WPAD + W, :]
        o_ref[...] = out[None].astype(o_ref.dtype)

    return kernel


def residual_dense_block_3c_dp(x, params, *, kernel_size=3, tile_h=None,
                               mxu_dtype=jnp.bfloat16):
    """Fused forward of ResidualDenseBlock_3C_dp.

    x      : (N, nf, H, W) NCHW, like the PyTorch module.
    params : dict with
        "conv1"/"conv2"/"conv3": (w_dw, b_dw, a_dw, w_pw, b_pw) in PyTorch layouts
            w_dw:(Ci,1,K,K)  b_dw:(Ci,)  a_dw:(Ci,)  w_pw:(Oi,Ci,1,1)  b_pw:(Oi,)
            with (C1,O1)=(nf,gc), (C2,O2)=(nf+gc,gc), (C3,O3)=(nf+2gc,nf)
        "a_block": (gc,)  shared PReLU applied to the conv1/conv2 outputs.
    returns (N, nf, H, W).
    """
    N, nf, H, W = x.shape
    K = kernel_size
    p = K // 2
    gc = params["conv1"][3].shape[0]
    assert K % 2 == 1 and p <= 4, "odd kernel sizes up to 9 supported"
    assert W % 8 == 0, "W must be a multiple of 8 (TPU sublane tiling)"
    # TODO(synk): support W not divisible by 8 by also padding the output width.

    if tile_h is None:                   # largest row tile <= 32 that divides H
        tile_h = H
        for cand in range(min(H, 32), 0, -1):
            if H % cand == 0:
                tile_h = cand
                break
    TH = tile_h
    assert H % TH == 0, "tile_h must divide H"

    Cp = max(128, _round_up(nf + 2 * gc, 128))   # lane-dense channel workspace
    m2 = _round_up(p, 4)                         # stage column margins keep every
    m1 = 2 * m2                                  # matmul row block 8-aligned
    PADH, WPAD = 3 * p, m1 + p

    # ---- one-time parameter packing: channel-pad + "place" each stage --------
    widths = (nf, nf + gc, nf + 2 * gc)          # input channels per stage
    outs = (gc, gc, nf)                          # output channels per stage
    offs = (nf, nf + gc, 0)                      # channel slot of each stage output
    wdw = jnp.zeros((3, K, K, Cp), jnp.float32)
    wpw = jnp.zeros((3, Cp, Cp), jnp.float32)
    vec = jnp.zeros((_NUM_VEC, Cp), jnp.float32)
    for i, name in enumerate(("conv1", "conv2", "conv3")):
        w_dw, b_dw, a_dw, w_pw, b_pw = params[name]
        ci, oi, oo = widths[i], outs[i], offs[i]
        wdw = wdw.at[i, :, :, :ci].set(
            jnp.transpose(w_dw[:, 0], (1, 2, 0)).astype(jnp.float32))
        wpw = wpw.at[i, :ci, oo:oo + oi].set(
            jnp.transpose(w_pw[:, :, 0, 0], (1, 0)).astype(jnp.float32))
        vec = vec.at[3 * i + _B_DW, :ci].set(b_dw.astype(jnp.float32))
        vec = vec.at[3 * i + _A_DW, :ci].set(a_dw.astype(jnp.float32))
        vec = vec.at[3 * i + _B_PW, oo:oo + oi].set(b_pw.astype(jnp.float32))
    a_blk = params["a_block"].astype(jnp.float32)
    vec = vec.at[_A_BLOCK, nf:nf + gc].set(a_blk)
    vec = vec.at[_A_BLOCK, nf + gc:nf + 2 * gc].set(a_blk)
    wpw = wpw.astype(mxu_dtype)                  # MXU operands (bf16 by default)

    # ---- input glue: NCHW -> channel-padded NHWC with a zero spatial halo ----
    x_nhwc = jnp.transpose(x, (0, 2, 3, 1)).astype(jnp.float32)
    xp = jnp.pad(x_nhwc, ((0, 0), (PADH, PADH), (WPAD, WPAD), (0, Cp - nf)))

    grid = (N, H // TH)
    kernel = _make_block_kernel(H=H, W=W, TH=TH, Cp=Cp, K=K, m1=m1, m2=m2)

    flops = 2 * N * H * W * sum(K * K * c + c * o for c, o in zip(widths, outs))
    bytes_accessed = (xp.size * 4 + N * H * W * Cp * 4 + wdw.size * 4
                      + wpw.size * wpw.dtype.itemsize + vec.size * 4)

    out_nhwc = pl.pallas_call(
        kernel,
        out_shape=jax.ShapeDtypeStruct((N, H, W, Cp), x.dtype),
        grid_spec=pltpu.PrefetchScalarGridSpec(
            num_scalar_prefetch=0,
            grid=grid,
            in_specs=[
                pl.BlockSpec(memory_space=pl.ANY),                      # x (HBM)
                pl.BlockSpec((3, K, K, Cp), lambda n, t: (0, 0, 0, 0)),  # depthwise w
                pl.BlockSpec((3, Cp, Cp), lambda n, t: (0, 0, 0)),       # placed 1x1 w
                pl.BlockSpec((_NUM_VEC, Cp), lambda n, t: (0, 0)),       # biases/alphas
            ],
            out_specs=pl.BlockSpec((1, TH, W, Cp), lambda n, t: (n, t, 0, 0)),
            scratch_shapes=[
                pltpu.VMEM((TH + 2 * PADH, W + 2 * WPAD, Cp), jnp.float32),
                pltpu.SemaphoreType.DMA((1,)),
            ],
        ),
        compiler_params=pltpu.CompilerParams(
            dimension_semantics=("parallel", "parallel"),
            vmem_limit_bytes=64 * 1024 * 1024,
        ),
        cost_estimate=pl.CostEstimate(
            flops=flops, transcendentals=0, bytes_accessed=bytes_accessed),
    )(xp, wdw, wpw, vec)

    out = out_nhwc[..., :nf]                      # drop lane padding
    return jnp.transpose(out, (0, 3, 1, 2))       # back to NCHW


# ----------------------------- pure-JAX reference -----------------------------
def _convdw_reference(x, w_dw, b_dw, a_dw, w_pw, b_pw, K):
    C = x.shape[1]
    pad = K // 2
    y = lax.conv_general_dilated(
        x, w_dw, (1, 1), ((pad, pad), (pad, pad)),
        dimension_numbers=("NCHW", "OIHW", "NCHW"),
        feature_group_count=C, precision=lax.Precision.HIGHEST)
    y = y + b_dw.reshape(1, C, 1, 1)
    y = jnp.where(y > 0, y, a_dw.reshape(1, C, 1, 1) * y)
    z = lax.conv_general_dilated(
        y, w_pw, (1, 1), ((0, 0), (0, 0)),
        dimension_numbers=("NCHW", "OIHW", "NCHW"),
        precision=lax.Precision.HIGHEST)
    return z + b_pw.reshape(1, -1, 1, 1)


def _block_reference(x, params, K):
    a = params["a_block"].reshape(1, -1, 1, 1)
    c1 = _convdw_reference(x, *params["conv1"], K)
    x1 = jnp.where(c1 > 0, c1, a * c1)
    c2 = _convdw_reference(jnp.concatenate((x, x1), 1), *params["conv2"], K)
    x2 = jnp.where(c2 > 0, c2, a * c2)
    x3 = _convdw_reference(jnp.concatenate((x, x1, x2), 1), *params["conv3"], K)
    return x3 * 0.2 + x


def _init_convdw(key, ci, co, K):
    k = jax.random.split(key, 5)
    return (jax.random.normal(k[0], (ci, 1, K, K), jnp.float32) * 0.1,
            jax.random.normal(k[1], (ci,), jnp.float32) * 0.5,
            jax.random.uniform(k[2], (ci,), jnp.float32, 0.05, 0.6),
            jax.random.normal(k[3], (co, ci, 1, 1), jnp.float32) * 0.1,
            jax.random.normal(k[4], (co,), jnp.float32) * 0.5)


def _init_params(key, nf, gc, K):
    k = jax.random.split(key, 4)
    return {
        "conv1": _init_convdw(k[0], nf, gc, K),
        "conv2": _init_convdw(k[1], nf + gc, gc, K),
        "conv3": _init_convdw(k[2], nf + 2 * gc, nf, K),
        "a_block": jax.random.uniform(k[3], (gc,), jnp.float32, 0.05, 0.6),
    }


if __name__ == "__main__":
    key = jax.random.PRNGKey(0)
    N, nf, gc, H, W, K = 2, 8, 4, 16, 16, 3

    kx, kp = jax.random.split(key)
    x = jax.random.normal(kx, (N, nf, H, W), jnp.float32)
    params = _init_params(kp, nf, gc, K)

    ref = _block_reference(x, params, K)

    # Strict check: f32 MXU operands, tiled grid (2 batches x 2 row tiles).
    out_f32 = residual_dense_block_3c_dp(
        x, params, kernel_size=K, tile_h=8, mxu_dtype=jnp.float32)
    out_f32 = jax.block_until_ready(out_f32)
    assert out_f32.shape == (N, nf, H, W)
    assert jnp.allclose(out_f32, ref, atol=5e-3, rtol=5e-3), "f32 path mismatch"

    # Default perf path: bf16 MXU operands (f32 accumulation).
    out_bf16 = residual_dense_block_3c_dp(
        x, params, kernel_size=K, tile_h=8, mxu_dtype=jnp.bfloat16)
    out_bf16 = jax.block_until_ready(out_bf16)
    assert jnp.allclose(out_bf16, ref, atol=3e-2, rtol=3e-2), "bf16 path mismatch"

    print("KERNEL_OK")
</pallas_src>

<mosaic_0001>
module attributes {stable_mosaic.version = 11 : i64} {
  func.func @kernel(%arg0: i32, %arg1: i32, %arg2: memref<2x22x34x128xf32, #tpu.memory_space<any>>, %arg3: memref<3x3x3x128xf32, #tpu.memory_space<vmem>>, %arg4: memref<3x128x128xf32, #tpu.memory_space<vmem>>, %arg5: memref<10x128xf32, #tpu.memory_space<vmem>>, %arg6: memref<1x8x16x128xf32, #tpu.memory_space<vmem>>, %arg7: memref<14x34x128xf32, #tpu.memory_space<vmem>>, %arg8: memref<1x!tpu.dma_semaphore, #tpu.memory_space<semaphore_mem>>) attributes {dimension_semantics = [#tpu.dimension_semantics<parallel>, #tpu.dimension_semantics<parallel>], iteration_bounds = array<i64: 2, 2>, scalar_prefetch = 0 : i64, scratch_operands = 2 : i64, tpu.core_type = #tpu.core_type<tc>, window_params = [{}, {pipeline_mode = #tpu.pipeline_mode<synchronous>, transform_indices = @transform_1, window_bounds = array<i64: 3, 3, 3, 128>}, {pipeline_mode = #tpu.pipeline_mode<synchronous>, transform_indices = @transform_2, window_bounds = array<i64: 3, 128, 128>}, {pipeline_mode = #tpu.pipeline_mode<synchronous>, transform_indices = @transform_3, window_bounds = array<i64: 10, 128>}, {transform_indices = @transform_4, window_bounds = array<i64: 1, 8, 16, 128>}]} {
    %c8_i32 = arith.constant 8 : i32
    %0 = arith.muli %arg1, %c8_i32 : i32
    %c0_i32 = arith.constant 0 : i32
    %c0_i32_0 = arith.constant 0 : i32
    %c0_i32_1 = arith.constant 0 : i32
    %1 = tpu.memref_slice %arg2[%arg0, %0, %c0_i32_0, %c0_i32_1] : memref<2x22x34x128xf32, #tpu.memory_space<any>> -> memref<1x14x34x128xf32, #tpu.memory_space<any>>
    %2 = tpu.memref_squeeze %1 : memref<1x14x34x128xf32, #tpu.memory_space<any>> -> memref<14x34x128xf32, #tpu.memory_space<any>>
    %3 = tpu.memref_slice %arg8[%c0_i32] : memref<1x!tpu.dma_semaphore, #tpu.memory_space<semaphore_mem>> -> memref<1x!tpu.dma_semaphore, #tpu.memory_space<semaphore_mem>>
    %4 = tpu.memref_squeeze %3 : memref<1x!tpu.dma_semaphore, #tpu.memory_space<semaphore_mem>> -> memref<!tpu.dma_semaphore, #tpu.memory_space<semaphore_mem>>
    tpu.enqueue_dma source(%2 : memref<14x34x128xf32, #tpu.memory_space<any>>) target(%arg7 : memref<14x34x128xf32, #tpu.memory_space<vmem>>) target_semaphore(%4 : memref<!tpu.dma_semaphore, #tpu.memory_space<semaphore_mem>>)
    %c0_i32_2 = arith.constant 0 : i32
    %c0_i32_3 = arith.constant 0 : i32
    %c0_i32_4 = arith.constant 0 : i32
    %5 = tpu.memref_slice %arg2[%arg0, %0, %c0_i32_3, %c0_i32_4] : memref<2x22x34x128xf32, #tpu.memory_space<any>> -> memref<1x14x34x128xf32, #tpu.memory_space<any>>
    %6 = tpu.memref_squeeze %5 : memref<1x14x34x128xf32, #tpu.memory_space<any>> -> memref<14x34x128xf32, #tpu.memory_space<any>>
    %7 = tpu.memref_slice %arg8[%c0_i32_2] : memref<1x!tpu.dma_semaphore, #tpu.memory_space<semaphore_mem>> -> memref<1x!tpu.dma_semaphore, #tpu.memory_space<semaphore_mem>>
    %8 = tpu.memref_squeeze %7 : memref<1x!tpu.dma_semaphore, #tpu.memory_space<semaphore_mem>> -> memref<!tpu.dma_semaphore, #tpu.memory_space<semaphore_mem>>
    tpu.wait_dma2 semaphore(%8 : memref<!tpu.dma_semaphore, #tpu.memory_space<semaphore_mem>>) src(%6 : memref<14x34x128xf32, #tpu.memory_space<any>>) dst(%arg7 : memref<14x34x128xf32, #tpu.memory_space<vmem>>)
    %c0 = arith.constant 0 : index
    %c0_5 = arith.constant 0 : index
    %c0_6 = arith.constant 0 : index
    %9 = vector.load %arg7[%c0, %c0_5, %c0_6] : memref<14x34x128xf32, #tpu.memory_space<vmem>>, vector<14x34x128xf32>
    %c0_7 = arith.constant 0 : index
    %c0_8 = arith.constant 0 : index
    %10 = vector.load %arg5[%c0_7, %c0_8] : memref<10x128xf32, #tpu.memory_space<vmem>>, vector<10x128xf32>
    %11 = vector.extract_strided_slice %10 {offsets = [9, 0], sizes = [1, 128], strides = [1, 1]} : vector<10x128xf32> to vector<1x128xf32>
    %12 = vector.shape_cast %11 : vector<1x128xf32> to vector<128xf32>
    %c0_9 = arith.constant 0 : index
    %c0_10 = arith.constant 0 : index
    %c0_11 = arith.constant 0 : index
    %c0_12 = arith.constant 0 : index
    %13 = vector.load %arg3[%c0_9, %c0_10, %c0_11, %c0_12] : memref<3x3x3x128xf32, #tpu.memory_space<vmem>>, vector<1x3x3x128xf32>
    %14 = vector.shape_cast %13 : vector<1x3x3x128xf32> to vector<3x3x128xf32>
    %cst = arith.constant 0.000000e+00 : f32
    %15 = vector.broadcast %cst : f32 to vector<12x32x128xf32>
    %16 = vector.extract_strided_slice %9 {offsets = [0, 0, 0], sizes = [12, 32, 128], strides = [1, 1, 1]} : vector<14x34x128xf32> to vector<12x32x128xf32>
    %17 = vector.extract_strided_slice %14 {offsets = [0, 0, 0], sizes = [1, 1, 128], strides = [1, 1, 1]} : vector<3x3x128xf32> to vector<1x1x128xf32>
    %18 = vector.shape_cast %17 : vector<1x1x128xf32> to vector<128xf32>
    %19 = vector.shape_cast %18 : vector<128xf32> to vector<1x1x128xf32>
    %20 = vector.broadcast %19 : vector<1x1x128xf32> to vector<12x32x128xf32>
    %21 = arith.mulf %16, %20 : vector<12x32x128xf32>
    %22 = arith.addf %15, %21 : vector<12x32x128xf32>
    %23 = vector.extract_strided_slice %9 {offsets = [0, 1, 0], sizes = [12, 32, 128], strides = [1, 1, 1]} : vector<14x34x128xf32> to vector<12x32x128xf32>
    %24 = vector.extract_strided_slice %14 {offsets = [0, 1, 0], sizes = [1, 1, 128], strides = [1, 1, 1]} : vector<3x3x128xf32> to vector<1x1x128xf32>
    %25 = vector.shape_cast %24 : vector<1x1x128xf32> to vector<128xf32>
    %26 = vector.shape_cast %25 : vector<128xf32> to vector<1x1x128xf32>
    %27 = vector.broadcast %26 : vector<1x1x128xf32> to vector<12x32x128xf32>
    %28 = arith.mulf %23, %27 : vector<12x32x128xf32>
    %29 = arith.addf %22, %28 : vector<12x32x128xf32>
    %30 = vector.extract_strided_slice %9 {offsets = [0, 2, 0], sizes = [12, 32, 128], strides = [1, 1, 1]} : vector<14x34x128xf32> to vector<12x32x128xf32>
    %31 = vector.extract_strided_slice %14 {offsets = [0, 2, 0], sizes = [1, 1, 128], strides = [1, 1, 1]} : vector<3x3x128xf32> to vector<1x1x128xf32>
    %32 = vector.shape_cast %31 : vector<1x1x128xf32> to vector<128xf32>
    %33 = vector.shape_cast %32 : vector<128xf32> to vector<1x1x128xf32>
    %34 = vector.broadcast %33 : vector<1x1x128xf32> to vector<12x32x128xf32>
    %35 = arith.mulf %30, %34 : vector<12x32x128xf32>
    %36 = arith.addf %29, %35 : vector<12x32x128xf32>
    %37 = vector.extract_strided_slice %9 {offsets = [1, 0, 0], sizes = [12, 32, 128], strides = [1, 1, 1]} : vector<14x34x128xf32> to vector<12x32x128xf32>
    %38 = vector.extract_strided_slice %14 {offsets = [1, 0, 0], sizes = [1, 1, 128], strides = [1, 1, 1]} : vector<3x3x128xf32> to vector<1x1x128xf32>
    %39 = vector.shape_cast %38 : vector<1x1x128xf32> to vector<128xf32>
    %40 = vector.shape_cast %39 : vector<128xf32> to vector<1x1x128xf32>
    %41 = vector.broadcast %40 : vector<1x1x128xf32> to vector<12x32x128xf32>
    %42 = arith.mulf %37, %41 : vector<12x32x128xf32>
    %43 = arith.addf %36, %42 : vector<12x32x128xf32>
    %44 = vector.extract_strided_slice %9 {offsets = [1, 1, 0], sizes = [12, 32, 128], strides = [1, 1, 1]} : vector<14x34x128xf32> to vector<12x32x128xf32>
    %45 = vector.extract_strided_slice %14 {offsets = [1, 1, 0], sizes = [1, 1, 128], strides = [1, 1, 1]} : vector<3x3x128xf32> to vector<1x1x128xf32>
    %46 = vector.shape_cast %45 : vector<1x1x128xf32> to vector<128xf32>
    %47 = vector.shape_cast %46 : vector<128xf32> to vector<1x1x128xf32>
    %48 = vector.broadcast %47 : vector<1x1x128xf32> to vector<12x32x128xf32>
    %49 = arith.mulf %44, %48 : vector<12x32x128xf32>
    %50 = arith.addf %43, %49 : vector<12x32x128xf32>
    %51 = vector.extract_strided_slice %9 {offsets = [1, 2, 0], sizes = [12, 32, 128], strides = [1, 1, 1]} : vector<14x34x128xf32> to vector<12x32x128xf32>
    %52 = vector.extract_strided_slice %14 {offsets = [1, 2, 0], sizes = [1, 1, 128], strides = [1, 1, 1]} : vector<3x3x128xf32> to vector<1x1x128xf32>
    %53 = vector.shape_cast %52 : vector<1x1x128xf32> to vector<128xf32>
    %54 = vector.shape_cast %53 : vector<128xf32> to vector<1x1x128xf32>
    %55 = vector.broadcast %54 : vector<1x1x128xf32> to vector<12x32x128xf32>
    %56 = arith.mulf %51, %55 : vector<12x32x128xf32>
    %57 = arith.addf %50, %56 : vector<12x32x128xf32>
    %58 = vector.extract_strided_slice %9 {offsets = [2, 0, 0], sizes = [12, 32, 128], strides = [1, 1, 1]} : vector<14x34x128xf32> to vector<12x32x128xf32>
    %59 = vector.extract_strided_slice %14 {offsets = [2, 0, 0], sizes = [1, 1, 128], strides = [1, 1, 1]} : vector<3x3x128xf32> to vector<1x1x128xf32>
    %60 = vector.shape_cast %59 : vector<1x1x128xf32> to vector<128xf32>
    %61 = vector.shape_cast %60 : vector<128xf32> to vector<1x1x128xf32>
    %62 = vector.broadcast %61 : vector<1x1x128xf32> to vector<12x32x128xf32>
    %63 = arith.mulf %58, %62 : vector<12x32x128xf32>
    %64 = arith.addf %57, %63 : vector<12x32x128xf32>
    %65 = vector.extract_strided_slice %9 {offsets = [2, 1, 0], sizes = [12, 32, 128], strides = [1, 1, 1]} : vector<14x34x128xf32> to vector<12x32x128xf32>
    %66 = vector.extract_strided_slice %14 {offsets = [2, 1, 0], sizes = [1, 1, 128], strides = [1, 1, 1]} : vector<3x3x128xf32> to vector<1x1x128xf32>
    %67 = vector.shape_cast %66 : vector<1x1x128xf32> to vector<128xf32>
    %68 = vector.shape_cast %67 : vector<128xf32> to vector<1x1x128xf32>
    %69 = vector.broadcast %68 : vector<1x1x128xf32> to vector<12x32x128xf32>
    %70 = arith.mulf %65, %69 : vector<12x32x128xf32>
    %71 = arith.addf %64, %70 : vector<12x32x128xf32>
    %72 = vector.extract_strided_slice %9 {offsets = [2, 2, 0], sizes = [12, 32, 128], strides = [1, 1, 1]} : vector<14x34x128xf32> to vector<12x32x128xf32>
    %73 = vector.extract_strided_slice %14 {offsets = [2, 2, 0], sizes = [1, 1, 128], strides = [1, 1, 1]} : vector<3x3x128xf32> to vector<1x1x128xf32>
    %74 = vector.shape_cast %73 : vector<1x1x128xf32> to vector<128xf32>
    %75 = vector.shape_cast %74 : vector<128xf32> to vector<1x1x128xf32>
    %76 = vector.broadcast %75 : vector<1x1x128xf32> to vector<12x32x128xf32>
    %77 = arith.mulf %72, %76 : vector<12x32x128xf32>
    %78 = arith.addf %71, %77 : vector<12x32x128xf32>
    %79 = vector.extract_strided_slice %10 {offsets = [0, 0], sizes = [1, 128], strides = [1, 1]} : vector<10x128xf32> to vector<1x128xf32>
    %80 = vector.shape_cast %79 : vector<1x128xf32> to vector<128xf32>
    %81 = vector.shape_cast %80 : vector<128xf32> to vector<1x1x128xf32>
    %82 = vector.broadcast %81 : vector<1x1x128xf32> to vector<12x32x128xf32>
    %83 = arith.addf %78, %82 : vector<12x32x128xf32>
    %84 = vector.extract_strided_slice %10 {offsets = [1, 0], sizes = [1, 128], strides = [1, 1]} : vector<10x128xf32> to vector<1x128xf32>
    %85 = vector.shape_cast %84 : vector<1x128xf32> to vector<128xf32>
    %cst_13 = arith.constant 0.000000e+00 : f32
    %86 = vector.broadcast %cst_13 : f32 to vector<12x32x128xf32>
    %87 = arith.cmpf ogt, %83, %86 : vector<12x32x128xf32>
    %88 = vector.shape_cast %85 : vector<128xf32> to vector<1x1x128xf32>
    %89 = vector.broadcast %88 : vector<1x1x128xf32> to vector<12x32x128xf32>
    %90 = arith.mulf %89, %83 : vector<12x32x128xf32>
    %91 = arith.select %87, %83, %90 : vector<12x32x128xi1>, vector<12x32x128xf32>
    %c0_14 = arith.constant 0 : index
    %c0_15 = arith.constant 0 : index
    %c0_16 = arith.constant 0 : index
    %92 = vector.load %arg4[%c0_14, %c0_15, %c0_16] : memref<3x128x128xf32, #tpu.memory_space<vmem>>, vector<1x128x128xf32>
    %93 = vector.shape_cast %92 : vector<1x128x128xf32> to vector<128x128xf32>
    %94 = vector.shape_cast %91 : vector<12x32x128xf32> to vector<384x128xf32>
    %cst_17 = arith.constant dense<0.000000e+00> : vector<384x128xf32>
    %95 = tpu.matmul %94, %93, %cst_17 {dimension_numbers = #tpu.dot_dimension_numbers<[1], [0], [0], [1], [0, 0, 1, 1], [], []>} : vector<384x128xf32>, vector<128x128xf32>, vector<384x128xf32> -> vector<384x128xf32>
    %96 = vector.shape_cast %95 : vector<384x128xf32> to vector<12x32x128xf32>
    %97 = vector.extract_strided_slice %10 {offsets = [2, 0], sizes = [1, 128], strides = [1, 1]} : vector<10x128xf32> to vector<1x128xf32>
    %98 = vector.shape_cast %97 : vector<1x128xf32> to vector<128xf32>
    %99 = vector.shape_cast %98 : vector<128xf32> to vector<1x1x128xf32>
    %100 = vector.broadcast %99 : vector<1x1x128xf32> to vector<12x32x128xf32>
    %101 = arith.addf %96, %100 : vector<12x32x128xf32>
    %cst_18 = arith.constant 0.000000e+00 : f32
    %102 = vector.broadcast %cst_18 : f32 to vector<12x32x128xf32>
    %103 = arith.cmpf ogt, %101, %102 : vector<12x32x128xf32>
    %104 = vector.shape_cast %12 : vector<128xf32> to vector<1x1x128xf32>
    %105 = vector.broadcast %104 : vector<1x1x128xf32> to vector<12x32x128xf32>
    %106 = arith.mulf %105, %101 : vector<12x32x128xf32>
    %107 = arith.select %103, %101, %106 : vector<12x32x128xi1>, vector<12x32x128xf32>
    %108 = tpu.iota {dimensions = array<i32: 0>} : vector<12x32x1xi32>
    %109 = tpu.iota {dimensions = array<i32: 1>} : vector<12x32x1xi32>
    %c1_i32 = arith.constant 1 : i32
    %110 = arith.addi %0, %c1_i32 : i32
    %c3_i32 = arith.constant 3 : i32
    %111 = arith.subi %110, %c3_i32 : i32
    %112 = vector.broadcast %111 : i32 to vector<12x32x1xi32>
    %113 = arith.addi %112, %108 : vector<12x32x1xi32>
    %c-8_i32 = arith.constant -8 : i32
    %114 = vector.broadcast %c-8_i32 : i32 to vector<12x32x1xi32>
    %115 = arith.addi %114, %109 : vector<12x32x1xi32>
    %c0_i32_19 = arith.constant 0 : i32
    %116 = vector.broadcast %c0_i32_19 : i32 to vector<12x32x1xi32>
    %117 = arith.cmpi sge, %113, %116 : vector<12x32x1xi32>
    %c16_i32 = arith.constant 16 : i32
    %118 = vector.broadcast %c16_i32 : i32 to vector<12x32x1xi32>
    %119 = arith.cmpi slt, %113, %118 : vector<12x32x1xi32>
    %120 = arith.andi %117, %119 : vector<12x32x1xi1>
    %c0_i32_20 = arith.constant 0 : i32
    %121 = vector.broadcast %c0_i32_20 : i32 to vector<12x32x1xi32>
    %122 = arith.cmpi sge, %115, %121 : vector<12x32x1xi32>
    %123 = arith.andi %120, %122 : vector<12x32x1xi1>
    %c16_i32_21 = arith.constant 16 : i32
    %124 = vector.broadcast %c16_i32_21 : i32 to vector<12x32x1xi32>
    %125 = arith.cmpi slt, %115, %124 : vector<12x32x1xi32>
    %126 = arith.andi %123, %125 : vector<12x32x1xi1>
    %cst_22 = arith.constant 0.000000e+00 : f32
    %127 = vector.shape_cast %126 : vector<12x32x1xi1> to vector<12x32x1xi1>
    %128 = vector.broadcast %127 : vector<12x32x1xi1> to vector<12x32x128xi1>
    %129 = vector.broadcast %cst_22 : f32 to vector<12x32x128xf32>
    %130 = arith.select %128, %107, %129 : vector<12x32x128xi1>, vector<12x32x128xf32>
    %131 = vector.extract_strided_slice %9 {offsets = [1, 1, 0], sizes = [12, 32, 128], strides = [1, 1, 1]} : vector<14x34x128xf32> to vector<12x32x128xf32>
    %132 = arith.addf %131, %130 : vector<12x32x128xf32>
    %c1 = arith.constant 1 : index
    %c0_23 = arith.constant 0 : index
    %c0_24 = arith.constant 0 : index
    %c0_25 = arith.constant 0 : index
    %133 = vector.load %arg3[%c1, %c0_23, %c0_24, %c0_25] : memref<3x3x3x128xf32, #tpu.memory_space<vmem>>, vector<1x3x3x128xf32>
    %134 = vector.shape_cast %133 : vector<1x3x3x128xf32> to vector<3x3x128xf32>
    %cst_26 = arith.constant 0.000000e+00 : f32
    %135 = vector.broadcast %cst_26 : f32 to vector<10x24x128xf32>
    %136 = vector.extract_strided_slice %132 {offsets = [0, 3, 0], sizes = [10, 24, 128], strides = [1, 1, 1]} : vector<12x32x128xf32> to vector<10x24x128xf32>
    %137 = vector.extract_strided_slice %134 {offsets = [0, 0, 0], sizes = [1, 1, 128], strides = [1, 1, 1]} : vector<3x3x128xf32> to vector<1x1x128xf32>
    %138 = vector.shape_cast %137 : vector<1x1x128xf32> to vector<128xf32>
    %139 = vector.shape_cast %138 : vector<128xf32> to vector<1x1x128xf32>
    %140 = vector.broadcast %139 : vector<1x1x128xf32> to vector<10x24x128xf32>
    %141 = arith.mulf %136, %140 : vector<10x24x128xf32>
    %142 = arith.addf %135, %141 : vector<10x24x128xf32>
    %143 = vector.extract_strided_slice %132 {offsets = [0, 4, 0], sizes = [10, 24, 128], strides = [1, 1, 1]} : vector<12x32x128xf32> to vector<10x24x128xf32>
    %144 = vector.extract_strided_slice %134 {offsets = [0, 1, 0], sizes = [1, 1, 128], strides = [1, 1, 1]} : vector<3x3x128xf32> to vector<1x1x128xf32>
    %145 = vector.shape_cast %144 : vector<1x1x128xf32> to vector<128xf32>
    %146 = vector.shape_cast %145 : vector<128xf32> to vector<1x1x128xf32>
    %147 = vector.broadcast %146 : vector<1x1x128xf32> to vector<10x24x128xf32>
    %148 = arith.mulf %143, %147 : vector<10x24x128xf32>
    %149 = arith.addf %142, %148 : vector<10x24x128xf32>
    %150 = vector.extract_strided_slice %132 {offsets = [0, 5, 0], sizes = [10, 24, 128], strides = [1, 1, 1]} : vector<12x32x128xf32> to vector<10x24x128xf32>
    %151 = vector.extract_strided_slice %134 {offsets = [0, 2, 0], sizes = [1, 1, 128], strides = [1, 1, 1]} : vector<3x3x128xf32> to vector<1x1x128xf32>
    %152 = vector.shape_cast %151 : vector<1x1x128xf32> to vector<128xf32>
    %153 = vector.shape_cast %152 : vector<128xf32> to vector<1x1x128xf32>
    %154 = vector.broadcast %153 : vector<1x1x128xf32> to vector<10x24x128xf32>
    %155 = arith.mulf %150, %154 : vector<10x24x128xf32>
    %156 = arith.addf %149, %155 : vector<10x24x128xf32>
    %157 = vector.extract_strided_slice %132 {offsets = [1, 3, 0], sizes = [10, 24, 128], strides = [1, 1, 1]} : vector<12x32x128xf32> to vector<10x24x128xf32>
    %158 = vector.extract_strided_slice %134 {offsets = [1, 0, 0], sizes = [1, 1, 128], strides = [1, 1, 1]} : vector<3x3x128xf32> to vector<1x1x128xf32>
    %159 = vector.shape_cast %158 : vector<1x1x128xf32> to vector<128xf32>
    %160 = vector.shape_cast %159 : vector<128xf32> to vector<1x1x128xf32>
    %161 = vector.broadcast %160 : vector<1x1x128xf32> to vector<10x24x128xf32>
    %162 = arith.mulf %157, %161 : vector<10x24x128xf32>
    %163 = arith.addf %156, %162 : vector<10x24x128xf32>
    %164 = vector.extract_strided_slice %132 {offsets = [1, 4, 0], sizes = [10, 24, 128], strides = [1, 1, 1]} : vector<12x32x128xf32> to vector<10x24x128xf32>
    %165 = vector.extract_strided_slice %134 {offsets = [1, 1, 0], sizes = [1, 1, 128], strides = [1, 1, 1]} : vector<3x3x128xf32> to vector<1x1x128xf32>
    %166 = vector.shape_cast %165 : vector<1x1x128xf32> to vector<128xf32>
    %167 = vector.shape_cast %166 : vector<128xf32> to vector<1x1x128xf32>
    %168 = vector.broadcast %167 : vector<1x1x128xf32> to vector<10x24x128xf32>
    %169 = arith.mulf %164, %168 : vector<10x24x128xf32>
    %170 = arith.addf %163, %169 : vector<10x24x128xf32>
    %171 = vector.extract_strided_slice %132 {offsets = [1, 5, 0], sizes = [10, 24, 128], strides = [1, 1, 1]} : vector<12x32x128xf32> to vector<10x24x128xf32>
    %172 = vector.extract_strided_slice %134 {offsets = [1, 2, 0], sizes = [1, 1, 128], strides = [1, 1, 1]} : vector<3x3x128xf32> to vector<1x1x128xf32>
    %173 = vector.shape_cast %172 : vector<1x1x128xf32> to vector<128xf32>
    %174 = vector.shape_cast %173 : vector<128xf32> to vector<1x1x128xf32>
    %175 = vector.broadcast %174 : vector<1x1x128xf32> to vector<10x24x128xf32>
    %176 = arith.mulf %171, %175 : vector<10x24x128xf32>
    %177 = arith.addf %170, %176 : vector<10x24x128xf32>
    %178 = vector.extract_strided_slice %132 {offsets = [2, 3, 0], sizes = [10, 24, 128], strides = [1, 1, 1]} : vector<12x32x128xf32> to vector<10x24x128xf32>
    %179 = vector.extract_strided_slice %134 {offsets = [2, 0, 0], sizes = [1, 1, 128], strides = [1, 1, 1]} : vector<3x3x128xf32> to vector<1x1x128xf32>
    %180 = vector.shape_cast %179 : vector<1x1x128xf32> to vector<128xf32>
    %181 = vector.shape_cast %180 : vector<128xf32> to vector<1x1x128xf32>
    %182 = vector.broadcast %181 : vector<1x1x128xf32> to vector<10x24x128xf32>
    %183 = arith.mulf %178, %182 : vector<10x24x128xf32>
    %184 = arith.addf %177, %183 : vector<10x24x128xf32>
    %185 = vector.extract_strided_slice %132 {offsets = [2, 4, 0], sizes = [10, 24, 128], strides = [1, 1, 1]} : vector<12x32x128xf32> to vector<10x24x128xf32>
    %186 = vector.extract_strided_slice %134 {offsets = [2, 1, 0], sizes = [1, 1, 128], strides = [1, 1, 1]} : vector<3x3x128xf32> to vector<1x1x128xf32>
    %187 = vector.shape_cast %186 : vector<1x1x128xf32> to vector<128xf32>
    %188 = vector.shape_cast %187 : vector<128xf32> to vector<1x1x128xf32>
    %189 = vector.broadcast %188 : vector<1x1x128xf32> to vector<10x24x128xf32>
    %190 = arith.mulf %185, %189 : vector<10x24x128xf32>
    %191 = arith.addf %184, %190 : vector<10x24x128xf32>
    %192 = vector.extract_strided_slice %132 {offsets = [2, 5, 0], sizes = [10, 24, 128], strides = [1, 1, 1]} : vector<12x32x128xf32> to vector<10x24x128xf32>
    %193 = vector.extract_strided_slice %134 {offsets = [2, 2, 0], sizes = [1, 1, 128], strides = [1, 1, 1]} : vector<3x3x128xf32> to vector<1x1x128xf32>
    %194 = vector.shape_cast %193 : vector<1x1x128xf32> to vector<128xf32>
    %195 = vector.shape_cast %194 : vector<128xf32> to vector<1x1x128xf32>
    %196 = vector.broadcast %195 : vector<1x1x128xf32> to vector<10x24x128xf32>
    %197 = arith.mulf %192, %196 : vector<10x24x128xf32>
    %198 = arith.addf %191, %197 : vector<10x24x128xf32>
    %199 = vector.extract_strided_slice %10 {offsets = [3, 0], sizes = [1, 128], strides = [1, 1]} : vector<10x128xf32> to vector<1x128xf32>
    %200 = vector.shape_cast %199 : vector<1x128xf32> to vector<128xf32>
    %201 = vector.shape_cast %200 : vector<128xf32> to vector<1x1x128xf32>
    %202 = vector.broadcast %201 : vector<1x1x128xf32> to vector<10x24x128xf32>
    %203 = arith.addf %198, %202 : vector<10x24x128xf32>
    %204 = vector.extract_strided_slice %10 {offsets = [4, 0], sizes = [1, 128], strides = [1, 1]} : vector<10x128xf32> to vector<1x128xf32>
    %205 = vector.shape_cast %204 : vector<1x128xf32> to vector<128xf32>
    %cst_27 = arith.constant 0.000000e+00 : f32
    %206 = vector.broadcast %cst_27 : f32 to vector<10x24x128xf32>
    %207 = arith.cmpf ogt, %203, %206 : vector<10x24x128xf32>
    %208 = vector.shape_cast %205 : vector<128xf32> to vector<1x1x128xf32>
    %209 = vector.broadcast %208 : vector<1x1x128xf32> to vector<10x24x128xf32>
    %210 = arith.mulf %209, %203 : vector<10x24x128xf32>
    %211 = arith.select %207, %203, %210 : vector<10x24x128xi1>, vector<10x24x128xf32>
    %c1_28 = arith.constant 1 : index
    %c0_29 = arith.constant 0 : index
    %c0_30 = arith.constant 0 : index
    %212 = vector.load %arg4[%c1_28, %c0_29, %c0_30] : memref<3x128x128xf32, #tpu.memory_space<vmem>>, vector<1x128x128xf32>
    %213 = vector.shape_cast %212 : vector<1x128x128xf32> to vector<128x128xf32>
    %214 = vector.shape_cast %211 : vector<10x24x128xf32> to vector<240x128xf32>
    %cst_31 = arith.constant dense<0.000000e+00> : vector<240x128xf32>
    %215 = tpu.matmul %214, %213, %cst_31 {dimension_numbers = #tpu.dot_dimension_numbers<[1], [0], [0], [1], [0, 0, 1, 1], [], []>} : vector<240x128xf32>, vector<128x128xf32>, vector<240x128xf32> -> vector<240x128xf32>
    %216 = vector.shape_cast %215 : vector<240x128xf32> to vector<10x24x128xf32>
    %217 = vector.extract_strided_slice %10 {offsets = [5, 0], sizes = [1, 128], strides = [1, 1]} : vector<10x128xf32> to vector<1x128xf32>
    %218 = vector.shape_cast %217 : vector<1x128xf32> to vector<128xf32>
    %219 = vector.shape_cast %218 : vector<128xf32> to vector<1x1x128xf32>
    %220 = vector.broadcast %219 : vector<1x1x128xf32> to vector<10x24x128xf32>
    %221 = arith.addf %216, %220 : vector<10x24x128xf32>
    %cst_32 = arith.constant 0.000000e+00 : f32
    %222 = vector.broadcast %cst_32 : f32 to vector<10x24x128xf32>
    %223 = arith.cmpf ogt, %221, %222 : vector<10x24x128xf32>
    %224 = vector.shape_cast %12 : vector<128xf32> to vector<1x1x128xf32>
    %225 = vector.broadcast %224 : vector<1x1x128xf32> to vector<10x24x128xf32>
    %226 = arith.mulf %225, %221 : vector<10x24x128xf32>
    %227 = arith.select %223, %221, %226 : vector<10x24x128xi1>, vector<10x24x128xf32>
    %228 = tpu.iota {dimensions = array<i32: 0>} : vector<10x24x1xi32>
    %229 = tpu.iota {dimensions = array<i32: 1>} : vector<10x24x1xi32>
    %c2_i32 = arith.constant 2 : i32
    %230 = arith.addi %0, %c2_i32 : i32
    %c3_i32_33 = arith.constant 3 : i32
    %231 = arith.subi %230, %c3_i32_33 : i32
    %232 = vector.broadcast %231 : i32 to vector<10x24x1xi32>
    %233 = arith.addi %232, %228 : vector<10x24x1xi32>
    %c-4_i32 = arith.constant -4 : i32
    %234 = vector.broadcast %c-4_i32 : i32 to vector<10x24x1xi32>
    %235 = arith.addi %234, %229 : vector<10x24x1xi32>
    %c0_i32_34 = arith.constant 0 : i32
    %236 = vector.broadcast %c0_i32_34 : i32 to vector<10x24x1xi32>
    %237 = arith.cmpi sge, %233, %236 : vector<10x24x1xi32>
    %c16_i32_35 = arith.constant 16 : i32
    %238 = vector.broadcast %c16_i32_35 : i32 to vector<10x24x1xi32>
    %239 = arith.cmpi slt, %233, %238 : vector<10x24x1xi32>
    %240 = arith.andi %237, %239 : vector<10x24x1xi1>
    %c0_i32_36 = arith.constant 0 : i32
    %241 = vector.broadcast %c0_i32_36 : i32 to vector<10x24x1xi32>
    %242 = arith.cmpi sge, %235, %241 : vector<10x24x1xi32>
    %243 = arith.andi %240, %242 : vector<10x24x1xi1>
    %c16_i32_37 = arith.constant 16 : i32
    %244 = vector.broadcast %c16_i32_37 : i32 to vector<10x24x1xi32>
    %245 = arith.cmpi slt, %235, %244 : vector<10x24x1xi32>
    %246 = arith.andi %243, %245 : vector<10x24x1xi1>
    %cst_38 = arith.constant 0.000000e+00 : f32
    %247 = vector.shape_cast %246 : vector<10x24x1xi1> to vector<10x24x1xi1>
    %248 = vector.broadcast %247 : vector<10x24x1xi1> to vector<10x24x128xi1>
    %249 = vector.broadcast %cst_38 : f32 to vector<10x24x128xf32>
    %250 = arith.select %248, %227, %249 : vector<10x24x128xi1>, vector<10x24x128xf32>
    %251 = vector.extract_strided_slice %132 {offsets = [1, 4, 0], sizes = [10, 24, 128], strides = [1, 1, 1]} : vector<12x32x128xf32> to vector<10x24x128xf32>
    %252 = arith.addf %251, %250 : vector<10x24x128xf32>
    %c2 = arith.constant 2 : index
    %c0_39 = arith.constant 0 : index
    %c0_40 = arith.constant 0 : index
    %c0_41 = arith.constant 0 : index
    %253 = vector.load %arg3[%c2, %c0_39, %c0_40, %c0_41] : memref<3x3x3x128xf32, #tpu.memory_space<vmem>>, vector<1x3x3x128xf32>
    %254 = vector.shape_cast %253 : vector<1x3x3x128xf32> to vector<3x3x128xf32>
    %cst_42 = arith.constant 0.000000e+00 : f32
    %255 = vector.broadcast %cst_42 : f32 to vector<8x16x128xf32>
    %256 = vector.extract_strided_slice %252 {offsets = [0, 3, 0], sizes = [8, 16, 128], strides = [1, 1, 1]} : vector<10x24x128xf32> to vector<8x16x128xf32>
    %257 = vector.extract_strided_slice %254 {offsets = [0, 0, 0], sizes = [1, 1, 128], strides = [1, 1, 1]} : vector<3x3x128xf32> to vector<1x1x128xf32>
    %258 = vector.shape_cast %257 : vector<1x1x128xf32> to vector<128xf32>
    %259 = vector.shape_cast %258 : vector<128xf32> to vector<1x1x128xf32>
    %260 = vector.broadcast %259 : vector<1x1x128xf32> to vector<8x16x128xf32>
    %261 = arith.mulf %256, %260 : vector<8x16x128xf32>
    %262 = arith.addf %255, %261 : vector<8x16x128xf32>
    %263 = vector.extract_strided_slice %252 {offsets = [0, 4, 0], sizes = [8, 16, 128], strides = [1, 1, 1]} : vector<10x24x128xf32> to vector<8x16x128xf32>
    %264 = vector.extract_strided_slice %254 {offsets = [0, 1, 0], sizes = [1, 1, 128], strides = [1, 1, 1]} : vector<3x3x128xf32> to vector<1x1x128xf32>
    %265 = vector.shape_cast %264 : vector<1x1x128xf32> to vector<128xf32>
    %266 = vector.shape_cast %265 : vector<128xf32> to vector<1x1x128xf32>
    %267 = vector.broadcast %266 : vector<1x1x128xf32> to vector<8x16x128xf32>
    %268 = arith.mulf %263, %267 : vector<8x16x128xf32>
    %269 = arith.addf %262, %268 : vector<8x16x128xf32>
    %270 = vector.extract_strided_slice %252 {offsets = [0, 5, 0], sizes = [8, 16, 128], strides = [1, 1, 1]} : vector<10x24x128xf32> to vector<8x16x128xf32>
    %271 = vector.extract_strided_slice %254 {offsets = [0, 2, 0], sizes = [1, 1, 128], strides = [1, 1, 1]} : vector<3x3x128xf32> to vector<1x1x128xf32>
    %272 = vector.shape_cast %271 : vector<1x1x128xf32> to vector<128xf32>
    %273 = vector.shape_cast %272 : vector<128xf32> to vector<1x1x128xf32>
    %274 = vector.broadcast %273 : vector<1x1x128xf32> to vector<8x16x128xf32>
    %275 = arith.mulf %270, %274 : vector<8x16x128xf32>
    %276 = arith.addf %269, %275 : vector<8x16x128xf32>
    %277 = vector.extract_strided_slice %252 {offsets = [1, 3, 0], sizes = [8, 16, 128], strides = [1, 1, 1]} : vector<10x24x128xf32> to vector<8x16x128xf32>
    %278 = vector.extract_strided_slice %254 {offsets = [1, 0, 0], sizes = [1, 1, 128], strides = [1, 1, 1]} : vector<3x3x128xf32> to vector<1x1x128xf32>
    %279 = vector.shape_cast %278 : vector<1x1x128xf32> to vector<128xf32>
    %280 = vector.shape_cast %279 : vector<128xf32> to vector<1x1x128xf32>
    %281 = vector.broadcast %280 : vector<1x1x128xf32> to vector<8x16x128xf32>
    %282 = arith.mulf %277, %281 : vector<8x16x128xf32>
    %283 = arith.addf %276, %282 : vector<8x16x128xf32>
    %284 = vector.extract_strided_slice %252 {offsets = [1, 4, 0], sizes = [8, 16, 128], strides = [1, 1, 1]} : vector<10x24x128xf32> to vector<8x16x128xf32>
    %285 = vector.extract_strided_slice %254 {offsets = [1, 1, 0], sizes = [1, 1, 128], strides = [1, 1, 1]} : vector<3x3x128xf32> to vector<1x1x128xf32>
    %286 = vector.shape_cast %285 : vector<1x1x128xf32> to vector<128xf32>
    %287 = vector.shape_cast %286 : vector<128xf32> to vector<1x1x128xf32>
    %288 = vector.broadcast %287 : vector<1x1x128xf32> to vector<8x16x128xf32>
    %289 = arith.mulf %284, %288 : vector<8x16x128xf32>
    %290 = arith.addf %283, %289 : vector<8x16x128xf32>
    %291 = vector.extract_strided_slice %252 {offsets = [1, 5, 0], sizes = [8, 16, 128], strides = [1, 1, 1]} : vector<10x24x128xf32> to vector<8x16x128xf32>
    %292 = vector.extract_strided_slice %254 {offsets = [1, 2, 0], sizes = [1, 1, 128], strides = [1, 1, 1]} : vector<3x3x128xf32> to vector<1x1x128xf32>
    %293 = vector.shape_cast %292 : vector<1x1x128xf32> to vector<128xf32>
    %294 = vector.shape_cast %293 : vector<128xf32> to vector<1x1x128xf32>
    %295 = vector.broadcast %294 : vector<1x1x128xf32> to vector<8x16x128xf32>
    %296 = arith.mulf %291, %295 : vector<8x16x128xf32>
    %297 = arith.addf %290, %296 : vector<8x16x128xf32>
    %298 = vector.extract_strided_slice %252 {offsets = [2, 3, 0], sizes = [8, 16, 128], strides = [1, 1, 1]} : vector<10x24x128xf32> to vector<8x16x128xf32>
    %299 = vector.extract_strided_slice %254 {offsets = [2, 0, 0], sizes = [1, 1, 128], strides = [1, 1, 1]} : vector<3x3x128xf32> to vector<1x1x128xf32>
    %300 = vector.shape_cast %299 : vector<1x1x128xf32> to vector<128xf32>
    %301 = vector.shape_cast %300 : vector<128xf32> to vector<1x1x128xf32>
    %302 = vector.broadcast %301 : vector<1x1x128xf32> to vector<8x16x128xf32>
    %303 = arith.mulf %298, %302 : vector<8x16x128xf32>
    %304 = arith.addf %297, %303 : vector<8x16x128xf32>
    %305 = vector.extract_strided_slice %252 {offsets = [2, 4, 0], sizes = [8, 16, 128], strides = [1, 1, 1]} : vector<10x24x128xf32> to vector<8x16x128xf32>
    %306 = vector.extract_strided_slice %254 {offsets = [2, 1, 0], sizes = [1, 1, 128], strides = [1, 1, 1]} : vector<3x3x128xf32> to vector<1x1x128xf32>
    %307 = vector.shape_cast %306 : vector<1x1x128xf32> to vector<128xf32>
    %308 = vector.shape_cast %307 : vector<128xf32> to vector<1x1x128xf32>
    %309 = vector.broadcast %308 : vector<1x1x128xf32> to vector<8x16x128xf32>
    %310 = arith.mulf %305, %309 : vector<8x16x128xf32>
    %311 = arith.addf %304, %310 : vector<8x16x128xf32>
    %312 = vector.extract_strided_slice %252 {offsets = [2, 5, 0], sizes = [8, 16, 128], strides = [1, 1, 1]} : vector<10x24x128xf32> to vector<8x16x128xf32>
    %313 = vector.extract_strided_slice %254 {offsets = [2, 2, 0], sizes = [1, 1, 128], strides = [1, 1, 1]} : vector<3x3x128xf32> to vector<1x1x128xf32>
    %314 = vector.shape_cast %313 : vector<1x1x128xf32> to vector<128xf32>
    %315 = vector.shape_cast %314 : vector<128xf32> to vector<1x1x128xf32>
    %316 = vector.broadcast %315 : vector<1x1x128xf32> to vector<8x16x128xf32>
    %317 = arith.mulf %312, %316 : vector<8x16x128xf32>
    %318 = arith.addf %311, %317 : vector<8x16x128xf32>
    %319 = vector.extract_strided_slice %10 {offsets = [6, 0], sizes = [1, 128], strides = [1, 1]} : vector<10x128xf32> to vector<1x128xf32>
    %320 = vector.shape_cast %319 : vector<1x128xf32> to vector<128xf32>
    %321 = vector.shape_cast %320 : vector<128xf32> to vector<1x1x128xf32>
    %322 = vector.broadcast %321 : vector<1x1x128xf32> to vector<8x16x128xf32>
    %323 = arith.addf %318, %322 : vector<8x16x128xf32>
    %324 = vector.extract_strided_slice %10 {offsets = [7, 0], sizes = [1, 128], strides = [1, 1]} : vector<10x128xf32> to vector<1x128xf32>
    %325 = vector.shape_cast %324 : vector<1x128xf32> to vector<128xf32>
    %cst_43 = arith.constant 0.000000e+00 : f32
    %326 = vector.broadcast %cst_43 : f32 to vector<8x16x128xf32>
    %327 = arith.cmpf ogt, %323, %326 : vector<8x16x128xf32>
    %328 = vector.shape_cast %325 : vector<128xf32> to vector<1x1x128xf32>
    %329 = vector.broadcast %328 : vector<1x1x128xf32> to vector<8x16x128xf32>
    %330 = arith.mulf %329, %323 : vector<8x16x128xf32>
    %331 = arith.select %327, %323, %330 : vector<8x16x128xi1>, vector<8x16x128xf32>
    %c2_44 = arith.constant 2 : index
    %c0_45 = arith.constant 0 : index
    %c0_46 = arith.constant 0 : index
    %332 = vector.load %arg4[%c2_44, %c0_45, %c0_46] : memref<3x128x128xf32, #tpu.memory_space<vmem>>, vector<1x128x128xf32>
    %333 = vector.shape_cast %332 : vector<1x128x128xf32> to vector<128x128xf32>
    %334 = vector.shape_cast %331 : vector<8x16x128xf32> to vector<128x128xf32>
    %cst_47 = arith.constant dense<0.000000e+00> : vector<128x128xf32>
    %335 = tpu.matmul %334, %333, %cst_47 {dimension_numbers = #tpu.dot_dimension_numbers<[1], [0], [0], [1], [0, 0, 1, 1], [], []>} : vector<128x128xf32>, vector<128x128xf32>, vector<128x128xf32> -> vector<128x128xf32>
    %336 = vector.shape_cast %335 : vector<128x128xf32> to vector<8x16x128xf32>
    %337 = vector.extract_strided_slice %10 {offsets = [8, 0], sizes = [1, 128], strides = [1, 1]} : vector<10x128xf32> to vector<1x128xf32>
    %338 = vector.shape_cast %337 : vector<1x128xf32> to vector<128xf32>
    %339 = vector.shape_cast %338 : vector<128xf32> to vector<1x1x128xf32>
    %340 = vector.broadcast %339 : vector<1x1x128xf32> to vector<8x16x128xf32>
    %341 = arith.addf %336, %340 : vector<8x16x128xf32>
    %cst_48 = arith.constant 2.000000e-01 : f32
    %342 = vector.broadcast %cst_48 : f32 to vector<8x16x128xf32>
    %343 = arith.mulf %341, %342 : vector<8x16x128xf32>
    %344 = vector.extract_strided_slice %9 {offsets = [3, 9, 0], sizes = [8, 16, 128], strides = [1, 1, 1]} : vector<14x34x128xf32> to vector<8x16x128xf32>
    %345 = arith.addf %343, %344 : vector<8x16x128xf32>
    %346 = vector.shape_cast %345 : vector<8x16x128xf32> to vector<1x8x16x128xf32>
    %c0_49 = arith.constant 0 : index
    %c0_50 = arith.constant 0 : index
    %c0_51 = arith.constant 0 : index
    %c0_52 = arith.constant 0 : index
    %347 = vector.load %arg6[%c0_49, %c0_50, %c0_51, %c0_52] : memref<1x8x16x128xf32, #tpu.memory_space<vmem>>, vector<1x8x16x128xf32>
    tpu.vector_store %arg6[%c0_49, %c0_50, %c0_51, %c0_52], %346 {strides = array<i32>} : memref<1x8x16x128xf32, #tpu.memory_space<vmem>>, vector<1x8x16x128xf32>,
    return
  }
  func.func @transform_1(%arg0: i32, %arg1: i32) -> (i32, i32, i32, i32) {
    %c0_i32 = arith.constant 0 : i32
    %c0_i32_0 = arith.constant 0 : i32
    %c0_i32_1 = arith.constant 0 : i32
    %c0_i32_2 = arith.constant 0 : i32
    %c0_i32_3 = arith.constant 0 : i32
    return %c0_i32, %c0_i32_0, %c0_i32_1, %c0_i32_2 : i32, i32, i32, i32
  }
  func.func @transform_2(%arg0: i32, %arg1: i32) -> (i32, i32, i32) {
    %c0_i32 = arith.constant 0 : i32
    %c0_i32_0 = arith.constant 0 : i32
    %c0_i32_1 = arith.constant 0 : i32
    %c0_i32_2 = arith.constant 0 : i32
    return %c0_i32, %c0_i32_0, %c0_i32_1 : i32, i32, i32
  }
  func.func @transform_3(%arg0: i32, %arg1: i32) -> (i32, i32) {
    %c0_i32 = arith.constant 0 : i32
    %c0_i32_0 = arith.constant 0 : i32
    %c0_i32_1 = arith.constant 0 : i32
    return %c0_i32, %c0_i32_0 : i32, i32
  }
  func.func @transform_4(%arg0: i32, %arg1: i32) -> (i32, i32, i32, i32) {
    %c0_i32 = arith.constant 0 : i32
    %c0_i32_0 = arith.constant 0 : i32
    %c0_i32_1 = arith.constant 0 : i32
    return %arg0, %arg1, %c0_i32, %c0_i32_0 : i32, i32, i32, i32
  }
}

</mosaic_0001>

<bundles_post_ra>
// kernel: tpu_custom_call.1
= control target key start
LH: loop header
LB: loop body
LE: loop exit
PB: predicated region body
PF: predicated region fallthrough
CT: control target
= control target key end

     0   :  { %9 = vsyncpa [#allocation5], 0  ;;  %s13850_s0 = inlined_call_operand.hbm [shape: f32[2,22,34,128], index: 0, kind: input, shape index: {}]   ;;  %s13851_s1 = inlined_call_operand.hbm [shape: f32[3,3,3,128], index: 1, kind: input, shape index: {}]   ;;  %s13852_s2 = inlined_call_operand.hbm [shape: f32[3,128,128], index: 2, kind: input, shape index: {}]   ;;  %s13853_s3 = inlined_call_operand.hbm [shape: f32[10,128], index: 3, kind: input, shape index: {}]   ;;  %s13854_s4 = inlined_call_operand.hbm [shape: f32[2,16,16,128], index: 4, kind: output, shape index: {}]  }
   0x1   :  { %10 = vsyncpa [#allocation8], 0 }
   0x2   :  { %11 = vsyncpa [#allocation6], 0 }
   0x3   :  { %13 = vsyncpa [#allocation6 + $0x1], 0  ;;  %s8790_s15 = smov 0   ;;  %s8792_s16 = smov 0  }
   0x4   :  { %s8794_s17 = smov 0   ;;  %s8796_s18 = smov 0  }
   0x5   :  { %s8798_s19 = smov 0   ;;  %s8800_s20 = smov 0  }
   0x6   :  { %s8802_s21 = smov 0   ;;  %s8804_s22 = smov 0  }
   0x7 LB: > { %13942 = sst [smem:[#allocation16_spill]] %s8741_s20  ;;  %s7852_s23 = sadd.s32 4294967295, %s8749_s22   ;;  %s8749_s22 = sphi %s8804_s22, %s19_s22   ;;  %s8745_s21 = sphi %s8802_s21, %s14163_s21   ;;  %s8741_s20 = sphi %s8800_s20, %s14162_s20   ;;  %s8737_s19 = sphi %s8798_s19, %s14167_s19   ;;  %s8733_s18 = sphi %s8796_s18, %s14160_s18   ;;  %s8729_s17 = sphi %s8794_s17, %s14166_s17   ;;  %s8725_s16 = sphi %s8792_s16, %s14165_s16   ;;  %s8721_s15 = sphi %s8790_s15, %s14164_s15  }
   0x8   : > { %13943 = sst [smem:[#allocation17_spill]] %s8745_s21  ;;  %s7853_s24 = sadd.s32 4294967294, %s8749_s22  }
   0x9   : > { %s28_s25 = sadd.s32 1, %s8741_s20  ;;  %s31_s26 = sadd.s32 1, %s8745_s21 }
   0xa   : > { %p29_p0 = scmp.ge.s32.totalorder %s28_s25, 2  ;;  %s103_s27 = sadd.s32 1, %s8729_s17 }
   0xb   : > { %p113_p1 = scmp.ne.s32.totalorder %s8729_s17, %s8725_s16  ;;  %p114_p2 = scmp.eq.s32.totalorder %s7852_s23, 3 }
   0xc   : > { %s14169_s25 = smov (%p29_p0, %s28_s25), 0  ;;  %s14171_s26 = smov (!%p29_p0, %s31_s26), %s8745_s21 }
   0xd   : > { %13944 = sst [smem:[#allocation18_spill]] %s14169_s25  ;;  %s99_s28 = ssub.s32 %s8741_s20, %s14169_s25 }
   0xe   : > { %p8842_p3 = por %p114_p2, %p113_p1  ;;  %p33_p4 = scmp.ge.s32.totalorder %s14171_s26, 2 }
   0xf   : > { %p119_p5 = scmp.ne.s32.totalorder %s8725_s16, %s8721_s15  ;;  %p120_p6 = scmp.eq.s32.totalorder %s7853_s24, 3 }
  0x10   : > { %s13945_s29 = scalar_select %p8842_p3, 1, 0 }
  0x11   : > { %p7854_p7 = scmp.ge.s32.totalorder %s8749_s22, 1  ;;  %s14173_s26 = smov (%p33_p4, %s14171_s26), 0 }
  0x12   : > { %13946 = sst [smem:[#allocation19_spill]] %s14173_s26  ;;  %p8851_p8 = por %p120_p6, %p119_p5 }
  0x13   : > { %p127_p9 = scmp.lt.s32.totalorder %s8749_s22, 5  ;;  %s98_s5 = ssub.s32 %s8745_s21, %s14173_s26 }
  0x14   : > { %s13947_s30 = scalar_select %p8851_p8, 1, 0 }
  0x15   : > { %s100_s6 = sor.u32 %s99_s28, %s98_s5  ;;  %p8858_p10 = pnand %p7854_p7, %p127_p9 }
  0x16   : > { %p101_p11 = scmp.eq.s32.totalorder %s100_s6, 0  ;;  %p8862_p12 = scmp.eq.s32.totalorder %s7852_s23, 0 }
  0x17   : > { %s13948_s7 = scalar_select %p8858_p10, 1, 0 }
  0x18   : > { %s13949_s8 = scalar_select %p8862_p12, 1, 0 }
  0x19   : > { %p8364_p13 = pneg %p8858_p10  ;;  %s8751_s11 = smov [#allocation7]  }
  0x1a   : > { %s8869_s9 = scalar_select %p101_p11, %s8729_s17, %s103_s27  }
  0x1b   : > { %p8873_p0 = pnand %p8862_p12, %p8364_p13  ;;  %s152_s12 = sshll.u32 %s8751_s11, 4  ;;  %s153_s12 = int_to_ptr.vmem [resolvable:$true] %s152_s12 }
  0x1c   : > { %13950 = sst [smem:[#allocation20_spill]] %s8869_s9  ;;  %s8537_s23 = scalar_lea.hbm %s13852_s2, 6144 }
  0x1d   : > { %p8538_p1 = scmp.ne.s32.totalorder %s13852_s2, %s8537_s23  ;;  %p8885_p2 = pneg %p8873_p0 }
  0x1e   : > { %p8544_p6 = scmp.lt.u32.totalorder %s8537_s23, %s13852_s2 }
  0x1f   : > { %p8540_p4 = pnand %p8885_p2, %p8538_p1 }
  0x21   : > { %p8541_p5 = pneg %p8540_p4 }
  0x23   : > { %p8546_p7 = pnand %p8544_p6, %p8541_p5 }
  0x25   : > { %8549 = shalt.err (!%p8546_p7)
}
  0x26   : > { %s8550_s11 = scalar_lea.vmem %s153_s12, 6144  ;;  %p8558_p8 = scmp.lt.s32.totalorder %s153_s12, %s153_s12 }
  0x27   : > { %p8551_p9 = scmp.ne.s32.totalorder %s153_s12, %s8550_s11  ;;  %p8559_p3 = scmp.lt.s32.totalorder %s8550_s11, %s8550_s11 }
  0x29   : > { %p8553_p11 = pnand %p8551_p9, %p8885_p2  ;;  %p8560_p12 = por %p8559_p3, %p8558_p8 }
  0x2b   : > { %p8554_p13 = pneg %p8553_p11 }
  0x2d   : > { %p8561_p10 = pnand %p8560_p12, %p8554_p13 }
  0x2f   : > { %8564 = shalt.err (!%p8561_p10)
}
  0x30   : > { %s13863_s13 = smov 128   ;;  %s13864_s14 = smov 8  }
  0x31   : > { %8370 = dma.hbm_to_vmem [thread:$0]  (!%p8873_p0), %s13852_s2, 6144, %s153_s12, [#allocation8], %s13863_s13, %s13863_s13, %s13864_s14  }
  0x32   : > { %s8754_s28 = smov [#allocation4]   ;;  %s8565_s26 = scalar_lea.hbm %s13851_s1, 576 }
  0x33   : > { %s139_s5 = sshll.u32 %s8754_s28, 4  ;;  %p8566_p3 = scmp.ne.s32.totalorder %s13851_s1, %s8565_s26  ;;  %s140_s5 = int_to_ptr.vmem [resolvable:$true] %s139_s5 }
  0x34   : > { %p8572_p12 = scmp.lt.u32.totalorder %s8565_s26, %s13851_s1 }
  0x35   : > { %p8568_p8 = pnand %p8566_p3, %p8885_p2 }
  0x37   : > { %p8569_p10 = pneg %p8568_p8 }
  0x39   : > { %p8574_p1 = pnand %p8572_p12, %p8569_p10 }
  0x3b   : > { %8577 = shalt.err (!%p8574_p1)
}
  0x3c   : > { %s8578_s12 = scalar_lea.vmem %s140_s5, 576  ;;  %p8586_p7 = scmp.lt.s32.totalorder %s140_s5, %s140_s5 }
  0x3d   : > { %p8579_p4 = scmp.ne.s32.totalorder %s140_s5, %s8578_s12  ;;  %p8587_p9 = scmp.lt.s32.totalorder %s8578_s12, %s8578_s12 }
  0x3f   : > { %p8581_p5 = pnand %p8579_p4, %p8885_p2  ;;  %p8588_p11 = por %p8587_p9, %p8586_p7 }
  0x41   : > { %p8582_p6 = pneg %p8581_p5 }
  0x43   : > { %p8589_p13 = pnand %p8588_p11, %p8582_p6 }
  0x45   : > { %8592 = shalt.err (!%p8589_p13)
}
  0x46   : > { %s8755_s21 = smov 64   ;;  %s8756_s25 = smov 4  }
  0x47   : > { %8367 = dma.hbm_to_vmem [thread:$0]  (!%p8873_p0), %s13851_s1, 576, %s140_s5, [#allocation5], %s8755_s21, %s8755_s21, %s8756_s25  }
  0x48   : > { %s8757_s9 = smov [#allocation9]   ;;  %s8593_s6 = scalar_lea.hbm %s13853_s3, 256 }
  0x49   : > { %s165_s23 = sshll.u32 %s8757_s9, 4  ;;  %p8594_p3 = scmp.ne.s32.totalorder %s13853_s3, %s8593_s6  ;;  %s166_s23 = int_to_ptr.vmem [resolvable:$true] %s165_s23 }
  0x4a   : > { %p8600_p12 = scmp.lt.u32.totalorder %s8593_s6, %s13853_s3 }
  0x4b   : > { %p8596_p8 = pnand %p8594_p3, %p8885_p2 }
  0x4d   : > { %p8597_p10 = pneg %p8596_p8 }
  0x4f   : > { %p8602_p1 = pnand %p8600_p12, %p8597_p10 }
  0x51   : > { %8605 = shalt.err (!%p8602_p1)
}
  0x52   : > { %s8606_s5 = scalar_lea.vmem %s166_s23, 256  ;;  %p8614_p7 = scmp.lt.s32.totalorder %s166_s23, %s166_s23 }
  0x53   : > { %p8607_p4 = scmp.ne.s32.totalorder %s166_s23, %s8606_s5  ;;  %p8615_p9 = scmp.lt.s32.totalorder %s8606_s5, %s8606_s5 }
  0x55   : > { %p8609_p5 = pnand %p8607_p4, %p8885_p2  ;;  %p8616_p11 = por %p8615_p9, %p8614_p7 }
  0x57   : > { %p8610_p6 = pneg %p8609_p5 }
  0x59   : > { %p8617_p13 = pnand %p8616_p11, %p8610_p6 }
  0x5b   : > { %8620 = shalt.err (!%p8617_p13)
}
  0x5c   : > { %s13953_s21 = smov 8   ;;  %s13954_s25 = smov 128  }
  0x5d   : > { %8373 = dma.hbm_to_vmem [thread:$0]  (!%p8873_p0), %s13853_s3, 256, %s166_s23, [#allocation8], %s13954_s25, %s13954_s25, %s13953_s21  }
  0x5e   : > { %p13955_p3 = scmp.ne.s32.totalorder %s13948_s7, 0 }
  0x60   : > { %181 = sbr.rel (%p13955_p3) target bundleno = 1486 (0x5ce), region = 32 }
  0x67   : > { %p13956_p2 = scmp.ne.s32.totalorder %s13949_s8, 0 }
  0x69   : > { %8706 = dma.done.wait (%p13956_p2), [#allocation5], 576  }
  0x6a   : > { %8708 = vsyncadd (%p13956_p2), [#allocation5], 4294966720 }
  0x6b   : > { %8710 = dma.done.wait (%p13956_p2), [#allocation8], 6400  }
  0x6c   : > { %8712 = vsyncadd (%p13956_p2), [#allocation8], 4294960896  ;;  %s205_s10 = sand.u32 1, %s8725_s16   ;;  %s7863_s7 = sshll.u32 %s8733_s18, 3 }
  0x6d   : > { %s8957_s27 = sshll.u32 %s205_s10, 7  ;;  %s7864_s20 = smul.u32 320, %s8733_s18 }
  0x6e   : > { %s211_s26 = smul.u32 880, %s8737_s19  ;;  %s8758_s23 = smov [#allocation2]  }
  0x6f   : > { %s216_s24 = sshll.u32 %s8758_s23, 4  ;;  %s8623_s25 = scalar_lea.hbm %s13850_s0, 28160  ;;  %s217_s24 = int_to_ptr.vmem [resolvable:$true] %s216_s24 }
  0x70   : > { %s212_s9 = sadd.s32 %s7864_s20, %s211_s26 }
  0x71   : > { %s7865_s28 = sshll.u32 %s212_s9, 4 }
  0x72   : > { %s214_s11 = scalar_lea.hbm %s13850_s0, %s7865_s28 }
  0x73   : > { %s8621_s12 = scalar_lea.hbm %s214_s11, 7616  ;;  %p8624_p8 = scmp.lt.u32.totalorder %s214_s11, %s13850_s0 }
  0x74   : > { %p8622_p0 = scmp.ne.s32.totalorder %s214_s11, %s8621_s12  ;;  %p8625_p10 = scmp.lt.u32.totalorder %s8623_s25, %s8621_s12 }
  0x75   : > { %p8627_p1 = scmp.lt.u32.totalorder %s8621_s12, %s214_s11 }
  0x76   : > { %p8626_p12 = por %p8625_p10, %p8624_p8 }
  0x78   : > { %p8628_p4 = por %p8627_p1, %p8626_p12 }
  0x7a   : > { %p8629_p5 = pnand %p8628_p4, %p8622_p0 }
  0x7c   : > { %8632 = shalt.err (!%p8629_p5)  }
  0x7d   : > { %s8633_s20 = scalar_lea.vmem %s217_s24, 7616  ;;  %s8637_s26 = scalar_lea.vmem %s217_s24, 8960 }
  0x7e   : > { %p8634_p6 = scmp.ne.s32.totalorder %s217_s24, %s8633_s20  ;;  %p8638_p7 = scmp.lt.s32.totalorder %s217_s24, %s217_s24 }
  0x7f   : > { %p8639_p9 = scmp.lt.s32.totalorder %s8637_s26, %s8633_s20 }
  0x81   : > { %p8640_p11 = por %p8639_p9, %p8638_p7 }
  0x83   : > { %p8641_p13 = pnand %p8640_p11, %p8634_p6 }
  0x85   : > { %8644 = shalt.err (!%p8641_p13)  }
  0x86   : > { %s8759_s9 = smov 640   ;;  %s8760_s23 = smov 34  }
  0x87   : > { %219 = dma.hbm_to_vmem [thread:$0]  %s214_s11, 7616, %s217_s24, [#allocation3], %s8759_s9, %s8759_s9, %s8760_s23 }
  0x88   : > { %s8971_s28 = scalar_lea.vmem [#allocation10], %s8957_s27 }
  0x89   : > { %8713 = dma.done.wait [#allocation3], 7616 }
  0x8a   : > { %8714 = vsyncadd [#allocation3], 4294959680  ;;  %v299_v0 = vlaneseq  ;;  %v2769_v1 = vld [vmem:[#allocation7] sm:$0xff]  ;;  %v2770_v2 = vld [vmem:[#allocation7 + $0x8] sm:$0xff]  ;;  %vm523_vm0 = vcmask 1046528   ;;  %vm852_vm1 = vcmask 1045504  }
  0x8b   : > { %v2771_v3 = vld [vmem:[#allocation7 + $0x10] sm:$0xff]  ;;  %v8254_v4 = vpack.c.bf16 %v2770_v2, %v2769_v1  ;;  %v2772_v5 = vld [vmem:[#allocation7 + $0x18] sm:$0xff]  ;;  %v2773_v6 = vld [vmem:[#allocation7 + $0x20] sm:$0xff]  ;;  %s3295_s27 = sadd.s32 4294967294, %s7863_s7  ;;  %s6150_s24 = sadd.s32 4294967295, %s7863_s7 }
  0x8c   : > { %v8973_v7 = vshrl.u32 %v299_v0, 7  ;;  %v8258_v8 = vpack.c.bf16 %v2772_v5, %v2771_v3  ;;  %v2774_v9 = vld [vmem:[#allocation7 + $0x28] sm:$0xff]  ;;  %v2775_v10 = vld [vmem:[#allocation7 + $0x30] sm:$0xff]  ;;  %v2776_v11 = vld [vmem:[#allocation7 + $0x38] sm:$0xff]  ;;  %s7874_s7 = sshll.u32 %s8733_s18, 4  ;;  %s7869_s6 = sshll.u32 %s8737_s19, 5 }
  0x8d   : > { %8255 = vmatprep.subr.bf16.mxu0 %v8254_v4  ;;  %v2777_v12 = vld [vmem:[#allocation7 + $0x40] sm:$0xff]  ;;  %v2778_v13 = vld [vmem:[#allocation7 + $0x48] sm:$0xff]  ;;  %v2779_v14 = vld [vmem:[#allocation7 + $0x50] sm:$0xff]  ;;  %v8262_v18 = vpack.c.bf16 %v2774_v9, %v2773_v6  ;;  %v8266_v25 = vpack.c.bf16 %v2776_v11, %v2775_v10  ;;  %s7743_s8 = sadd.s32 %s7874_s7, %s7869_s6  ;;  %s7746_s18 = sshll.u32 %s8971_s28, 4  ;;  %s13787_s18 = int_to_ptr.vmem [resolvable:$true] %s7746_s18 }
  0x8e   : > { %13957 = vst [vmem:[#allocation21_spill] sm:$0xff] %v8973_v7  ;;  %8257 = vmatpush3.bf16.msra.mxu0 %v8254_v4  ;;  %v2780_v15 = vld [vmem:[#allocation7 + $0x58] sm:$0xff]  ;;  %v2781_v16 = vld [vmem:[#allocation7 + $0x60] sm:$0xff]  ;;  %v2782_v17 = vld [vmem:[#allocation7 + $0x68] sm:$0xff]  ;;  %v8976_v21 = vsub.s32 0, %v8973_v7  ;;  %v8979_v22 = vsub.s32 1, %v8973_v7  ;;  %v8984_v26 = vpack.c.bf16 %v2778_v13, %v2777_v12 }
  0x8f   : > { %8259 = vmatprep.subr.bf16.mxu0 %v8258_v8  ;;  %v2783_v19 = vld [vmem:[#allocation7 + $0x70] sm:$0xff]  ;;  %v2784_v20 = vld [vmem:[#allocation7 + $0x78] sm:$0xff]  ;;  %v8982_v23 = vsub.s32 2, %v8973_v7  ;;  %v8986_v27 = vpack.c.bf16 %v2780_v15, %v2779_v14  ;;  %v8988_v28 = vpack.c.bf16 %v2782_v17, %v2781_v16  ;;  %v294_v30 = vld [vmem:[#allocation9] sm:$0xff]  ;;  %s7870_s19 = sshll.u32 %s7743_s8, 7  ;;  %s13798_s21 = scalar_lea.sflag [#allocation6], %s205_s10 }
  0x90   : > { %13958 = vst [vmem:[#allocation22_spill] sm:$0xff] %v8976_v21  ;;  %13959 = vst [vmem:[#allocation23_spill] sm:$0xff] %v8979_v22  ;;  %v224_v24 = vld [vmem:[#allocation2] sm:$0xff]  ;;  %v225_v29 = vld [vmem:[#allocation2 + $0x8] sm:$0xff]  ;;  %v8990_v32 = vpack.c.bf16 %v2784_v20, %v2783_v19  ;;  %v8993_v36 = vrot.slane %v294_v30, %v8976_v21  ;;  %v8996_v37 = vrot.slane %v294_v30, %v8979_v22  ;;  %s13792_s5 = scalar_lea.hbm %s13854_s4, %s7870_s19  ;;  %s8645_s25 = scalar_lea.vmem %s13787_s18, 2048 }
  0x91   : > { %13960 = vst [vmem:[#allocation24_spill] sm:$0xff] %v8982_v23  ;;  %v295_v31 = vld [vmem:[#allocation9 + $0x8] sm:$0x3]  ;;  %v296_v33 = vld [vmem:[#allocation4] sm:$0x7]  ;;  %v9001_v39 = vld [vmem:[#allocation2 + $0x28] sm:$0xff]  ;;  %p8646_p3 = scmp.ne.s32.totalorder %s13787_s18, %s8645_s25 }
  0x92   : > { %8261 = vmatpush3.bf16.msra.mxu0 %v8258_v8  ;;  %v297_v34 = vld [vmem:[#allocation4 + $0x4] sm:$0x7]  ;;  %v298_v35 = vld [vmem:[#allocation4 + $0x8] sm:$0x7]  ;;  %v8999_v38 = vrot.slane %v295_v31, %v8979_v22  ;;  %v9006_v41 = vrot.slane %v296_v33, %v8976_v21  ;;  %v9009_v42 = vrot.slane %v296_v33, %v8979_v22  ;;  %v9012_v43 = vrot.slane %v296_v33, %v8982_v23  ;;  %p14157_p2 = scmp.ne.s32.totalorder %s13945_s29, 0  ;;  %s8762_s13 = smov [#allocation10]  }
  0x93   : > { %8263 = vmatprep.subr.bf16.mxu0 %v8262_v18  ;;  %v9003_v40 = vld [vmem:[#allocation2 + $0x30] sm:$0xff]  ;;  %v9015_v44 = vrot.slane %v297_v34, %v8976_v21  ;;  %v9018_v45 = vrot.slane %v297_v34, %v8979_v22  ;;  %v9021_v46 = vrot.slane %v297_v34, %v8982_v23  ;;  %v9024_v47 = vrot.slane %v298_v35, %v8976_v21  ;;  %v9044_v62 = vld [vmem:[#allocation2 + $0x58] sm:$0xff]  ;;  %s8649_s14 = sshll.u32 %s8762_s13, 4  ;;  %s8650_s14 = int_to_ptr.vmem [resolvable:$false] %s8649_s14 }
  0x94   : > { %v9027_v48 = vrot.slane %v298_v35, %v8979_v22  ;;  %v303_v49 = vmul.f32 %v9006_v41, %v224_v24  ;;  %v403_v50 = vmul.f32 %v9009_v42, %v224_v24  ;;  %v404_v51 = vmul.f32 %v9009_v42, %v225_v29  ;;  %v9033_v53 = vld [vmem:[#allocation2 + $0x50] sm:$0xff]  ;;  %v9061_v16 = vld [vmem:[#allocation2 + $0x38] sm:$0xff]  ;;  %p8647_p0 = pnand %p8646_p3, %p14157_p2  ;;  %s8651_s20 = scalar_lea.vmem %s8650_s14, 4096 }
  0x95   : > { %v732_v52 = vmul.f32 %v9012_v43, %v224_v24  ;;  %v733_v54 = vmul.f32 %v9012_v43, %v225_v29  ;;  %v1061_v55 = vmul.f32 %v9015_v44, %v9001_v39  ;;  %v1161_v56 = vmul.f32 %v9018_v45, %v9001_v39  ;;  %v226_v8 = vld [vmem:[#allocation2 + $0x10] sm:$0xff]  ;;  %p8652_p10 = scmp.lt.s32.totalorder %s13787_s18, %s8650_s14  ;;  %p8653_p12 = scmp.lt.s32.totalorder %s8651_s20, %s8645_s25 }
  0x96   : > { %8265 = vmatpush3.bf16.msra.mxu0 %v8262_v18  ;;  %v1162_v57 = vmul.f32 %v9018_v45, %v9003_v40  ;;  %v524_v58 = vrot.slane %v403_v50, 1  ;;  %v525_v59 = vrot.slane %v404_v51, 1  ;;  %v1489_v61 = vmul.f32 %v9021_v46, %v9001_v39  ;;  %p8648_p8 = pneg %p8647_p0 }
  0x97   : > { %8267 = vmatprep.subr.bf16.mxu0 %v8266_v25  ;;  %v853_v60 = vrot.slane %v732_v52, 2  ;;  %v854_v63 = vrot.slane %v733_v54, 2  ;;  %v1281_v0 = vrot.slane %v1161_v56, 1  ;;  %v1490_v2 = vmul.f32 %v9021_v46, %v9003_v40  ;;  %v9078_v54 = vld [vmem:[#allocation2 + $0x60] sm:$0xff]  ;;  %p8654_p1 = por %p8653_p12, %p8652_p10 }
  0x98   : > { %v1282_v1 = vrot.slane %v1162_v57, 1  ;;  %v526_v3 = vsel %vm523_vm0, %v524_v58, %v525_v59  ;;  %v1609_v4 = vrot.slane %v1489_v61, 2  ;;  %v1817_v5 = vmul.f32 %v9024_v47, %v9033_v53 }
  0x99   : > { %v1917_v6 = vmul.f32 %v9027_v48, %v9033_v53  ;;  %v680_v9 = vadd.f32 %v526_v3, %v303_v49  ;;  %v855_v10 = vsel %vm852_vm1, %v853_v60, %v854_v63  ;;  %v1610_v12 = vrot.slane %v1490_v2, 2  ;;  %v227_v60 = vld [vmem:[#allocation2 + $0x18] sm:$0xff]  ;;  %p8655_p4 = pnand %p8654_p1, %p8648_p8 }
  0x9a   : > { %8269 = vmatpush3.bf16.msra.mxu0 %v8266_v25  ;;  %v1283_v11 = vsel %vm523_vm0, %v1281_v0, %v1282_v1  ;;  %v1918_v13 = vmul.f32 %v9027_v48, %v9044_v62  ;;  %v9059_v15 = vrot.slane %v298_v35, %v8982_v23  ;;  %v304_v17 = vmul.f32 %v9006_v41, %v225_v29 }
  0x9b   : > { %8271 = vmatprep.subr.bf16.mxu0 %v8984_v26  ;;  %v2037_v14 = vrot.slane %v1917_v6, 1  ;;  %v1009_v18 = vadd.f32 %v855_v10, %v680_v9  ;;  %v1611_v19 = vsel %vm852_vm1, %v1609_v4, %v1610_v12  ;;  %v405_v20 = vmul.f32 %v9009_v42, %v226_v8 }
  0x9c   : > { %v734_v24 = vmul.f32 %v9012_v43, %v226_v8  ;;  %v2038_v25 = vrot.slane %v1918_v13, 1  ;;  %v2245_v30 = vmul.f32 %v9059_v15, %v9033_v53  ;;  %v2246_v31 = vmul.f32 %v9059_v15, %v9044_v62 }
  0x9d   : > { %v1062_v33 = vmul.f32 %v9015_v44, %v9003_v40  ;;  %v1109_v29 = vadd.f32 %v1061_v55, %v1009_v18  ;;  %v527_v34 = vrot.slane %v405_v20, 1  ;;  %v1163_v49 = vmul.f32 %v9018_v45, %v9061_v16 }
  0x9e   : > { %8273 = vmatpush3.bf16.msra.mxu0 %v8984_v26  ;;  %v856_v35 = vrot.slane %v734_v24, 2  ;;  %v2039_v50 = vsel %vm523_vm0, %v2037_v14, %v2038_v25  ;;  %v2365_v51 = vrot.slane %v2245_v30, 2  ;;  %v2366_v52 = vrot.slane %v2246_v31, 2  ;;  %v9109_v31 = vld [vmem:[#allocation2 + $0x68] sm:$0xff] }
  0x9f   : > { %8275 = vmatprep.subr.bf16.mxu0 %v8986_v27  ;;  %v1491_v56 = vmul.f32 %v9021_v46, %v9061_v16  ;;  %v1437_v57 = vadd.f32 %v1283_v11, %v1109_v29  ;;  %v528_v26 = vsel %vm523_vm0, %v525_v59, %v527_v34  ;;  %v1284_v58 = vrot.slane %v1163_v49, 1 }
  0xa0   : > { %v857_v55 = vsel %vm852_vm1, %v854_v63, %v856_v35  ;;  %v2367_v61 = vsel %vm852_vm1, %v2365_v51, %v2366_v52  ;;  %v681_v0 = vadd.f32 %v528_v26, %v304_v17  ;;  %v1818_v3 = vmul.f32 %v9024_v47, %v9044_v62  ;;  %v9093_v63 = vld [vmem:[#allocation2 + $0x40] sm:$0xff] }
  0xa1   : > { %v1612_v2 = vrot.slane %v1491_v56, 2  ;;  %v1765_v4 = vadd.f32 %v1611_v19, %v1437_v57  ;;  %v1285_v6 = vsel %vm523_vm0, %v1282_v1, %v1284_v58  ;;  %v1919_v9 = vmul.f32 %v9027_v48, %v9078_v54 }
  0xa2   : > { %8277 = vmatpush3.bf16.msra.mxu0 %v8986_v27  ;;  %v2247_v59 = vmul.f32 %v9059_v15, %v9078_v54  ;;  %v1010_v10 = vadd.f32 %v857_v55, %v681_v0  ;;  %v305_v13 = vmul.f32 %v9006_v41, %v226_v8  ;;  %v406_v27 = vmul.f32 %v9009_v42, %v227_v60 }
  0xa3   : > { %8279 = vmatprep.subr.bf16.mxu0 %v8988_v28  ;;  %v1613_v11 = vsel %vm852_vm1, %v1610_v12, %v1612_v2  ;;  %v1865_v14 = vadd.f32 %v1817_v5, %v1765_v4  ;;  %v2040_v17 = vrot.slane %v1919_v9, 1  ;;  %v735_v18 = vmul.f32 %v9012_v43, %v227_v60 }
  0xa4   : > { %v2368_v1 = vrot.slane %v2247_v59, 2  ;;  %v1110_v19 = vadd.f32 %v1062_v33, %v1010_v10  ;;  %v529_v20 = vrot.slane %v406_v27, 1  ;;  %v1063_v24 = vmul.f32 %v9015_v44, %v9061_v16 }
  0xa5   : > { %v9104_v30 = vmul.f32 %v9018_v45, %v9093_v63  ;;  %v2193_v12 = vadd.f32 %v2039_v50, %v1865_v14  ;;  %v2041_v8 = vsel %vm523_vm0, %v2038_v25, %v2040_v17  ;;  %v858_v29 = vrot.slane %v735_v18, 2 }
  0xa6   : > { %8281 = vmatpush3.bf16.msra.mxu0 %v8988_v28  ;;  %v2369_v5 = vsel %vm852_vm1, %v2366_v52, %v2368_v1  ;;  %v1438_v33 = vadd.f32 %v1285_v6, %v1110_v19  ;;  %v530_v49 = vsel %vm523_vm0, %v527_v34, %v529_v20  ;;  %v1492_v56 = vmul.f32 %v9021_v46, %v9093_v63  ;;  %v228_v52 = vld [vmem:[#allocation2 + $0x20] sm:$0x3] }
  0xa7   : > { %8283 = vmatprep.subr.bf16.mxu0 %v8990_v32  ;;  %v1286_v51 = vrot.slane %v9104_v30, 1  ;;  %v2521_v57 = vadd.f32 %v2367_v61, %v2193_v12  ;;  %v682_v28 = vadd.f32 %v530_v49, %v305_v13  ;;  %v859_v50 = vsel %vm852_vm1, %v856_v35, %v858_v29  ;;  %v9135_v12 = vld [vmem:[#allocation2 + $0x70] sm:$0x3] }
  0xa8   : > { %v1819_v25 = vmul.f32 %v9024_v47, %v9078_v54  ;;  %v1766_v26 = vadd.f32 %v1613_v11, %v1438_v33  ;;  %v1614_v0 = vrot.slane %v1492_v56, 2  ;;  %v1920_v34 = vmul.f32 %v9027_v48, %v9109_v31 }
  0xa9   : > { %v1287_v55 = vsel %vm523_vm0, %v1284_v58, %v1286_v51  ;;  %v2573_v4 = vadd.f32 %v8993_v36, %v2521_v57  ;;  %v1011_v6 = vadd.f32 %v859_v50, %v682_v28  ;;  %v2248_v61 = vmul.f32 %v9059_v15, %v9109_v31 }
  0xaa   : > { %8285 = vmatpush3.bf16.msra.mxu0 %v8990_v32  ;;  %v306_v35 = vmul.f32 %v9006_v41, %v227_v60  ;;  %v1866_v9 = vadd.f32 %v1818_v3, %v1766_v26  ;;  %v1615_v59 = vsel %vm852_vm1, %v1612_v2, %v1614_v0  ;;  %v2042_v10 = vrot.slane %v1920_v34, 1  ;;  %v9130_v32 = vld [vmem:[#allocation2 + $0x48] sm:$0x3] }
  0xab   : > { %v407_v58 = vmul.f32 %v9009_v42, %v228_v52  ;;  %vm2621_vm2 = vcmp.gt.f32.partialorder %v2573_v4, 0.0  ;;  %v2673_v11 = vmul.f32 %v8996_v37, %v2573_v4  ;;  %v1111_v13 = vadd.f32 %v1063_v24, %v1011_v6 }
  0xac   : > { %v2370_v27 = vrot.slane %v2248_v61, 2  ;;  %v2194_v14 = vadd.f32 %v2041_v8, %v1866_v9  ;;  %v2043_v18 = vsel %vm523_vm0, %v2040_v17, %v2042_v10  ;;  %v736_v30 = vmul.f32 %v9012_v43, %v228_v52 }
  0xad   : > { %v531_v19 = vrot.slane %v407_v58, 1  ;;  %v2721_v60 = vsel %vm2621_vm2, %v2573_v4, %v2673_v11  ;;  %v1439_v3 = vadd.f32 %v1287_v55, %v1111_v13  ;;  %v1064_v33 = vmul.f32 %v9015_v44, %v9093_v63 }
  0xae   : > { %v2371_v2 = vsel %vm852_vm1, %v2368_v1, %v2370_v27  ;;  %8049 = vmatprep.mubr.f32.mxu0 %v2721_v60  ;;  %v2522_v24 = vadd.f32 %v2369_v5, %v2194_v14  ;;  %v860_v56 = vrot.slane %v736_v30, 2  ;;  %v1165_v17 = vmul.f32 %v9018_v45, %v9130_v32 }
  0xaf   : > { %v532_v49 = vsel %vm523_vm0, %v529_v20, %v531_v19  ;;  %v1767_v8 = vadd.f32 %v1615_v59, %v1439_v3  ;;  %v1493_v28 = vmul.f32 %v9021_v46, %v9130_v32  ;;  %v1820_v1 = vmul.f32 %v9024_v47, %v9109_v31 }
  0xb0   : > { %v683_v57 = vadd.f32 %v532_v49, %v306_v35  ;;  %v2574_v50 = vadd.f32 %v8993_v36, %v2522_v24  ;;  %v861_v52 = vsel %vm852_vm1, %v858_v29, %v860_v56  ;;  %v1288_v26 = vrot.slane %v1165_v17, 1 }
  0xb1   : > { %v1921_v20 = vmul.f32 %v9027_v48, %v9135_v12  ;;  %v1867_v5 = vadd.f32 %v1819_v25, %v1767_v8  ;;  %v1616_v34 = vrot.slane %v1493_v28, 2  ;;  %v2249_v4 = vmul.f32 %v9059_v15, %v9135_v12  ;;  %v9185_v28 = vld [vmem:[#allocation2 + $0x78] sm:$0xff] }
  0xb2   : > { %v1012_v55 = vadd.f32 %v861_v52, %v683_v57  ;;  %vm2622_vm3 = vcmp.gt.f32.partialorder %v2574_v50, 0.0  ;;  %v2674_v6 = vmul.f32 %v8996_v37, %v2574_v50  ;;  %v1289_v61 = vsel %vm523_vm0, %v1286_v51, %v1288_v26  ;;  %v9188_v52 = vld [vmem:[#allocation2 + $0x80] sm:$0xff] }
  0xb3   : > { %v2044_v35 = vrot.slane %v1921_v20, 1  ;;  %v2195_v9 = vadd.f32 %v2043_v18, %v1867_v5  ;;  %v1617_v29 = vsel %vm852_vm1, %v1614_v0, %v1616_v34  ;;  %v2372_v58 = vrot.slane %v2249_v4, 2 }
  0xb4   : > { %v1112_v59 = vadd.f32 %v1064_v33, %v1012_v55  ;;  %v2722_v11 = vsel %vm2622_vm3, %v2574_v50, %v2674_v6  ;;  %v307_v25 = vmul.f32 %v9006_v41, %v9001_v39  ;;  %v408_v14 = vmul.f32 %v9009_v42, %v9001_v39 }
  0xb5   : > { %v2045_v13 = vsel %vm523_vm0, %v2042_v10, %v2044_v35  ;;  %8050 = vmatmul.mubr.f32.vlgmr.msra.gmra.mrb[0].mxu0 %v2722_v11  ;;  %v2523_v19 = vadd.f32 %v2371_v2, %v2195_v9  ;;  %v2373_v51 = vsel %vm852_vm1, %v2370_v27, %v2372_v58  ;;  %v9163_v18 = vmul.f32 %v9009_v42, %v9003_v40 }
  0xb6   : > { %v1440_v30 = vadd.f32 %v1289_v61, %v1112_v59  ;;  %v533_v0 = vrot.slane %v408_v14, 1  ;;  %v737_v60 = vmul.f32 %v9012_v43, %v9001_v39  ;;  %v9169_v10 = vmul.f32 %v9012_v43, %v9003_v40 }
  0xb7   : > { %v1065_v3 = vmul.f32 %v9015_v44, %v9033_v53  ;;  %v2575_v2 = vadd.f32 %v8993_v36, %v2523_v19  ;;  %v534_v27 = vrot.slane %v9163_v18, 1  ;;  %v1166_v24 = vmul.f32 %v9018_v45, %v9033_v53 }
  0xb8   : > { %v1768_v33 = vadd.f32 %v1617_v29, %v1440_v30  ;;  %v862_v49 = vrot.slane %v737_v60, 2  ;;  %v863_v56 = vrot.slane %v9169_v10, 2  ;;  %v9180_v39 = vmul.f32 %v9018_v45, %v9044_v62 }
  0xb9   : > { %v1494_v17 = vmul.f32 %v9021_v46, %v9033_v53  ;;  %vm2623_vm4 = vcmp.gt.f32.partialorder %v2575_v2, 0.0  ;;  %v2675_v8 = vmul.f32 %v8996_v37, %v2575_v2  ;;  %v535_v50 = vsel %vm523_vm0, %v533_v0, %v534_v27 }
  0xba   : > { %v1868_v57 = vadd.f32 %v1820_v1, %v1768_v33  ;;  %v684_v26 = vadd.f32 %v535_v50, %v307_v25  ;;  %v864_v20 = vsel %vm852_vm1, %v862_v49, %v863_v56  ;;  %v1290_v5 = vrot.slane %v1166_v24, 1 }
  0xbb   : > { %v1291_v55 = vrot.slane %v9180_v39, 1  ;;  %v2723_v34 = vsel %vm2623_vm4, %v2575_v2, %v2675_v8  ;;  %v1495_v6 = vmul.f32 %v9021_v46, %v9044_v62  ;;  %v1618_v61 = vrot.slane %v1494_v17, 2 }
  0xbc   : > { %v2196_v4 = vadd.f32 %v2045_v13, %v1868_v57  ;;  %8052 = vmatprep.mubr.f32.mxu0 %v2723_v34  ;;  %v1013_v1 = vadd.f32 %v864_v20, %v684_v26  ;;  %v1821_v9 = vmul.f32 %v9024_v47, %v9185_v28  ;;  %v1922_v59 = vmul.f32 %v9027_v48, %v9185_v28 }
  0xbd   : > { %v1292_v35 = vsel %vm523_vm0, %v1290_v5, %v1291_v55  ;;  %v1619_v58 = vrot.slane %v1495_v6, 2  ;;  %v1923_v11 = vmul.f32 %v9027_v48, %v9188_v52  ;;  %v2250_v13 = vmul.f32 %v9059_v15, %v9185_v28 }
  0xbe   : > { %v2524_v29 = vadd.f32 %v2373_v51, %v2196_v4  ;;  %v1113_v25 = vadd.f32 %v1065_v3, %v1013_v1  ;;  %v2046_v14 = vrot.slane %v1922_v59, 1  ;;  %v2251_v19 = vmul.f32 %v9059_v15, %v9188_v52 }
  0xbf   : > { %v308_v30 = vmul.f32 %v9006_v41, %v9003_v40  ;;  %v1620_v0 = vsel %vm852_vm1, %v1618_v61, %v1619_v58  ;;  %v2047_v51 = vrot.slane %v1923_v11, 1  ;;  %v2374_v60 = vrot.slane %v2250_v13, 2  ;;  %v9215_v40 = vld [vmem:[#allocation2 + $0x88] sm:$0xff] }
  0xc0   : > { %v2576_v18 = vadd.f32 %v8993_v36, %v2524_v29  ;;  %v1441_v10 = vadd.f32 %v1292_v35, %v1113_v25  ;;  %v2375_v2 = vrot.slane %v2251_v19, 2  ;;  %v410_v33 = vmul.f32 %v9009_v42, %v9061_v16 }
  0xc1   : > { %v739_v3 = vmul.f32 %v9012_v43, %v9061_v16  ;;  %v2048_v49 = vsel %vm523_vm0, %v2046_v14, %v2047_v51  ;;  %v1066_v39 = vmul.f32 %v9015_v44, %v9044_v62  ;;  %v1168_v20 = vmul.f32 %v9018_v45, %v9078_v54 }
  0xc2   : > { %vm2624_vm5 = vcmp.gt.f32.partialorder %v2576_v18, 0.0  ;;  %v2676_v24 = vmul.f32 %v8996_v37, %v2576_v18  ;;  %v1769_v17 = vadd.f32 %v1620_v0, %v1441_v10  ;;  %v2376_v8 = vsel %vm852_vm1, %v2374_v60, %v2375_v2 }
  0xc3   : > { %v536_v57 = vrot.slane %v410_v33, 1  ;;  %v865_v50 = vrot.slane %v739_v3, 2  ;;  %v1496_v5 = vmul.f32 %v9021_v46, %v9078_v54  ;;  %v1822_v34 = vmul.f32 %v9024_v47, %v9188_v52 }
  0xc4   : > { %v2724_v26 = vsel %vm2624_vm5, %v2576_v18, %v2676_v24  ;;  %v1869_v4 = vadd.f32 %v1821_v9, %v1769_v17  ;;  %v1924_v1 = vmul.f32 %v9027_v48, %v9215_v40  ;;  %v1293_v59 = vrot.slane %v1168_v20, 1 }
  0xc5   : > { %8053 = vmatmul.mubr.f32.gmra.mrb[2].mxu0 %v2724_v26  ;;  %v537_v6 = vsel %vm523_vm0, %v534_v27, %v536_v57  ;;  %v866_v61 = vsel %vm852_vm1, %v863_v56, %v865_v50  ;;  %v1621_v29 = vrot.slane %v1496_v5, 2  ;;  %v2252_v11 = vmul.f32 %v9059_v15, %v9215_v40 }
  0xc6   : > { %v685_v35 = vadd.f32 %v537_v6, %v308_v30  ;;  %v2197_v13 = vadd.f32 %v2048_v49, %v1869_v4  ;;  %v2049_v25 = vrot.slane %v1924_v1, 1  ;;  %v309_v14 = vmul.f32 %v9006_v41, %v9061_v16 }
  0xc7   : > { %v411_v9 = vmul.f32 %v9009_v42, %v9093_v63  ;;  %v1294_v56 = vsel %vm523_vm0, %v1291_v55, %v1293_v59  ;;  %v1622_v19 = vsel %vm852_vm1, %v1619_v58, %v1621_v29  ;;  %v2377_v18 = vrot.slane %v2252_v11, 2  ;;  %v9247_v58 = vld [vmem:[#allocation2 + $0x90] sm:$0xff] }
  0xc8   : > { %v1014_v27 = vadd.f32 %v866_v61, %v685_v35  ;;  %v2525_v30 = vadd.f32 %v2376_v8, %v2197_v13  ;;  %v2050_v0 = vsel %vm523_vm0, %v2047_v51, %v2049_v25  ;;  %v740_v10 = vmul.f32 %v9012_v43, %v9093_v63 }
  0xc9   : > { %v538_v60 = vrot.slane %v411_v9, 1  ;;  %v2378_v3 = vsel %vm852_vm1, %v2375_v2, %v2377_v18  ;;  %v1067_v16 = vmul.f32 %v9015_v44, %v9078_v54  ;;  %v1169_v24 = vmul.f32 %v9018_v45, %v9109_v31 }
  0xca   : > { %v1114_v33 = vadd.f32 %v1066_v39, %v1014_v27  ;;  %v2577_v55 = vadd.f32 %v8993_v36, %v2525_v30  ;;  %v867_v51 = vrot.slane %v740_v10, 2  ;;  %v1497_v17 = vmul.f32 %v9021_v46, %v9109_v31 }
  0xcb   : > { %v539_v49 = vsel %vm523_vm0, %v536_v57, %v538_v60  ;;  %v1295_v26 = vrot.slane %v1169_v24, 1  ;;  %v1823_v2 = vmul.f32 %v9024_v47, %v9215_v40  ;;  %v1925_v1 = vmul.f32 %v9027_v48, %v9247_v58  ;;  %v9274_v24 = vld [vmem:[#allocation2 + $0x98] sm:$0x3] }
  0xcc   : > { %v1442_v8 = vadd.f32 %v1294_v56, %v1114_v33  ;;  %v686_v39 = vadd.f32 %v539_v49, %v309_v14  ;;  %vm2625_vm6 = vcmp.gt.f32.partialorder %v2577_v55, 0.0  ;;  %v2677_v20 = vmul.f32 %v8996_v37, %v2577_v55 }
  0xcd   : > { %v868_v5 = vsel %vm852_vm1, %v865_v50, %v867_v51  ;;  %v1623_v4 = vrot.slane %v1497_v17, 2  ;;  %v1296_v57 = vsel %vm523_vm0, %v1293_v59, %v1295_v26  ;;  %v2253_v13 = vmul.f32 %v9059_v15, %v9247_v58 }
  0xce   : > { %v1770_v6 = vadd.f32 %v1622_v19, %v1442_v8  ;;  %v1015_v61 = vadd.f32 %v868_v5, %v686_v39  ;;  %v2725_v35 = vsel %vm2625_vm6, %v2577_v55, %v2677_v20  ;;  %v310_v14 = vmul.f32 %v9006_v41, %v9093_v63 }
  0xcf   : > { %v1624_v11 = vsel %vm852_vm1, %v1621_v29, %v1623_v4  ;;  %8055 = vmatprep.mubr.f32.mxu0 %v2725_v35  ;;  %v2051_v27 = vrot.slane %v1925_v1, 1  ;;  %v412_v56 = vmul.f32 %v9009_v42, %v9130_v32  ;;  %v2379_v59 = vrot.slane %v2253_v13, 2 }
  0xd0   : > { %v1870_v9 = vadd.f32 %v1822_v34, %v1770_v6  ;;  %v1115_v50 = vadd.f32 %v1067_v16, %v1015_v61  ;;  %v741_v19 = vmul.f32 %v9012_v43, %v9130_v32  ;;  %v1068_v29 = vmul.f32 %v9015_v44, %v9109_v31 }
  0xd1   : > { %v1170_v30 = vmul.f32 %v9018_v45, %v9135_v12  ;;  %v2052_v63 = vsel %vm523_vm0, %v2049_v25, %v2051_v27  ;;  %v540_v34 = vrot.slane %v412_v56, 1  ;;  %v2380_v16 = vsel %vm852_vm1, %v2377_v18, %v2379_v59 }
  0xd2   : > { %v2198_v10 = vadd.f32 %v2050_v0, %v1870_v9  ;;  %v1443_v33 = vadd.f32 %v1296_v57, %v1115_v50  ;;  %v869_v55 = vrot.slane %v741_v19, 2  ;;  %v1498_v32 = vmul.f32 %v9021_v46, %v9135_v12 }
  0xd3   : > { %v1297_v49 = vrot.slane %v1170_v30, 1  ;;  %v541_v39 = vsel %vm523_vm0, %v538_v60, %v540_v34  ;;  %v1824_v0 = vmul.f32 %v9024_v47, %v9247_v58  ;;  %v1926_v57 = vmul.f32 %v9027_v48, %v9274_v24 }
  0xd4   : > { %v2526_v17 = vadd.f32 %v2378_v3, %v2198_v10  ;;  %v1771_v8 = vadd.f32 %v1624_v11, %v1443_v33  ;;  %v687_v20 = vadd.f32 %v541_v39, %v310_v14  ;;  %v870_v25 = vsel %vm852_vm1, %v867_v51, %v869_v55 }
  0xd5   : > { %v1298_v5 = vsel %vm523_vm0, %v1295_v26, %v1297_v49  ;;  %v1625_v18 = vrot.slane %v1498_v32, 2  ;;  %v2254_v3 = vmul.f32 %v9059_v15, %v9274_v24  ;;  %v311_v35 = vmul.f32 %v9006_v41, %v9033_v53  ;;  %v9312_v49 = vld [vmem:[#allocation2 + $0xa0] sm:$0xff] }
  0xd6   : > { %v2578_v6 = vadd.f32 %v8993_v36, %v2526_v17  ;;  %v1871_v61 = vadd.f32 %v1823_v2, %v1771_v8  ;;  %v1016_v1 = vadd.f32 %v870_v25, %v687_v20  ;;  %v413_v51 = vmul.f32 %v9009_v42, %v9033_v53 }
  0xd7   : > { %v1626_v60 = vsel %vm852_vm1, %v1623_v4, %v1625_v18  ;;  %v2053_v2 = vrot.slane %v1926_v57, 1  ;;  %v2381_v14 = vrot.slane %v2254_v3, 2  ;;  %v9296_v9 = vmul.f32 %v9009_v42, %v9044_v62 }
  0xd8   : > { %vm2626_vm7 = vcmp.gt.f32.partialorder %v2578_v6, 0.0  ;;  %v2678_v26 = vmul.f32 %v8996_v37, %v2578_v6  ;;  %v2199_v11 = vadd.f32 %v2052_v63, %v1871_v61  ;;  %v1116_v13 = vadd.f32 %v1068_v29, %v1016_v1 }
  0xd9   : > { %v542_v50 = vrot.slane %v413_v51, 1  ;;  %v2054_v19 = vsel %vm523_vm0, %v2051_v27, %v2053_v2  ;;  %v742_v30 = vmul.f32 %v9012_v43, %v9033_v53  ;;  %v2382_v33 = vsel %vm852_vm1, %v2379_v59, %v2381_v14 }
  0xda   : > { %v2726_v56 = vsel %vm2626_vm7, %v2578_v6, %v2678_v26  ;;  %v2527_v4 = vadd.f32 %v2380_v16, %v2199_v11  ;;  %v1444_v10 = vadd.f32 %v1298_v5, %v1116_v13  ;;  %v543_v63 = vrot.slane %v9296_v9, 1  ;;  %v9319_v5 = vld [vmem:[#allocation2 + $0xa8] sm:$0xff] }
  0xdb   : > { %8056 = vmatmul.mubr.f32.gmra.mrb[4].mxu0 %v2726_v56  ;;  %v9305_v29 = vmul.f32 %v9012_v43, %v9044_v62  ;;  %v871_v55 = vrot.slane %v742_v30, 2  ;;  %v1069_v16 = vmul.f32 %v9015_v44, %v9185_v28  ;;  %v1171_v27 = vmul.f32 %v9018_v45, %v9185_v28 }
  0xdc   : > { %v2579_v34 = vadd.f32 %v8993_v36, %v2527_v4  ;;  %v1772_v53 = vadd.f32 %v1626_v60, %v1444_v10  ;;  %v544_v59 = vsel %vm523_vm0, %v542_v50, %v543_v63  ;;  %v1172_v17 = vmul.f32 %v9018_v45, %v9188_v52 }
  0xdd   : > { %v872_v32 = vrot.slane %v9305_v29, 2  ;;  %v688_v39 = vadd.f32 %v544_v59, %v311_v35  ;;  %v1299_v20 = vrot.slane %v1171_v27, 1  ;;  %v1499_v61 = vmul.f32 %v9021_v46, %v9185_v28  ;;  %v9346_v59 = vld [vmem:[#allocation2 + $0xb0] sm:$0xff] }
  0xde   : > { %vm2627_vm8 = vcmp.gt.f32.partialorder %v2579_v34, 0.0  ;;  %v2679_v8 = vmul.f32 %v8996_v37, %v2579_v34  ;;  %v1872_v25 = vadd.f32 %v1824_v0, %v1772_v53  ;;  %v1300_v6 = vrot.slane %v1172_v17, 1 }
  0xdf   : > { %v873_v18 = vsel %vm852_vm1, %v871_v55, %v872_v32  ;;  %v1500_v1 = vmul.f32 %v9021_v46, %v9188_v52  ;;  %v1825_v60 = vmul.f32 %v9024_v47, %v9312_v49  ;;  %v1627_v51 = vrot.slane %v1499_v61, 2 }
  0xe0   : > { %v2727_v57 = vsel %vm2627_vm8, %v2579_v34, %v2679_v8  ;;  %v1017_v3 = vadd.f32 %v873_v18, %v688_v39  ;;  %v2200_v35 = vadd.f32 %v2054_v19, %v1872_v25  ;;  %v1301_v0 = vsel %vm523_vm0, %v1299_v20, %v1300_v6 }
  0xe1   : > { %8058 = vmatprep.mubr.f32.mxu0 %v2727_v57  ;;  %v1927_v26 = vmul.f32 %v9027_v48, %v9312_v49  ;;  %v1628_v2 = vrot.slane %v1500_v1, 2  ;;  %v1928_v13 = vmul.f32 %v9027_v48, %v9319_v5  ;;  %v2255_v14 = vmul.f32 %v9059_v15, %v9312_v49 }
  0xe2   : > { %v1117_v11 = vadd.f32 %v1069_v16, %v1017_v3  ;;  %v2528_v9 = vadd.f32 %v2382_v33, %v2200_v35  ;;  %v2256_v56 = vmul.f32 %v9059_v15, %v9319_v5  ;;  %v312_v4 = vmul.f32 %v9006_v41, %v9044_v62 }
  0xe3   : > { %v2055_v50 = vrot.slane %v1927_v26, 1  ;;  %v1629_v30 = vsel %vm852_vm1, %v1627_v51, %v1628_v2  ;;  %v2056_v10 = vrot.slane %v1928_v13, 1  ;;  %v2383_v29 = vrot.slane %v2255_v14, 2 }
  0xe4   : > { %v1445_v19 = vadd.f32 %v1301_v0, %v1117_v11  ;;  %v2580_v34 = vadd.f32 %v8993_v36, %v2528_v9  ;;  %v2384_v55 = vrot.slane %v2256_v56, 2  ;;  %v415_v16 = vmul.f32 %v9009_v42, %v9078_v54 }
  0xe5   : > { %v744_v33 = vmul.f32 %v9012_v43, %v9078_v54  ;;  %v2057_v53 = vsel %vm523_vm0, %v2055_v50, %v2056_v10  ;;  %v1070_v62 = vmul.f32 %v9015_v44, %v9188_v52  ;;  %v1173_v17 = vmul.f32 %v9018_v45, %v9215_v40 }
  0xe6   : > { %v1773_v27 = vadd.f32 %v1629_v30, %v1445_v19  ;;  %vm2628_vm9 = vcmp.gt.f32.partialorder %v2580_v34, 0.0  ;;  %v2680_v8 = vmul.f32 %v8996_v37, %v2580_v34  ;;  %v2385_v39 = vsel %vm852_vm1, %v2383_v29, %v2384_v55 }
  0xe7   : > { %v545_v20 = vrot.slane %v415_v16, 1  ;;  %v874_v18 = vrot.slane %v744_v33, 2  ;;  %v1302_v61 = vrot.slane %v1173_v17, 1  ;;  %v1501_v57 = vmul.f32 %v9021_v46, %v9215_v40 }
  0xe8   : > { %v1873_v25 = vadd.f32 %v1825_v60, %v1773_v27  ;;  %v2728_v3 = vsel %vm2628_vm9, %v2580_v34, %v2680_v8  ;;  %v1826_v35 = vmul.f32 %v9024_v47, %v9319_v5  ;;  %v1929_v0 = vmul.f32 %v9027_v48, %v9346_v59 }
  0xe9   : > { %v546_v1 = vsel %vm523_vm0, %v543_v63, %v545_v20  ;;  %8059 = vmatmul.mubr.f32.gmra.mrb[6].mxu0 %v2728_v3  ;;  %v875_v11 = vsel %vm852_vm1, %v872_v32, %v874_v18  ;;  %v1303_v60 = vsel %vm523_vm0, %v1300_v6, %v1302_v61  ;;  %v1630_v13 = vrot.slane %v1501_v57, 2 }
  0xea   : > { %v2201_v51 = vadd.f32 %v2057_v53, %v1873_v25  ;;  %v689_v26 = vadd.f32 %v546_v1, %v312_v4  ;;  %v2058_v14 = vrot.slane %v1929_v0, 1  ;;  %v2257_v9 = vmul.f32 %v9059_v15, %v9346_v59  ;;  %v9377_v53 = vld [vmem:[#allocation2 + $0xb8] sm:$0xff] }
  0xeb   : > { %v313_v63 = vmul.f32 %v9006_v41, %v9078_v54  ;;  %v416_v19 = vmul.f32 %v9009_v42, %v9109_v31  ;;  %v745_v4 = vmul.f32 %v9012_v43, %v9109_v31  ;;  %v1631_v32 = vsel %vm852_vm1, %v1628_v2, %v1630_v13 }
  0xec   : > { %v2529_v50 = vadd.f32 %v2385_v39, %v2201_v51  ;;  %v1018_v56 = vadd.f32 %v875_v11, %v689_v26  ;;  %v2059_v6 = vsel %vm523_vm0, %v2056_v10, %v2058_v14  ;;  %v2386_v30 = vrot.slane %v2257_v9, 2 }
  0xed   : > { %v1071_v29 = vmul.f32 %v9015_v44, %v9215_v40  ;;  %v547_v54 = vrot.slane %v416_v19, 1  ;;  %v876_v33 = vrot.slane %v745_v4, 2  ;;  %v1174_v17 = vmul.f32 %v9018_v45, %v9247_v58  ;;  %v9398_v4 = vld [vmem:[#allocation2 + $0xc0] sm:$0x3] }
  0xee   : > { %v2581_v34 = vadd.f32 %v8993_v36, %v2529_v50  ;;  %v1118_v16 = vadd.f32 %v1070_v62, %v1018_v56  ;;  %v2387_v27 = vsel %vm852_vm1, %v2384_v55, %v2386_v30  ;;  %v1502_v2 = vmul.f32 %v9021_v46, %v9247_v58 }
  0xef   : > { %v1827_v10 = vmul.f32 %v9024_v47, %v9346_v59  ;;  %v548_v62 = vsel %vm523_vm0, %v545_v20, %v547_v54  ;;  %v877_v55 = vsel %vm852_vm1, %v874_v18, %v876_v33  ;;  %v1304_v57 = vrot.slane %v1174_v17, 1 }
  0xf0   : > { %vm2629_vm10 = vcmp.gt.f32.partialorder %v2581_v34, 0.0  ;;  %v2681_v8 = vmul.f32 %v8996_v37, %v2581_v34  ;;  %v1446_v39 = vadd.f32 %v1303_v60, %v1118_v16  ;;  %v690_v25 = vadd.f32 %v548_v62, %v313_v63 }
  0xf1   : > { %v1632_v3 = vrot.slane %v1502_v2, 2  ;;  %v1930_v51 = vmul.f32 %v9027_v48, %v9377_v53  ;;  %v2258_v26 = vmul.f32 %v9059_v15, %v9377_v53  ;;  %v1305_v9 = vsel %vm523_vm0, %v1302_v61, %v1304_v57 }
  0xf2   : > { %v2729_v1 = vsel %vm2629_vm10, %v2581_v34, %v2681_v8  ;;  %v1774_v0 = vadd.f32 %v1631_v32, %v1446_v39  ;;  %v1019_v11 = vadd.f32 %v877_v55, %v690_v25  ;;  %v314_v20 = vmul.f32 %v9006_v41, %v9109_v31 }
  0xf3   : > { %8061 = vmatprep.mubr.f32.mxu0 %v2729_v1  ;;  %v1633_v60 = vsel %vm852_vm1, %v1630_v13, %v1632_v3  ;;  %v2060_v63 = vrot.slane %v1930_v51, 1  ;;  %v2388_v50 = vrot.slane %v2258_v26, 2  ;;  %v417_v56 = vmul.f32 %v9009_v42, %v9135_v12 }
  0xf4   : > { %v1874_v18 = vadd.f32 %v1826_v35, %v1774_v0  ;;  %v1119_v19 = vadd.f32 %v1071_v29, %v1019_v11  ;;  %v746_v32 = vmul.f32 %v9012_v43, %v9135_v12  ;;  %v1072_v61 = vmul.f32 %v9015_v44, %v9247_v58 }
  0xf5   : > { %v1175_v13 = vmul.f32 %v9018_v45, %v9274_v24  ;;  %v2061_v31 = vsel %vm523_vm0, %v2058_v14, %v2060_v63  ;;  %v2389_v35 = vsel %vm852_vm1, %v2386_v30, %v2388_v50  ;;  %v549_v16 = vrot.slane %v417_v56, 1 }
  0xf6   : > { %v2202_v34 = vadd.f32 %v2059_v6, %v1874_v18  ;;  %v1447_v17 = vadd.f32 %v1305_v9, %v1119_v19  ;;  %v878_v2 = vrot.slane %v746_v32, 2  ;;  %v1503_v8 = vmul.f32 %v9021_v46, %v9274_v24 }
  0xf7   : > { %v1306_v29 = vrot.slane %v1175_v13, 1  ;;  %v550_v12 = vsel %vm523_vm0, %v547_v54, %v549_v16  ;;  %v1828_v62 = vmul.f32 %v9024_v47, %v9377_v53  ;;  %v1931_v6 = vmul.f32 %v9027_v48, %v9398_v4 }
  0xf8   : > { %v2530_v39 = vadd.f32 %v2387_v27, %v2202_v34  ;;  %v1775_v25 = vadd.f32 %v1633_v60, %v1447_v17  ;;  %v691_v14 = vadd.f32 %v550_v12, %v314_v20  ;;  %v879_v30 = vsel %vm852_vm1, %v876_v33, %v878_v2 }
  0xf9   : > { %v1307_v55 = vsel %vm523_vm0, %v1304_v57, %v1306_v29  ;;  %v1634_v0 = vrot.slane %v1503_v8, 2  ;;  %v2062_v51 = vrot.slane %v1931_v6, 1  ;;  %v2259_v27 = vmul.f32 %v9059_v15, %v9398_v4 }
  0xfa   : > { %v2582_v1 = vadd.f32 %v8993_v36, %v2530_v39  ;;  %v1875_v54 = vadd.f32 %v1827_v10, %v1775_v25  ;;  %v1020_v26 = vadd.f32 %v879_v30, %v691_v14  ;;  %v315_v11 = vmul.f32 %v9006_v41, %v9185_v28  ;;  %v9445_v39 = vld [vmem:[#allocation2 + $0xc8] sm:$0xff] }
  0xfb   : > { %v418_v9 = vmul.f32 %v9009_v42, %v9185_v28  ;;  %v1635_v57 = vsel %vm852_vm1, %v1632_v3, %v1634_v0  ;;  %v2063_v60 = vsel %vm523_vm0, %v2060_v63, %v2062_v51  ;;  %v2390_v56 = vrot.slane %v2259_v27, 2 }
  0xfc   : > { %vm2630_vm11 = vcmp.gt.f32.partialorder %v2582_v1, 0.0  ;;  %v2682_v33 = vmul.f32 %v8996_v37, %v2582_v1  ;;  %v2203_v20 = vadd.f32 %v2061_v31, %v1875_v54  ;;  %v1120_v18 = vadd.f32 %v1072_v61, %v1020_v26 }
  0xfd   : > { %v9429_v10 = vmul.f32 %v9009_v42, %v9188_v52  ;;  %v551_v32 = vrot.slane %v418_v9, 1  ;;  %v747_v13 = vmul.f32 %v9012_v43, %v9185_v28  ;;  %v9435_v34 = vmul.f32 %v9012_v43, %v9188_v52 }
  0xfe   : > { %v2730_v19 = vsel %vm2630_vm11, %v2582_v1, %v2682_v33  ;;  %v2531_v3 = vadd.f32 %v2389_v35, %v2203_v20  ;;  %v1448_v16 = vadd.f32 %v1307_v55, %v1120_v18  ;;  %v2391_v63 = vsel %vm852_vm1, %v2388_v50, %v2390_v56  ;;  %v9456_v1 = vld [vmem:[#allocation2 + $0xd0] sm:$0xff] }
  0xff   : > { %8062 = vmatmul.mubr.f32.gmra.mrb[8].mxu0 %v2730_v19  ;;  %v552_v61 = vrot.slane %v9429_v10, 1  ;;  %v880_v31 = vrot.slane %v747_v13, 2  ;;  %v881_v17 = vrot.slane %v9435_v34, 2  ;;  %v1073_v2 = vmul.f32 %v9015_v44, %v9312_v49 }
 0x100   : > { %v1176_v28 = vmul.f32 %v9018_v45, %v9312_v49  ;;  %v2583_v29 = vadd.f32 %v8993_v36, %v2531_v3  ;;  %v1776_v8 = vadd.f32 %v1635_v57, %v1448_v16  ;;  %v1177_v50 = vmul.f32 %v9018_v45, %v9319_v5 }
 0x101   : > { %v553_v35 = vsel %vm523_vm0, %v551_v32, %v552_v61  ;;  %v882_v6 = vsel %vm852_vm1, %v880_v31, %v881_v17  ;;  %v1504_v14 = vmul.f32 %v9021_v46, %v9312_v49  ;;  %v1505_v27 = vmul.f32 %v9021_v46, %v9319_v5 }
 0x102   : > { %v692_v12 = vadd.f32 %v553_v35, %v315_v11  ;;  %v1308_v25 = vrot.slane %v1176_v28, 1  ;;  %vm2631_vm12 = vcmp.gt.f32.partialorder %v2583_v29, 0.0  ;;  %v2683_v30 = vmul.f32 %v8996_v37, %v2583_v29 }
 0x103   : > { %v1876_v55 = vadd.f32 %v1828_v62, %v1776_v8  ;;  %v1309_v0 = vrot.slane %v1177_v50, 1  ;;  %v1636_v54 = vrot.slane %v1504_v14, 2  ;;  %v1829_v26 = vmul.f32 %v9024_v47, %v9445_v39  ;;  %v9480_v50 = vld [vmem:[#allocation2 + $0xd8] sm:$0xff] }
 0x104   : > { %v1021_v51 = vadd.f32 %v882_v6, %v692_v12  ;;  %v2731_v11 = vsel %vm2631_vm12, %v2583_v29, %v2683_v30  ;;  %v1932_v57 = vmul.f32 %v9027_v48, %v9445_v39  ;;  %v1637_v20 = vrot.slane %v1505_v27, 2 }
 0x105   : > { %v2204_v9 = vadd.f32 %v2063_v60, %v1876_v55  ;;  %v1310_v33 = vsel %vm523_vm0, %v1308_v25, %v1309_v0  ;;  %8064 = vmatprep.mubr.f32.mxu0 %v2731_v11  ;;  %v1933_v18 = vmul.f32 %v9027_v48, %v9456_v1  ;;  %v2260_v56 = vmul.f32 %v9059_v15, %v9445_v39 }
 0x106   : > { %v1121_v62 = vadd.f32 %v1073_v2, %v1021_v51  ;;  %v2064_v19 = vrot.slane %v1932_v57, 1  ;;  %v2261_v32 = vmul.f32 %v9059_v15, %v9456_v1  ;;  %v316_v60 = vmul.f32 %v9006_v41, %v9188_v52 }
 0x107   : > { %v2532_v10 = vadd.f32 %v2391_v63, %v2204_v9  ;;  %v1638_v3 = vsel %vm852_vm1, %v1636_v54, %v1637_v20  ;;  %v2065_v16 = vrot.slane %v1933_v18, 1  ;;  %v2392_v31 = vrot.slane %v2260_v56, 2 }
 0x108   : > { %v1449_v13 = vadd.f32 %v1310_v33, %v1121_v62  ;;  %v2393_v28 = vrot.slane %v2261_v32, 2  ;;  %v420_v29 = vmul.f32 %v9009_v42, %v9215_v40  ;;  %v749_v63 = vmul.f32 %v9012_v43, %v9215_v40 }
 0x109   : > { %v2584_v2 = vadd.f32 %v8993_v36, %v2532_v10  ;;  %v2066_v35 = vsel %vm523_vm0, %v2064_v19, %v2065_v16  ;;  %v1074_v52 = vmul.f32 %v9015_v44, %v9319_v5  ;;  %v1178_v12 = vmul.f32 %v9018_v45, %v9346_v59 }
 0x10a   : > { %v1777_v8 = vadd.f32 %v1638_v3, %v1449_v13  ;;  %v2394_v25 = vsel %vm852_vm1, %v2392_v31, %v2393_v28  ;;  %v554_v14 = vrot.slane %v420_v29, 1  ;;  %v883_v55 = vrot.slane %v749_v63, 2 }
 0x10b   : > { %vm2632_vm13 = vcmp.gt.f32.partialorder %v2584_v2, 0.0  ;;  %v2684_v6 = vmul.f32 %v8996_v37, %v2584_v2  ;;  %v1311_v51 = vrot.slane %v1178_v12, 1  ;;  %v1506_v27 = vmul.f32 %v9021_v46, %v9346_v59 }
 0x10c   : > { %v1877_v30 = vadd.f32 %v1829_v26, %v1777_v8  ;;  %v555_v11 = vsel %vm523_vm0, %v552_v61, %v554_v14  ;;  %v1830_v9 = vmul.f32 %v9024_v47, %v9456_v1  ;;  %v1934_v33 = vmul.f32 %v9027_v48, %v9480_v50 }
 0x10d   : > { %v2732_v54 = vsel %vm2632_vm13, %v2584_v2, %v2684_v6  ;;  %v693_v62 = vadd.f32 %v555_v11, %v316_v60  ;;  %v884_v26 = vsel %vm852_vm1, %v881_v17, %v883_v55  ;;  %v1312_v18 = vsel %vm523_vm0, %v1309_v0, %v1311_v51 }
 0x10e   : > { %8065 = vmatmul.mubr.f32.gmra.mrb[10].mxu0 %v2732_v54  ;;  %v2205_v57 = vadd.f32 %v2066_v35, %v1877_v30  ;;  %v1639_v56 = vrot.slane %v1506_v27, 2  ;;  %v2067_v10 = vrot.slane %v1934_v33, 1  ;;  %v2262_v61 = vmul.f32 %v9059_v15, %v9480_v50  ;;  %v9513_v35 = vld [vmem:[#allocation2 + $0xe0] sm:$0xff] }
 0x10f   : > { %v317_v19 = vmul.f32 %v9006_v41, %v9215_v40  ;;  %v1022_v13 = vadd.f32 %v884_v26, %v693_v62  ;;  %v421_v3 = vmul.f32 %v9009_v42, %v9247_v58  ;;  %v750_v34 = vmul.f32 %v9012_v43, %v9247_v58 }
 0x110   : > { %v2533_v32 = vadd.f32 %v2394_v25, %v2205_v57  ;;  %v1640_v17 = vsel %vm852_vm1, %v1637_v20, %v1639_v56  ;;  %v2068_v0 = vsel %vm523_vm0, %v2065_v16, %v2067_v10  ;;  %v2395_v60 = vrot.slane %v2262_v61, 2 }
 0x111   : > { %v1075_v31 = vmul.f32 %v9015_v44, %v9346_v59  ;;  %v1122_v29 = vadd.f32 %v1074_v52, %v1022_v13  ;;  %v556_v40 = vrot.slane %v421_v3, 1  ;;  %v885_v63 = vrot.slane %v750_v34, 2  ;;  %v9534_v34 = vld [vmem:[#allocation2 + $0xe8] sm:$0x3] }
 0x112   : > { %v2585_v2 = vadd.f32 %v8993_v36, %v2533_v32  ;;  %v2396_v8 = vsel %vm852_vm1, %v2393_v28, %v2395_v60  ;;  %v1179_v12 = vmul.f32 %v9018_v45, %v9377_v53  ;;  %v1507_v20 = vmul.f32 %v9021_v46, %v9377_v53 }
 0x113   : > { %v1831_v16 = vmul.f32 %v9024_v47, %v9480_v50  ;;  %v1450_v25 = vadd.f32 %v1312_v18, %v1122_v29  ;;  %v557_v52 = vsel %vm523_vm0, %v554_v14, %v556_v40  ;;  %v886_v28 = vsel %vm852_vm1, %v883_v55, %v885_v63 }
 0x114   : > { %vm2633_vm14 = vcmp.gt.f32.partialorder %v2585_v2, 0.0  ;;  %v2685_v6 = vmul.f32 %v8996_v37, %v2585_v2  ;;  %v694_v30 = vadd.f32 %v557_v52, %v317_v19  ;;  %v1313_v27 = vrot.slane %v1179_v12, 1 }
 0x115   : > { %v1641_v54 = vrot.slane %v1507_v20, 2  ;;  %v1778_v33 = vadd.f32 %v1640_v17, %v1450_v25  ;;  %v1935_v57 = vmul.f32 %v9027_v48, %v9513_v35  ;;  %v2263_v62 = vmul.f32 %v9059_v15, %v9513_v35 }
 0x116   : > { %v2733_v11 = vsel %vm2633_vm14, %v2585_v2, %v2685_v6  ;;  %v1023_v26 = vadd.f32 %v886_v28, %v694_v30  ;;  %v1314_v61 = vsel %vm523_vm0, %v1311_v51, %v1313_v27  ;;  %v318_v14 = vmul.f32 %v9006_v41, %v9247_v58 }
 0x117   : > { %8067 = vmatprep.mubr.f32.mxu0 %v2733_v11  ;;  %v1642_v18 = vsel %vm852_vm1, %v1639_v56, %v1641_v54  ;;  %v1878_v55 = vadd.f32 %v1830_v9, %v1778_v33  ;;  %v2069_v19 = vrot.slane %v1935_v57, 1  ;;  %v2397_v32 = vrot.slane %v2263_v62, 2 }
 0x118   : > { %v422_v13 = vmul.f32 %v9009_v42, %v9274_v24  ;;  %v1123_v3 = vadd.f32 %v1075_v31, %v1023_v26  ;;  %v751_v17 = vmul.f32 %v9012_v43, %v9274_v24  ;;  %v1076_v51 = vmul.f32 %v9015_v44, %v9377_v53 }
 0x119   : > { %v1180_v56 = vmul.f32 %v9018_v45, %v9398_v4  ;;  %v2206_v2 = vadd.f32 %v2068_v0, %v1878_v55  ;;  %v2070_v58 = vsel %vm523_vm0, %v2067_v10, %v2069_v19  ;;  %v2398_v9 = vsel %vm852_vm1, %v2395_v60, %v2397_v32 }
 0x11a   : > { %v558_v29 = vrot.slane %v422_v13, 1  ;;  %v1451_v12 = vadd.f32 %v1314_v61, %v1123_v3  ;;  %v887_v20 = vrot.slane %v751_v17, 2  ;;  %v1508_v6 = vmul.f32 %v9021_v46, %v9398_v4 }
 0x11b   : > { %v1315_v31 = vrot.slane %v1180_v56, 1  ;;  %v2534_v25 = vadd.f32 %v2396_v8, %v2206_v2  ;;  %v1832_v52 = vmul.f32 %v9024_v47, %v9513_v35  ;;  %v1936_v0 = vmul.f32 %v9027_v48, %v9534_v34 }
 0x11c   : > { %v559_v24 = vsel %vm523_vm0, %v556_v40, %v558_v29  ;;  %v1779_v30 = vadd.f32 %v1642_v18, %v1451_v12  ;;  %v888_v60 = vsel %vm852_vm1, %v885_v63, %v887_v20  ;;  %v1643_v33 = vrot.slane %v1508_v6, 2 }
 0x11d   : > { %v695_v10 = vadd.f32 %v559_v24, %v318_v14  ;;  %v1316_v28 = vsel %vm523_vm0, %v1313_v27, %v1315_v31  ;;  %v2586_v11 = vadd.f32 %v8993_v36, %v2534_v25  ;;  %v2071_v57 = vrot.slane %v1936_v0, 1  ;;  %v9581_v25 = vld [vmem:[#allocation2 + $0xf0] sm:$0xff] }
 0x11e   : > { %v2264_v8 = vmul.f32 %v9059_v15, %v9534_v34  ;;  %v1879_v40 = vadd.f32 %v1831_v16, %v1779_v30  ;;  %v319_v26 = vmul.f32 %v9006_v41, %v9312_v49  ;;  %v423_v61 = vmul.f32 %v9009_v42, %v9312_v49 }
 0x11f   : > { %v1024_v62 = vadd.f32 %v888_v60, %v695_v10  ;;  %vm2634_vm15 = vcmp.gt.f32.partialorder %v2586_v11, 0.0  ;;  %v2686_v63 = vmul.f32 %v8996_v37, %v2586_v11  ;;  %v1644_v27 = vsel %vm852_vm1, %v1641_v54, %v1643_v33 }
 0x120   : > { %v2072_v18 = vsel %vm523_vm0, %v2069_v19, %v2071_v57  ;;  %v2207_v14 = vadd.f32 %v2070_v58, %v1879_v40  ;;  %v2399_v13 = vrot.slane %v2264_v8, 2  ;;  %v9565_v16 = vmul.f32 %v9009_v42, %v9319_v5 }
 0x121   : > { %v1124_v55 = vadd.f32 %v1076_v51, %v1024_v62  ;;  %v2734_v3 = vsel %vm2634_vm15, %v2586_v11, %v2686_v63  ;;  %v560_v17 = vrot.slane %v423_v61, 1  ;;  %v752_v56 = vmul.f32 %v9012_v43, %v9312_v49  ;;  %v9592_v11 = vld [vmem:[#allocation2 + $0xf8] sm:$0xff] }
 0x122   : > { %v9571_v2 = vmul.f32 %v9012_v43, %v9319_v5  ;;  %8068 = vmatmul.mubr.f32.gmra.mrb[12].mxu0 %v2734_v3  ;;  %v2535_v54 = vadd.f32 %v2398_v9, %v2207_v14  ;;  %v2400_v19 = vsel %vm852_vm1, %v2397_v32, %v2399_v13  ;;  %v561_v51 = vrot.slane %v9565_v16, 1 }
 0x123   : > { %v1452_v29 = vadd.f32 %v1316_v28, %v1124_v55  ;;  %v889_v58 = vrot.slane %v752_v56, 2  ;;  %v1077_v20 = vmul.f32 %v9015_v44, %v9445_v39  ;;  %v1181_v49 = vmul.f32 %v9018_v45, %v9445_v39 }
 0x124   : > { %v890_v12 = vrot.slane %v9571_v2, 2  ;;  %v2587_v31 = vadd.f32 %v8993_v36, %v2535_v54  ;;  %v562_v9 = vsel %vm523_vm0, %v560_v17, %v561_v51  ;;  %v1182_v32 = vmul.f32 %v9018_v45, %v9456_v1 }
 0x125   : > { %v1780_v6 = vadd.f32 %v1644_v27, %v1452_v29  ;;  %v696_v24 = vadd.f32 %v562_v9, %v319_v26  ;;  %v1317_v30 = vrot.slane %v1181_v49, 1  ;;  %v1509_v10 = vmul.f32 %v9021_v46, %v9445_v39 }
 0x126   : > { %v891_v0 = vsel %vm852_vm1, %v889_v58, %v890_v12  ;;  %vm2635_vm2 = vcmp.gt.f32.partialorder %v2587_v31, 0.0  ;;  %v2687_v60 = vmul.f32 %v8996_v37, %v2587_v31  ;;  %v1318_v33 = vrot.slane %v1182_v32, 1  ;;  %v9616_v32 = vld [vmem:[#allocation2 + $0x100] sm:$0xff] }
 0x127   : > { %v1880_v28 = vadd.f32 %v1832_v52, %v1780_v6  ;;  %v1025_v57 = vadd.f32 %v891_v0, %v696_v24  ;;  %v1510_v8 = vmul.f32 %v9021_v46, %v9456_v1  ;;  %v1645_v40 = vrot.slane %v1509_v10, 2 }
 0x128   : > { %v1833_v62 = vmul.f32 %v9024_v47, %v9581_v25  ;;  %v2735_v26 = vsel %vm2635_vm2, %v2587_v31, %v2687_v60  ;;  %v1319_v63 = vsel %vm523_vm0, %v1317_v30, %v1318_v33  ;;  %v1937_v27 = vmul.f32 %v9027_v48, %v9581_v25 }
 0x129   : > { %v2208_v61 = vadd.f32 %v2072_v18, %v1880_v28  ;;  %8070 = vmatprep.mubr.f32.mxu0 %v2735_v26  ;;  %v1125_v52 = vadd.f32 %v1077_v20, %v1025_v57  ;;  %v1646_v14 = vrot.slane %v1510_v8, 2  ;;  %v1938_v55 = vmul.f32 %v9027_v48, %v9592_v11 }
 0x12a   : > { %v2265_v13 = vmul.f32 %v9059_v15, %v9581_v25  ;;  %v2073_v3 = vrot.slane %v1937_v27, 1  ;;  %v2266_v17 = vmul.f32 %v9059_v15, %v9592_v11  ;;  %v320_v18 = vmul.f32 %v9006_v41, %v9319_v5 }
 0x12b   : > { %v2536_v16 = vadd.f32 %v2400_v19, %v2208_v61  ;;  %v1453_v56 = vadd.f32 %v1319_v63, %v1125_v52  ;;  %v1647_v54 = vsel %vm852_vm1, %v1645_v40, %v1646_v14  ;;  %v2074_v29 = vrot.slane %v1938_v55, 1 }
 0x12c   : > { %v2401_v58 = vrot.slane %v2265_v13, 2  ;;  %v2402_v49 = vrot.slane %v2266_v17, 2  ;;  %v425_v31 = vmul.f32 %v9009_v42, %v9346_v59  ;;  %v754_v19 = vmul.f32 %v9012_v43, %v9346_v59 }
 0x12d   : > { %v2588_v20 = vadd.f32 %v8993_v36, %v2536_v16  ;;  %v1781_v6 = vadd.f32 %v1647_v54, %v1453_v56  ;;  %v2075_v9 = vsel %vm523_vm0, %v2073_v3, %v2074_v29  ;;  %v1078_v5 = vmul.f32 %v9015_v44, %v9456_v1 }
 0x12e   : > { %v1183_v24 = vmul.f32 %v9018_v45, %v9480_v50  ;;  %v2403_v30 = vsel %vm852_vm1, %v2401_v58, %v2402_v49  ;;  %v563_v10 = vrot.slane %v425_v31, 1  ;;  %v892_v28 = vrot.slane %v754_v19, 2 }
 0x12f   : > { %vm2636_vm3 = vcmp.gt.f32.partialorder %v2588_v20, 0.0  ;;  %v2688_v0 = vmul.f32 %v8996_v37, %v2588_v20  ;;  %v1881_v60 = vadd.f32 %v1833_v62, %v1781_v6  ;;  %v1511_v8 = vmul.f32 %v9021_v46, %v9480_v50 }
 0x130   : > { %v1320_v57 = vrot.slane %v1183_v24, 1  ;;  %v564_v26 = vsel %vm523_vm0, %v561_v51, %v563_v10  ;;  %v1834_v61 = vmul.f32 %v9024_v47, %v9592_v11  ;;  %v1939_v63 = vmul.f32 %v9027_v48, %v9616_v32 }
 0x131   : > { %v2736_v40 = vsel %vm2636_vm3, %v2588_v20, %v2688_v0  ;;  %v2209_v27 = vadd.f32 %v2075_v9, %v1881_v60  ;;  %v697_v52 = vadd.f32 %v564_v26, %v320_v18  ;;  %v893_v62 = vsel %vm852_vm1, %v890_v12, %v892_v28  ;;  %v9649_v9 = vld [vmem:[#allocation2 + $0x108] sm:$0xff] }
 0x132   : > { %8071 = vmatmul.mubr.f32.gmra.mrb[14].mxu0 %v2736_v40  ;;  %v1321_v55 = vsel %vm523_vm0, %v1318_v33, %v1320_v57  ;;  %v1648_v13 = vrot.slane %v1511_v8, 2  ;;  %v2076_v16 = vrot.slane %v1939_v63, 1  ;;  %v2267_v51 = vmul.f32 %v9059_v15, %v9616_v32 }
 0x133   : > { %v321_v3 = vmul.f32 %v9006_v41, %v9346_v59  ;;  %v2537_v17 = vadd.f32 %v2403_v30, %v2209_v27  ;;  %v1026_v56 = vadd.f32 %v893_v62, %v697_v52  ;;  %v426_v54 = vmul.f32 %v9009_v42, %v9377_v53 }
 0x134   : > { %v755_v2 = vmul.f32 %v9012_v43, %v9377_v53  ;;  %v1649_v12 = vsel %vm852_vm1, %v1646_v14, %v1648_v13  ;;  %v2077_v33 = vsel %vm523_vm0, %v2074_v29, %v2076_v16  ;;  %v2404_v18 = vrot.slane %v2267_v51, 2 }
 0x135   : > { %v1079_v58 = vmul.f32 %v9015_v44, %v9480_v50  ;;  %v2589_v20 = vadd.f32 %v8993_v36, %v2537_v17  ;;  %v1126_v31 = vadd.f32 %v1078_v5, %v1026_v56  ;;  %v565_v59 = vrot.slane %v426_v54, 1 }
 0x136   : > { %v894_v19 = vrot.slane %v755_v2, 2  ;;  %v2405_v6 = vsel %vm852_vm1, %v2402_v49, %v2404_v18  ;;  %v1184_v24 = vmul.f32 %v9018_v45, %v9513_v35  ;;  %v1512_v14 = vmul.f32 %v9021_v46, %v9513_v35  ;;  %v9670_v2 = vld [vmem:[#allocation2 + $0x110] sm:$0x3] }
 0x137   : > { %v1835_v29 = vmul.f32 %v9024_v47, %v9616_v32  ;;  %vm2637_vm4 = vcmp.gt.f32.partialorder %v2589_v20, 0.0  ;;  %v2689_v0 = vmul.f32 %v8996_v37, %v2589_v20  ;;  %v1454_v30 = vadd.f32 %v1321_v55, %v1126_v31 }
 0x138   : > { %v566_v5 = vsel %vm523_vm0, %v563_v10, %v565_v59  ;;  %v895_v49 = vsel %vm852_vm1, %v892_v28, %v894_v19  ;;  %v1322_v8 = vrot.slane %v1184_v24, 1  ;;  %v1650_v40 = vrot.slane %v1512_v14, 2 }
 0x139   : > { %v698_v60 = vadd.f32 %v566_v5, %v321_v3  ;;  %v2737_v26 = vsel %vm2637_vm4, %v2589_v20, %v2689_v0  ;;  %v1782_v63 = vadd.f32 %v1649_v12, %v1454_v30  ;;  %v1940_v27 = vmul.f32 %v9027_v48, %v9649_v9 }
 0x13a   : > { %v2268_v52 = vmul.f32 %v9059_v15, %v9649_v9  ;;  %8073 = vmatprep.mubr.f32.mxu0 %v2737_v26  ;;  %v1323_v51 = vsel %vm523_vm0, %v1320_v57, %v1322_v8  ;;  %v1651_v55 = vsel %vm852_vm1, %v1648_v13, %v1650_v40  ;;  %v322_v10 = vmul.f32 %v9006_v41, %v9377_v53 }
 0x13b   : > { %v1027_v62 = vadd.f32 %v895_v49, %v698_v60  ;;  %v1882_v28 = vadd.f32 %v1834_v61, %v1782_v63  ;;  %v2078_v3 = vrot.slane %v1940_v27, 1  ;;  %v427_v56 = vmul.f32 %v9009_v42, %v9398_v4 }
 0x13c   : > { %v2406_v17 = vrot.slane %v2268_v52, 2  ;;  %v756_v12 = vmul.f32 %v9012_v43, %v9398_v4  ;;  %v1080_v57 = vmul.f32 %v9015_v44, %v9513_v35  ;;  %v1185_v13 = vmul.f32 %v9018_v45, %v9534_v34 }
 0x13d   : > { %v1127_v54 = vadd.f32 %v1079_v58, %v1027_v62  ;;  %v2210_v20 = vadd.f32 %v2077_v33, %v1882_v28  ;;  %v2079_v53 = vsel %vm523_vm0, %v2076_v16, %v2078_v3  ;;  %v567_v31 = vrot.slane %v427_v56, 1 }
 0x13e   : > { %v2407_v61 = vsel %vm852_vm1, %v2404_v18, %v2406_v17  ;;  %v896_v14 = vrot.slane %v756_v12, 2  ;;  %v1324_v58 = vrot.slane %v1185_v13, 1  ;;  %v1513_v0 = vmul.f32 %v9021_v46, %v9534_v34 }
 0x13f   : > { %v1455_v24 = vadd.f32 %v1323_v51, %v1127_v54  ;;  %v2538_v30 = vadd.f32 %v2405_v6, %v2210_v20  ;;  %v568_v4 = vsel %vm523_vm0, %v565_v59, %v567_v31  ;;  %v1836_v5 = vmul.f32 %v9024_v47, %v9649_v9 }
 0x140   : > { %v1941_v33 = vmul.f32 %v9027_v48, %v9670_v2  ;;  %v699_v16 = vadd.f32 %v568_v4, %v322_v10  ;;  %v897_v18 = vsel %vm852_vm1, %v894_v19, %v896_v14  ;;  %v1325_v49 = vsel %vm523_vm0, %v1322_v8, %v1324_v58 }
 0x141   : > { %v1783_v60 = vadd.f32 %v1651_v55, %v1455_v24  ;;  %v2590_v26 = vadd.f32 %v8993_v36, %v2538_v30  ;;  %v1652_v63 = vrot.slane %v1513_v0, 2  ;;  %v2269_v6 = vmul.f32 %v9059_v15, %v9670_v2  ;;  %v9717_v30 = vld [vmem:[#allocation2 + $0x118] sm:$0xff] }
 0x142   : > { %v2080_v27 = vrot.slane %v1941_v33, 1  ;;  %v1028_v52 = vadd.f32 %v897_v18, %v699_v16  ;;  %v323_v62 = vmul.f32 %v9006_v41, %v9445_v39  ;;  %v428_v51 = vmul.f32 %v9009_v42, %v9445_v39 }
 0x143   : > { %v1883_v59 = vadd.f32 %v1835_v29, %v1783_v60  ;;  %vm2638_vm5 = vcmp.gt.f32.partialorder %v2590_v26, 0.0  ;;  %v2690_v19 = vmul.f32 %v8996_v37, %v2590_v26  ;;  %v1653_v8 = vsel %vm852_vm1, %v1650_v40, %v1652_v63 }
 0x144   : > { %v2081_v55 = vsel %vm523_vm0, %v2078_v3, %v2080_v27  ;;  %v1128_v28 = vadd.f32 %v1080_v57, %v1028_v52  ;;  %v2408_v56 = vrot.slane %v2269_v6, 2  ;;  %v9701_v29 = vmul.f32 %v9009_v42, %v9456_v1 }
 0x145   : > { %v2211_v10 = vadd.f32 %v2079_v53, %v1883_v59  ;;  %v2738_v54 = vsel %vm2638_vm5, %v2590_v26, %v2690_v19  ;;  %v569_v12 = vrot.slane %v428_v51, 1  ;;  %v757_v13 = vmul.f32 %v9012_v43, %v9445_v39  ;;  %v9728_v26 = vld [vmem:[#allocation2 + $0x120] sm:$0xff] }
 0x146   : > { %v9707_v20 = vmul.f32 %v9012_v43, %v9456_v1  ;;  %8074 = vmatmul.mubr.f32.gmra.mrb[16].mxu0 %v2738_v54  ;;  %v1456_v31 = vadd.f32 %v1325_v49, %v1128_v28  ;;  %v2409_v3 = vsel %vm852_vm1, %v2406_v17, %v2408_v56  ;;  %v570_v57 = vrot.slane %v9701_v29, 1 }
 0x147   : > { %v2539_v40 = vadd.f32 %v2407_v61, %v2211_v10  ;;  %v898_v53 = vrot.slane %v757_v13, 2  ;;  %v1081_v14 = vmul.f32 %v9015_v44, %v9581_v25  ;;  %v1186_v39 = vmul.f32 %v9018_v45, %v9581_v25 }
 0x148   : > { %v899_v24 = vrot.slane %v9707_v20, 2  ;;  %v1784_v0 = vadd.f32 %v1653_v8, %v1456_v31  ;;  %v571_v61 = vsel %vm523_vm0, %v569_v12, %v570_v57  ;;  %v1187_v17 = vmul.f32 %v9018_v45, %v9592_v11 }
 0x149   : > { %v2591_v58 = vadd.f32 %v8993_v36, %v2539_v40  ;;  %v700_v4 = vadd.f32 %v571_v61, %v323_v62  ;;  %v1326_v60 = vrot.slane %v1186_v39, 1  ;;  %v1514_v16 = vmul.f32 %v9021_v46, %v9581_v25 }
 0x14a   : > { %v900_v33 = vsel %vm852_vm1, %v898_v53, %v899_v24  ;;  %v1884_v49 = vadd.f32 %v1836_v5, %v1784_v0  ;;  %v1327_v63 = vrot.slane %v1187_v17, 1  ;;  %v1515_v6 = vmul.f32 %v9021_v46, %v9592_v11  ;;  %v9752_v17 = vld [vmem:[#allocation2 + $0x128] sm:$0xff] }
 0x14b   : > { %vm2639_vm6 = vcmp.gt.f32.partialorder %v2591_v58, 0.0  ;;  %v2691_v18 = vmul.f32 %v8996_v37, %v2591_v58  ;;  %v1029_v27 = vadd.f32 %v900_v33, %v700_v4  ;;  %v1654_v59 = vrot.slane %v1514_v16, 2 }
 0x14c   : > { %v1837_v52 = vmul.f32 %v9024_v47, %v9717_v30  ;;  %v2212_v51 = vadd.f32 %v2081_v55, %v1884_v49  ;;  %v1328_v19 = vsel %vm523_vm0, %v1326_v60, %v1327_v63  ;;  %v1942_v8 = vmul.f32 %v9027_v48, %v9717_v30 }
 0x14d   : > { %v2739_v62 = vsel %vm2639_vm6, %v2591_v58, %v2691_v18  ;;  %v1129_v5 = vadd.f32 %v1081_v14, %v1029_v27  ;;  %v1655_v10 = vrot.slane %v1515_v6, 2  ;;  %v1943_v28 = vmul.f32 %v9027_v48, %v9728_v26 }
 0x14e   : > { %8076 = vmatprep.mubr.f32.mxu0 %v2739_v62  ;;  %v2270_v56 = vmul.f32 %v9059_v15, %v9717_v30  ;;  %v2540_v29 = vadd.f32 %v2409_v3, %v2212_v51  ;;  %v2082_v54 = vrot.slane %v1942_v8, 1  ;;  %v2271_v12 = vmul.f32 %v9059_v15, %v9728_v26 }
 0x14f   : > { %v324_v55 = vmul.f32 %v9006_v41, %v9456_v1  ;;  %v1457_v13 = vadd.f32 %v1328_v19, %v1129_v5  ;;  %v1656_v40 = vsel %vm852_vm1, %v1654_v59, %v1655_v10  ;;  %v2083_v31 = vrot.slane %v1943_v28, 1 }
 0x150   : > { %v2410_v53 = vrot.slane %v2270_v56, 2  ;;  %v2592_v14 = vadd.f32 %v8993_v36, %v2540_v29  ;;  %v2411_v39 = vrot.slane %v2271_v12, 2  ;;  %v430_v58 = vmul.f32 %v9009_v42, %v9480_v50 }
 0x151   : > { %v759_v3 = vmul.f32 %v9012_v43, %v9480_v50  ;;  %v1785_v0 = vadd.f32 %v1656_v40, %v1457_v13  ;;  %v2084_v61 = vsel %vm523_vm0, %v2082_v54, %v2083_v31  ;;  %v1082_v1 = vmul.f32 %v9015_v44, %v9592_v11 }
 0x152   : > { %v1188_v4 = vmul.f32 %v9018_v45, %v9616_v32  ;;  %vm2640_vm7 = vcmp.gt.f32.partialorder %v2592_v14, 0.0  ;;  %v2692_v33 = vmul.f32 %v8996_v37, %v2592_v14  ;;  %v2412_v60 = vsel %vm852_vm1, %v2410_v53, %v2411_v39 }
 0x153   : > { %v572_v16 = vrot.slane %v430_v58, 1  ;;  %v1885_v18 = vadd.f32 %v1837_v52, %v1785_v0  ;;  %v901_v49 = vrot.slane %v759_v3, 2  ;;  %v1516_v6 = vmul.f32 %v9021_v46, %v9616_v32 }
 0x154   : > { %v1329_v27 = vrot.slane %v1188_v4, 1  ;;  %v2740_v59 = vsel %vm2640_vm7, %v2592_v14, %v2692_v33  ;;  %v1838_v51 = vmul.f32 %v9024_v47, %v9728_v26  ;;  %v1944_v19 = vmul.f32 %v9027_v48, %v9752_v17 }
 0x155   : > { %v573_v62 = vsel %vm523_vm0, %v570_v57, %v572_v16  ;;  %8077 = vmatmul.mubr.f32.gmra.mrb[18].mxu0 %v2740_v59  ;;  %v2213_v8 = vadd.f32 %v2084_v61, %v1885_v18  ;;  %v902_v52 = vsel %vm852_vm1, %v899_v24, %v901_v49  ;;  %v1657_v56 = vrot.slane %v1516_v6, 2  ;;  %v9785_v61 = vld [vmem:[#allocation2 + $0x130] sm:$0xff] }
 0x156   : > { %v701_v5 = vadd.f32 %v573_v62, %v324_v55  ;;  %v1330_v28 = vsel %vm523_vm0, %v1327_v63, %v1329_v27  ;;  %v2085_v29 = vrot.slane %v1944_v19, 1  ;;  %v2272_v57 = vmul.f32 %v9059_v15, %v9752_v17 }
 0x157   : > { %v325_v54 = vmul.f32 %v9006_v41, %v9480_v50  ;;  %v2541_v12 = vadd.f32 %v2412_v60, %v2213_v8  ;;  %v431_v40 = vmul.f32 %v9009_v42, %v9513_v35  ;;  %v760_v20 = vmul.f32 %v9012_v43, %v9513_v35 }
 0x158   : > { %v1030_v13 = vadd.f32 %v902_v52, %v701_v5  ;;  %v1658_v24 = vsel %vm852_vm1, %v1655_v10, %v1657_v56  ;;  %v2086_v63 = vsel %vm523_vm0, %v2083_v31, %v2085_v29  ;;  %v2413_v55 = vrot.slane %v2272_v57, 2 }
 0x159   : > { %v1083_v53 = vmul.f32 %v9015_v44, %v9616_v32  ;;  %v2593_v14 = vadd.f32 %v8993_v36, %v2541_v12  ;;  %v574_v50 = vrot.slane %v431_v40, 1  ;;  %v903_v3 = vrot.slane %v760_v20, 2  ;;  %v9806_v20 = vld [vmem:[#allocation2 + $0x138] sm:$0x3] }
 0x15a   : > { %v1130_v58 = vadd.f32 %v1082_v1, %v1030_v13  ;;  %v2414_v0 = vsel %vm852_vm1, %v2411_v39, %v2413_v55  ;;  %v1189_v4 = vmul.f32 %v9018_v45, %v9649_v9  ;;  %v1517_v10 = vmul.f32 %v9021_v46, %v9649_v9 }
 0x15b   : > { %v1839_v31 = vmul.f32 %v9024_v47, %v9752_v17  ;;  %vm2641_vm8 = vcmp.gt.f32.partialorder %v2593_v14, 0.0  ;;  %v2693_v33 = vmul.f32 %v8996_v37, %v2593_v14  ;;  %v575_v1 = vsel %vm523_vm0, %v572_v16, %v574_v50 }
 0x15c   : > { %v1458_v60 = vadd.f32 %v1330_v28, %v1130_v58  ;;  %v702_v18 = vadd.f32 %v575_v1, %v325_v54  ;;  %v904_v39 = vsel %vm852_vm1, %v901_v49, %v903_v3  ;;  %v1331_v6 = vrot.slane %v1189_v4, 1 }
 0x15d   : > { %v1659_v59 = vrot.slane %v1517_v10, 2  ;;  %v2741_v62 = vsel %vm2641_vm8, %v2593_v14, %v2693_v33  ;;  %v1945_v8 = vmul.f32 %v9027_v48, %v9785_v61  ;;  %v2273_v5 = vmul.f32 %v9059_v15, %v9785_v61 }
 0x15e   : > { %v1786_v19 = vadd.f32 %v1658_v24, %v1458_v60  ;;  %8079 = vmatprep.mubr.f32.mxu0 %v2741_v62  ;;  %v1031_v52 = vadd.f32 %v904_v39, %v702_v18  ;;  %v1332_v57 = vsel %vm523_vm0, %v1329_v27, %v1331_v6  ;;  %v326_v16 = vmul.f32 %v9006_v41, %v9513_v35 }
 0x15f   : > { %v1660_v28 = vsel %vm852_vm1, %v1657_v56, %v1659_v59  ;;  %v2087_v54 = vrot.slane %v1945_v8, 1  ;;  %v2415_v12 = vrot.slane %v2273_v5, 2  ;;  %v432_v13 = vmul.f32 %v9009_v42, %v9534_v34 }
 0x160   : > { %v1886_v49 = vadd.f32 %v1838_v51, %v1786_v19  ;;  %v1131_v40 = vadd.f32 %v1083_v53, %v1031_v52  ;;  %v761_v24 = vmul.f32 %v9012_v43, %v9534_v34  ;;  %v1084_v27 = vmul.f32 %v9015_v44, %v9649_v9 }
 0x161   : > { %v1190_v56 = vmul.f32 %v9018_v45, %v9670_v2  ;;  %v2088_v35 = vsel %vm523_vm0, %v2085_v29, %v2087_v54  ;;  %v2416_v51 = vsel %vm852_vm1, %v2413_v55, %v2415_v12  ;;  %v576_v58 = vrot.slane %v432_v13, 1 }
 0x162   : > { %v2214_v14 = vadd.f32 %v2086_v63, %v1886_v49  ;;  %v1459_v4 = vadd.f32 %v1332_v57, %v1131_v40  ;;  %v905_v10 = vrot.slane %v761_v24, 2  ;;  %v1518_v33 = vmul.f32 %v9021_v46, %v9670_v2 }
 0x163   : > { %v1333_v53 = vrot.slane %v1190_v56, 1  ;;  %v577_v34 = vsel %vm523_vm0, %v574_v50, %v576_v58  ;;  %v1840_v1 = vmul.f32 %v9024_v47, %v9785_v61  ;;  %v1946_v63 = vmul.f32 %v9027_v48, %v9806_v20 }
 0x164   : > { %v2542_v60 = vadd.f32 %v2414_v0, %v2214_v14  ;;  %v1787_v18 = vadd.f32 %v1660_v28, %v1459_v4  ;;  %v703_v29 = vadd.f32 %v577_v34, %v326_v16  ;;  %v906_v55 = vsel %vm852_vm1, %v903_v3, %v905_v10 }
 0x165   : > { %v1334_v39 = vsel %vm523_vm0, %v1331_v6, %v1333_v53  ;;  %v1661_v19 = vrot.slane %v1518_v33, 2  ;;  %v2089_v8 = vrot.slane %v1946_v63, 1  ;;  %v2274_v0 = vmul.f32 %v9059_v15, %v9806_v20 }
 0x166   : > { %v2594_v62 = vadd.f32 %v8993_v36, %v2542_v60  ;;  %v1887_v50 = vadd.f32 %v1839_v31, %v1787_v18  ;;  %v1032_v5 = vadd.f32 %v906_v55, %v703_v29  ;;  %v327_v52 = vmul.f32 %v9006_v41, %v9581_v25  ;;  %v9853_v60 = vld [vmem:[#allocation2 + $0x140] sm:$0xff] }
 0x167   : > { %v433_v57 = vmul.f32 %v9009_v42, %v9581_v25  ;;  %v1662_v6 = vsel %vm852_vm1, %v1659_v59, %v1661_v19  ;;  %v2090_v28 = vsel %vm523_vm0, %v2087_v54, %v2089_v8  ;;  %v2417_v13 = vrot.slane %v2274_v0, 2 }
 0x168   : > { %vm2642_vm9 = vcmp.gt.f32.partialorder %v2594_v62, 0.0  ;;  %v2694_v3 = vmul.f32 %v8996_v37, %v2594_v62  ;;  %v2215_v16 = vadd.f32 %v2088_v35, %v1887_v50  ;;  %v1132_v49 = vadd.f32 %v1084_v27, %v1032_v5 }
 0x169   : > { %v9837_v31 = vmul.f32 %v9009_v42, %v9592_v11  ;;  %v578_v24 = vrot.slane %v433_v57, 1  ;;  %v762_v56 = vmul.f32 %v9012_v43, %v9581_v25  ;;  %v9843_v14 = vmul.f32 %v9012_v43, %v9592_v11 }
 0x16a   : > { %v2742_v40 = vsel %vm2642_vm9, %v2594_v62, %v2694_v3  ;;  %v2543_v59 = vadd.f32 %v2416_v51, %v2215_v16  ;;  %v1460_v58 = vadd.f32 %v1334_v39, %v1132_v49  ;;  %v2418_v54 = vsel %vm852_vm1, %v2415_v12, %v2417_v13  ;;  %v9864_v62 = vld [vmem:[#allocation2 + $0x148] sm:$0xff] }
 0x16b   : > { %8080 = vmatmul.mubr.f32.gmra.mrb[20].mxu0 %v2742_v40  ;;  %v579_v27 = vrot.slane %v9837_v31, 1  ;;  %v907_v35 = vrot.slane %v762_v56, 2  ;;  %v908_v4 = vrot.slane %v9843_v14, 2  ;;  %v1085_v10 = vmul.f32 %v9015_v44, %v9717_v30 }
 0x16c   : > { %v1191_v25 = vmul.f32 %v9018_v45, %v9717_v30  ;;  %v2595_v53 = vadd.f32 %v8993_v36, %v2543_v59  ;;  %v1788_v33 = vadd.f32 %v1662_v6, %v1460_v58  ;;  %v1192_v12 = vmul.f32 %v9018_v45, %v9728_v26 }
 0x16d   : > { %v580_v51 = vsel %vm523_vm0, %v578_v24, %v579_v27  ;;  %v909_v63 = vsel %vm852_vm1, %v907_v35, %v908_v4  ;;  %v1519_v29 = vmul.f32 %v9021_v46, %v9717_v30  ;;  %v1520_v0 = vmul.f32 %v9021_v46, %v9728_v26 }
 0x16e   : > { %v704_v34 = vadd.f32 %v580_v51, %v327_v52  ;;  %v1335_v18 = vrot.slane %v1191_v25, 1  ;;  %vm2643_vm10 = vcmp.gt.f32.partialorder %v2595_v53, 0.0  ;;  %v2695_v55 = vmul.f32 %v8996_v37, %v2595_v53 }
 0x16f   : > { %v1888_v39 = vadd.f32 %v1840_v1, %v1788_v33  ;;  %v1336_v19 = vrot.slane %v1192_v12, 1  ;;  %v1663_v50 = vrot.slane %v1519_v29, 2  ;;  %v1841_v5 = vmul.f32 %v9024_v47, %v9853_v60  ;;  %v9888_v12 = vld [vmem:[#allocation2 + $0x150] sm:$0xff] }
 0x170   : > { %v1033_v8 = vadd.f32 %v909_v63, %v704_v34  ;;  %v2743_v52 = vsel %vm2643_vm10, %v2595_v53, %v2695_v55  ;;  %v1947_v6 = vmul.f32 %v9027_v48, %v9853_v60  ;;  %v1664_v16 = vrot.slane %v1520_v0, 2 }
 0x171   : > { %v2216_v57 = vadd.f32 %v2090_v28, %v1888_v39  ;;  %v1337_v3 = vsel %vm523_vm0, %v1335_v18, %v1336_v19  ;;  %8082 = vmatprep.mubr.f32.mxu0 %v2743_v52  ;;  %v1948_v49 = vmul.f32 %v9027_v48, %v9864_v62  ;;  %v2275_v13 = vmul.f32 %v9059_v15, %v9853_v60 }
 0x172   : > { %v1133_v1 = vadd.f32 %v1085_v10, %v1033_v8  ;;  %v2091_v40 = vrot.slane %v1947_v6, 1  ;;  %v2276_v24 = vmul.f32 %v9059_v15, %v9864_v62  ;;  %v328_v28 = vmul.f32 %v9006_v41, %v9592_v11 }
 0x173   : > { %v2544_v31 = vadd.f32 %v2418_v54, %v2216_v57  ;;  %v1665_v59 = vsel %vm852_vm1, %v1663_v50, %v1664_v16  ;;  %v2092_v58 = vrot.slane %v1948_v49, 1  ;;  %v2419_v35 = vrot.slane %v2275_v13, 2 }
 0x174   : > { %v1461_v56 = vadd.f32 %v1337_v3, %v1133_v1  ;;  %v2420_v25 = vrot.slane %v2276_v24, 2  ;;  %v435_v53 = vmul.f32 %v9009_v42, %v9616_v32  ;;  %v764_v54 = vmul.f32 %v9012_v43, %v9616_v32 }
 0x175   : > { %v2596_v10 = vadd.f32 %v8993_v36, %v2544_v31  ;;  %v2093_v51 = vsel %vm523_vm0, %v2091_v40, %v2092_v58  ;;  %v1086_v11 = vmul.f32 %v9015_v44, %v9728_v26  ;;  %v1193_v34 = vmul.f32 %v9018_v45, %v9752_v17 }
 0x176   : > { %v1789_v33 = vadd.f32 %v1665_v59, %v1461_v56  ;;  %v2421_v18 = vsel %vm852_vm1, %v2419_v35, %v2420_v25  ;;  %v581_v29 = vrot.slane %v435_v53, 1  ;;  %v910_v39 = vrot.slane %v764_v54, 2 }
 0x177   : > { %vm2644_vm11 = vcmp.gt.f32.partialorder %v2596_v10, 0.0  ;;  %v2696_v63 = vmul.f32 %v8996_v37, %v2596_v10  ;;  %v1338_v8 = vrot.slane %v1193_v34, 1  ;;  %v1521_v0 = vmul.f32 %v9021_v46, %v9752_v17 }
 0x178   : > { %v1889_v55 = vadd.f32 %v1841_v5, %v1789_v33  ;;  %v582_v52 = vsel %vm523_vm0, %v579_v27, %v581_v29  ;;  %v1842_v57 = vmul.f32 %v9024_v47, %v9864_v62  ;;  %v1949_v3 = vmul.f32 %v9027_v48, %v9888_v12 }
 0x179   : > { %v2744_v50 = vsel %vm2644_vm11, %v2596_v10, %v2696_v63  ;;  %v705_v1 = vadd.f32 %v582_v52, %v328_v28  ;;  %v911_v5 = vsel %vm852_vm1, %v908_v4, %v910_v39  ;;  %v1339_v49 = vsel %vm523_vm0, %v1336_v19, %v1338_v8 }
 0x17a   : > { %8083 = vmatmul.mubr.f32.gmra.mrb[22].mxu0 %v2744_v50  ;;  %v2217_v6 = vadd.f32 %v2093_v51, %v1889_v55  ;;  %v1666_v13 = vrot.slane %v1521_v0, 2  ;;  %v2094_v31 = vrot.slane %v1949_v3, 1  ;;  %v2277_v27 = vmul.f32 %v9059_v15, %v9888_v12  ;;  %v9921_v51 = vld [vmem:[#allocation2 + $0x158] sm:$0xff] }
 0x17b   : > { %v329_v40 = vmul.f32 %v9006_v41, %v9616_v32  ;;  %v1034_v56 = vadd.f32 %v911_v5, %v705_v1  ;;  %v436_v59 = vmul.f32 %v9009_v42, %v9649_v9  ;;  %v765_v14 = vmul.f32 %v9012_v43, %v9649_v9 }
 0x17c   : > { %v2545_v24 = vadd.f32 %v2421_v18, %v2217_v6  ;;  %v1667_v4 = vsel %vm852_vm1, %v1664_v16, %v1666_v13  ;;  %v2095_v19 = vsel %vm523_vm0, %v2092_v58, %v2094_v31  ;;  %v2422_v28 = vrot.slane %v2277_v27, 2 }
 0x17d   : > { %v1087_v35 = vmul.f32 %v9015_v44, %v9752_v17  ;;  %v1134_v53 = vadd.f32 %v1086_v11, %v1034_v56  ;;  %v583_v32 = vrot.slane %v436_v59, 1  ;;  %v912_v54 = vrot.slane %v765_v14, 2  ;;  %v9942_v14 = vld [vmem:[#allocation2 + $0x160] sm:$0x3] }
 0x17e   : > { %v2597_v10 = vadd.f32 %v8993_v36, %v2545_v24  ;;  %v2423_v33 = vsel %vm852_vm1, %v2420_v25, %v2422_v28  ;;  %v1194_v34 = vmul.f32 %v9018_v45, %v9785_v61  ;;  %v1522_v16 = vmul.f32 %v9021_v46, %v9785_v61 }
 0x17f   : > { %v1843_v58 = vmul.f32 %v9024_v47, %v9888_v12  ;;  %v1462_v18 = vadd.f32 %v1339_v49, %v1134_v53  ;;  %v584_v11 = vsel %vm523_vm0, %v581_v29, %v583_v32  ;;  %v913_v25 = vsel %vm852_vm1, %v910_v39, %v912_v54 }
 0x180   : > { %vm2645_vm12 = vcmp.gt.f32.partialorder %v2597_v10, 0.0  ;;  %v2697_v63 = vmul.f32 %v8996_v37, %v2597_v10  ;;  %v706_v55 = vadd.f32 %v584_v11, %v329_v40  ;;  %v1340_v0 = vrot.slane %v1194_v34, 1 }
 0x181   : > { %v1668_v50 = vrot.slane %v1522_v16, 2  ;;  %v1790_v3 = vadd.f32 %v1667_v4, %v1462_v18  ;;  %v1950_v6 = vmul.f32 %v9027_v48, %v9921_v51  ;;  %v2278_v1 = vmul.f32 %v9059_v15, %v9921_v51 }
 0x182   : > { %v2745_v52 = vsel %vm2645_vm12, %v2597_v10, %v2697_v63  ;;  %v1035_v5 = vadd.f32 %v913_v25, %v706_v55  ;;  %v1341_v27 = vsel %vm523_vm0, %v1338_v8, %v1340_v0  ;;  %v330_v29 = vmul.f32 %v9006_v41, %v9649_v9 }
 0x183   : > { %8085 = vmatprep.mubr.f32.mxu0 %v2745_v52  ;;  %v1669_v49 = vsel %vm852_vm1, %v1666_v13, %v1668_v50  ;;  %v1890_v39 = vadd.f32 %v1842_v57, %v1790_v3  ;;  %v2096_v40 = vrot.slane %v1950_v6, 1  ;;  %v2424_v24 = vrot.slane %v2278_v1, 2 }
 0x184   : > { %v437_v56 = vmul.f32 %v9009_v42, %v9670_v2  ;;  %v1135_v59 = vadd.f32 %v1087_v35, %v1035_v5  ;;  %v766_v4 = vmul.f32 %v9012_v43, %v9670_v2  ;;  %v1088_v8 = vmul.f32 %v9015_v44, %v9785_v61 }
 0x185   : > { %v1195_v13 = vmul.f32 %v9018_v45, %v9806_v20  ;;  %v2218_v10 = vadd.f32 %v2095_v19, %v1890_v39  ;;  %v2097_v9 = vsel %vm523_vm0, %v2094_v31, %v2096_v40  ;;  %v2425_v57 = vsel %vm852_vm1, %v2422_v28, %v2424_v24 }
 0x186   : > { %v585_v53 = vrot.slane %v437_v56, 1  ;;  %v1463_v34 = vadd.f32 %v1341_v27, %v1135_v59  ;;  %v914_v16 = vrot.slane %v766_v4, 2  ;;  %v1523_v63 = vmul.f32 %v9021_v46, %v9806_v20 }
 0x187   : > { %v1342_v35 = vrot.slane %v1195_v13, 1  ;;  %v2546_v18 = vadd.f32 %v2423_v33, %v2218_v10  ;;  %v1844_v11 = vmul.f32 %v9024_v47, %v9921_v51  ;;  %v1951_v19 = vmul.f32 %v9027_v48, %v9942_v14 }
 0x188   : > { %v586_v2 = vsel %vm523_vm0, %v583_v32, %v585_v53  ;;  %v1791_v55 = vadd.f32 %v1669_v49, %v1463_v34  ;;  %v915_v28 = vsel %vm852_vm1, %v912_v54, %v914_v16  ;;  %v1670_v3 = vrot.slane %v1523_v63, 2 }
 0x189   : > { %v707_v31 = vadd.f32 %v586_v2, %v330_v29  ;;  %v1343_v25 = vsel %vm523_vm0, %v1340_v0, %v1342_v35  ;;  %v2598_v52 = vadd.f32 %v8993_v36, %v2546_v18  ;;  %v2098_v6 = vrot.slane %v1951_v19, 1  ;;  %v9989_v18 = vld [vmem:[#allocation2 + $0x168] sm:$0xff] }
 0x18a   : > { %v2279_v33 = vmul.f32 %v9059_v15, %v9942_v14  ;;  %v1891_v32 = vadd.f32 %v1843_v58, %v1791_v55  ;;  %v331_v5 = vmul.f32 %v9006_v41, %v9717_v30  ;;  %v438_v27 = vmul.f32 %v9009_v42, %v9717_v30 }
 0x18b   : > { %v1036_v1 = vadd.f32 %v915_v28, %v707_v31  ;;  %vm2646_vm13 = vcmp.gt.f32.partialorder %v2598_v52, 0.0  ;;  %v2698_v54 = vmul.f32 %v8996_v37, %v2598_v52  ;;  %v1671_v0 = vsel %vm852_vm1, %v1668_v50, %v1670_v3 }
 0x18c   : > { %v2099_v49 = vsel %vm523_vm0, %v2096_v40, %v2098_v6  ;;  %v2219_v29 = vadd.f32 %v2097_v9, %v1891_v32  ;;  %v2426_v56 = vrot.slane %v2279_v33, 2  ;;  %v9973_v58 = vmul.f32 %v9009_v42, %v9728_v26 }
 0x18d   : > { %v1136_v39 = vadd.f32 %v1088_v8, %v1036_v1  ;;  %v2746_v59 = vsel %vm2646_vm13, %v2598_v52, %v2698_v54  ;;  %v587_v4 = vrot.slane %v438_v27, 1  ;;  %v767_v13 = vmul.f32 %v9012_v43, %v9717_v30  ;;  %v10000_v52 = vld [vmem:[#allocation2 + $0x170] sm:$0xff] }
 0x18e   : > { %v9979_v10 = vmul.f32 %v9012_v43, %v9728_v26  ;;  %8086 = vmatmul.mubr.f32.gmra.mrb[24].mxu0 %v2746_v59  ;;  %v2547_v50 = vadd.f32 %v2425_v57, %v2219_v29  ;;  %v2427_v40 = vsel %vm852_vm1, %v2424_v24, %v2426_v56  ;;  %v588_v8 = vrot.slane %v9973_v58, 1 }
 0x18f   : > { %v1464_v53 = vadd.f32 %v1343_v25, %v1136_v39  ;;  %v916_v9 = vrot.slane %v767_v13, 2  ;;  %v1089_v16 = vmul.f32 %v9015_v44, %v9853_v60  ;;  %v1196_v30 = vmul.f32 %v9018_v45, %v9853_v60 }
 0x190   : > { %v917_v34 = vrot.slane %v9979_v10, 2  ;;  %v2599_v35 = vadd.f32 %v8993_v36, %v2547_v50  ;;  %v589_v57 = vsel %vm523_vm0, %v587_v4, %v588_v8  ;;  %v1197_v24 = vmul.f32 %v9018_v45, %v9864_v62 }
 0x191   : > { %v1792_v63 = vadd.f32 %v1671_v0, %v1464_v53  ;;  %v708_v2 = vadd.f32 %v589_v57, %v331_v5  ;;  %v1344_v55 = vrot.slane %v1196_v30, 1  ;;  %v1524_v31 = vmul.f32 %v9021_v46, %v9853_v60 }
 0x192   : > { %v918_v19 = vsel %vm852_vm1, %v916_v9, %v917_v34  ;;  %vm2647_vm14 = vcmp.gt.f32.partialorder %v2599_v35, 0.0  ;;  %v2699_v28 = vmul.f32 %v8996_v37, %v2599_v35  ;;  %v1345_v3 = vrot.slane %v1197_v24, 1  ;;  %v10024_v24 = vld [vmem:[#allocation2 + $0x178] sm:$0xff] }
 0x193   : > { %v1892_v25 = vadd.f32 %v1844_v11, %v1792_v63  ;;  %v1037_v6 = vadd.f32 %v918_v19, %v708_v2  ;;  %v1525_v33 = vmul.f32 %v9021_v46, %v9864_v62  ;;  %v1672_v32 = vrot.slane %v1524_v31, 2 }
 0x194   : > { %v1845_v1 = vmul.f32 %v9024_v47, %v9989_v18  ;;  %v2747_v5 = vsel %vm2647_vm14, %v2599_v35, %v2699_v28  ;;  %v1346_v54 = vsel %vm523_vm0, %v1344_v55, %v1345_v3  ;;  %v1952_v0 = vmul.f32 %v9027_v48, %v9989_v18 }
 0x195   : > { %v2220_v27 = vadd.f32 %v2099_v49, %v1892_v25  ;;  %8088 = vmatprep.mubr.f32.mxu0 %v2747_v5  ;;  %v1137_v11 = vadd.f32 %v1089_v16, %v1037_v6  ;;  %v1673_v29 = vrot.slane %v1525_v33, 2  ;;  %v1953_v39 = vmul.f32 %v9027_v48, %v10000_v52 }
 0x196   : > { %v2280_v56 = vmul.f32 %v9059_v15, %v9989_v18  ;;  %v2100_v59 = vrot.slane %v1952_v0, 1  ;;  %v2281_v4 = vmul.f32 %v9059_v15, %v10000_v52  ;;  %v332_v49 = vmul.f32 %v9006_v41, %v9728_v26 }
 0x197   : > { %v2548_v58 = vadd.f32 %v2427_v40, %v2220_v27  ;;  %v1465_v13 = vadd.f32 %v1346_v54, %v1137_v11  ;;  %v1674_v50 = vsel %vm852_vm1, %v1672_v32, %v1673_v29  ;;  %v2101_v53 = vrot.slane %v1953_v39, 1 }
 0x198   : > { %v2428_v9 = vrot.slane %v2280_v56, 2  ;;  %v2429_v30 = vrot.slane %v2281_v4, 2  ;;  %v440_v35 = vmul.f32 %v9009_v42, %v9752_v17  ;;  %v769_v40 = vmul.f32 %v9012_v43, %v9752_v17 }
 0x199   : > { %v2600_v16 = vadd.f32 %v8993_v36, %v2548_v58  ;;  %v1793_v63 = vadd.f32 %v1674_v50, %v1465_v13  ;;  %v2102_v57 = vsel %vm523_vm0, %v2100_v59, %v2101_v53  ;;  %v1090_v26 = vmul.f32 %v9015_v44, %v9864_v62 }
 0x19a   : > { %v1198_v2 = vmul.f32 %v9018_v45, %v9888_v12  ;;  %v2430_v55 = vsel %vm852_vm1, %v2428_v9, %v2429_v30  ;;  %v590_v31 = vrot.slane %v440_v35, 1  ;;  %v919_v25 = vrot.slane %v769_v40, 2 }
 0x19b   : > { %vm2648_vm15 = vcmp.gt.f32.partialorder %v2600_v16, 0.0  ;;  %v2700_v19 = vmul.f32 %v8996_v37, %v2600_v16  ;;  %v1893_v28 = vadd.f32 %v1845_v1, %v1793_v63  ;;  %v1526_v33 = vmul.f32 %v9021_v46, %v9888_v12 }
 0x19c   : > { %v1347_v6 = vrot.slane %v1198_v2, 1  ;;  %v591_v5 = vsel %vm523_vm0, %v588_v8, %v590_v31  ;;  %v1846_v27 = vmul.f32 %v9024_v47, %v10000_v52  ;;  %v1954_v54 = vmul.f32 %v9027_v48, %v10024_v24 }
 0x19d   : > { %v2748_v32 = vsel %vm2648_vm15, %v2600_v16, %v2700_v19  ;;  %v2221_v0 = vadd.f32 %v2102_v57, %v1893_v28  ;;  %v709_v11 = vadd.f32 %v591_v5, %v332_v49  ;;  %v920_v1 = vsel %vm852_vm1, %v917_v34, %v919_v25  ;;  %v10057_v57 = vld [vmem:[#allocation2 + $0x180] sm:$0xff] }
 0x19e   : > { %8089 = vmatmul.mubr.f32.gmra.mrb[26].mxu0 %v2748_v32  ;;  %v1348_v39 = vsel %vm523_vm0, %v1345_v3, %v1347_v6  ;;  %v1675_v56 = vrot.slane %v1526_v33, 2  ;;  %v2103_v58 = vrot.slane %v1954_v54, 1  ;;  %v2282_v8 = vmul.f32 %v9059_v15, %v10024_v24 }
 0x19f   : > { %v333_v59 = vmul.f32 %v9006_v41, %v9752_v17  ;;  %v2549_v4 = vadd.f32 %v2430_v55, %v2221_v0  ;;  %v1038_v13 = vadd.f32 %v920_v1, %v709_v11  ;;  %v441_v50 = vmul.f32 %v9009_v42, %v9785_v61 }
 0x1a0   : > { %v770_v10 = vmul.f32 %v9012_v43, %v9785_v61  ;;  %v1676_v34 = vsel %vm852_vm1, %v1673_v29, %v1675_v56  ;;  %v2104_v3 = vsel %vm523_vm0, %v2101_v53, %v2103_v58  ;;  %v2431_v49 = vrot.slane %v2282_v8, 2 }
 0x1a1   : > { %v1091_v9 = vmul.f32 %v9015_v44, %v9888_v12  ;;  %v2601_v16 = vadd.f32 %v8993_v36, %v2549_v4  ;;  %v1138_v35 = vadd.f32 %v1090_v26, %v1038_v13  ;;  %v592_v17 = vrot.slane %v441_v50, 1 }
 0x1a2   : > { %v921_v40 = vrot.slane %v770_v10, 2  ;;  %v2432_v63 = vsel %vm852_vm1, %v2429_v30, %v2431_v49  ;;  %v1199_v2 = vmul.f32 %v9018_v45, %v9921_v51  ;;  %v1527_v29 = vmul.f32 %v9021_v46, %v9921_v51  ;;  %v10078_v10 = vld [vmem:[#allocation2 + $0x188] sm:$0x3] }
 0x1a3   : > { %v1847_v53 = vmul.f32 %v9024_v47, %v10024_v24  ;;  %vm2649_vm2 = vcmp.gt.f32.partialorder %v2601_v16, 0.0  ;;  %v2701_v19 = vmul.f32 %v8996_v37, %v2601_v16  ;;  %v1466_v55 = vadd.f32 %v1348_v39, %v1138_v35 }
 0x1a4   : > { %v593_v26 = vsel %vm523_vm0, %v590_v31, %v592_v17  ;;  %v922_v30 = vsel %vm852_vm1, %v919_v25, %v921_v40  ;;  %v1349_v33 = vrot.slane %v1199_v2, 1  ;;  %v1677_v32 = vrot.slane %v1527_v29, 2 }
 0x1a5   : > { %v710_v28 = vadd.f32 %v593_v26, %v333_v59  ;;  %v2749_v5 = vsel %vm2649_vm2, %v2601_v16, %v2701_v19  ;;  %v1794_v54 = vadd.f32 %v1676_v34, %v1466_v55  ;;  %v1955_v0 = vmul.f32 %v9027_v48, %v10057_v57 }
 0x1a6   : > { %v2283_v11 = vmul.f32 %v9059_v15, %v10057_v57  ;;  %8091 = vmatprep.mubr.f32.mxu0 %v2749_v5  ;;  %v1350_v8 = vsel %vm523_vm0, %v1347_v6, %v1349_v33  ;;  %v1678_v39 = vsel %vm852_vm1, %v1675_v56, %v1677_v32  ;;  %v334_v31 = vmul.f32 %v9006_v41, %v9785_v61 }
 0x1a7   : > { %v1039_v1 = vadd.f32 %v922_v30, %v710_v28  ;;  %v1894_v25 = vadd.f32 %v1846_v27, %v1794_v54  ;;  %v2105_v59 = vrot.slane %v1955_v0, 1  ;;  %v442_v13 = vmul.f32 %v9009_v42, %v9806_v20 }
 0x1a8   : > { %v2433_v4 = vrot.slane %v2283_v11, 2  ;;  %v771_v34 = vmul.f32 %v9012_v43, %v9806_v20  ;;  %v1092_v6 = vmul.f32 %v9015_v44, %v9921_v51  ;;  %v1200_v56 = vmul.f32 %v9018_v45, %v9942_v14 }
 0x1a9   : > { %v1139_v50 = vadd.f32 %v1091_v9, %v1039_v1  ;;  %v2222_v16 = vadd.f32 %v2104_v3, %v1894_v25  ;;  %v2106_v61 = vsel %vm523_vm0, %v2103_v58, %v2105_v59  ;;  %v594_v35 = vrot.slane %v442_v13, 1 }
 0x1aa   : > { %v2434_v27 = vsel %vm852_vm1, %v2431_v49, %v2433_v4  ;;  %v923_v29 = vrot.slane %v771_v34, 2  ;;  %v1351_v9 = vrot.slane %v1200_v56, 1  ;;  %v1528_v19 = vmul.f32 %v9021_v46, %v9942_v14 }
 0x1ab   : > { %v1467_v2 = vadd.f32 %v1350_v8, %v1139_v50  ;;  %v2550_v55 = vadd.f32 %v2432_v63, %v2222_v16  ;;  %v595_v20 = vsel %vm523_vm0, %v592_v17, %v594_v35  ;;  %v1848_v26 = vmul.f32 %v9024_v47, %v10057_v57 }
 0x1ac   : > { %v1956_v3 = vmul.f32 %v9027_v48, %v10078_v10  ;;  %v711_v58 = vadd.f32 %v595_v20, %v334_v31  ;;  %v924_v49 = vsel %vm852_vm1, %v921_v40, %v923_v29  ;;  %v1352_v30 = vsel %vm523_vm0, %v1349_v33, %v1351_v9 }
 0x1ad   : > { %v1795_v28 = vadd.f32 %v1678_v39, %v1467_v2  ;;  %v2602_v5 = vadd.f32 %v8993_v36, %v2550_v55  ;;  %v1679_v54 = vrot.slane %v1528_v19, 2  ;;  %v2284_v63 = vmul.f32 %v9059_v15, %v10078_v10  ;;  %v10125_v55 = vld [vmem:[#allocation2 + $0x190] sm:$0xff] }
 0x1ae   : > { %v2107_v0 = vrot.slane %v1956_v3, 1  ;;  %v1040_v11 = vadd.f32 %v924_v49, %v711_v58  ;;  %v335_v1 = vmul.f32 %v9006_v41, %v9853_v60  ;;  %v443_v8 = vmul.f32 %v9009_v42, %v9853_v60 }
 0x1af   : > { %v1895_v17 = vadd.f32 %v1847_v53, %v1795_v28  ;;  %vm2650_vm3 = vcmp.gt.f32.partialorder %v2602_v5, 0.0  ;;  %v2702_v40 = vmul.f32 %v8996_v37, %v2602_v5  ;;  %v1680_v33 = vsel %vm852_vm1, %v1677_v32, %v1679_v54 }
 0x1b0   : > { %v2108_v39 = vsel %vm523_vm0, %v2105_v59, %v2107_v0  ;;  %v1140_v25 = vadd.f32 %v1092_v6, %v1040_v11  ;;  %v2435_v13 = vrot.slane %v2284_v63, 2  ;;  %v10109_v53 = vmul.f32 %v9009_v42, %v9864_v62 }
 0x1b1   : > { %v2223_v31 = vadd.f32 %v2106_v61, %v1895_v17  ;;  %v2750_v50 = vsel %vm2650_vm3, %v2602_v5, %v2702_v40  ;;  %v596_v34 = vrot.slane %v443_v8, 1  ;;  %v772_v56 = vmul.f32 %v9012_v43, %v9853_v60  ;;  %v10136_v5 = vld [vmem:[#allocation2 + $0x198] sm:$0xff] }
 0x1b2   : > { %v10115_v16 = vmul.f32 %v9012_v43, %v9864_v62  ;;  %8092 = vmatmul.mubr.f32.gmra.mrb[28].mxu0 %v2750_v50  ;;  %v1468_v35 = vadd.f32 %v1352_v30, %v1140_v25  ;;  %v2436_v59 = vsel %vm852_vm1, %v2433_v4, %v2435_v13  ;;  %v597_v6 = vrot.slane %v10109_v53, 1 }
 0x1b3   : > { %v2551_v32 = vadd.f32 %v2434_v27, %v2223_v31  ;;  %v925_v61 = vrot.slane %v772_v56, 2  ;;  %v1093_v29 = vmul.f32 %v9015_v44, %v9989_v18  ;;  %v1201_v60 = vmul.f32 %v9018_v45, %v9989_v18 }
 0x1b4   : > { %v926_v2 = vrot.slane %v10115_v16, 2  ;;  %v1796_v19 = vadd.f32 %v1680_v33, %v1468_v35  ;;  %v598_v27 = vsel %vm523_vm0, %v596_v34, %v597_v6  ;;  %v1202_v4 = vmul.f32 %v9018_v45, %v10000_v52 }
 0x1b5   : > { %v2603_v9 = vadd.f32 %v8993_v36, %v2551_v32  ;;  %v712_v20 = vadd.f32 %v598_v27, %v335_v1  ;;  %v1353_v28 = vrot.slane %v1201_v60, 1  ;;  %v1529_v58 = vmul.f32 %v9021_v46, %v9989_v18 }
 0x1b6   : > { %v927_v3 = vsel %vm852_vm1, %v925_v61, %v926_v2  ;;  %v1896_v30 = vadd.f32 %v1848_v26, %v1796_v19  ;;  %v1354_v54 = vrot.slane %v1202_v4, 1  ;;  %v1530_v63 = vmul.f32 %v9021_v46, %v10000_v52  ;;  %v10160_v4 = vld [vmem:[#allocation2 + $0x1a0] sm:$0xff] }
 0x1b7   : > { %vm2651_vm4 = vcmp.gt.f32.partialorder %v2603_v9, 0.0  ;;  %v2703_v49 = vmul.f32 %v8996_v37, %v2603_v9  ;;  %v1041_v0 = vadd.f32 %v927_v3, %v712_v20  ;;  %v1681_v17 = vrot.slane %v1529_v58, 2 }
 0x1b8   : > { %v1849_v11 = vmul.f32 %v9024_v47, %v10125_v55  ;;  %v2224_v8 = vadd.f32 %v2108_v39, %v1896_v30  ;;  %v1355_v40 = vsel %vm523_vm0, %v1353_v28, %v1354_v54  ;;  %v1957_v33 = vmul.f32 %v9027_v48, %v10125_v55 }
 0x1b9   : > { %v2751_v1 = vsel %vm2651_vm4, %v2603_v9, %v2703_v49  ;;  %v1141_v26 = vadd.f32 %v1093_v29, %v1041_v0  ;;  %v1682_v31 = vrot.slane %v1530_v63, 2  ;;  %v1958_v25 = vmul.f32 %v9027_v48, %v10136_v5 }
 0x1ba   : > { %8094 = vmatprep.mubr.f32.mxu0 %v2751_v1  ;;  %v2285_v13 = vmul.f32 %v9059_v15, %v10125_v55  ;;  %v2552_v53 = vadd.f32 %v2436_v59, %v2224_v8  ;;  %v2109_v50 = vrot.slane %v1957_v33, 1  ;;  %v2286_v34 = vmul.f32 %v9059_v15, %v10136_v5 }
 0x1bb   : > { %v336_v39 = vmul.f32 %v9006_v41, %v9864_v62  ;;  %v1469_v56 = vadd.f32 %v1355_v40, %v1141_v26  ;;  %v1683_v32 = vsel %vm852_vm1, %v1681_v17, %v1682_v31  ;;  %v2110_v35 = vrot.slane %v1958_v25, 1 }
 0x1bc   : > { %v2437_v61 = vrot.slane %v2285_v13, 2  ;;  %v2604_v29 = vadd.f32 %v8993_v36, %v2552_v53  ;;  %v2438_v60 = vrot.slane %v2286_v34, 2  ;;  %v445_v9 = vmul.f32 %v9009_v42, %v9888_v12 }
 0x1bd   : > { %v774_v59 = vmul.f32 %v9012_v43, %v9888_v12  ;;  %v1797_v19 = vadd.f32 %v1683_v32, %v1469_v56  ;;  %v2111_v27 = vsel %vm523_vm0, %v2109_v50, %v2110_v35  ;;  %v1094_v62 = vmul.f32 %v9015_v44, %v10000_v52 }
 0x1be   : > { %v1203_v20 = vmul.f32 %v9018_v45, %v10024_v24  ;;  %vm2652_vm5 = vcmp.gt.f32.partialorder %v2604_v29, 0.0  ;;  %v2704_v3 = vmul.f32 %v8996_v37, %v2604_v29  ;;  %v2439_v28 = vsel %vm852_vm1, %v2437_v61, %v2438_v60 }
 0x1bf   : > { %v599_v58 = vrot.slane %v445_v9, 1  ;;  %v1897_v49 = vadd.f32 %v1849_v11, %v1797_v19  ;;  %v928_v30 = vrot.slane %v774_v59, 2  ;;  %v1531_v63 = vmul.f32 %v9021_v46, %v10024_v24 }
 0x1c0   : > { %v1356_v0 = vrot.slane %v1203_v20, 1  ;;  %v2752_v17 = vsel %vm2652_vm5, %v2604_v29, %v2704_v3  ;;  %v1850_v8 = vmul.f32 %v9024_v47, %v10136_v5  ;;  %v1959_v40 = vmul.f32 %v9027_v48, %v10160_v4 }
 0x1c1   : > { %v600_v1 = vsel %vm523_vm0, %v597_v6, %v599_v58  ;;  %8095 = vmatmul.mubr.f32.gmra.mrb[30].mxu0 %v2752_v17  ;;  %v2225_v33 = vadd.f32 %v2111_v27, %v1897_v49  ;;  %v929_v11 = vsel %vm852_vm1, %v926_v2, %v928_v30  ;;  %v1684_v13 = vrot.slane %v1531_v63, 2  ;;  %v10193_v27 = vld [vmem:[#allocation2 + $0x1a8] sm:$0xff] }
 0x1c2   : > { %v713_v26 = vadd.f32 %v600_v1, %v336_v39  ;;  %v1357_v25 = vsel %vm523_vm0, %v1354_v54, %v1356_v0  ;;  %v2112_v53 = vrot.slane %v1959_v40, 1  ;;  %v2287_v6 = vmul.f32 %v9059_v15, %v10160_v4 }
 0x1c3   : > { %v337_v50 = vmul.f32 %v9006_v41, %v9888_v12  ;;  %v2553_v34 = vadd.f32 %v2439_v28, %v2225_v33  ;;  %v446_v32 = vmul.f32 %v9009_v42, %v9921_v51  ;;  %v775_v16 = vmul.f32 %v9012_v43, %v9921_v51 }
 0x1c4   : > { %v1042_v56 = vadd.f32 %v929_v11, %v713_v26  ;;  %v1685_v2 = vsel %vm852_vm1, %v1682_v31, %v1684_v13  ;;  %v2113_v54 = vsel %vm523_vm0, %v2110_v35, %v2112_v53  ;;  %v2440_v39 = vrot.slane %v2287_v6, 2 }
 0x1c5   : > { %v1095_v61 = vmul.f32 %v9015_v44, %v10024_v24  ;;  %v2605_v29 = vadd.f32 %v8993_v36, %v2553_v34  ;;  %v601_v12 = vrot.slane %v446_v32, 1  ;;  %v930_v59 = vrot.slane %v775_v16, 2  ;;  %v10214_v16 = vld [vmem:[#allocation2 + $0x1b0] sm:$0x3] }
 0x1c6   : > { %v1142_v9 = vadd.f32 %v1094_v62, %v1042_v56  ;;  %v2441_v19 = vsel %vm852_vm1, %v2438_v60, %v2440_v39  ;;  %v1204_v20 = vmul.f32 %v9018_v45, %v10057_v57  ;;  %v1532_v31 = vmul.f32 %v9021_v46, %v10057_v57 }
 0x1c7   : > { %v1851_v35 = vmul.f32 %v9024_v47, %v10160_v4  ;;  %vm2653_vm6 = vcmp.gt.f32.partialorder %v2605_v29, 0.0  ;;  %v2705_v3 = vmul.f32 %v8996_v37, %v2605_v29  ;;  %v602_v62 = vsel %vm523_vm0, %v599_v58, %v601_v12 }
 0x1c8   : > { %v1470_v28 = vadd.f32 %v1357_v25, %v1142_v9  ;;  %v714_v49 = vadd.f32 %v602_v62, %v337_v50  ;;  %v931_v60 = vsel %vm852_vm1, %v928_v30, %v930_v59  ;;  %v1358_v63 = vrot.slane %v1204_v20, 1 }
 0x1c9   : > { %v1686_v17 = vrot.slane %v1532_v31, 2  ;;  %v2753_v1 = vsel %vm2653_vm6, %v2605_v29, %v2705_v3  ;;  %v1960_v33 = vmul.f32 %v9027_v48, %v10193_v27  ;;  %v2288_v26 = vmul.f32 %v9059_v15, %v10193_v27 }
 0x1ca   : > { %v1798_v40 = vadd.f32 %v1685_v2, %v1470_v28  ;;  %8097 = vmatprep.mubr.f32.mxu0 %v2753_v1  ;;  %v1043_v11 = vadd.f32 %v931_v60, %v714_v49  ;;  %v1359_v6 = vsel %vm523_vm0, %v1356_v0, %v1358_v63  ;;  %v338_v58 = vmul.f32 %v9006_v41, %v9921_v51 }
 0x1cb   : > { %v1687_v25 = vsel %vm852_vm1, %v1684_v13, %v1686_v17  ;;  %v2114_v50 = vrot.slane %v1960_v33, 1  ;;  %v2442_v34 = vrot.slane %v2288_v26, 2  ;;  %v447_v56 = vmul.f32 %v9009_v42, %v9942_v14 }
 0x1cc   : > { %v1898_v30 = vadd.f32 %v1850_v8, %v1798_v40  ;;  %v1143_v32 = vadd.f32 %v1095_v61, %v1043_v11  ;;  %v776_v2 = vmul.f32 %v9012_v43, %v9942_v14  ;;  %v1096_v0 = vmul.f32 %v9015_v44, %v10057_v57 }
 0x1cd   : > { %v1205_v13 = vmul.f32 %v9018_v45, %v10078_v10  ;;  %v2115_v51 = vsel %vm523_vm0, %v2112_v53, %v2114_v50  ;;  %v2443_v8 = vsel %vm852_vm1, %v2440_v39, %v2442_v34  ;;  %v603_v9 = vrot.slane %v447_v56, 1 }
 0x1ce   : > { %v2226_v29 = vadd.f32 %v2113_v54, %v1898_v30  ;;  %v1471_v20 = vadd.f32 %v1359_v6, %v1143_v32  ;;  %v932_v31 = vrot.slane %v776_v2, 2  ;;  %v1533_v3 = vmul.f32 %v9021_v46, %v10078_v10 }
 0x1cf   : > { %v1360_v61 = vrot.slane %v1205_v13, 1  ;;  %v604_v14 = vsel %vm523_vm0, %v601_v12, %v603_v9  ;;  %v1852_v62 = vmul.f32 %v9024_v47, %v10193_v27  ;;  %v1961_v54 = vmul.f32 %v9027_v48, %v10214_v16  ;;  %v10236_v12 = vpop.f32.mrb[0].mxu0 }
 0x1d0   : > { %v2554_v28 = vadd.f32 %v2441_v19, %v2226_v29  ;;  %v1799_v49 = vadd.f32 %v1687_v25, %v1471_v20  ;;  %v715_v53 = vadd.f32 %v604_v14, %v338_v58  ;;  %v933_v39 = vsel %vm852_vm1, %v930_v59, %v932_v31  ;;  %v2851_v59 = vpop.f32.mrb[1].mxu0 }
 0x1d1   : > { %v1361_v60 = vsel %vm523_vm0, %v1358_v63, %v1360_v61  ;;  %v1688_v40 = vrot.slane %v1533_v3, 2  ;;  %v2116_v33 = vrot.slane %v1961_v54, 1  ;;  %v2289_v19 = vmul.f32 %v9059_v15, %v10214_v16  ;;  %v8054_v56 = vpop.f32.mrb[2].mxu0 }
 0x1d2   : > { %v2606_v1 = vadd.f32 %v8993_v36, %v2554_v28  ;;  %v1899_v26 = vadd.f32 %v1851_v35, %v1799_v49  ;;  %v1044_v11 = vadd.f32 %v933_v39, %v715_v53  ;;  %v339_v6 = vmul.f32 %v9006_v41, %v9989_v18  ;;  %v10249_v29 = vpop.f32.mrb[3].mxu0  ;;  %v10265_v53 = vld [vmem:[#allocation2 + $0x1b8] sm:$0xff] }
 0x1d3   : > { %v448_v25 = vmul.f32 %v9009_v42, %v9989_v18  ;;  %v1689_v58 = vsel %vm852_vm1, %v1686_v17, %v1688_v40  ;;  %v2117_v30 = vsel %vm523_vm0, %v2114_v50, %v2116_v33  ;;  %v2444_v13 = vrot.slane %v2289_v19, 2 }
 0x1d4   : > { %vm2654_vm7 = vcmp.gt.f32.partialorder %v2606_v1, 0.0  ;;  %v2706_v63 = vmul.f32 %v8996_v37, %v2606_v1  ;;  %v2227_v32 = vadd.f32 %v2115_v51, %v1899_v26  ;;  %v1144_v2 = vadd.f32 %v1096_v0, %v1044_v11  ;;  %v10280_v26 = vld [vmem:[#allocation2 + $0x1c0] sm:$0xff] }
 0x1d5   : > { %v10247_v35 = vmul.f32 %v9009_v42, %v10000_v52  ;;  %v605_v20 = vrot.slane %v448_v25, 1  ;;  %v777_v31 = vmul.f32 %v9012_v43, %v9989_v18  ;;  %v10255_v17 = vmul.f32 %v9012_v43, %v10000_v52  ;;  %v10283_v25 = vpop.f32.mrb[4].mxu0 }
 0x1d6   : > { %v2754_v9 = vsel %vm2654_vm7, %v2606_v1, %v2706_v63  ;;  %v2555_v50 = vadd.f32 %v2443_v8, %v2227_v32  ;;  %v1472_v51 = vadd.f32 %v1361_v60, %v1144_v2  ;;  %v2445_v0 = vsel %vm852_vm1, %v2442_v34, %v2444_v13  ;;  %v2871_v56 = vpop.f32.mrb[5].mxu0 }
 0x1d7   : > { %8098 = vmatmul.mubr.f32.gmra.mrb[32].mxu0 %v2754_v9  ;;  %v606_v61 = vrot.slane %v10247_v35, 1  ;;  %v934_v3 = vrot.slane %v777_v31, 2  ;;  %v935_v28 = vrot.slane %v10255_v17, 2  ;;  %v1097_v14 = vmul.f32 %v9015_v44, %v10125_v55  ;;  %v8060_v9 = vpop.f32.mrb[6].mxu0  ;;  %v10314_v56 = vld [vmem:[#allocation2 + $0x1c8] sm:$0xff] }
 0x1d8   : > { %v1206_v18 = vmul.f32 %v9018_v45, %v10125_v55  ;;  %v2607_v54 = vadd.f32 %v8993_v36, %v2555_v50  ;;  %v1800_v49 = vadd.f32 %v1689_v58, %v1472_v51  ;;  %v10272_v8 = vmul.f32 %v9018_v45, %v10136_v5 }
 0x1d9   : > { %v607_v34 = vsel %vm523_vm0, %v605_v20, %v606_v61  ;;  %v936_v60 = vsel %vm852_vm1, %v934_v3, %v935_v28  ;;  %v1534_v40 = vmul.f32 %v9021_v46, %v10125_v55  ;;  %v1853_v58 = vmul.f32 %v9024_v47, %v10265_v53  ;;  %v10299_v3 = vpop.f32.mrb[7].mxu0 }
 0x1da   : > { %v716_v39 = vadd.f32 %v607_v34, %v339_v6  ;;  %v1362_v1 = vrot.slane %v1206_v18, 1  ;;  %vm2655_vm8 = vcmp.gt.f32.partialorder %v2607_v54, 0.0  ;;  %v2707_v33 = vmul.f32 %v8996_v37, %v2607_v54  ;;  %v10305_v34 = vpop.f32.mrb[8].mxu0 }
 0x1db   : > { %v1900_v19 = vadd.f32 %v1852_v62, %v1800_v49  ;;  %v1363_v11 = vrot.slane %v10272_v8, 1  ;;  %v10287_v6 = vmul.f32 %v9021_v46, %v10136_v5  ;;  %v1690_v63 = vrot.slane %v1534_v40, 2 }
 0x1dc   : > { %v1045_v59 = vadd.f32 %v936_v60, %v716_v39  ;;  %v2755_v32 = vsel %vm2655_vm8, %v2607_v54, %v2707_v33  ;;  %v1962_v13 = vmul.f32 %v9027_v48, %v10265_v53  ;;  %v1963_v50 = vmul.f32 %v9027_v48, %v10280_v26 }
 0x1dd   : > { %v2228_v2 = vadd.f32 %v2117_v30, %v1900_v19  ;;  %v1364_v62 = vsel %vm523_vm0, %v1362_v1, %v1363_v11  ;;  %8100 = vmatprep.mubr.f32.mxu0 %v2755_v32  ;;  %v1691_v31 = vrot.slane %v10287_v6, 2  ;;  %v2290_v51 = vmul.f32 %v9059_v15, %v10265_v53  ;;  %v2891_v1 = vpop.f32.mrb[9].mxu0 }
 0x1de   : > { %v1145_v20 = vadd.f32 %v1097_v14, %v1045_v59  ;;  %v2118_v30 = vrot.slane %v1962_v13, 1  ;;  %v2291_v54 = vmul.f32 %v9059_v15, %v10280_v26  ;;  %v340_v49 = vmul.f32 %v9006_v41, %v10000_v52 }
 0x1df   : > { %v2556_v18 = vadd.f32 %v2445_v0, %v2228_v2  ;;  %v1692_v8 = vsel %vm852_vm1, %v1690_v63, %v1691_v31  ;;  %v2119_v39 = vrot.slane %v1963_v50, 1  ;;  %v2446_v60 = vrot.slane %v2290_v51, 2 }
 0x1e0   : > { %v1473_v14 = vadd.f32 %v1364_v62, %v1145_v20  ;;  %v2447_v33 = vrot.slane %v2291_v54, 2  ;;  %v450_v0 = vmul.f32 %v9009_v42, %v10024_v24  ;;  %v779_v19 = vmul.f32 %v9012_v43, %v10024_v24 }
 0x1e1   : > { %v2608_v40 = vadd.f32 %v8993_v36, %v2556_v18  ;;  %v8066_v59 = vpop.f32.mrb[10].mxu0  ;;  %v2120_v52 = vsel %vm523_vm0, %v2118_v30, %v2119_v39  ;;  %v1098_v63 = vmul.f32 %v9015_v44, %v10136_v5  ;;  %v1208_v32 = vmul.f32 %v9018_v45, %v10160_v4 }
 0x1e2   : > { %v1801_v6 = vadd.f32 %v1692_v8, %v1473_v14  ;;  %v2448_v62 = vsel %vm852_vm1, %v2446_v60, %v2447_v33  ;;  %v608_v13 = vrot.slane %v450_v0, 1  ;;  %v10322_v9 = vpop.f32.mrb[11].mxu0  ;;  %v937_v50 = vrot.slane %v779_v19, 2 }
 0x1e3   : > { %vm2656_vm9 = vcmp.gt.f32.partialorder %v2608_v40, 0.0  ;;  %v2708_v2 = vmul.f32 %v8996_v37, %v2608_v40  ;;  %13961 = vst [vmem:[#allocation25_spill] sm:$0xff] %v10322_v9  ;;  %v1365_v51 = vrot.slane %v1208_v32, 1  ;;  %v1536_v18 = vmul.f32 %v9021_v46, %v10160_v4 }
 0x1e4   : > { %v1901_v20 = vadd.f32 %v1853_v58, %v1801_v6  ;;  %v609_v54 = vsel %vm523_vm0, %v606_v61, %v608_v13  ;;  %v1854_v14 = vmul.f32 %v9024_v47, %v10280_v26  ;;  %v1964_v8 = vmul.f32 %v9027_v48, %v10314_v56 }
 0x1e5   : > { %v2756_v30 = vsel %vm2656_vm9, %v2608_v40, %v2708_v2  ;;  %v717_v1 = vadd.f32 %v609_v54, %v340_v49  ;;  %v938_v58 = vsel %vm852_vm1, %v935_v28, %v937_v50  ;;  %v1366_v0 = vsel %vm523_vm0, %v1363_v11, %v1365_v51 }
 0x1e6   : > { %8101 = vmatmul.mubr.f32.gmra.mrb[34].mxu0 %v2756_v30  ;;  %v2229_v60 = vadd.f32 %v2120_v52, %v1901_v20  ;;  %v1693_v40 = vrot.slane %v1536_v18, 2  ;;  %v2121_v19 = vrot.slane %v1964_v8, 1  ;;  %v2292_v35 = vmul.f32 %v9059_v15, %v10314_v56  ;;  %v10351_v30 = vld [vmem:[#allocation2 + $0x1d0] sm:$0xff] }
 0x1e7   : > { %v341_v61 = vmul.f32 %v9006_v41, %v10024_v24  ;;  %v1046_v6 = vadd.f32 %v938_v58, %v717_v1  ;;  %v451_v52 = vmul.f32 %v9009_v42, %v10057_v57  ;;  %v780_v17 = vmul.f32 %v9012_v43, %v10057_v57 }
 0x1e8   : > { %v2557_v59 = vadd.f32 %v2448_v62, %v2229_v60  ;;  %v1694_v28 = vsel %vm852_vm1, %v1691_v31, %v1693_v40  ;;  %v2122_v11 = vsel %vm523_vm0, %v2119_v39, %v2121_v19  ;;  %v2449_v49 = vrot.slane %v2292_v35, 2 }
 0x1e9   : > { %v1099_v32 = vmul.f32 %v9015_v44, %v10160_v4  ;;  %v1146_v20 = vadd.f32 %v1098_v63, %v1046_v6  ;;  %v610_v24 = vrot.slane %v451_v52, 1  ;;  %v939_v62 = vrot.slane %v780_v17, 2 }
 0x1ea   : > { %v2609_v2 = vadd.f32 %v8993_v36, %v2557_v59  ;;  %v2450_v18 = vsel %vm852_vm1, %v2447_v33, %v2449_v49  ;;  %v1209_v54 = vmul.f32 %v9018_v45, %v10193_v27  ;;  %v1537_v31 = vmul.f32 %v9021_v46, %v10193_v27 }
 0x1eb   : > { %v1855_v39 = vmul.f32 %v9024_v47, %v10314_v56  ;;  %v1474_v60 = vadd.f32 %v1366_v0, %v1146_v20  ;;  %v611_v63 = vsel %vm523_vm0, %v608_v13, %v610_v24  ;;  %v940_v33 = vsel %vm852_vm1, %v937_v50, %v939_v62 }
 0x1ec   : > { %vm2657_vm10 = vcmp.gt.f32.partialorder %v2609_v2, 0.0  ;;  %v2709_v8 = vmul.f32 %v8996_v37, %v2609_v2  ;;  %v718_v1 = vadd.f32 %v611_v63, %v341_v61  ;;  %v1367_v58 = vrot.slane %v1209_v54, 1  ;;  %v10372_v54 = vld [vmem:[#allocation2 + $0x1d8] sm:$0x3] }
 0x1ed   : > { %v1695_v35 = vrot.slane %v1537_v31, 2  ;;  %v1802_v6 = vadd.f32 %v1694_v28, %v1474_v60  ;;  %v1965_v52 = vmul.f32 %v9027_v48, %v10351_v30  ;;  %v2293_v17 = vmul.f32 %v9059_v15, %v10351_v30 }
 0x1ee   : > { %v2757_v59 = vsel %vm2657_vm10, %v2609_v2, %v2709_v8  ;;  %v1047_v7 = vadd.f32 %v940_v33, %v718_v1  ;;  %v1368_v9 = vsel %vm523_vm0, %v1365_v51, %v1367_v58  ;;  %v342_v13 = vmul.f32 %v9006_v41, %v10057_v57 }
 0x1ef   : > { %8103 = vmatprep.mubr.f32.mxu0 %v2757_v59  ;;  %v1696_v0 = vsel %vm852_vm1, %v1693_v40, %v1695_v35  ;;  %v1902_v50 = vadd.f32 %v1854_v14, %v1802_v6  ;;  %v2123_v61 = vrot.slane %v1965_v52, 1  ;;  %v2451_v20 = vrot.slane %v2293_v17, 2 }
 0x1f0   : > { %v452_v28 = vmul.f32 %v9009_v42, %v10078_v10  ;;  %v1147_v2 = vadd.f32 %v1099_v32, %v1047_v7  ;;  %v781_v31 = vmul.f32 %v9012_v43, %v10078_v10  ;;  %v1100_v51 = vmul.f32 %v9015_v44, %v10193_v27 }
 0x1f1   : > { %v1210_v40 = vmul.f32 %v9018_v45, %v10214_v16  ;;  %v2230_v8 = vadd.f32 %v2122_v11, %v1902_v50  ;;  %v2124_v57 = vsel %vm523_vm0, %v2121_v19, %v2123_v61  ;;  %v2452_v14 = vsel %vm852_vm1, %v2449_v49, %v2451_v20 }
 0x1f2   : > { %v612_v60 = vrot.slane %v452_v28, 1  ;;  %v1475_v63 = vadd.f32 %v1368_v9, %v1147_v2  ;;  %v941_v1 = vrot.slane %v781_v31, 2  ;;  %v1538_v32 = vmul.f32 %v9021_v46, %v10214_v16 }
 0x1f3   : > { %v1369_v7 = vrot.slane %v1210_v40, 1  ;;  %v2558_v33 = vadd.f32 %v2450_v18, %v2230_v8  ;;  %v1856_v59 = vmul.f32 %v9024_v47, %v10351_v30  ;;  %v1966_v11 = vmul.f32 %v9027_v48, %v10372_v54 }
 0x1f4   : > { %v613_v10 = vsel %vm523_vm0, %v610_v24, %v612_v60  ;;  %v1803_v6 = vadd.f32 %v1696_v0, %v1475_v63  ;;  %v942_v49 = vsel %vm852_vm1, %v939_v62, %v941_v1  ;;  %v1697_v17 = vrot.slane %v1538_v32, 2 }
 0x1f5   : > { %v719_v19 = vadd.f32 %v613_v10, %v342_v13  ;;  %v1370_v9 = vsel %vm523_vm0, %v1367_v58, %v1369_v7  ;;  %v2610_v52 = vadd.f32 %v8993_v36, %v2558_v33  ;;  %v2125_v50 = vrot.slane %v1966_v11, 1  ;;  %v10394_v24 = vpop.f32.mrb[12].mxu0 }
 0x1f6   : > { %v2294_v18 = vmul.f32 %v9059_v15, %v10372_v54  ;;  %13962 = vst [vmem:[#allocation26_spill] sm:$0xff] %v10394_v24  ;;  %v1903_v28 = vadd.f32 %v1855_v39, %v1803_v6  ;;  %v343_v31 = vmul.f32 %v9006_v41, %v10125_v55  ;;  %v453_v0 = vmul.f32 %v9009_v42, %v10125_v55  ;;  %v2911_v62 = vpop.f32.mrb[13].mxu0 }
 0x1f7   : > { %v1048_v2 = vadd.f32 %v942_v49, %v719_v19  ;;  %vm2658_vm11 = vcmp.gt.f32.partialorder %v2610_v52, 0.0  ;;  %v2710_v58 = vmul.f32 %v8996_v37, %v2610_v52  ;;  %v1698_v13 = vsel %vm852_vm1, %v1695_v35, %v1697_v17 }
 0x1f8   : > { %v2126_v40 = vsel %vm523_vm0, %v2123_v61, %v2125_v50  ;;  %v2231_v8 = vadd.f32 %v2124_v57, %v1903_v28  ;;  %v2453_v63 = vrot.slane %v2294_v18, 2  ;;  %v10405_v39 = vmul.f32 %v9009_v42, %v10136_v5 }
 0x1f9   : > { %v1148_v60 = vadd.f32 %v1100_v51, %v1048_v2  ;;  %v2758_v1 = vsel %vm2658_vm11, %v2610_v52, %v2710_v58  ;;  %v614_v7 = vrot.slane %v453_v0, 1  ;;  %v782_v32 = vmul.f32 %v9012_v43, %v10125_v55  ;;  %v10421_v52 = vld [vmem:[#allocation2 + $0x1e0] sm:$0xff]  ;;  %v10432_v0 = vld [vmem:[#allocation2 + $0x1e8] sm:$0xff] }
 0x1fa   : > { %v10411_v33 = vmul.f32 %v9012_v43, %v10136_v5  ;;  %8104 = vmatmul.mubr.f32.gmra.mrb[36].mxu0 %v2758_v1  ;;  %v2559_v35 = vadd.f32 %v2452_v14, %v2231_v8  ;;  %v2454_v61 = vsel %vm852_vm1, %v2451_v20, %v2453_v63  ;;  %v615_v51 = vrot.slane %v10405_v39, 1 }
 0x1fb   : > { %v1476_v10 = vadd.f32 %v1370_v9, %v1148_v60  ;;  %v943_v57 = vrot.slane %v782_v32, 2  ;;  %v1101_v6 = vmul.f32 %v9015_v44, %v10265_v53  ;;  %v1211_v55 = vmul.f32 %v9018_v45, %v10265_v53 }
 0x1fc   : > { %v944_v11 = vrot.slane %v10411_v33, 2  ;;  %v2611_v19 = vadd.f32 %v8993_v36, %v2559_v35  ;;  %v616_v14 = vsel %vm523_vm0, %v614_v7, %v615_v51  ;;  %v1212_v20 = vmul.f32 %v9018_v45, %v10280_v26 }
 0x1fd   : > { %v1804_v49 = vadd.f32 %v1698_v13, %v1476_v10  ;;  %v720_v9 = vadd.f32 %v616_v14, %v343_v31  ;;  %v1371_v50 = vrot.slane %v1211_v55, 1  ;;  %v1539_v18 = vmul.f32 %v9021_v46, %v10265_v53 }
 0x1fe   : > { %v945_v17 = vsel %vm852_vm1, %v943_v57, %v944_v11  ;;  %vm2659_vm12 = vcmp.gt.f32.partialorder %v2611_v19, 0.0  ;;  %v2711_v28 = vmul.f32 %v8996_v37, %v2611_v19  ;;  %v1372_v62 = vrot.slane %v1212_v20, 1 }
 0x1ff   : > { %v1904_v2 = vadd.f32 %v1856_v59, %v1804_v49  ;;  %v1049_v58 = vadd.f32 %v945_v17, %v720_v9  ;;  %v1540_v13 = vmul.f32 %v9021_v46, %v10280_v26  ;;  %v1699_v31 = vrot.slane %v1539_v18, 2 }
 0x200   : > { %v1857_v8 = vmul.f32 %v9024_v47, %v10421_v52  ;;  %v2759_v60 = vsel %vm2659_vm12, %v2611_v19, %v2711_v28  ;;  %v1373_v39 = vsel %vm523_vm0, %v1371_v50, %v1372_v62  ;;  %v1967_v1 = vmul.f32 %v9027_v48, %v10421_v52 }
 0x201   : > { %v2232_v63 = vadd.f32 %v2126_v40, %v1904_v2  ;;  %8106 = vmatprep.mubr.f32.mxu0 %v2759_v60  ;;  %v1149_v59 = vadd.f32 %v1101_v6, %v1049_v58  ;;  %v1700_v7 = vrot.slane %v1540_v13, 2  ;;  %v1968_v32 = vmul.f32 %v9027_v48, %v10432_v0  ;;  %v10456_v2 = vld [vmem:[#allocation2 + $0x1f0] sm:$0xff] }
 0x202   : > { %v2295_v35 = vmul.f32 %v9059_v15, %v10421_v52  ;;  %v2127_v57 = vrot.slane %v1967_v1, 1  ;;  %v2296_v55 = vmul.f32 %v9059_v15, %v10432_v0  ;;  %v344_v40 = vmul.f32 %v9006_v41, %v10136_v5 }
 0x203   : > { %v2560_v10 = vadd.f32 %v2454_v61, %v2232_v63  ;;  %v1477_v19 = vadd.f32 %v1373_v39, %v1149_v59  ;;  %v1701_v49 = vsel %vm852_vm1, %v1699_v31, %v1700_v7  ;;  %v2128_v14 = vrot.slane %v1968_v32, 1 }
 0x204   : > { %v2455_v6 = vrot.slane %v2295_v35, 2  ;;  %v2456_v9 = vrot.slane %v2296_v55, 2  ;;  %v455_v17 = vmul.f32 %v9009_v42, %v10160_v4  ;;  %v784_v61 = vmul.f32 %v9012_v43, %v10160_v4 }
 0x205   : > { %v2612_v20 = vadd.f32 %v8993_v36, %v2560_v10  ;;  %v8072_v50 = vpop.f32.mrb[14].mxu0  ;;  %v1805_v18 = vadd.f32 %v1701_v49, %v1477_v19  ;;  %v2129_v28 = vsel %vm523_vm0, %v2127_v57, %v2128_v14  ;;  %v1102_v5 = vmul.f32 %v9015_v44, %v10280_v26 }
 0x206   : > { %v1213_v58 = vmul.f32 %v9018_v45, %v10314_v56  ;;  %v10462_v13 = vpop.f32.mrb[15].mxu0  ;;  %v2457_v60 = vsel %vm852_vm1, %v2455_v6, %v2456_v9  ;;  %v617_v63 = vrot.slane %v455_v17, 1  ;;  %v946_v1 = vrot.slane %v784_v61, 2 }
 0x207   : > { %13963 = vst [vmem:[#allocation27_spill] sm:$0xff] %v10462_v13  ;;  %vm2660_vm13 = vcmp.gt.f32.partialorder %v2612_v20, 0.0  ;;  %v2712_v31 = vmul.f32 %v8996_v37, %v2612_v20  ;;  %v1905_v39 = vadd.f32 %v1857_v8, %v1805_v18  ;;  %v1541_v32 = vmul.f32 %v9021_v46, %v10314_v56 }
 0x208   : > { %v1374_v59 = vrot.slane %v1213_v58, 1  ;;  %v618_v10 = vsel %vm523_vm0, %v615_v51, %v617_v63  ;;  %v1858_v57 = vmul.f32 %v9024_v47, %v10432_v0  ;;  %v1969_v55 = vmul.f32 %v9027_v48, %v10456_v2 }
 0x209   : > { %v2760_v35 = vsel %vm2660_vm13, %v2612_v20, %v2712_v31  ;;  %v2233_v19 = vadd.f32 %v2129_v28, %v1905_v39  ;;  %v721_v49 = vadd.f32 %v618_v10, %v344_v40  ;;  %v947_v8 = vsel %vm852_vm1, %v944_v11, %v946_v1 }
 0x20a   : > { %8107 = vmatmul.mubr.f32.gmra.mrb[38].mxu0 %v2760_v35  ;;  %v1375_v6 = vsel %vm523_vm0, %v1372_v62, %v1374_v59  ;;  %v1702_v17 = vrot.slane %v1541_v32, 2  ;;  %v2130_v61 = vrot.slane %v1969_v55, 1  ;;  %v2297_v51 = vmul.f32 %v9059_v15, %v10456_v2  ;;  %v10491_v35 = vld [vmem:[#allocation2 + $0x1f8] sm:$0xff] }
 0x20b   : > { %v345_v20 = vmul.f32 %v9006_v41, %v10160_v4  ;;  %v2561_v50 = vadd.f32 %v2457_v60, %v2233_v19  ;;  %v1050_v18 = vadd.f32 %v947_v8, %v721_v49  ;;  %v456_v28 = vmul.f32 %v9009_v42, %v10193_v27 }
 0x20c   : > { %v785_v33 = vmul.f32 %v9012_v43, %v10193_v27  ;;  %v1703_v11 = vsel %vm852_vm1, %v1700_v7, %v1702_v17  ;;  %v2131_v62 = vsel %vm523_vm0, %v2128_v14, %v2130_v61  ;;  %v2458_v40 = vrot.slane %v2297_v51, 2 }
 0x20d   : > { %v1103_v58 = vmul.f32 %v9015_v44, %v10314_v56  ;;  %v2613_v31 = vadd.f32 %v8993_v36, %v2561_v50  ;;  %v1150_v39 = vadd.f32 %v1102_v5, %v1050_v18  ;;  %v619_v4 = vrot.slane %v456_v28, 1 }
 0x20e   : > { %v948_v60 = vrot.slane %v785_v33, 2  ;;  %v2459_v32 = vsel %vm852_vm1, %v2456_v9, %v2458_v40  ;;  %v1214_v10 = vmul.f32 %v9018_v45, %v10351_v30  ;;  %v1542_v7 = vmul.f32 %v9021_v46, %v10351_v30 }
 0x20f   : > { %v1859_v14 = vmul.f32 %v9024_v47, %v10456_v2  ;;  %vm2661_vm14 = vcmp.gt.f32.partialorder %v2613_v31, 0.0  ;;  %v2713_v55 = vmul.f32 %v8996_v37, %v2613_v31  ;;  %v1478_v19 = vadd.f32 %v1375_v6, %v1150_v39 }
 0x210   : > { %v620_v5 = vsel %vm523_vm0, %v617_v63, %v619_v4  ;;  %v949_v9 = vsel %vm852_vm1, %v946_v1, %v948_v60  ;;  %v1376_v8 = vrot.slane %v1214_v10, 1  ;;  %v1704_v51 = vrot.slane %v1542_v7, 2  ;;  %v10512_v10 = vld [vmem:[#allocation2 + $0x200] sm:$0x3] }
 0x211   : > { %v722_v49 = vadd.f32 %v620_v5, %v345_v20  ;;  %v2761_v50 = vsel %vm2661_vm14, %v2613_v31, %v2713_v55  ;;  %v1806_v18 = vadd.f32 %v1703_v11, %v1478_v19  ;;  %v1970_v28 = vmul.f32 %v9027_v48, %v10491_v35 }
 0x212   : > { %v2298_v33 = vmul.f32 %v9059_v15, %v10491_v35  ;;  %8109 = vmatprep.mubr.f32.mxu0 %v2761_v50  ;;  %v1377_v24 = vsel %vm523_vm0, %v1374_v59, %v1376_v8  ;;  %v1705_v6 = vsel %vm852_vm1, %v1702_v17, %v1704_v51  ;;  %v346_v63 = vmul.f32 %v9006_v41, %v10193_v27 }
 0x213   : > { %v1051_v13 = vadd.f32 %v949_v9, %v722_v49  ;;  %v1906_v1 = vadd.f32 %v1858_v57, %v1806_v18  ;;  %v2132_v20 = vrot.slane %v1970_v28, 1  ;;  %v457_v11 = vmul.f32 %v9009_v42, %v10214_v16 }
 0x214   : > { %v2460_v39 = vrot.slane %v2298_v33, 2  ;;  %v786_v7 = vmul.f32 %v9012_v43, %v10214_v16  ;;  %v1104_v59 = vmul.f32 %v9015_v44, %v10351_v30  ;;  %v1215_v17 = vmul.f32 %v9018_v45, %v10372_v54 }
 0x215   : > { %v1151_v31 = vadd.f32 %v1103_v58, %v1051_v13  ;;  %v2234_v55 = vadd.f32 %v2131_v62, %v1906_v1  ;;  %v2133_v27 = vsel %vm523_vm0, %v2130_v61, %v2132_v20  ;;  %v621_v19 = vrot.slane %v457_v11, 1 }
 0x216   : > { %v2461_v57 = vsel %vm852_vm1, %v2458_v40, %v2460_v39  ;;  %v950_v49 = vrot.slane %v786_v7, 2  ;;  %v1378_v13 = vrot.slane %v1215_v17, 1  ;;  %v1543_v58 = vmul.f32 %v9021_v46, %v10372_v54 }
 0x217   : > { %v1479_v5 = vadd.f32 %v1377_v24, %v1151_v31  ;;  %v2562_v9 = vadd.f32 %v2459_v32, %v2234_v55  ;;  %v622_v16 = vsel %vm523_vm0, %v619_v4, %v621_v19  ;;  %v1860_v50 = vmul.f32 %v9024_v47, %v10491_v35 }
 0x218   : > { %v1971_v62 = vmul.f32 %v9027_v48, %v10512_v10  ;;  %v723_v61 = vadd.f32 %v622_v16, %v346_v63  ;;  %v951_v40 = vsel %vm852_vm1, %v948_v60, %v950_v49  ;;  %v1379_v24 = vsel %vm523_vm0, %v1376_v8, %v1378_v13 }
 0x219   : > { %v1807_v18 = vadd.f32 %v1705_v6, %v1479_v5  ;;  %v2614_v28 = vadd.f32 %v8993_v36, %v2562_v9  ;;  %v1706_v33 = vrot.slane %v1543_v58, 2  ;;  %v2299_v32 = vmul.f32 %v9059_v15, %v10512_v10  ;;  %v10534_v4 = vpop.f32.mrb[16].mxu0 }
 0x21a   : > { %v2134_v1 = vrot.slane %v1971_v62, 1  ;;  %v1052_v31 = vadd.f32 %v951_v40, %v723_v61  ;;  %v347_v7 = vmul.f32 %v9006_v41, %v10265_v53  ;;  %v458_v6 = vmul.f32 %v9009_v42, %v10265_v53  ;;  %v2931_v60 = vpop.f32.mrb[17].mxu0 }
 0x21b   : > { %v1907_v11 = vadd.f32 %v1859_v14, %v1807_v18  ;;  %vm2662_vm15 = vcmp.gt.f32.partialorder %v2614_v28, 0.0  ;;  %v2714_v8 = vmul.f32 %v8996_v37, %v2614_v28  ;;  %v1707_v63 = vsel %vm852_vm1, %v1704_v51, %v1706_v33 }
 0x21c   : > { %v2135_v17 = vsel %vm523_vm0, %v2132_v20, %v2134_v1  ;;  %v1152_v19 = vadd.f32 %v1104_v59, %v1052_v31  ;;  %v2462_v5 = vrot.slane %v2299_v32, 2  ;;  %v10545_v14 = vmul.f32 %v9009_v42, %v10280_v26 }
 0x21d   : > { %v2235_v55 = vadd.f32 %v2133_v27, %v1907_v11  ;;  %v2762_v49 = vsel %vm2662_vm15, %v2614_v28, %v2714_v8  ;;  %v623_v13 = vrot.slane %v458_v6, 1  ;;  %v787_v58 = vmul.f32 %v9012_v43, %v10265_v53  ;;  %v289_v28 = vld [vmem:[#allocation2 + $0x208] sm:$0xff]  ;;  %v290_v6 = vld [vmem:[#allocation2 + $0x210] sm:$0xff] }
 0x21e   : > { %v10551_v9 = vmul.f32 %v9012_v43, %v10280_v26  ;;  %8110 = vmatmul.mubr.f32.gmra.mrb[40].mxu0 %v2762_v49  ;;  %v1480_v16 = vadd.f32 %v1379_v24, %v1152_v19  ;;  %v2463_v20 = vsel %vm852_vm1, %v2460_v39, %v2462_v5  ;;  %v624_v59 = vrot.slane %v10545_v14, 1 }
 0x21f   : > { %v2563_v51 = vadd.f32 %v2461_v57, %v2235_v55  ;;  %v952_v27 = vrot.slane %v787_v58, 2  ;;  %v1105_v18 = vmul.f32 %v9015_v44, %v10421_v52  ;;  %v1216_v53 = vmul.f32 %v9018_v45, %v10421_v52 }
 0x220   : > { %v953_v62 = vrot.slane %v10551_v9, 2  ;;  %v1808_v40 = vadd.f32 %v1707_v63, %v1480_v16  ;;  %v625_v57 = vsel %vm523_vm0, %v623_v13, %v624_v59  ;;  %v1217_v39 = vmul.f32 %v9018_v45, %v10432_v0 }
 0x221   : > { %v2615_v61 = vadd.f32 %v8993_v36, %v2563_v51  ;;  %v724_v24 = vadd.f32 %v625_v57, %v347_v7  ;;  %v1380_v1 = vrot.slane %v1216_v53, 1  ;;  %v1544_v32 = vmul.f32 %v9021_v46, %v10421_v52 }
 0x222   : > { %v954_v33 = vsel %vm852_vm1, %v952_v27, %v953_v62  ;;  %v1908_v31 = vadd.f32 %v1860_v50, %v1808_v40  ;;  %v1381_v60 = vrot.slane %v1217_v39, 1  ;;  %v1545_v63 = vmul.f32 %v9021_v46, %v10432_v0 }
 0x223   : > { %vm2663_vm2 = vcmp.gt.f32.partialorder %v2615_v61, 0.0  ;;  %v2715_v11 = vmul.f32 %v8996_v37, %v2615_v61  ;;  %v1053_v8 = vadd.f32 %v954_v33, %v724_v24  ;;  %v1708_v55 = vrot.slane %v1544_v32, 2  ;;  %v291_v32 = vld [vmem:[#allocation2 + $0x218] sm:$0xff] }
 0x224   : > { %v1861_v7 = vmul.f32 %v9024_v47, %v289_v28  ;;  %v2236_v5 = vadd.f32 %v2135_v17, %v1908_v31  ;;  %v1382_v14 = vsel %vm523_vm0, %v1380_v1, %v1381_v60  ;;  %v1972_v49 = vmul.f32 %v9027_v48, %v289_v28 }
 0x225   : > { %v2763_v19 = vsel %vm2663_vm2, %v2615_v61, %v2715_v11  ;;  %v1153_v52 = vadd.f32 %v1105_v18, %v1053_v8  ;;  %v1709_v13 = vrot.slane %v1545_v63, 2  ;;  %v1973_v50 = vmul.f32 %v9027_v48, %v290_v6 }
 0x226   : > { %8112 = vmatprep.mubr.f32.mxu0 %v2763_v19  ;;  %v2300_v58 = vmul.f32 %v9059_v15, %v289_v28  ;;  %v2564_v51 = vadd.f32 %v2463_v20, %v2236_v5  ;;  %v2136_v16 = vrot.slane %v1972_v49, 1  ;;  %v2301_v27 = vmul.f32 %v9059_v15, %v290_v6 }
 0x227   : > { %v348_v53 = vmul.f32 %v9006_v41, %v10280_v26  ;;  %v1481_v61 = vadd.f32 %v1382_v14, %v1153_v52  ;;  %v1710_v17 = vsel %vm852_vm1, %v1708_v55, %v1709_v13  ;;  %v2137_v40 = vrot.slane %v1973_v50, 1 }
 0x228   : > { %v2464_v57 = vrot.slane %v2300_v58, 2  ;;  %v2616_v39 = vadd.f32 %v8993_v36, %v2564_v51  ;;  %v2465_v18 = vrot.slane %v2301_v27, 2  ;;  %v460_v24 = vmul.f32 %v9009_v42, %v10314_v56  ;;  %v8078_v28 = vpop.f32.mrb[18].mxu0 }
 0x229   : > { %v789_v20 = vmul.f32 %v9012_v43, %v10314_v56  ;;  %v1809_v33 = vadd.f32 %v1710_v17, %v1481_v61  ;;  %v2138_v1 = vsel %vm523_vm0, %v2136_v16, %v2137_v40  ;;  %v1106_v26 = vmul.f32 %v9015_v44, %v10432_v0  ;;  %v10591_v31 = vpop.f32.mrb[19].mxu0 }
 0x22a   : > { %v1218_v11 = vmul.f32 %v9018_v45, %v10456_v2  ;;  %vm2664_vm3 = vcmp.gt.f32.partialorder %v2616_v39, 0.0  ;;  %v2716_v8 = vmul.f32 %v8996_v37, %v2616_v39  ;;  %v2466_v63 = vsel %vm852_vm1, %v2464_v57, %v2465_v18 }
 0x22b   : > { %v626_v55 = vrot.slane %v460_v24, 1  ;;  %v1909_v19 = vadd.f32 %v1861_v7, %v1809_v33  ;;  %v955_v5 = vrot.slane %v789_v20, 2  ;;  %v1546_v49 = vmul.f32 %v9021_v46, %v10456_v2 }
 0x22c   : > { %v1383_v14 = vrot.slane %v1218_v11, 1  ;;  %v2764_v52 = vsel %vm2664_vm3, %v2616_v39, %v2716_v8  ;;  %v1862_v50 = vmul.f32 %v9024_v47, %v290_v6  ;;  %v1974_v58 = vmul.f32 %v9027_v48, %v291_v32  ;;  %v292_v8 = vld [vmem:[#allocation2 + $0x220] sm:$0xff] }
 0x22d   : > { %v627_v0 = vsel %vm523_vm0, %v624_v59, %v626_v55  ;;  %8113 = vmatmul.mubr.f32.gmra.mrb[42].mxu0 %v2764_v52  ;;  %v2237_v51 = vadd.f32 %v2138_v1, %v1909_v19  ;;  %v956_v27 = vsel %vm852_vm1, %v953_v62, %v955_v5  ;;  %v1711_v61 = vrot.slane %v1546_v49, 2 }
 0x22e   : > { %v725_v16 = vadd.f32 %v627_v0, %v348_v53  ;;  %v1384_v7 = vsel %vm523_vm0, %v1381_v60, %v1383_v14  ;;  %v2139_v17 = vrot.slane %v1974_v58, 1  ;;  %v2302_v57 = vmul.f32 %v9059_v15, %v291_v32 }
 0x22f   : > { %v349_v59 = vmul.f32 %v9006_v41, %v10314_v56  ;;  %v2565_v39 = vadd.f32 %v2466_v63, %v2237_v51  ;;  %v461_v24 = vmul.f32 %v9009_v42, %v10351_v30  ;;  %v790_v53 = vmul.f32 %v9012_v43, %v10351_v30 }
 0x230   : > { %v1054_v6 = vadd.f32 %v956_v27, %v725_v16  ;;  %v1712_v9 = vsel %vm852_vm1, %v1709_v13, %v1711_v61  ;;  %v2140_v62 = vsel %vm523_vm0, %v2137_v40, %v2139_v17  ;;  %v2467_v60 = vrot.slane %v2302_v57, 2 }
 0x231   : > { %v1107_v20 = vmul.f32 %v9015_v44, %v10456_v2  ;;  %v2617_v28 = vadd.f32 %v8993_v36, %v2565_v39  ;;  %v628_v56 = vrot.slane %v461_v24, 1  ;;  %v957_v1 = vrot.slane %v790_v53, 2  ;;  %v293_v53 = vld [vmem:[#allocation2 + $0x228] sm:$0x3] }
 0x232   : > { %v1154_v33 = vadd.f32 %v1106_v26, %v1054_v6  ;;  %v2468_v11 = vsel %vm852_vm1, %v2465_v18, %v2467_v60  ;;  %v1219_v63 = vmul.f32 %v9018_v45, %v10491_v35  ;;  %v1547_v13 = vmul.f32 %v9021_v46, %v10491_v35 }
 0x233   : > { %v1863_v40 = vmul.f32 %v9024_v47, %v291_v32  ;;  %vm2665_vm4 = vcmp.gt.f32.partialorder %v2617_v28, 0.0  ;;  %v2717_v19 = vmul.f32 %v8996_v37, %v2617_v28  ;;  %v629_v49 = vsel %vm523_vm0, %v626_v55, %v628_v56 }
 0x234   : > { %v1482_v2 = vadd.f32 %v1384_v7, %v1154_v33  ;;  %v726_v26 = vadd.f32 %v629_v49, %v349_v59  ;;  %v958_v52 = vsel %vm852_vm1, %v955_v5, %v957_v1  ;;  %v1385_v0 = vrot.slane %v1219_v63, 1 }
 0x235   : > { %v1713_v18 = vrot.slane %v1547_v13, 2  ;;  %v2765_v58 = vsel %vm2665_vm4, %v2617_v28, %v2717_v19  ;;  %v1975_v16 = vmul.f32 %v9027_v48, %v292_v8  ;;  %v2303_v27 = vmul.f32 %v9059_v15, %v292_v8 }
 0x236   : > { %v1810_v51 = vadd.f32 %v1712_v9, %v1482_v2  ;;  %8115 = vmatprep.mubr.f32.mxu0 %v2765_v58  ;;  %v1055_v57 = vadd.f32 %v958_v52, %v726_v26  ;;  %v1386_v32 = vsel %vm523_vm0, %v1383_v14, %v1385_v0  ;;  %v350_v55 = vmul.f32 %v9006_v41, %v10351_v30 }
 0x237   : > { %v1714_v39 = vsel %vm852_vm1, %v1711_v61, %v1713_v18  ;;  %v2141_v59 = vrot.slane %v1975_v16, 1  ;;  %v2469_v5 = vrot.slane %v2303_v27, 2  ;;  %v462_v6 = vmul.f32 %v9009_v42, %v10372_v54 }
 0x238   : > { %v1910_v7 = vadd.f32 %v1862_v50, %v1810_v51  ;;  %v1155_v24 = vadd.f32 %v1107_v20, %v1055_v57  ;;  %v791_v9 = vmul.f32 %v9012_v43, %v10372_v54  ;;  %v1108_v14 = vmul.f32 %v9015_v44, %v10491_v35  ;;  %v3826_v51 = vld [vmem:[#allocation4 + $0xc] sm:$0x7] }
 0x239   : > { %v1220_v61 = vmul.f32 %v9018_v45, %v10512_v10  ;;  %v2142_v41 = vsel %vm523_vm0, %v2139_v17, %v2141_v59  ;;  %v2470_v30 = vsel %vm852_vm1, %v2467_v60, %v2469_v5  ;;  %v630_v50 = vrot.slane %v462_v6, 1 }
 0x23a   : > { %v2238_v28 = vadd.f32 %v2140_v62, %v1910_v7  ;;  %v1483_v33 = vadd.f32 %v1386_v32, %v1155_v24  ;;  %v959_v42 = vrot.slane %v791_v9, 2  ;;  %v1548_v63 = vmul.f32 %v9021_v46, %v10512_v10 }
 0x23b   : > { %v1387_v20 = vrot.slane %v1220_v61, 1  ;;  %v631_v43 = vsel %vm523_vm0, %v628_v56, %v630_v50  ;;  %v1864_v44 = vmul.f32 %v9024_v47, %v292_v8  ;;  %v1976_v54 = vmul.f32 %v9027_v48, %v293_v53 }
 0x23c   : > { %v2566_v13 = vadd.f32 %v2468_v11, %v2238_v28  ;;  %v1811_v45 = vadd.f32 %v1714_v39, %v1483_v33  ;;  %v727_v35 = vadd.f32 %v631_v43, %v350_v55  ;;  %v960_v17 = vsel %vm852_vm1, %v957_v1, %v959_v42  ;;  %v10654_v11 = vld [vmem:[#allocation9] sm:$0xff]  ;;  %v8463_v33 = vld [vmem:[#allocation2 + $0x28] sm:$0xff] }
 0x23d   : > { %v1388_v62 = vsel %vm523_vm0, %v1385_v0, %v1387_v20  ;;  %v1715_v19 = vrot.slane %v1548_v63, 2  ;;  %v2143_v2 = vrot.slane %v1976_v54, 1  ;;  %v2304_v46 = vmul.f32 %v9059_v15, %v293_v53 }
 0x23e   : > { %v2618_v60 = vadd.f32 %v8993_v36, %v2566_v13  ;;  %v10652_v10 = vpop.f32.mrb[20].mxu0  ;;  %v1911_v56 = vadd.f32 %v1863_v40, %v1811_v45  ;;  %v1056_v47 = vadd.f32 %v960_v17, %v727_v35  ;;  %v10658_v48 = vrot.slane %v10654_v11, %v8982_v23  ;;  %v8464_v45 = vld [vmem:[#allocation2 + $0x30] sm:$0xff] }
 0x23f   : > { %v10660_v8 = vstv %s3295_s27  ;;  %v2951_v1 = vpop.f32.mrb[21].mxu0  ;;  %v1716_v26 = vsel %vm852_vm1, %v1713_v18, %v1715_v19  ;;  %v2144_v15 = vsel %vm523_vm0, %v2141_v59, %v2143_v2  ;;  %v2471_v40 = vrot.slane %v2304_v46, 2 }
 0x240   : > { %vm2666_vm5 = vcmp.gt.f32.partialorder %v2618_v60, 0.0  ;;  %v2718_v49 = vmul.f32 %v8996_v37, %v2618_v60  ;;  %v2239_v52 = vadd.f32 %v2142_v41, %v1911_v56  ;;  %v1156_v0 = vadd.f32 %v1108_v14, %v1056_v47 }
 0x241   : > { %v3095_v58 = vadd.f32 %v10236_v12, %v10658_v48  ;;  %vm3312_vm6 = vcmp.ge.s32.totalorder %v10660_v8, 0  ;;  %vm3324_vm7 = vcmp.lt.s32.totalorder %v10660_v8, 16  ;;  %vm3644_vm8 = vcmask 1040384  }
 0x242   : > { %v2766_v16 = vsel %vm2666_vm5, %v2618_v60, %v2718_v49  ;;  %v2567_v27 = vadd.f32 %v2470_v30, %v2239_v52  ;;  %v1484_v57 = vadd.f32 %v1388_v62, %v1156_v0  ;;  %v2472_v18 = vsel %vm852_vm1, %v2469_v5, %v2471_v40  ;;  %vm10671_vm10 = vmand %vm3312_vm6, %vm3324_vm7 }
 0x243   : > { %8116 = vmatmul.mubr.f32.gmra.mrb[44].mxu0 %v2766_v16  ;;  %vm3143_vm9 = vcmp.gt.f32.partialorder %v3095_v58, 0.0  ;;  %v3195_v32 = vmul.f32 %v8999_v38, %v3095_v58  ;;  %v10676_v12 = vrot.slane %v3826_v51, %v8976_v21  ;;  %v10679_v55 = vrot.slane %v3826_v51, %v8979_v22 }
 0x244   : > { %v2619_v7 = vadd.f32 %v8993_v36, %v2567_v27  ;;  %v1812_v59 = vadd.f32 %v1716_v26, %v1484_v57  ;;  %v8761_v6 = vmov 0.0   ;;  %v10685_v5 = vrot.slane %v3826_v51, %v8982_v23 }
 0x245   : > { %v10682_v24 = vrot.slane %v8761_v6, 7  ;;  %v3243_v53 = vsel %vm3143_vm9, %v3095_v58, %v3195_v32  ;;  %v3096_v9 = vadd.f32 %v10658_v48, %v10249_v29  ;;  %v3099_v14 = vadd.f32 %v10283_v25, %v10658_v48  ;;  %v8465_v32 = vld [vmem:[#allocation2 + $0x38] sm:$0xff] }
 0x246   : > { %v3297_v61 = vadd.s32 1, %v10660_v8  ;;  %vm2667_vm11 = vcmp.gt.f32.partialorder %v2619_v7, 0.0  ;;  %v2719_v28 = vmul.f32 %v8996_v37, %v2619_v7  ;;  %v1912_v41 = vadd.f32 %v1864_v44, %v1812_v59  ;;  %v8466_v59 = vld [vmem:[#allocation2 + $0x40] sm:$0xff] }
 0x247   : > { %v3549_v30 = vsel %vm10671_vm10, %v3243_v53, 0.0  ;;  %v3777_v42 = vadd.f32 %v8463_v33, %v10682_v24  ;;  %vm3144_vm12 = vcmp.gt.f32.partialorder %v3096_v9, 0.0  ;;  %v3196_v20 = vmul.f32 %v8999_v38, %v3096_v9 }
 0x248   : > { %v3646_v50 = vrot.slane %v3549_v30, 7  ;;  %v2767_v29 = vsel %vm2667_vm11, %v2619_v7, %v2719_v28  ;;  %v2240_v63 = vadd.f32 %v2144_v15, %v1912_v41  ;;  %vm3147_vm13 = vcmp.gt.f32.partialorder %v3099_v14, 0.0 }
 0x249   : > { %v3199_v25 = vmul.f32 %v8999_v38, %v3099_v14  ;;  %8118 = vmatprep.mubr.f32.mxu0 %v2767_v29  ;;  %v3917_v43 = vmul.f32 %v10679_v55, %v3777_v42  ;;  %v4151_v44 = vmul.f32 %v10685_v5, %v3777_v42  ;;  %v3833_v17 = vmul.f32 %v10676_v12, %v3777_v42 }
 0x24a   : > { %v3647_v13 = vsel %vm3644_vm8, %v10682_v24, %v3646_v50  ;;  %v2568_v54 = vadd.f32 %v2472_v18, %v2240_v63  ;;  %v3244_v62 = vsel %vm3144_vm12, %v3096_v9, %v3196_v20  ;;  %vm3313_vm14 = vcmp.ge.s32.totalorder %v3297_v61, 0 }
 0x24b   : > { %v3778_v35 = vadd.f32 %v8464_v45, %v3647_v13  ;;  %v3997_v60 = vrot.slane %v3917_v43, 1  ;;  %v3550_v19 = vsel %vm10671_vm10, %v3244_v62, 0.0  ;;  %v3247_v2 = vsel %vm3147_vm13, %v3099_v14, %v3199_v25 }
 0x24c   : > { %v2620_v46 = vadd.f32 %v8993_v36, %v2568_v54  ;;  %v4231_v1 = vrot.slane %v4151_v44, 2  ;;  %v3648_v15 = vrot.slane %v3550_v19, 7  ;;  %vm3325_vm15 = vcmp.lt.s32.totalorder %v3297_v61, 16 }
 0x24d   : > { %v3918_v56 = vmul.f32 %v10679_v55, %v3778_v35  ;;  %v4152_v47 = vmul.f32 %v10685_v5, %v3778_v35  ;;  %v8084_v49 = vpop.f32.mrb[22].mxu0  ;;  %v3834_v26 = vmul.f32 %v10676_v12, %v3778_v35  ;;  %v3100_v52 = vadd.f32 %v10658_v48, %v10299_v3  ;;  %vm10715_vm3 = vmand %vm3313_vm14, %vm3325_vm15 }
 0x24e   : > { %v10711_v0 = vpop.f32.mrb[23].mxu0  ;;  %vm2668_vm2 = vcmp.gt.f32.partialorder %v2620_v46, 0.0  ;;  %v2720_v40 = vmul.f32 %v8996_v37, %v2620_v46  ;;  %v3649_v16 = vsel %vm3644_vm8, %v3646_v50, %v3648_v15  ;;  %v3651_v27 = vsel %vm3644_vm8, %v3648_v15, %v10682_v24 }
 0x24f   : > { %v3998_v58 = vrot.slane %v3918_v56, 1  ;;  %v4232_v36 = vrot.slane %v4152_v47, 2  ;;  %v3553_v3 = vsel %vm10715_vm3, %v3247_v2, 0.0  ;;  %v3103_v57 = vadd.f32 %v10305_v34, %v10658_v48  ;;  %v5654_v2 = vld [vmem:[#allocation7 + $0x80] sm:$0xff] }
 0x250   : > { %v2768_v18 = vsel %vm2668_vm2, %v2620_v46, %v2720_v40  ;;  %v3779_v39 = vadd.f32 %v8465_v32, %v3649_v16  ;;  %vm3148_vm4 = vcmp.gt.f32.partialorder %v3100_v52, 0.0  ;;  %v3780_v6 = vadd.f32 %v8466_v59, %v3651_v27  ;;  %v5655_v46 = vld [vmem:[#allocation7 + $0x88] sm:$0xff]  ;;  %v5657_v40 = vld [vmem:[#allocation7 + $0x98] sm:$0xff] }
 0x251   : > { %v3999_v37 = vsel %vm523_vm0, %v3997_v60, %v3998_v58  ;;  %8119 = vmatmul.mubr.f32.gmra.mrb[46].mxu0 %v2768_v18  ;;  %v3653_v53 = vrot.slane %v3553_v3, 7  ;;  %v3200_v9 = vmul.f32 %v8999_v38, %v3100_v52  ;;  %v4233_v14 = vsel %vm852_vm1, %v4231_v1, %v4232_v36  ;;  %v8467_v47 = vld [vmem:[#allocation2 + $0x58] sm:$0xff] }
 0x252   : > { %v4107_v7 = vadd.f32 %v3999_v37, %v3833_v17  ;;  %v3835_v61 = vmul.f32 %v10676_v12, %v3779_v39  ;;  %v3919_v28 = vmul.f32 %v10679_v55, %v3779_v39  ;;  %v4153_v34 = vmul.f32 %v10685_v5, %v3779_v39  ;;  %v13970_v37 = vld [vmem:[#allocation25_spill] sm:$0xff] }
 0x253   : > { %v3920_v30 = vmul.f32 %v10679_v55, %v3780_v6  ;;  %v4154_v50 = vmul.f32 %v10685_v5, %v3780_v6  ;;  %vm3151_vm5 = vcmp.gt.f32.partialorder %v3103_v57, 0.0  ;;  %v3836_v33 = vmul.f32 %v10676_v12, %v3780_v6  ;;  %v8469_v39 = vld [vmem:[#allocation2 + $0x68] sm:$0xff] }
 0x254   : > { %v10732_v41 = vadd.f32 %v4233_v14, %v4107_v7  ;;  %v4000_v42 = vrot.slane %v3919_v28, 1  ;;  %v4234_v20 = vrot.slane %v4153_v34, 2  ;;  %v3248_v29 = vsel %vm3148_vm4, %v3100_v52, %v3200_v9  ;;  %v5656_v52 = vld [vmem:[#allocation7 + $0x90] sm:$0xff]  ;;  %v13972_v6 = vld [vmem:[#allocation26_spill] sm:$0xff]  ;;  %v5658_v14 = vld [vmem:[#allocation7 + $0xa0] sm:$0xff] }
 0x255   : > { %v4002_v63 = vrot.slane %v3920_v30, 1  ;;  %v4236_v25 = vrot.slane %v4154_v50, 2  ;;  %v3654_v13 = vsel %vm3644_vm8, %v10682_v24, %v3653_v53  ;;  %v3554_v43 = vsel %vm10715_vm3, %v3248_v29, 0.0 }
 0x256   : > { %v4001_v44 = vsel %vm523_vm0, %v3998_v58, %v4000_v42  ;;  %v4235_v54 = vsel %vm852_vm1, %v4232_v36, %v4234_v20  ;;  %v3655_v45 = vrot.slane %v3554_v43, 7  ;;  %v3203_v35 = vmul.f32 %v8999_v38, %v3103_v57 }
 0x257   : > { %v4003_v17 = vsel %vm523_vm0, %v4000_v42, %v4002_v63  ;;  %v4108_v62 = vadd.f32 %v4001_v44, %v3834_v26  ;;  %v4110_v60 = vadd.f32 %v4002_v63, %v3836_v33  ;;  %v4237_v19 = vsel %vm852_vm1, %v4234_v20, %v4236_v25  ;;  %v8468_v26 = vld [vmem:[#allocation2 + $0x60] sm:$0xff]  ;;  %v13977_v20 = vld [vmem:[#allocation27_spill] sm:$0xff] }
 0x258   : > { %v4109_v56 = vadd.f32 %v4003_v17, %v3835_v61  ;;  %v10747_v1 = vadd.f32 %v8467_v47, %v3654_v13  ;;  %v3656_v49 = vsel %vm3644_vm8, %v3653_v53, %v3655_v45  ;;  %v3658_v15 = vsel %vm3644_vm8, %v3655_v45, %v10682_v24  ;;  %v5659_v61 = vld [vmem:[#allocation7 + $0xa8] sm:$0xff]  ;;  %v5660_v63 = vld [vmem:[#allocation7 + $0xb0] sm:$0xff] }
 0x259   : > { %v10752_v58 = vadd.f32 %v4235_v54, %v4108_v62  ;;  %v10754_v36 = vadd.f32 %v4236_v25, %v4110_v60  ;;  %v10756_v51 = vadd.f32 %v8468_v26, %v3656_v49  ;;  %v3251_v16 = vsel %vm3151_vm5, %v3103_v57, %v3203_v35  ;;  %v5661_v25 = vld [vmem:[#allocation7 + $0xb8] sm:$0xff]  ;;  %v5662_v49 = vld [vmem:[#allocation7 + $0xc0] sm:$0xff] }
 0x25a   : > { %13968 = vst [vmem:[#allocation28_spill] sm:$0xff] %v10747_v1  ;;  %v10759_v27 = vadd.f32 %v4237_v19, %v4109_v56  ;;  %v3298_v3 = vadd.s32 2, %v10660_v8  ;;  %v8286_v18 = vpack.c.bf16 %v5655_v46, %v5654_v2  ;;  %v3104_v32 = vadd.f32 %v10658_v48, %v13970_v37 }
 0x25b   : > { %13969 = vst [vmem:[#allocation29_spill] sm:$0xff] %v10756_v51  ;;  %v10764_v7 = vadd.f32 %v8469_v39, %v3658_v15  ;;  %v8290_v59 = vpack.c.bf16 %v5657_v40, %v5656_v52  ;;  %v3107_v53 = vadd.f32 %v13972_v6, %v10658_v48  ;;  %v3299_v9 = vadd.s32 3, %v10660_v8  ;;  %v5663_v15 = vld [vmem:[#allocation7 + $0xc8] sm:$0xff] }
 0x25c   : > { %vm3314_vm6 = vcmp.ge.s32.totalorder %v3298_v3, 0  ;;  %vm3326_vm7 = vcmp.lt.s32.totalorder %v3298_v3, 16  ;;  %8287 = vmatprep.subr.bf16.mxu1 %v8286_v18  ;;  %vm3152_vm9 = vcmp.gt.f32.partialorder %v3104_v32, 0.0  ;;  %v3204_v57 = vmul.f32 %v8999_v38, %v3104_v32  ;;  %v8470_v40 = vld [vmem:[#allocation2 + $0x80] sm:$0xff] }
 0x25d   : > { %13971 = vst [vmem:[#allocation25_spill] sm:$0xff] %v10764_v7  ;;  %vm10770_vm10 = vmand %vm3314_vm6, %vm3326_vm7  ;;  %8289 = vmatpush3.bf16.msra.mxu1 %v8286_v18  ;;  %vm3155_vm11 = vcmp.gt.f32.partialorder %v3107_v53, 0.0  ;;  %v3207_v34 = vmul.f32 %v8999_v38, %v3107_v53  ;;  %vm3315_vm12 = vcmp.ge.s32.totalorder %v3299_v9, 0  ;;  %vm3327_vm13 = vcmp.lt.s32.totalorder %v3299_v9, 16 }
 0x25e   : > { %v3557_v30 = vsel %vm10770_vm10, %v3251_v16, 0.0  ;;  %v3252_v50 = vsel %vm3152_vm9, %v3104_v32, %v3204_v57  ;;  %8291 = vmatprep.subr.bf16.mxu1 %v8290_v59  ;;  %vm10777_vm14 = vmand %vm3315_vm12, %vm3327_vm13  ;;  %v8294_v42 = vpack.c.bf16 %v5659_v61, %v5658_v14  ;;  %v3108_v29 = vadd.f32 %v10658_v48, %v13977_v20  ;;  %v8471_v16 = vld [vmem:[#allocation2 + $0x88] sm:$0xff]  ;;  %v8472_v32 = vld [vmem:[#allocation2 + $0x90] sm:$0xff] }
 0x25f   : > { %v3660_v13 = vrot.slane %v3557_v30, 7  ;;  %v3558_v43 = vsel %vm10770_vm10, %v3252_v50, 0.0  ;;  %v3255_v44 = vsel %vm3155_vm11, %v3107_v53, %v3207_v34  ;;  %v3111_v54 = vadd.f32 %v10534_v4, %v10658_v48  ;;  %v5664_v14 = vld [vmem:[#allocation7 + $0xd0] sm:$0xff]  ;;  %v5665_v61 = vld [vmem:[#allocation7 + $0xd8] sm:$0xff] }
 0x260   : > { %v3662_v45 = vrot.slane %v3558_v43, 7  ;;  %v3561_v35 = vsel %vm10777_vm14, %v3255_v44, 0.0  ;;  %vm3156_vm15 = vcmp.gt.f32.partialorder %v3108_v29, 0.0  ;;  %v3208_v17 = vmul.f32 %v8999_v38, %v3108_v29  ;;  %v8474_v20 = vld [vmem:[#allocation2 + $0xb0] sm:$0xff]  ;;  %v8475_v43 = vld [vmem:[#allocation2 + $0xb8] sm:$0xff] }
 0x261   : > { %v3661_v62 = vsel %vm3644_vm8, %v10682_v24, %v3660_v13  ;;  %v3667_v60 = vrot.slane %v3561_v35, 7  ;;  %8293 = vmatpush3.bf16.msra.mxu1 %v8290_v59  ;;  %v8298_v19 = vpack.c.bf16 %v5661_v25, %v5660_v63  ;;  %v3211_v2 = vmul.f32 %v8999_v38, %v3111_v54  ;;  %v10793_v46 = vpop.f32.mrb[24].mxu0  ;;  %v8473_v59 = vld [vmem:[#allocation2 + $0xa8] sm:$0xff]  ;;  %v5666_v35 = vld [vmem:[#allocation7 + $0xe0] sm:$0xff] }
 0x262   : > { %v3663_v56 = vsel %vm3644_vm8, %v3660_v13, %v3662_v45  ;;  %v3665_v4 = vsel %vm3644_vm8, %v3662_v45, %v10682_v24  ;;  %8295 = vmatprep.subr.bf16.mxu1 %v8294_v42  ;;  %v3256_v47 = vsel %vm3156_vm15, %v3108_v29, %v3208_v17  ;;  %vm3159_vm2 = vcmp.gt.f32.partialorder %v3111_v54, 0.0  ;;  %v2971_v52 = vpop.f32.mrb[25].mxu0  ;;  %v5667_v17 = vld [vmem:[#allocation7 + $0xe8] sm:$0xff] }
 0x263   : > { %v10798_v26 = vadd.f32 %v8470_v40, %v3661_v62  ;;  %v10800_v3 = vadd.f32 %v8471_v16, %v3663_v56  ;;  %v3668_v18 = vsel %vm3644_vm8, %v10682_v24, %v3667_v60  ;;  %v3562_v37 = vsel %vm10777_vm14, %v3256_v47, 0.0  ;;  %v8483_v47 = vld [vmem:[#allocation2 + $0x108] sm:$0xff] }
 0x264   : > { %v10806_v39 = vadd.f32 %v8472_v32, %v3665_v4  ;;  %v10808_v6 = vadd.f32 %v8473_v59, %v3668_v18  ;;  %v3669_v53 = vrot.slane %v3562_v37, 7  ;;  %v3300_v9 = vadd.s32 4, %v10660_v8 }
 0x265   : > { %13978 = vst [vmem:[#allocation26_spill] sm:$0xff] %v10798_v26  ;;  %13979 = vst [vmem:[#allocation27_spill] sm:$0xff] %v10800_v3  ;;  %8297 = vmatpush3.bf16.msra.mxu1 %v8294_v42  ;;  %v3259_v57 = vsel %vm3159_vm2, %v3111_v54, %v3211_v2  ;;  %v8302_v28 = vpack.c.bf16 %v5663_v15, %v5662_v49  ;;  %v3112_v34 = vadd.f32 %v10658_v48, %v10591_v31  ;;  %v5668_v49 = vld [vmem:[#allocation7 + $0xf0] sm:$0xff]  ;;  %v8476_v15 = vld [vmem:[#allocation2 + $0xd0] sm:$0xff] }
 0x266   : > { %13980 = vst [vmem:[#allocation30_spill] sm:$0xff] %v10806_v39  ;;  %13981 = vst [vmem:[#allocation31_spill] sm:$0xff] %v10808_v6  ;;  %v3115_v30 = vadd.f32 %v10652_v10, %v10658_v48  ;;  %v3670_v50 = vsel %vm3644_vm8, %v3667_v60, %v3669_v53  ;;  %v3672_v33 = vsel %vm3644_vm8, %v3669_v53, %v10682_v24  ;;  %8299 = vmatprep.subr.bf16.mxu1 %v8298_v19  ;;  %v8479_v42 = vld [vmem:[#allocation2 + $0xf8] sm:$0xff] }
 0x267   : > { %vm3316_vm3 = vcmp.ge.s32.totalorder %v3300_v9, 0  ;;  %vm3328_vm4 = vcmp.lt.s32.totalorder %v3300_v9, 16  ;;  %v10819_v29 = vadd.f32 %v8474_v20, %v3670_v50  ;;  %vm3160_vm6 = vcmp.gt.f32.partialorder %v3112_v34, 0.0  ;;  %v3827_v9 = vld [vmem:[#allocation4 + $0x10] sm:$0x7] }
 0x268   : > { %vm10821_vm5 = vmand %vm3316_vm3, %vm3328_vm4  ;;  %v3212_v31 = vmul.f32 %v8999_v38, %v3112_v34  ;;  %v8306_v63 = vpack.c.bf16 %v5665_v61, %v5664_v14  ;;  %vm3163_vm7 = vcmp.gt.f32.partialorder %v3115_v30, 0.0  ;;  %v3215_v25 = vmul.f32 %v8999_v38, %v3115_v30  ;;  %v8477_v14 = vld [vmem:[#allocation2 + $0xd8] sm:$0xff] }
 0x269   : > { %13982 = vst [vmem:[#allocation32_spill] sm:$0xff] %v10819_v29  ;;  %v3565_v10 = vsel %vm10821_vm5, %v3259_v57, 0.0  ;;  %v3301_v13 = vadd.s32 5, %v10660_v8  ;;  %v10830_v44 = vadd.f32 %v8475_v43, %v3672_v33  ;;  %8301 = vmatpush3.bf16.msra.mxu1 %v8298_v19  ;;  %v3116_v62 = vadd.f32 %v10658_v48, %v10711_v0  ;;  %v5669_v0 = vld [vmem:[#allocation7 + $0xf8] sm:$0xff]  ;;  %v8478_v33 = vld [vmem:[#allocation2 + $0xe0] sm:$0xff] }
 0x26a   : > { %v3674_v54 = vrot.slane %v3565_v10, 7  ;;  %v3260_v45 = vsel %vm3160_vm6, %v3112_v34, %v3212_v31  ;;  %8303 = vmatprep.subr.bf16.mxu1 %v8302_v28  ;;  %v3263_v2 = vsel %vm3163_vm7, %v3115_v30, %v3215_v25  ;;  %v8310_v16 = vpack.c.bf16 %v5667_v17, %v5666_v35  ;;  %v8480_v10 = vld [vmem:[#allocation2 + $0x50] sm:$0xff]  ;;  %v3828_v17 = vld [vmem:[#allocation4 + $0x14] sm:$0x7] }
 0x26b   : > { %13985 = vst [vmem:[#allocation33_spill] sm:$0xff] %v10830_v44  ;;  %v3566_v60 = vsel %vm10821_vm5, %v3260_v45, 0.0  ;;  %vm3317_vm9 = vcmp.ge.s32.totalorder %v3301_v13, 0  ;;  %vm3329_vm10 = vcmp.lt.s32.totalorder %v3301_v13, 16  ;;  %vm3164_vm12 = vcmp.gt.f32.partialorder %v3116_v62, 0.0 }
 0x26c   : > { %v3675_v56 = vsel %vm3644_vm8, %v10682_v24, %v3674_v54  ;;  %v3676_v4 = vrot.slane %v3566_v60, 7  ;;  %vm10838_vm11 = vmand %vm3317_vm9, %vm3329_vm10  ;;  %v3216_v19 = vmul.f32 %v8999_v38, %v3116_v62  ;;  %v3119_v18 = vadd.f32 %v10793_v46, %v10658_v48  ;;  %v8481_v60 = vld [vmem:[#allocation2 + $0x100] sm:$0xff] }
 0x26d   : > { %v10843_v52 = vadd.f32 %v8476_v15, %v3675_v56  ;;  %v3569_v40 = vsel %vm10838_vm11, %v3263_v2, 0.0  ;;  %8305 = vmatpush3.bf16.msra.mxu1 %v8302_v28  ;;  %v8314_v34 = vpack.c.bf16 %v5669_v0, %v5668_v49  ;;  %v3302_v50 = vadd.s32 6, %v10660_v8  ;;  %v8482_v56 = vld [vmem:[#allocation2 + $0x78] sm:$0xff] }
 0x26e   : > { %v3677_v37 = vsel %vm3644_vm8, %v3674_v54, %v3676_v4  ;;  %v3679_v32 = vsel %vm3644_vm8, %v3676_v4, %v10682_v24  ;;  %v3681_v59 = vrot.slane %v3569_v40, 7  ;;  %v3264_v53 = vsel %vm3164_vm12, %v3116_v62, %v3216_v19  ;;  %8307 = vmatprep.subr.bf16.mxu1 %v8306_v63 }
 0x26f   : > { %13988 = vst [vmem:[#allocation34_spill] sm:$0xff] %v10843_v52  ;;  %v10852_v61 = vadd.f32 %v8477_v14, %v3677_v37  ;;  %v3570_v57 = vsel %vm10838_vm11, %v3264_v53, 0.0  ;;  %vm3167_vm13 = vcmp.gt.f32.partialorder %v3119_v18, 0.0  ;;  %v3219_v30 = vmul.f32 %v8999_v38, %v3119_v18 }
 0x270   : > { %v3682_v46 = vsel %vm3644_vm8, %v10682_v24, %v3681_v59  ;;  %v3683_v28 = vrot.slane %v3570_v57, 7  ;;  %v10860_v20 = vadd.f32 %v8478_v33, %v3679_v32  ;;  %v10865_v25 = vadd.f32 %v8480_v10, %v10682_v24 }
 0x271   : > { %13989 = vst [vmem:[#allocation35_spill] sm:$0xff] %v10852_v61  ;;  %v10862_v31 = vadd.f32 %v8479_v42, %v3682_v46  ;;  %v10868_v13 = vrot.slane %v3827_v9, %v8976_v21  ;;  %v8090_v43 = vpop.f32.mrb[26].mxu0  ;;  %8309 = vmatpush3.bf16.msra.mxu1 %v8306_v63  ;;  %v3267_v35 = vsel %vm3167_vm13, %v3119_v18, %v3219_v30  ;;  %vm3318_vm14 = vcmp.ge.s32.totalorder %v3302_v50, 0 }
 0x272   : > { %13990 = vst [vmem:[#allocation36_spill] sm:$0xff] %v10860_v20  ;;  %v3684_v54 = vsel %vm3644_vm8, %v3681_v59, %v3683_v28  ;;  %v3686_v45 = vsel %vm3644_vm8, %v3683_v28, %v10682_v24  ;;  %v10874_v62 = vpop.f32.mrb[27].mxu0  ;;  %8311 = vmatprep.subr.bf16.mxu1 %v8310_v16  ;;  %vm3330_vm15 = vcmp.lt.s32.totalorder %v3302_v50, 16  ;;  %v10879_v4 = vadd.f32 %v8482_v56, %v10682_v24 }
 0x273   : > { %13991 = vst [vmem:[#allocation37_spill] sm:$0xff] %v10862_v31  ;;  %v10876_v2 = vadd.f32 %v8481_v60, %v3684_v54  ;;  %v4385_v63 = vmul.f32 %v10868_v13, %v10865_v25  ;;  %v10883_v19 = vadd.f32 %v8483_v47, %v3686_v45  ;;  %vm10885_vm2 = vmand %vm3318_vm14, %vm3330_vm15  ;;  %v4386_v0 = vmul.f32 %v10868_v13, %v10747_v1 }
 0x274   : > { %v10892_v15 = vrot.slane %v3827_v9, %v8979_v22  ;;  %v10895_v40 = vrot.slane %v3827_v9, %v8982_v23  ;;  %v3573_v18 = vsel %vm10885_vm2, %v3267_v35, 0.0  ;;  %v10901_v32 = vrot.slane %v3828_v17, %v8976_v21 }
 0x275   : > { %13992 = vst [vmem:[#allocation38_spill] sm:$0xff] %v10876_v2  ;;  %13993 = vst [vmem:[#allocation39_spill] sm:$0xff] %v10883_v19  ;;  %v4425_v37 = vadd.f32 %v4385_v63, %v10732_v41  ;;  %v10904_v59 = vrot.slane %v3828_v17, %v8979_v22  ;;  %8313 = vmatpush3.bf16.msra.mxu1 %v8310_v16  ;;  %v10906_v53 = vrot.slane %v3573_v18, 7  ;;  %vm5710_vm3 = vcmask 1043456  }
 0x276   : > { %v4469_v14 = vmul.f32 %v10892_v15, %v10865_v25  ;;  %v4470_v9 = vmul.f32 %v10892_v15, %v10747_v1  ;;  %v10913_v57 = vrot.slane %v3828_v17, %v8982_v23  ;;  %8315 = vmatprep.subr.bf16.mxu1 %v8314_v34  ;;  %v10917_v41 = vmul.f32 %v10892_v15, %v10756_v51 }
 0x277   : > { %v4703_v46 = vmul.f32 %v10895_v40, %v10865_v25  ;;  %v4704_v16 = vmul.f32 %v10895_v40, %v10747_v1  ;;  %v10925_v28 = vmul.f32 %v10895_v40, %v10756_v51  ;;  %v3689_v30 = vsel %vm3644_vm8, %v10682_v24, %v10906_v53 }
 0x278   : > { %v4426_v50 = vadd.f32 %v4386_v0, %v10752_v58  ;;  %v4549_v33 = vrot.slane %v4469_v14, 1  ;;  %v4550_v42 = vrot.slane %v4470_v9, 1  ;;  %v4552_v10 = vrot.slane %v10917_v41, 1 }
 0x279   : > { %v4783_v43 = vrot.slane %v4703_v46, 2  ;;  %v4784_v54 = vrot.slane %v4704_v16, 2  ;;  %v4937_v45 = vmul.f32 %v10901_v32, %v10879_v4  ;;  %8317 = vmatpush3.bf16.msra.mxu1 %v8314_v34  ;;  %v4786_v17 = vrot.slane %v10925_v28, 2 }
 0x27a   : > { %v4551_v35 = vsel %vm523_vm0, %v4549_v33, %v4550_v42  ;;  %v4938_v60 = vmul.f32 %v10901_v32, %v10798_v26  ;;  %v5021_v58 = vmul.f32 %v10904_v59, %v10879_v4  ;;  %v4553_v56 = vsel %vm523_vm0, %v4550_v42, %v4552_v10 }
 0x27b   : > { %v4659_v63 = vadd.f32 %v4551_v35, %v4425_v37  ;;  %v4785_v47 = vsel %vm852_vm1, %v4783_v43, %v4784_v54  ;;  %v5022_v0 = vmul.f32 %v10904_v59, %v10798_v26  ;;  %v4660_v18 = vadd.f32 %v4553_v56, %v4426_v50  ;;  %v13996_v50 = vld [vmem:[#allocation21_spill] sm:$0xff] }
 0x27c   : > { %v4787_v34 = vsel %vm852_vm1, %v4784_v54, %v4786_v17  ;;  %v5023_v14 = vmul.f32 %v10904_v59, %v10800_v3  ;;  %v5101_v9 = vrot.slane %v5021_v58, 1  ;;  %v5255_v16 = vmul.f32 %v10913_v57, %v10879_v4 }
 0x27d   : > { %v4893_v41 = vadd.f32 %v4785_v47, %v4659_v63  ;;  %v5102_v46 = vrot.slane %v5022_v0, 1  ;;  %v5256_v37 = vmul.f32 %v10913_v57, %v10798_v26  ;;  %v4894_v28 = vadd.f32 %v4787_v34, %v4660_v18  ;;  %v8484_v63 = vld [vmem:[#allocation2 + $0x120] sm:$0xff] }
 0x27e   : > { %v5104_v33 = vrot.slane %v5023_v14, 1  ;;  %v10953_v42 = vmul.f32 %v10913_v57, %v10800_v3  ;;  %v5487_v43 = vsub.s32 3, %v13996_v50  ;;  %v5335_v58 = vrot.slane %v5255_v16, 2 }
 0x27f   : > { %v4977_v54 = vadd.f32 %v4937_v45, %v4893_v41  ;;  %v5103_v35 = vsel %vm523_vm0, %v5101_v9, %v5102_v46  ;;  %v5336_v56 = vrot.slane %v5256_v37, 2  ;;  %v10957_v47 = vadd.f32 %v8484_v63, %v3689_v30 }
 0x280   : > { %v4978_v0 = vadd.f32 %v4938_v60, %v4894_v28  ;;  %v5105_v21 = vsel %vm523_vm0, %v5102_v46, %v5104_v33  ;;  %v5338_v18 = vrot.slane %v10953_v42, 2  ;;  %v10963_v23 = vrot.slane %v10654_v11, %v5487_v43 }
 0x281   : > { %13997 = vst [vmem:[#allocation40_spill] sm:$0xff] %v10957_v47  ;;  %v5211_v34 = vadd.f32 %v5103_v35, %v4977_v54  ;;  %v5337_v14 = vsel %vm852_vm1, %v5335_v58, %v5336_v56  ;;  %v5571_v45 = vsub.s32 4, %v13996_v50  ;;  %v4387_v9 = vmul.f32 %v10868_v13, %v10756_v51 }
 0x282   : > { %v5212_v41 = vadd.f32 %v5105_v21, %v4978_v0  ;;  %v4472_v30 = vmul.f32 %v10892_v15, %v10764_v7  ;;  %v5339_v60 = vsel %vm852_vm1, %v5336_v56, %v5338_v18  ;;  %v4706_v37 = vmul.f32 %v10895_v40, %v10764_v7 }
 0x283   : > { %v5445_v46 = vadd.f32 %v5337_v14, %v5211_v34  ;;  %v10972_v16 = vrot.slane %v10654_v11, %v5571_v45  ;;  %v4427_v42 = vadd.f32 %v4387_v9, %v10759_v27  ;;  %v5024_v43 = vmul.f32 %v10904_v59, %v10806_v39 }
 0x284   : > { %v5446_v28 = vadd.f32 %v5339_v60, %v5212_v41  ;;  %v4554_v21 = vrot.slane %v4472_v30, 1  ;;  %v4788_v35 = vrot.slane %v4706_v37, 2  ;;  %v5258_v58 = vmul.f32 %v10913_v57, %v10806_v39 }
 0x285   : > { %v5489_v54 = vadd.f32 %v10963_v23, %v5445_v46  ;;  %v4388_v11 = vmul.f32 %v10868_v13, %v10764_v7  ;;  %v4939_v27 = vmul.f32 %v10901_v32, %v10800_v3  ;;  %v5106_v0 = vrot.slane %v5024_v43, 1  ;;  %v8093_v34 = vpop.f32.mrb[28].mxu0 }
 0x286   : > { %v5490_v56 = vadd.f32 %v10963_v23, %v5446_v28  ;;  %v4555_v63 = vsel %vm523_vm0, %v4552_v10, %v4554_v21  ;;  %v4940_v41 = vmul.f32 %v10901_v32, %v10806_v39  ;;  %v2991_v9 = vpop.f32.mrb[29].mxu0  ;;  %v4789_v60 = vsel %vm852_vm1, %v4786_v17, %v4788_v35 }
 0x287   : > { %vm5529_vm4 = vcmp.gt.f32.partialorder %v5489_v54, 0.0  ;;  %v5573_v14 = vmul.f32 %v10972_v16, %v5489_v54  ;;  %v4661_v45 = vadd.f32 %v4555_v63, %v4427_v42  ;;  %v5340_v46 = vrot.slane %v5258_v58, 2 }
 0x288   : > { %vm5530_vm5 = vcmp.gt.f32.partialorder %v5490_v56, 0.0  ;;  %v5574_v30 = vmul.f32 %v10972_v16, %v5490_v56  ;;  %v4428_v28 = vadd.f32 %v4388_v11, %v10754_v36  ;;  %v3120_v43 = vadd.f32 %v10658_v48, %v10874_v62 }
 0x289   : > { %v5613_v10 = vsel %vm5529_vm4, %v5489_v54, %v5573_v14  ;;  %v4895_v37 = vadd.f32 %v4789_v60, %v4661_v45  ;;  %v5107_v63 = vsel %vm523_vm0, %v5104_v33, %v5106_v0  ;;  %v3123_v9 = vadd.f32 %v8093_v34, %v10658_v48  ;;  %v8485_v45 = vld [vmem:[#allocation2 + $0xa0] sm:$0xff] }
 0x28a   : > { %v10996_v22 = vsel %vm5530_vm5, %v5490_v56, %v5574_v30  ;;  %v5711_v42 = vrot.slane %v5613_v10, 4  ;;  %v4662_v19 = vadd.f32 %v4554_v21, %v4428_v28  ;;  %vm3168_vm6 = vcmp.gt.f32.partialorder %v3120_v43, 0.0 }
 0x28b   : > { %v5712_v50 = vrot.slane %v10996_v22, 4  ;;  %v4979_v47 = vadd.f32 %v4939_v27, %v4895_v37  ;;  %v3220_v17 = vmul.f32 %v8999_v38, %v3120_v43  ;;  %vm3171_vm7 = vcmp.gt.f32.partialorder %v3123_v9, 0.0 }
 0x28c   : > { %v3223_v36 = vmul.f32 %v8999_v38, %v3123_v9  ;;  %v3303_v54 = vadd.s32 7, %v10660_v8  ;;  %v5341_v11 = vsel %vm852_vm1, %v5338_v18, %v5340_v46  ;;  %v4896_v33 = vadd.f32 %v4788_v35, %v4662_v19 }
 0x28d   : > { %v5713_v62 = vsel %vm5710_vm3, %v5711_v42, %v5712_v50  ;;  %v5213_v58 = vadd.f32 %v5107_v63, %v4979_v47  ;;  %v3268_v56 = vsel %vm3168_vm6, %v3120_v43, %v3220_v17  ;;  %v11013_v47 = vadd.f32 %v8485_v45, %v10682_v24  ;;  %v8486_v17 = vld [vmem:[#allocation2 + $0x128] sm:$0xff] }
 0x28e   : > { %8153 = vmatprep.mubr.f32.mxu1 %v5713_v62  ;;  %v3271_v34 = vsel %vm3171_vm7, %v3123_v9, %v3223_v36  ;;  %vm3319_vm9 = vcmp.ge.s32.totalorder %v3303_v54, 0  ;;  %vm3331_vm10 = vcmp.lt.s32.totalorder %v3303_v54, 16  ;;  %v4980_v21 = vadd.f32 %v4940_v41, %v4896_v33  ;;  %v8487_v54 = vld [vmem:[#allocation2 + $0x130] sm:$0xff] }
 0x28f   : > { %v5447_v22 = vadd.f32 %v5341_v11, %v5213_v58  ;;  %v3574_v27 = vsel %vm10885_vm2, %v3268_v56, 0.0  ;;  %vm11008_vm11 = vmand %vm3319_vm9, %vm3331_vm10  ;;  %v3837_v35 = vmul.f32 %v10676_v12, %v10865_v25  ;;  %v3921_v41 = vmul.f32 %v10679_v55, %v10865_v25 }
 0x290   : > { %v3690_v18 = vrot.slane %v3574_v27, 7  ;;  %v3577_v19 = vsel %vm11008_vm11, %v3271_v34, 0.0  ;;  %v5214_v30 = vadd.f32 %v5106_v0, %v4980_v21  ;;  %v3922_v10 = vmul.f32 %v10679_v55, %v10747_v1 }
 0x291   : > { %v5491_v49 = vadd.f32 %v10963_v23, %v5447_v22  ;;  %v11022_v60 = vrot.slane %v3577_v19, 7  ;;  %v11032_v43 = vmul.f32 %v10679_v55, %v10756_v51  ;;  %v4004_v42 = vrot.slane %v3921_v41, 1 }
 0x292   : > { %v3691_v37 = vsel %vm3644_vm8, %v10906_v53, %v3690_v18  ;;  %v3693_v28 = vsel %vm3644_vm8, %v3690_v18, %v10682_v24  ;;  %v5448_v0 = vadd.f32 %v5340_v46, %v5214_v30  ;;  %v3838_v9 = vmul.f32 %v10676_v12, %v10747_v1 }
 0x293   : > { %vm5531_vm12 = vcmp.gt.f32.partialorder %v5491_v49, 0.0  ;;  %v5575_v63 = vmul.f32 %v10972_v16, %v5491_v49  ;;  %v11037_v36 = vadd.f32 %v8486_v17, %v3691_v37  ;;  %v11039_v53 = vadd.f32 %v8487_v54, %v3693_v28 }
 0x294   : > { %v4005_v62 = vrot.slane %v3922_v10, 1  ;;  %v13878_v58 = vrot.slane %v11032_v43, 1  ;;  %v5492_v33 = vadd.f32 %v10963_v23, %v5448_v0  ;;  %v11046_v56 = vsel %vm3644_vm8, %v10682_v24, %v11022_v60  ;;  %v8096_v34 = vpop.f32.mrb[30].mxu0 }
 0x295   : > { %14000 = vst [vmem:[#allocation41_spill] sm:$0xff] %v11037_v36  ;;  %14001 = vst [vmem:[#allocation42_spill] sm:$0xff] %v11039_v53  ;;  %v5615_v11 = vsel %vm5531_vm12, %v5491_v49, %v5575_v63  ;;  %v4155_v46 = vmul.f32 %v10685_v5, %v10865_v25  ;;  %v4156_v45 = vmul.f32 %v10685_v5, %v10747_v1  ;;  %v11056_v18 = vpop.f32.mrb[31].mxu0 }
 0x296   : > { %v5714_v22 = vrot.slane %v5615_v11, 4  ;;  %v4006_v21 = vsel %vm523_vm0, %v4004_v42, %v4005_v62  ;;  %v4008_v27 = vsel %vm523_vm0, %v4005_v62, %v13878_v58  ;;  %vm5532_vm13 = vcmp.gt.f32.partialorder %v5492_v33, 0.0 }
 0x297   : > { %v5576_v19 = vmul.f32 %v10972_v16, %v5492_v33  ;;  %v4111_v41 = vadd.f32 %v4006_v21, %v3837_v35  ;;  %v4112_v49 = vadd.f32 %v4008_v27, %v3838_v9  ;;  %v11062_v30 = vmul.f32 %v10685_v5, %v10756_v51 }
 0x298   : > { %v5715_v25 = vsel %vm5710_vm3, %v5712_v50, %v5714_v22  ;;  %v4238_v10 = vrot.slane %v4155_v46, 2  ;;  %v4239_v37 = vrot.slane %v4156_v45, 2  ;;  %v4389_v42 = vmul.f32 %v10868_v13, %v10879_v4 }
 0x299   : > { %8154 = vmatmul.mubr.f32.vlgmr.msra.gmra.mrb[0].mxu1 %v5715_v25  ;;  %v5616_v28 = vsel %vm5532_vm13, %v5492_v33, %v5576_v19  ;;  %v4390_v63 = vmul.f32 %v10868_v13, %v10798_v26  ;;  %v4473_v35 = vmul.f32 %v10892_v15, %v10879_v4  ;;  %v13877_v9 = vrot.slane %v11062_v30, 2 }
 0x29a   : > { %v5716_v0 = vrot.slane %v5616_v28, 4  ;;  %v4240_v50 = vsel %vm852_vm1, %v4238_v10, %v4239_v37  ;;  %v4474_v17 = vmul.f32 %v10892_v15, %v10798_v26  ;;  %v11076_v62 = vmul.f32 %v10892_v15, %v10800_v3 }
 0x29b   : > { %v4345_v54 = vadd.f32 %v4240_v50, %v4111_v41  ;;  %v4556_v11 = vrot.slane %v4473_v35, 1  ;;  %v4707_v33 = vmul.f32 %v10895_v40, %v10879_v4  ;;  %v4242_v34 = vsel %vm852_vm1, %v4239_v37, %v13877_v9 }
 0x29c   : > { %v5717_v46 = vsel %vm5710_vm3, %v5714_v22, %v5716_v0  ;;  %v4557_v21 = vrot.slane %v4474_v17, 1  ;;  %v4708_v27 = vmul.f32 %v10895_v40, %v10798_v26  ;;  %v4346_v45 = vadd.f32 %v4242_v34, %v4112_v49 }
 0x29d   : > { %8156 = vmatprep.mubr.f32.mxu1 %v5717_v46  ;;  %v4429_v19 = vadd.f32 %v4389_v42, %v4345_v54  ;;  %v13876_v41 = vrot.slane %v11076_v62, 1  ;;  %v11089_v25 = vmul.f32 %v10895_v40, %v10800_v3  ;;  %v4790_v22 = vrot.slane %v4707_v33, 2 }
 0x29e   : > { %v4558_v10 = vsel %vm523_vm0, %v4556_v11, %v4557_v21  ;;  %v4791_v28 = vrot.slane %v4708_v27, 2  ;;  %v4941_v37 = vmul.f32 %v10901_v32, %v11013_v47  ;;  %v4430_v35 = vadd.f32 %v4390_v63, %v4346_v45 }
 0x29f   : > { %v4560_v0 = vsel %vm523_vm0, %v4557_v21, %v13876_v41  ;;  %v4663_v49 = vadd.f32 %v4558_v10, %v4429_v19  ;;  %v4793_v42 = vrot.slane %v11089_v25, 2  ;;  %v4942_v17 = vmul.f32 %v10901_v32, %v10808_v6 }
 0x2a0   : > { %v4792_v50 = vsel %vm852_vm1, %v4790_v22, %v4791_v28  ;;  %v5025_v54 = vmul.f32 %v10904_v59, %v11013_v47  ;;  %v5026_v11 = vmul.f32 %v10904_v59, %v10808_v6  ;;  %v4664_v33 = vadd.f32 %v4560_v0, %v4430_v35  ;;  %v8488_v0 = vld [vmem:[#allocation2 + $0x148] sm:$0xff] }
 0x2a1   : > { %v4794_v63 = vsel %vm852_vm1, %v4791_v28, %v4793_v42  ;;  %v4897_v46 = vadd.f32 %v4792_v50, %v4663_v49  ;;  %v5027_v34 = vmul.f32 %v10904_v59, %v10819_v29  ;;  %v5259_v45 = vmul.f32 %v10913_v57, %v11013_v47 }
 0x2a2   : > { %v5108_v21 = vrot.slane %v5025_v54, 1  ;;  %v5109_v27 = vrot.slane %v5026_v11, 1  ;;  %v5260_v19 = vmul.f32 %v10913_v57, %v10808_v6  ;;  %v4898_v25 = vadd.f32 %v4794_v63, %v4664_v33 }
 0x2a3   : > { %v4981_v10 = vadd.f32 %v4941_v37, %v4897_v46  ;;  %v5111_v22 = vrot.slane %v5027_v34, 1  ;;  %v5261_v35 = vmul.f32 %v10913_v57, %v10819_v29  ;;  %v11115_v28 = vadd.f32 %v8488_v0, %v11046_v56 }
 0x2a4   : > { %v5110_v49 = vsel %vm523_vm0, %v5108_v21, %v5109_v27  ;;  %v5342_v50 = vrot.slane %v5259_v45, 2  ;;  %v5343_v54 = vrot.slane %v5260_v19, 2  ;;  %v4982_v11 = vadd.f32 %v4942_v17, %v4898_v25 }
 0x2a5   : > { %14002 = vst [vmem:[#allocation43_spill] sm:$0xff] %v11115_v28  ;;  %v5112_v41 = vsel %vm523_vm0, %v5109_v27, %v5111_v22  ;;  %v5215_v9 = vadd.f32 %v5110_v49, %v4981_v10  ;;  %v5345_v58 = vrot.slane %v5261_v35, 2  ;;  %v3839_v37 = vmul.f32 %v10676_v12, %v10756_v51 }
 0x2a6   : > { %v5344_v33 = vsel %vm852_vm1, %v5342_v50, %v5343_v54  ;;  %v3924_v63 = vmul.f32 %v10679_v55, %v10764_v7  ;;  %v4158_v56 = vmul.f32 %v10685_v5, %v10764_v7  ;;  %v5216_v46 = vadd.f32 %v5112_v41, %v4982_v11 }
 0x2a7   : > { %v5449_v34 = vadd.f32 %v5344_v33, %v5215_v9  ;;  %v4391_v17 = vmul.f32 %v10868_v13, %v10800_v3  ;;  %v11130_v21 = vmul.f32 %v10892_v15, %v10806_v39  ;;  %v5346_v27 = vsel %vm852_vm1, %v5343_v54, %v5345_v58 }
 0x2a8   : > { %v4009_v45 = vrot.slane %v3924_v63, 1  ;;  %v4243_v19 = vrot.slane %v4158_v56, 2  ;;  %v11135_v25 = vmul.f32 %v10895_v40, %v10806_v39  ;;  %v5450_v10 = vadd.f32 %v5346_v27, %v5216_v46 }
 0x2a9   : > { %v5493_v35 = vadd.f32 %v10963_v23, %v5449_v34  ;;  %v13882_v9 = vrot.slane %v11130_v21, 1  ;;  %v11141_v41 = vmul.f32 %v10904_v59, %v10830_v44  ;;  %v14003_v0 = vrot.slane %v11032_v43, 1 }
 0x2aa   : > { %v4943_v54 = vmul.f32 %v10901_v32, %v10819_v29  ;;  %v11151_v11 = vmul.f32 %v10913_v57, %v10830_v44  ;;  %v8099_v33 = vpop.f32.mrb[32].mxu0  ;;  %v5494_v63 = vadd.f32 %v10963_v23, %v5450_v10  ;;  %v14004_v43 = vrot.slane %v11062_v30, 2 }
 0x2ab   : > { %v4010_v49 = vsel %vm523_vm0, %v14003_v0, %v4009_v45  ;;  %vm5533_vm14 = vcmp.gt.f32.partialorder %v5493_v35, 0.0  ;;  %v5577_v56 = vmul.f32 %v10972_v16, %v5493_v35  ;;  %v3011_v34 = vpop.f32.mrb[33].mxu0  ;;  %v14005_v0 = vrot.slane %v11076_v62, 1 }
 0x2ac   : > { %v4113_v46 = vadd.f32 %v4010_v49, %v3839_v37  ;;  %v4244_v27 = vsel %vm852_vm1, %v14004_v43, %v4243_v19  ;;  %v5113_v51 = vrot.slane %v11141_v41, 1  ;;  %v13883_v1 = vrot.slane %v11151_v11, 2 }
 0x2ad   : > { %v4562_v50 = vsel %vm523_vm0, %v14005_v0, %v13882_v9  ;;  %vm5534_vm15 = vcmp.gt.f32.partialorder %v5494_v63, 0.0  ;;  %v5578_v10 = vmul.f32 %v10972_v16, %v5494_v63  ;;  %v5617_v28 = vsel %vm5533_vm14, %v5493_v35, %v5577_v56 }
 0x2ae   : > { %v4347_v37 = vadd.f32 %v4244_v27, %v4113_v46  ;;  %v5718_v49 = vrot.slane %v5617_v28, 4  ;;  %v14006_v30 = vrot.slane %v11135_v25, 2  ;;  %v5114_v62 = vsel %vm523_vm0, %v5111_v22, %v5113_v51 }
 0x2af   : > { %v3124_v43 = vadd.f32 %v10658_v48, %v11056_v18  ;;  %v11174_v0 = vsel %vm5534_vm15, %v5494_v63, %v5578_v10  ;;  %v5348_v35 = vsel %vm852_vm1, %v5345_v58, %v13883_v1  ;;  %v3840_v28 = vmul.f32 %v10676_v12, %v10764_v7 }
 0x2b0   : > { %v4796_v34 = vsel %vm852_vm1, %v4793_v42, %v14006_v30  ;;  %v4431_v9 = vadd.f32 %v4391_v17, %v4347_v37  ;;  %v5719_v56 = vrot.slane %v11174_v0, 4  ;;  %v4392_v22 = vmul.f32 %v10868_v13, %v10806_v39  ;;  %v8489_v37 = vld [vmem:[#allocation2 + $0xc8] sm:$0xff] }
 0x2b1   : > { %vm3172_vm2 = vcmp.gt.f32.partialorder %v3124_v43, 0.0  ;;  %v3224_v42 = vmul.f32 %v8999_v38, %v3124_v43  ;;  %v4114_v18 = vadd.f32 %v4009_v45, %v3840_v28  ;;  %v3127_v63 = vadd.f32 %v8099_v33, %v10658_v48 }
 0x2b2   : > { %v4665_v46 = vadd.f32 %v4562_v50, %v4431_v9  ;;  %v3304_v17 = vadd.s32 8, %v10660_v8  ;;  %v5720_v58 = vsel %vm5710_vm3, %v5718_v49, %v5719_v56  ;;  %v4944_v10 = vmul.f32 %v10901_v32, %v10830_v44 }
 0x2b3   : > { %v3272_v27 = vsel %vm3172_vm2, %v3124_v43, %v3224_v42  ;;  %v11193_v30 = vadd.f32 %v8489_v37, %v10682_v24  ;;  %8157 = vmatmul.mubr.f32.gmra.mrb[2].mxu1 %v5720_v58  ;;  %v4348_v9 = vadd.f32 %v4243_v19, %v4114_v18  ;;  %vm3175_vm4 = vcmp.gt.f32.partialorder %v3127_v63, 0.0  ;;  %v8490_v18 = vld [vmem:[#allocation2 + $0x150] sm:$0xff] }
 0x2b4   : > { %v4899_v1 = vadd.f32 %v4796_v34, %v4665_v46  ;;  %v3578_v45 = vsel %vm11008_vm11, %v3272_v27, 0.0  ;;  %v3227_v33 = vmul.f32 %v8999_v38, %v3127_v63  ;;  %vm3320_vm5 = vcmp.ge.s32.totalorder %v3304_v17, 0 }
 0x2b5   : > { %v3697_v50 = vrot.slane %v3578_v45, 7  ;;  %vm3332_vm6 = vcmp.lt.s32.totalorder %v3304_v17, 16  ;;  %v4432_v43 = vadd.f32 %v4392_v22, %v4348_v9  ;;  %v3841_v42 = vmul.f32 %v10676_v12, %v10879_v4 }
 0x2b6   : > { %v4983_v49 = vadd.f32 %v4943_v54, %v4899_v1  ;;  %vm11198_vm7 = vmand %vm3320_vm5, %vm3332_vm6  ;;  %v3925_v14 = vmul.f32 %v10679_v55, %v10879_v4  ;;  %v3275_v34 = vsel %vm3175_vm4, %v3127_v63, %v3227_v33  ;;  %v3842_v46 = vmul.f32 %v10676_v12, %v10798_v26 }
 0x2b7   : > { %v3698_v19 = vsel %vm3644_vm8, %v11022_v60, %v3697_v50  ;;  %v3926_v1 = vmul.f32 %v10679_v55, %v10798_v26  ;;  %v3700_v22 = vsel %vm3644_vm8, %v3697_v50, %v10682_v24  ;;  %v14010_v58 = vrot.slane %v11130_v21, 1 }
 0x2b8   : > { %v5217_v54 = vadd.f32 %v5114_v62, %v4983_v49  ;;  %v11214_v17 = vadd.f32 %v8490_v18, %v3698_v19  ;;  %v3581_v60 = vsel %vm11198_vm7, %v3275_v34, 0.0  ;;  %v11222_v63 = vmul.f32 %v10679_v55, %v10800_v3 }
 0x2b9   : > { %v4666_v27 = vadd.f32 %v14010_v58, %v4432_v43  ;;  %v4011_v37 = vrot.slane %v3925_v14, 1  ;;  %v4012_v45 = vrot.slane %v3926_v1, 1  ;;  %v14011_v62 = vrot.slane %v11135_v25, 2  ;;  %v8102_v21 = vpop.f32.mrb[34].mxu0  ;;  %v8491_v1 = vld [vmem:[#allocation2 + $0x158] sm:$0xff] }
 0x2ba   : > { %14009 = vst [vmem:[#allocation44_spill] sm:$0xff] %v11214_v17  ;;  %v5451_v9 = vadd.f32 %v5348_v35, %v5217_v54  ;;  %v11226_v50 = vrot.slane %v3581_v60, 7  ;;  %v4159_v49 = vmul.f32 %v10685_v5, %v10879_v4  ;;  %v13886_v19 = vrot.slane %v11222_v63, 1  ;;  %v11238_v35 = vpop.f32.mrb[35].mxu0 }
 0x2bb   : > { %v4900_v33 = vadd.f32 %v14011_v62, %v4666_v27  ;;  %v4013_v43 = vsel %vm523_vm0, %v4011_v37, %v4012_v45  ;;  %v4160_v34 = vmul.f32 %v10685_v5, %v10798_v26  ;;  %v11236_v14 = vmul.f32 %v10685_v5, %v10800_v3 }
 0x2bc   : > { %v5495_v25 = vadd.f32 %v10963_v23, %v5451_v9  ;;  %v11241_v54 = vadd.f32 %v8491_v1, %v3700_v22  ;;  %v4115_v18 = vadd.f32 %v4013_v43, %v3841_v42  ;;  %v11246_v58 = vsel %vm3644_vm8, %v10682_v24, %v11226_v50 }
 0x2bd   : > { %v4984_v4 = vadd.f32 %v4944_v10, %v4900_v33  ;;  %v4015_v27 = vsel %vm523_vm0, %v4012_v45, %v13886_v19  ;;  %v4245_v60 = vrot.slane %v4159_v49, 2  ;;  %v4246_v37 = vrot.slane %v4160_v34, 2 }
 0x2be   : > { %14012 = vst [vmem:[#allocation45_spill] sm:$0xff] %v11241_v54  ;;  %vm5535_vm9 = vcmp.gt.f32.partialorder %v5495_v25, 0.0  ;;  %v5579_v62 = vmul.f32 %v10972_v16, %v5495_v25  ;;  %v4116_v9 = vadd.f32 %v4015_v27, %v3842_v46  ;;  %v13885_v42 = vrot.slane %v11236_v14, 2 }
 0x2bf   : > { %v5218_v22 = vadd.f32 %v5113_v51, %v4984_v4  ;;  %v4247_v10 = vsel %vm852_vm1, %v4245_v60, %v4246_v37  ;;  %v4393_v33 = vmul.f32 %v10868_v13, %v11013_v47  ;;  %v4394_v21 = vmul.f32 %v10868_v13, %v10808_v6 }
 0x2c0   : > { %v5619_v45 = vsel %vm5535_vm9, %v5495_v25, %v5579_v62  ;;  %v14013_v49 = vrot.slane %v11151_v11, 2  ;;  %v4349_v34 = vadd.f32 %v4247_v10, %v4115_v18  ;;  %v4477_v41 = vmul.f32 %v10892_v15, %v11013_v47 }
 0x2c1   : > { %v5721_v51 = vrot.slane %v5619_v45, 4  ;;  %v4249_v46 = vsel %vm852_vm1, %v4246_v37, %v13885_v42  ;;  %v4478_v1 = vmul.f32 %v10892_v15, %v10808_v6  ;;  %v11271_v4 = vmul.f32 %v10892_v15, %v10819_v29 }
 0x2c2   : > { %v5452_v43 = vadd.f32 %v14013_v49, %v5218_v22  ;;  %v4350_v11 = vadd.f32 %v4249_v46, %v4116_v9  ;;  %v4433_v27 = vadd.f32 %v4393_v33, %v4349_v34  ;;  %v4563_v18 = vrot.slane %v4477_v41, 1 }
 0x2c3   : > { %v5722_v60 = vsel %vm5710_vm3, %v5719_v56, %v5721_v51  ;;  %v4564_v62 = vrot.slane %v4478_v1, 1  ;;  %v13884_v22 = vrot.slane %v11271_v4, 1  ;;  %v4711_v37 = vmul.f32 %v10895_v40, %v11013_v47 }
 0x2c4   : > { %v5496_v25 = vadd.f32 %v10963_v23, %v5452_v43  ;;  %8159 = vmatprep.mubr.f32.mxu1 %v5722_v60  ;;  %v4434_v45 = vadd.f32 %v4394_v21, %v4350_v11  ;;  %v4712_v9 = vmul.f32 %v10895_v40, %v10808_v6  ;;  %v11289_v56 = vmul.f32 %v10895_v40, %v10819_v29 }
 0x2c5   : > { %v4565_v33 = vsel %vm523_vm0, %v4563_v18, %v4564_v62  ;;  %v4567_v0 = vsel %vm523_vm0, %v4564_v62, %v13884_v22  ;;  %v4797_v49 = vrot.slane %v4711_v37, 2  ;;  %v4945_v11 = vmul.f32 %v10901_v32, %v11193_v30 }
 0x2c6   : > { %vm5536_vm10 = vcmp.gt.f32.partialorder %v5496_v25, 0.0  ;;  %v5580_v10 = vmul.f32 %v10972_v16, %v5496_v25  ;;  %v4667_v34 = vadd.f32 %v4565_v33, %v4433_v27  ;;  %v4668_v41 = vadd.f32 %v4567_v0, %v4434_v45 }
 0x2c7   : > { %v4798_v46 = vrot.slane %v4712_v9, 2  ;;  %v4800_v21 = vrot.slane %v11289_v56, 2  ;;  %v4946_v18 = vmul.f32 %v10901_v32, %v10843_v52  ;;  %v5029_v62 = vmul.f32 %v10904_v59, %v11193_v30 }
 0x2c8   : > { %v5620_v43 = vsel %vm5536_vm10, %v5496_v25, %v5580_v10  ;;  %v5030_v25 = vmul.f32 %v10904_v59, %v10843_v52  ;;  %v5031_v27 = vmul.f32 %v10904_v59, %v10852_v61  ;;  %v5263_v9 = vmul.f32 %v10913_v57, %v11193_v30 }
 0x2c9   : > { %v5723_v1 = vrot.slane %v5620_v43, 4  ;;  %v4799_v60 = vsel %vm852_vm1, %v4797_v49, %v4798_v46  ;;  %v4801_v10 = vsel %vm852_vm1, %v4798_v46, %v4800_v21  ;;  %v5115_v0 = vrot.slane %v5029_v62, 1 }
 0x2ca   : > { %v4901_v45 = vadd.f32 %v4799_v60, %v4667_v34  ;;  %v4902_v33 = vadd.f32 %v4801_v10, %v4668_v41  ;;  %v5116_v56 = vrot.slane %v5030_v25, 1  ;;  %v5118_v49 = vrot.slane %v5031_v27, 1 }
 0x2cb   : > { %v5724_v37 = vsel %vm5710_vm3, %v5721_v51, %v5723_v1  ;;  %v5264_v22 = vmul.f32 %v10913_v57, %v10843_v52  ;;  %v5265_v42 = vmul.f32 %v10913_v57, %v10852_v61  ;;  %v5349_v19 = vrot.slane %v5263_v9, 2  ;;  %v8492_v51 = vld [vmem:[#allocation2 + $0x170] sm:$0xff] }
 0x2cc   : > { %8160 = vmatmul.mubr.f32.gmra.mrb[4].mxu1 %v5724_v37  ;;  %v4985_v43 = vadd.f32 %v4945_v11, %v4901_v45  ;;  %v11312_v46 = vadd.f32 %v8492_v51, %v11246_v58  ;;  %v4986_v34 = vadd.f32 %v4946_v18, %v4902_v33  ;;  %v5117_v1 = vsel %vm523_vm0, %v5115_v0, %v5116_v56 }
 0x2cd   : > { %v5119_v41 = vsel %vm523_vm0, %v5116_v56, %v5118_v49  ;;  %v5350_v62 = vrot.slane %v5264_v22, 2  ;;  %v5352_v25 = vrot.slane %v5265_v42, 2  ;;  %v3928_v11 = vmul.f32 %v10679_v55, %v10806_v39  ;;  %v8105_v9 = vpop.f32.mrb[36].mxu0 }
 0x2ce   : > { %14014 = vst [vmem:[#allocation46_spill] sm:$0xff] %v11312_v46  ;;  %v5219_v60 = vadd.f32 %v5117_v1, %v4985_v43  ;;  %v5220_v27 = vadd.f32 %v5119_v41, %v4986_v34  ;;  %v3843_v37 = vmul.f32 %v10676_v12, %v10800_v3  ;;  %v4162_v10 = vmul.f32 %v10685_v5, %v10806_v39  ;;  %v3031_v51 = vpop.f32.mrb[37].mxu0 }
 0x2cf   : > { %v11324_v58 = vmul.f32 %v10892_v15, %v10830_v44  ;;  %v5351_v18 = vsel %vm852_vm1, %v5349_v19, %v5350_v62  ;;  %v5353_v45 = vsel %vm852_vm1, %v5350_v62, %v5352_v25  ;;  %v4016_v22 = vrot.slane %v3928_v11, 1 }
 0x2d0   : > { %v11330_v42 = vmul.f32 %v10895_v40, %v10830_v44  ;;  %v5453_v33 = vadd.f32 %v5351_v18, %v5219_v60  ;;  %v5454_v0 = vadd.f32 %v5353_v45, %v5220_v27  ;;  %v4250_v56 = vrot.slane %v4162_v10, 2 }
 0x2d1   : > { %v4568_v43 = vrot.slane %v11324_v58, 1  ;;  %v14015_v34 = vrot.slane %v11222_v63, 1  ;;  %v4395_v19 = vmul.f32 %v10868_v13, %v10819_v29  ;;  %v11341_v62 = vmul.f32 %v10904_v59, %v10860_v20 }
 0x2d2   : > { %v13890_v41 = vrot.slane %v11330_v42, 2  ;;  %v5497_v60 = vadd.f32 %v10963_v23, %v5453_v33  ;;  %v5498_v11 = vadd.f32 %v10963_v23, %v5454_v0  ;;  %v4947_v10 = vmul.f32 %v10901_v32, %v10852_v61 }
 0x2d3   : > { %v4017_v1 = vsel %vm523_vm0, %v14015_v34, %v4016_v22  ;;  %v14016_v63 = vrot.slane %v11236_v14, 2  ;;  %v14017_v18 = vrot.slane %v11271_v4, 1  ;;  %v5120_v51 = vrot.slane %v11341_v62, 1 }
 0x2d4   : > { %v4117_v27 = vadd.f32 %v4017_v1, %v3843_v37  ;;  %v11356_v34 = vmul.f32 %v10913_v57, %v10860_v20  ;;  %vm5537_vm11 = vcmp.gt.f32.partialorder %v5497_v60, 0.0  ;;  %vm5538_vm12 = vcmp.gt.f32.partialorder %v5498_v11, 0.0 }
 0x2d5   : > { %v4251_v58 = vsel %vm852_vm1, %v14016_v63, %v4250_v56  ;;  %v4569_v45 = vsel %vm523_vm0, %v14017_v18, %v4568_v43  ;;  %v5581_v37 = vmul.f32 %v10972_v16, %v5497_v60  ;;  %v5582_v33 = vmul.f32 %v10972_v16, %v5498_v11 }
 0x2d6   : > { %v4351_v0 = vadd.f32 %v4251_v58, %v4117_v27  ;;  %v4803_v14 = vsel %vm852_vm1, %v4800_v21, %v13890_v41  ;;  %v5121_v4 = vsel %vm523_vm0, %v5118_v49, %v5120_v51  ;;  %v5354_v1 = vrot.slane %v11356_v34, 2 }
 0x2d7   : > { %v5621_v63 = vsel %vm5537_vm11, %v5497_v60, %v5581_v37  ;;  %v11367_v18 = vsel %vm5538_vm12, %v5498_v11, %v5582_v33  ;;  %v3844_v3 = vmul.f32 %v10676_v12, %v10806_v39  ;;  %v4396_v26 = vmul.f32 %v10868_v13, %v10830_v44 }
 0x2d8   : > { %v5725_v27 = vrot.slane %v5621_v63, 4  ;;  %v13891_v58 = vrot.slane %v11367_v18, 4  ;;  %v4435_v7 = vadd.f32 %v4395_v19, %v4351_v0  ;;  %v4948_v21 = vmul.f32 %v10901_v32, %v10860_v20  ;;  %v8493_v0 = vld [vmem:[#allocation2 + $0xf0] sm:$0xff] }
 0x2d9   : > { %v4118_v41 = vadd.f32 %v4016_v22, %v3844_v3  ;;  %v3128_v49 = vadd.f32 %v10658_v48, %v11238_v35  ;;  %v3131_v60 = vadd.f32 %v8105_v9, %v10658_v48  ;;  %v3305_v11 = vadd.s32 9, %v10660_v8 }
 0x2da   : > { %v5727_v37 = vsel %vm5710_vm3, %v5725_v27, %v13891_v58  ;;  %v4669_v33 = vadd.f32 %v4569_v45, %v4435_v7  ;;  %v5355_v19 = vsel %vm852_vm1, %v5352_v25, %v5354_v1  ;;  %v11387_v63 = vadd.f32 %v8493_v0, %v10682_v24 }
 0x2db   : > { %8162 = vmatprep.mubr.f32.mxu1 %v5727_v37  ;;  %v4352_v3 = vadd.f32 %v4250_v56, %v4118_v41  ;;  %vm3176_vm13 = vcmp.gt.f32.partialorder %v3128_v49, 0.0  ;;  %v3228_v35 = vmul.f32 %v8999_v38, %v3128_v49  ;;  %vm3179_vm14 = vcmp.gt.f32.partialorder %v3131_v60, 0.0 }
 0x2dc   : > { %v4903_v22 = vadd.f32 %v4803_v14, %v4669_v33  ;;  %v3231_v9 = vmul.f32 %v8999_v38, %v3131_v60  ;;  %vm3321_vm15 = vcmp.ge.s32.totalorder %v3305_v11, 0  ;;  %vm3333_vm2 = vcmp.lt.s32.totalorder %v3305_v11, 16 }
 0x2dd   : > { %v4436_v7 = vadd.f32 %v4396_v26, %v4352_v3  ;;  %v3276_v45 = vsel %vm3176_vm13, %v3128_v49, %v3228_v35  ;;  %vm11391_vm4 = vmand %vm3321_vm15, %vm3333_vm2  ;;  %v3845_v25 = vmul.f32 %v10676_v12, %v11013_v47  ;;  %v3929_v56 = vmul.f32 %v10679_v55, %v11013_v47  ;;  %v8108_v3 = vpop.f32.mrb[38].mxu0 }
 0x2de   : > { %v4987_v41 = vadd.f32 %v4947_v10, %v4903_v22  ;;  %v3582_v14 = vsel %vm11198_vm7, %v3276_v45, 0.0  ;;  %v3279_v37 = vsel %vm3179_vm14, %v3131_v60, %v3231_v9  ;;  %v3930_v11 = vmul.f32 %v10679_v55, %v10808_v6  ;;  %v11411_v22 = vpop.f32.mrb[39].mxu0 }
 0x2df   : > { %v4670_v26 = vadd.f32 %v4568_v43, %v4436_v7  ;;  %v3704_v49 = vrot.slane %v3582_v14, 7  ;;  %v3585_v33 = vsel %vm11391_vm4, %v3279_v37, 0.0  ;;  %v11407_v0 = vmul.f32 %v10679_v55, %v10819_v29  ;;  %v8494_v37 = vld [vmem:[#allocation2 + $0x178] sm:$0xff] }
 0x2e0   : > { %v5221_v35 = vadd.f32 %v5121_v4, %v4987_v41  ;;  %v11409_v58 = vrot.slane %v3585_v33, 7  ;;  %v4018_v10 = vrot.slane %v3929_v56, 1  ;;  %v4019_v28 = vrot.slane %v3930_v11, 1  ;;  %v8495_v41 = vld [vmem:[#allocation2 + $0x180] sm:$0xff] }
 0x2e1   : > { %v14020_v60 = vrot.slane %v11330_v42, 2  ;;  %v3705_v43 = vsel %vm3644_vm8, %v11226_v50, %v3704_v49  ;;  %v3707_v7 = vsel %vm3644_vm8, %v3704_v49, %v10682_v24  ;;  %v13892_v45 = vrot.slane %v11407_v0, 1 }
 0x2e2   : > { %v5455_v14 = vadd.f32 %v5355_v19, %v5221_v35  ;;  %v11420_v4 = vadd.f32 %v8494_v37, %v3705_v43  ;;  %v11422_v56 = vadd.f32 %v8495_v41, %v3707_v7  ;;  %v3846_v11 = vmul.f32 %v10676_v12, %v10808_v6 }
 0x2e3   : > { %v4904_v9 = vadd.f32 %v14020_v60, %v4670_v26  ;;  %v11429_v50 = vsel %vm3644_vm8, %v10682_v24, %v11409_v58  ;;  %v4020_v26 = vsel %vm523_vm0, %v4018_v10, %v4019_v28  ;;  %v4022_v19 = vsel %vm523_vm0, %v4019_v28, %v13892_v45 }
 0x2e4   : > { %v5499_v49 = vadd.f32 %v10963_v23, %v5455_v14  ;;  %v4119_v33 = vadd.f32 %v4020_v26, %v3845_v25  ;;  %v4120_v3 = vadd.f32 %v4022_v19, %v3846_v11  ;;  %v4163_v35 = vmul.f32 %v10685_v5, %v11013_v47 }
 0x2e5   : > { %v4988_v42 = vadd.f32 %v4948_v21, %v4904_v9  ;;  %v4164_v60 = vmul.f32 %v10685_v5, %v10808_v6  ;;  %v11444_v10 = vmul.f32 %v10685_v5, %v10819_v29  ;;  %v4397_v28 = vmul.f32 %v10868_v13, %v11193_v30 }
 0x2e6   : > { %vm5539_vm5 = vcmp.gt.f32.partialorder %v5499_v49, 0.0  ;;  %v5583_v25 = vmul.f32 %v10972_v16, %v5499_v49  ;;  %v4252_v9 = vrot.slane %v4163_v35, 2  ;;  %v4398_v47 = vmul.f32 %v10868_v13, %v10843_v52 }
 0x2e7   : > { %v5222_v21 = vadd.f32 %v5120_v51, %v4988_v42  ;;  %v4253_v51 = vrot.slane %v4164_v60, 2  ;;  %v4255_v43 = vrot.slane %v11444_v10, 2  ;;  %v4481_v7 = vmul.f32 %v10892_v15, %v11193_v30 }
 0x2e8   : > { %v5623_v14 = vsel %vm5539_vm5, %v5499_v49, %v5583_v25  ;;  %v4482_v37 = vmul.f32 %v10892_v15, %v10843_v52  ;;  %v11460_v41 = vmul.f32 %v10892_v15, %v10852_v61  ;;  %v4715_v11 = vmul.f32 %v10895_v40, %v11193_v30 }
 0x2e9   : > { %v5456_v62 = vadd.f32 %v5354_v1, %v5222_v21  ;;  %v5728_v42 = vrot.slane %v5623_v14, 4  ;;  %v4254_v1 = vsel %vm852_vm1, %v4252_v9, %v4253_v51  ;;  %v4256_v26 = vsel %vm852_vm1, %v4253_v51, %v4255_v43 }
 0x2ea   : > { %v4353_v19 = vadd.f32 %v4254_v1, %v4119_v33  ;;  %v4354_v49 = vadd.f32 %v4256_v26, %v4120_v3  ;;  %v4570_v35 = vrot.slane %v4481_v7, 1  ;;  %v4571_v21 = vrot.slane %v4482_v37, 1 }
 0x2eb   : > { %v5500_v34 = vadd.f32 %v10963_v23, %v5456_v62  ;;  %v14021_v60 = vrot.slane %v11367_v18, 4  ;;  %v4573_v14 = vrot.slane %v11460_v41, 1  ;;  %v4716_v33 = vmul.f32 %v10895_v40, %v10843_v52 }
 0x2ec   : > { %v4437_v62 = vadd.f32 %v4397_v28, %v4353_v19  ;;  %v4438_v9 = vadd.f32 %v4398_v47, %v4354_v49  ;;  %v4572_v6 = vsel %vm523_vm0, %v4570_v35, %v4571_v21  ;;  %v11482_v51 = vmul.f32 %v10895_v40, %v10852_v61 }
 0x2ed   : > { %v5729_v25 = vsel %vm5710_vm3, %v14021_v60, %v5728_v42  ;;  %vm5540_vm6 = vcmp.gt.f32.partialorder %v5500_v34, 0.0  ;;  %v5584_v45 = vmul.f32 %v10972_v16, %v5500_v34  ;;  %v4574_v18 = vsel %vm523_vm0, %v4571_v21, %v4573_v14 }
 0x2ee   : > { %8163 = vmatmul.mubr.f32.gmra.mrb[6].mxu1 %v5729_v25  ;;  %v4804_v7 = vrot.slane %v4715_v11, 2  ;;  %v4671_v1 = vadd.f32 %v4572_v6, %v4437_v62  ;;  %v4672_v26 = vadd.f32 %v4574_v18, %v4438_v9  ;;  %v4805_v28 = vrot.slane %v4716_v33, 2  ;;  %v8496_v18 = vld [vmem:[#allocation2 + $0x198] sm:$0xff] }
 0x2ef   : > { %v5624_v3 = vsel %vm5540_vm6, %v5500_v34, %v5584_v45  ;;  %v4807_v47 = vrot.slane %v11482_v51, 2  ;;  %v4949_v19 = vmul.f32 %v10901_v32, %v11387_v63  ;;  %v4950_v45 = vmul.f32 %v10901_v32, %v10862_v31 }
 0x2f0   : > { %v5730_v37 = vrot.slane %v5624_v3, 4  ;;  %v5033_v34 = vmul.f32 %v10904_v59, %v11387_v63  ;;  %v4806_v35 = vsel %vm852_vm1, %v4804_v7, %v4805_v28  ;;  %v5034_v6 = vmul.f32 %v10904_v59, %v10862_v31 }
 0x2f1   : > { %v5035_v11 = vmul.f32 %v10904_v59, %v10876_v2  ;;  %v4808_v21 = vsel %vm852_vm1, %v4805_v28, %v4807_v47  ;;  %v4905_v60 = vadd.f32 %v4806_v35, %v4671_v1  ;;  %v5267_v62 = vmul.f32 %v10913_v57, %v11387_v63  ;;  %v8111_v35 = vpop.f32.mrb[40].mxu0 }
 0x2f2   : > { %v5731_v49 = vsel %vm5710_vm3, %v5728_v42, %v5730_v37  ;;  %v5122_v25 = vrot.slane %v5033_v34, 1  ;;  %v4906_v9 = vadd.f32 %v4808_v21, %v4672_v26  ;;  %v5123_v33 = vrot.slane %v5034_v6, 1 }
 0x2f3   : > { %8165 = vmatprep.mubr.f32.mxu1 %v5731_v49  ;;  %v5125_v3 = vrot.slane %v5035_v11, 1  ;;  %v5268_v42 = vmul.f32 %v10913_v57, %v10862_v31  ;;  %v11503_v51 = vadd.f32 %v8496_v18, %v11429_v50  ;;  %v4989_v7 = vadd.f32 %v4949_v19, %v4905_v60  ;;  %v3051_v19 = vpop.f32.mrb[41].mxu0 }
 0x2f4   : > { %v5269_v37 = vmul.f32 %v10913_v57, %v10876_v2  ;;  %v5356_v28 = vrot.slane %v5267_v62, 2  ;;  %v4990_v1 = vadd.f32 %v4950_v45, %v4906_v9  ;;  %v5124_v34 = vsel %vm523_vm0, %v5122_v25, %v5123_v33 }
 0x2f5   : > { %14022 = vst [vmem:[#allocation47_spill] sm:$0xff] %v11503_v51  ;;  %v5126_v49 = vsel %vm523_vm0, %v5123_v33, %v5125_v3  ;;  %v5357_v26 = vrot.slane %v5268_v42, 2  ;;  %v5223_v6 = vadd.f32 %v5124_v34, %v4989_v7  ;;  %v3932_v21 = vmul.f32 %v10679_v55, %v10830_v44 }
 0x2f6   : > { %v5359_v11 = vrot.slane %v5269_v37, 2  ;;  %v4166_v50 = vmul.f32 %v10685_v5, %v10830_v44  ;;  %v5224_v60 = vadd.f32 %v5126_v49, %v4990_v1  ;;  %v3847_v45 = vmul.f32 %v10676_v12, %v10819_v29 }
 0x2f7   : > { %v5358_v18 = vsel %vm852_vm1, %v5356_v28, %v5357_v26  ;;  %v11518_v25 = vmul.f32 %v10892_v15, %v10860_v20  ;;  %v4023_v33 = vrot.slane %v3932_v21, 1  ;;  %v4399_v37 = vmul.f32 %v10868_v13, %v10852_v61 }
 0x2f8   : > { %v5360_v62 = vsel %vm852_vm1, %v5357_v26, %v5359_v11  ;;  %v5457_v9 = vadd.f32 %v5358_v18, %v5223_v6  ;;  %v4257_v42 = vrot.slane %v4166_v50, 2  ;;  %v11526_v28 = vmul.f32 %v10895_v40, %v10860_v20  ;;  %v14024_v6 = vld [vmem:[#allocation39_spill] sm:$0xff] }
 0x2f9   : > { %v5458_v7 = vadd.f32 %v5360_v62, %v5224_v60  ;;  %v4575_v1 = vrot.slane %v11518_v25, 1  ;;  %v14023_v49 = vrot.slane %v11407_v0, 1  ;;  %v4951_v26 = vmul.f32 %v10901_v32, %v10876_v2 }
 0x2fa   : > { %v5501_v34 = vadd.f32 %v10963_v23, %v5457_v9  ;;  %v11536_v21 = vmul.f32 %v10904_v59, %v14024_v6  ;;  %v4258_v18 = vsel %vm852_vm1, %v4255_v43, %v4257_v42  ;;  %v4809_v25 = vrot.slane %v11526_v28, 2 }
 0x2fb   : > { %v4024_v19 = vsel %vm523_vm0, %v14023_v49, %v4023_v33  ;;  %v5502_v50 = vadd.f32 %v10963_v23, %v5458_v7  ;;  %v11547_v9 = vmul.f32 %v10913_v57, %v14024_v6  ;;  %v4576_v10 = vsel %vm523_vm0, %v4573_v14, %v4575_v1 }
 0x2fc   : > { %v4121_v60 = vadd.f32 %v4024_v19, %v3847_v45  ;;  %vm5541_vm7 = vcmp.gt.f32.partialorder %v5501_v34, 0.0  ;;  %v5585_v0 = vmul.f32 %v10972_v16, %v5501_v34  ;;  %v4810_v45 = vsel %vm852_vm1, %v4807_v47, %v4809_v25 }
 0x2fd   : > { %vm5542_vm9 = vcmp.gt.f32.partialorder %v5502_v50, 0.0  ;;  %v5586_v49 = vmul.f32 %v10972_v16, %v5502_v50  ;;  %v5361_v28 = vrot.slane %v11547_v9, 2  ;;  %v3132_v19 = vadd.f32 %v10658_v48, %v11411_v22 }
 0x2fe   : > { %v4355_v7 = vadd.f32 %v4258_v18, %v4121_v60  ;;  %v5625_v43 = vsel %vm5541_vm7, %v5501_v34, %v5585_v0  ;;  %v14025_v39 = vrot.slane %v11536_v21, 1  ;;  %v3848_v41 = vmul.f32 %v10676_v12, %v10830_v44 }
 0x2ff   : > { %v11557_v62 = vsel %vm5542_vm9, %v5502_v50, %v5586_v49  ;;  %v5732_v60 = vrot.slane %v5625_v43, 4  ;;  %vm3180_vm10 = vcmp.gt.f32.partialorder %v3132_v19, 0.0  ;;  %v3232_v47 = vmul.f32 %v8999_v38, %v3132_v19 }
 0x300   : > { %v4439_v29 = vadd.f32 %v4399_v37, %v4355_v7  ;;  %v5128_v51 = vsel %vm523_vm0, %v5125_v3, %v14025_v39  ;;  %v13897_v14 = vrot.slane %v11557_v62, 4  ;;  %v5362_v22 = vsel %vm852_vm1, %v5359_v11, %v5361_v28  ;;  %v8114_v43 = vpop.f32.mrb[42].mxu0 }
 0x301   : > { %v4122_v50 = vadd.f32 %v4023_v33, %v3848_v41  ;;  %v4400_v37 = vmul.f32 %v10868_v13, %v10860_v20  ;;  %v3280_v3 = vsel %vm3180_vm10, %v3132_v19, %v3232_v47  ;;  %v3135_v18 = vadd.f32 %v8111_v35, %v10658_v48  ;;  %v8497_v35 = vld [vmem:[#allocation2 + $0x118] sm:$0xff] }
 0x302   : > { %v4673_v34 = vadd.f32 %v4576_v10, %v4439_v29  ;;  %v5734_v39 = vsel %vm5710_vm3, %v5732_v60, %v13897_v14  ;;  %v3306_v0 = vadd.s32 10, %v10660_v8  ;;  %v3586_v29 = vsel %vm11391_vm4, %v3280_v3, 0.0 }
 0x303   : > { %8166 = vmatmul.mubr.f32.gmra.mrb[8].mxu1 %v5734_v39  ;;  %v4356_v7 = vadd.f32 %v4257_v42, %v4122_v50  ;;  %v4952_v11 = vmul.f32 %v10901_v32, %v14024_v6  ;;  %v3711_v33 = vrot.slane %v3586_v29, 7  ;;  %vm3183_vm11 = vcmp.gt.f32.partialorder %v3135_v18, 0.0 }
 0x304   : > { %v4907_v49 = vadd.f32 %v4810_v45, %v4673_v34  ;;  %v3235_v10 = vmul.f32 %v8999_v38, %v3135_v18  ;;  %vm3322_vm12 = vcmp.ge.s32.totalorder %v3306_v0, 0  ;;  %vm3334_vm13 = vcmp.lt.s32.totalorder %v3306_v0, 16  ;;  %v11584_v45 = vpop.f32.mrb[43].mxu0 }
 0x305   : > { %v4440_v41 = vadd.f32 %v4400_v37, %v4356_v7  ;;  %v11582_v60 = vadd.f32 %v8497_v35, %v10682_v24  ;;  %v3712_v27 = vsel %vm3644_vm8, %v11409_v58, %v3711_v33  ;;  %v3714_v42 = vsel %vm3644_vm8, %v3711_v33, %v10682_v24  ;;  %vm11590_vm14 = vmand %vm3322_vm12, %vm3334_vm13  ;;  %v8498_v37 = vld [vmem:[#allocation2 + $0x1a0] sm:$0xff] }
 0x306   : > { %v4991_v19 = vadd.f32 %v4951_v26, %v4907_v49  ;;  %v3283_v47 = vsel %vm3183_vm11, %v3135_v18, %v3235_v10  ;;  %v3849_v26 = vmul.f32 %v10676_v12, %v11193_v30  ;;  %v11596_v39 = vadd.f32 %v8498_v37, %v3712_v27  ;;  %v8499_v27 = vld [vmem:[#allocation2 + $0x1a8] sm:$0xff] }
 0x307   : > { %v4674_v3 = vadd.f32 %v4575_v1, %v4440_v41  ;;  %v3850_v0 = vmul.f32 %v10676_v12, %v10843_v52  ;;  %v3589_v58 = vsel %vm11590_vm14, %v3283_v47, 0.0  ;;  %v3933_v18 = vmul.f32 %v10679_v55, %v11193_v30 }
 0x308   : > { %v5225_v50 = vadd.f32 %v5128_v51, %v4991_v19  ;;  %v3934_v49 = vmul.f32 %v10679_v55, %v10843_v52  ;;  %v11608_v29 = vmul.f32 %v10679_v55, %v10852_v61  ;;  %v11610_v33 = vrot.slane %v3589_v58, 7 }
 0x309   : > { %v4908_v7 = vadd.f32 %v4809_v25, %v4674_v3  ;;  %v4167_v1 = vmul.f32 %v10685_v5, %v11193_v30  ;;  %v4025_v10 = vrot.slane %v3933_v18, 1  ;;  %v4168_v41 = vmul.f32 %v10685_v5, %v10843_v52 }
 0x30a   : > { %v5459_v51 = vadd.f32 %v5362_v22, %v5225_v50  ;;  %v4026_v43 = vrot.slane %v3934_v49, 1  ;;  %v13900_v19 = vrot.slane %v11608_v29, 1  ;;  %v11618_v47 = vadd.f32 %v8499_v27, %v3714_v42 }
 0x30b   : > { %v4992_v37 = vadd.f32 %v4952_v11, %v4908_v7  ;;  %v11622_v25 = vmul.f32 %v10685_v5, %v10852_v61  ;;  %v11627_v30 = vsel %vm3644_vm8, %v10682_v24, %v11610_v33  ;;  %v4259_v3 = vrot.slane %v4167_v1, 2 }
 0x30c   : > { %v5503_v35 = vadd.f32 %v10963_v23, %v5459_v51  ;;  %v4027_v22 = vsel %vm523_vm0, %v4025_v10, %v4026_v43  ;;  %v4029_v50 = vsel %vm523_vm0, %v4026_v43, %v13900_v19  ;;  %v14028_v11 = vrot.slane %v11536_v21, 1 }
 0x30d   : > { %v4123_v18 = vadd.f32 %v4027_v22, %v3849_v26  ;;  %v4124_v49 = vadd.f32 %v4029_v50, %v3850_v0  ;;  %v4260_v51 = vrot.slane %v4168_v41, 2  ;;  %v13899_v7 = vrot.slane %v11622_v25, 2 }
 0x30e   : > { %vm5543_vm15 = vcmp.gt.f32.partialorder %v5503_v35, 0.0  ;;  %v5587_v42 = vmul.f32 %v10972_v16, %v5503_v35  ;;  %v5226_v58 = vadd.f32 %v14028_v11, %v4992_v37  ;;  %v4401_v27 = vmul.f32 %v10868_v13, %v11387_v63 }
 0x30f   : > { %v4402_v1 = vmul.f32 %v10868_v13, %v10862_v31  ;;  %v4485_v43 = vmul.f32 %v10892_v15, %v11387_v63  ;;  %v4261_v26 = vsel %vm852_vm1, %v4259_v3, %v4260_v51  ;;  %v4263_v0 = vsel %vm852_vm1, %v4260_v51, %v13899_v7 }
 0x310   : > { %v5627_v10 = vsel %vm5543_vm15, %v5503_v35, %v5587_v42  ;;  %v5460_v14 = vadd.f32 %v5361_v28, %v5226_v58  ;;  %v4486_v41 = vmul.f32 %v10892_v15, %v10862_v31  ;;  %v4357_v9 = vadd.f32 %v4261_v26, %v4123_v18 }
 0x311   : > { %v5735_v21 = vrot.slane %v5627_v10, 4  ;;  %v4358_v28 = vadd.f32 %v4263_v0, %v4124_v49  ;;  %v11654_v37 = vmul.f32 %v10892_v15, %v10876_v2  ;;  %v14029_v22 = vrot.slane %v11557_v62, 4 }
 0x312   : > { %v5504_v35 = vadd.f32 %v10963_v23, %v5460_v14  ;;  %v4577_v3 = vrot.slane %v4485_v43, 1  ;;  %v4578_v42 = vrot.slane %v4486_v41, 1  ;;  %v4719_v11 = vmul.f32 %v10895_v40, %v11387_v63 }
 0x313   : > { %v5736_v50 = vsel %vm5710_vm3, %v14029_v22, %v5735_v21  ;;  %v4441_v14 = vadd.f32 %v4401_v27, %v4357_v9  ;;  %v4442_v18 = vadd.f32 %v4402_v1, %v4358_v28  ;;  %v13898_v51 = vrot.slane %v11654_v37, 1 }
 0x314   : > { %8168 = vmatprep.mubr.f32.mxu1 %v5736_v50  ;;  %vm5544_vm2 = vcmp.gt.f32.partialorder %v5504_v35, 0.0  ;;  %v5588_v58 = vmul.f32 %v10972_v16, %v5504_v35  ;;  %v4579_v49 = vsel %vm523_vm0, %v4577_v3, %v4578_v42  ;;  %v4720_v62 = vmul.f32 %v10895_v40, %v10862_v31  ;;  %v14030_v50 = vld [vmem:[#allocation40_spill] sm:$0xff] }
 0x315   : > { %v11668_v10 = vmul.f32 %v10895_v40, %v10876_v2  ;;  %v4675_v26 = vadd.f32 %v4579_v49, %v4441_v14  ;;  %v4811_v0 = vrot.slane %v4719_v11, 2  ;;  %v4953_v41 = vmul.f32 %v10901_v32, %v11582_v60 }
 0x316   : > { %v5628_v43 = vsel %vm5544_vm2, %v5504_v35, %v5588_v58  ;;  %v4581_v27 = vsel %vm523_vm0, %v4578_v42, %v13898_v51  ;;  %v4812_v1 = vrot.slane %v4720_v62, 2  ;;  %v4954_v3 = vmul.f32 %v10901_v32, %v14030_v50 }
 0x317   : > { %v5737_v22 = vrot.slane %v5628_v43, 4  ;;  %v4814_v9 = vrot.slane %v11668_v10, 2  ;;  %v4676_v28 = vadd.f32 %v4581_v27, %v4442_v18  ;;  %v5037_v35 = vmul.f32 %v10904_v59, %v11582_v60  ;;  %v8117_v27 = vpop.f32.mrb[44].mxu0 }
 0x318   : > { %v5038_v11 = vmul.f32 %v10904_v59, %v14030_v50  ;;  %v4813_v14 = vsel %vm852_vm1, %v4811_v0, %v4812_v1  ;;  %v5039_v42 = vmul.f32 %v10904_v59, %v11037_v36  ;;  %v5271_v7 = vmul.f32 %v10913_v57, %v11582_v60 }
 0x319   : > { %v5738_v58 = vsel %vm5710_vm3, %v5735_v21, %v5737_v22  ;;  %v4815_v49 = vsel %vm852_vm1, %v4812_v1, %v4814_v9  ;;  %v4909_v18 = vadd.f32 %v4813_v14, %v4675_v26  ;;  %v5129_v10 = vrot.slane %v5037_v35, 1  ;;  %v3071_v22 = vpop.f32.mrb[45].mxu0  ;;  %v8500_v1 = vld [vmem:[#allocation2 + $0x1c0] sm:$0xff] }
 0x31a   : > { %8169 = vmatmul.mubr.f32.gmra.mrb[10].mxu1 %v5738_v58  ;;  %v4910_v62 = vadd.f32 %v4815_v49, %v4676_v28  ;;  %v5130_v43 = vrot.slane %v5038_v11, 1  ;;  %v5132_v51 = vrot.slane %v5039_v42, 1  ;;  %v5272_v21 = vmul.f32 %v10913_v57, %v14030_v50 }
 0x31b   : > { %v11693_v0 = vmul.f32 %v10913_v57, %v11037_v36  ;;  %v11696_v58 = vadd.f32 %v8500_v1, %v11627_v30  ;;  %v4993_v26 = vadd.f32 %v4953_v41, %v4909_v18  ;;  %v5363_v14 = vrot.slane %v5271_v7, 2 }
 0x31c   : > { %v4994_v28 = vadd.f32 %v4954_v3, %v4910_v62  ;;  %v5131_v35 = vsel %vm523_vm0, %v5129_v10, %v5130_v43  ;;  %v5133_v11 = vsel %vm523_vm0, %v5130_v43, %v5132_v51  ;;  %v5364_v49 = vrot.slane %v5272_v21, 2 }
 0x31d   : > { %v5366_v42 = vrot.slane %v11693_v0, 2  ;;  %v5227_v19 = vadd.f32 %v5131_v35, %v4993_v26  ;;  %v3936_v44 = vmul.f32 %v10679_v55, %v10860_v20  ;;  %v4170_v22 = vmul.f32 %v10685_v5, %v10860_v20 }
 0x31e   : > { %v5228_v52 = vadd.f32 %v5133_v11, %v4994_v28  ;;  %v5365_v30 = vsel %vm852_vm1, %v5363_v14, %v5364_v49  ;;  %v3851_v3 = vmul.f32 %v10676_v12, %v10852_v61  ;;  %v11711_v7 = vmul.f32 %v10892_v15, %v14024_v6 }
 0x31f   : > { %v5367_v41 = vsel %vm852_vm1, %v5364_v49, %v5366_v42  ;;  %v5461_v18 = vadd.f32 %v5365_v30, %v5227_v19  ;;  %v4030_v10 = vrot.slane %v3936_v44, 1  ;;  %v4264_v43 = vrot.slane %v4170_v22, 2 }
 0x320   : > { %v5462_v62 = vadd.f32 %v5367_v41, %v5228_v52  ;;  %v4403_v21 = vmul.f32 %v10868_v13, %v10876_v2  ;;  %v4582_v0 = vrot.slane %v11711_v7, 1  ;;  %v11718_v1 = vmul.f32 %v10895_v40, %v14024_v6 }
 0x321   : > { %v11722_v26 = vmul.f32 %v10904_v59, %v11039_v53  ;;  %v5505_v28 = vadd.f32 %v10963_v23, %v5461_v18  ;;  %v14031_v44 = vrot.slane %v11608_v29, 1  ;;  %v4955_v35 = vmul.f32 %v10901_v32, %v11037_v36 }
 0x322   : > { %v5506_v19 = vadd.f32 %v10963_v23, %v5462_v62  ;;  %v14032_v14 = vrot.slane %v11622_v25, 2  ;;  %v4816_v22 = vrot.slane %v11718_v1, 2  ;;  %v14033_v18 = vrot.slane %v11654_v37, 1 }
 0x323   : > { %v4031_v52 = vsel %vm523_vm0, %v14031_v44, %v4030_v10  ;;  %v5134_v30 = vrot.slane %v11722_v26, 1  ;;  %vm5545_vm4 = vcmp.gt.f32.partialorder %v5505_v28, 0.0  ;;  %v5589_v41 = vmul.f32 %v10972_v16, %v5505_v28 }
 0x324   : > { %v4125_v11 = vadd.f32 %v4031_v52, %v3851_v3  ;;  %v4265_v49 = vsel %vm852_vm1, %v14032_v14, %v4264_v43  ;;  %vm5546_vm5 = vcmp.gt.f32.partialorder %v5506_v19, 0.0  ;;  %v5590_v29 = vmul.f32 %v10972_v16, %v5506_v19 }
 0x325   : > { %v4583_v62 = vsel %vm523_vm0, %v14033_v18, %v4582_v0  ;;  %v4817_v3 = vsel %vm852_vm1, %v4814_v9, %v4816_v22  ;;  %v11744_v25 = vmul.f32 %v10913_v57, %v11039_v53  ;;  %v5629_v1 = vsel %vm5545_vm4, %v5505_v28, %v5589_v41 }
 0x326   : > { %v4359_v7 = vadd.f32 %v4265_v49, %v4125_v11  ;;  %v11746_v44 = vsel %vm5546_vm5, %v5506_v19, %v5590_v29  ;;  %v5135_v52 = vsel %vm523_vm0, %v5132_v51, %v5134_v30  ;;  %v3852_v11 = vmul.f32 %v10676_v12, %v10860_v20 }
 0x327   : > { %v5739_v14 = vrot.slane %v5629_v1, 4  ;;  %v13904_v37 = vrot.slane %v11746_v44, 4  ;;  %v4404_v9 = vmul.f32 %v10868_v13, %v14024_v6  ;;  %v5368_v18 = vrot.slane %v11744_v25, 2 }
 0x328   : > { %v4443_v49 = vadd.f32 %v4403_v21, %v4359_v7  ;;  %v4126_v61 = vadd.f32 %v4030_v10, %v3852_v11  ;;  %v3136_v28 = vadd.f32 %v10658_v48, %v11584_v45  ;;  %v3139_v19 = vadd.f32 %v8117_v27, %v10658_v48  ;;  %v8120_v7 = vpop.f32.mrb[46].mxu0 }
 0x329   : > { %v5741_v51 = vsel %vm5710_vm3, %v5739_v14, %v13904_v37  ;;  %v4956_v29 = vmul.f32 %v10901_v32, %v11039_v53  ;;  %v3307_v21 = vadd.s32 11, %v10660_v8  ;;  %v11767_v45 = vpop.f32.mrb[47].mxu0  ;;  %v11794_v34 = vmul.f32 %v10679_v55, %v10876_v2 }
 0x32a   : > { %v4677_v41 = vadd.f32 %v4583_v62, %v4443_v49  ;;  %8171 = vmatprep.mubr.f32.mxu1 %v5741_v51  ;;  %v4360_v1 = vadd.f32 %v4264_v43, %v4126_v61  ;;  %vm3184_vm6 = vcmp.gt.f32.partialorder %v3136_v28, 0.0  ;;  %v3236_v10 = vmul.f32 %v8999_v38, %v3136_v28  ;;  %v8501_v61 = vld [vmem:[#allocation2 + $0x140] sm:$0xff] }
 0x32b   : > { %vm3187_vm7 = vcmp.gt.f32.partialorder %v3139_v19, 0.0  ;;  %v3239_v11 = vmul.f32 %v8999_v38, %v3139_v19  ;;  %vm3323_vm9 = vcmp.ge.s32.totalorder %v3307_v21, 0  ;;  %vm3335_vm10 = vcmp.lt.s32.totalorder %v3307_v21, 16 }
 0x32c   : > { %v4911_v27 = vadd.f32 %v4817_v3, %v4677_v41  ;;  %v5369_v62 = vsel %vm852_vm1, %v5366_v42, %v5368_v18  ;;  %v4444_v14 = vadd.f32 %v4404_v9, %v4360_v1  ;;  %v3284_v8 = vsel %vm3184_vm6, %v3136_v28, %v3236_v10  ;;  %vm11773_vm11 = vmand %vm3323_vm9, %vm3335_vm10 }
 0x32d   : > { %v11778_v43 = vadd.f32 %v8501_v61, %v10682_v24  ;;  %v3590_v3 = vsel %vm11590_vm14, %v3284_v8, 0.0  ;;  %v3287_v41 = vsel %vm3187_vm7, %v3139_v19, %v3239_v11  ;;  %v3853_v21 = vmul.f32 %v10676_v12, %v11387_v63 }
 0x32e   : > { %v4995_v51 = vadd.f32 %v4955_v35, %v4911_v27  ;;  %v4678_v7 = vadd.f32 %v4582_v0, %v4444_v14  ;;  %v3718_v42 = vrot.slane %v3590_v3, 7  ;;  %v3593_v9 = vsel %vm11773_vm11, %v3287_v41, 0.0  ;;  %v8502_v14 = vld [vmem:[#allocation2 + $0x1c8] sm:$0xff] }
 0x32f   : > { %v3937_v28 = vmul.f32 %v10679_v55, %v11387_v63  ;;  %v11788_v10 = vrot.slane %v3593_v9, 7  ;;  %v3938_v35 = vmul.f32 %v10679_v55, %v10862_v31  ;;  %v3854_v11 = vmul.f32 %v10676_v12, %v10862_v31  ;;  %v8504_v9 = vld [vmem:[#allocation2 + $0x1d0] sm:$0xff] }
 0x330   : > { %v5229_v1 = vadd.f32 %v5135_v52, %v4995_v51  ;;  %v4912_v19 = vadd.f32 %v4816_v22, %v4678_v7  ;;  %v3719_v0 = vsel %vm3644_vm8, %v11610_v33, %v3718_v42  ;;  %v3721_v27 = vsel %vm3644_vm8, %v3718_v42, %v10682_v24  ;;  %v8503_v22 = vld [vmem:[#allocation2 + $0x1e8] sm:$0xff] }
 0x331   : > { %v11802_v8 = vadd.f32 %v8502_v14, %v3719_v0  ;;  %v3724_v61 = vsel %vm3644_vm8, %v10682_v24, %v11788_v10  ;;  %v4032_v51 = vrot.slane %v3937_v28, 1  ;;  %v4033_v7 = vrot.slane %v3938_v35, 1 }
 0x332   : > { %v5463_v52 = vadd.f32 %v5369_v62, %v5229_v1  ;;  %v4996_v3 = vadd.f32 %v4956_v29, %v4912_v19  ;;  %v3822_v41 = vadd.f32 %v8503_v22, %v3724_v61  ;;  %v13907_v33 = vrot.slane %v11794_v34, 1 }
 0x333   : > { %14036 = vst [vmem:[#allocation48_spill] sm:$0xff] %v11802_v8  ;;  %v11809_v37 = vadd.f32 %v8504_v9, %v3721_v27  ;;  %v4171_v62 = vmul.f32 %v10685_v5, %v11387_v63  ;;  %v4172_v1 = vmul.f32 %v10685_v5, %v10862_v31  ;;  %v11825_v19 = vmul.f32 %v10685_v5, %v10876_v2 }
 0x334   : > { %v5507_v42 = vadd.f32 %v10963_v23, %v5463_v52  ;;  %v5230_v28 = vadd.f32 %v5134_v30, %v4996_v3  ;;  %v11818_v29 = vmul.f32 %v10901_v32, %v3822_v41  ;;  %v11821_v35 = vmul.f32 %v10904_v59, %v3822_v41 }
 0x335   : > { %14037 = vst [vmem:[#allocation49_spill] sm:$0xff] %v11809_v37  ;;  %v4034_v63 = vsel %vm523_vm0, %v4032_v51, %v4033_v7  ;;  %v4036_v26 = vsel %vm523_vm0, %v4033_v7, %v13907_v33  ;;  %v11836_v52 = vmul.f32 %v10913_v57, %v3822_v41  ;;  %v4266_v22 = vrot.slane %v4171_v62, 2 }
 0x336   : > { %14038 = vst [vmem:[#allocation50_spill] sm:$0xff] %v11818_v29  ;;  %14039 = vst [vmem:[#allocation51_spill] sm:$0xff] %v11821_v35  ;;  %vm5547_vm12 = vcmp.gt.f32.partialorder %v5507_v42, 0.0  ;;  %v5591_v0 = vmul.f32 %v10972_v16, %v5507_v42  ;;  %v5464_v30 = vadd.f32 %v5368_v18, %v5230_v28  ;;  %v4127_v14 = vadd.f32 %v4034_v63, %v3853_v21 }
 0x337   : > { %v4128_v3 = vadd.f32 %v4036_v26, %v3854_v11  ;;  %v4267_v9 = vrot.slane %v4172_v1, 2  ;;  %v13909_v20 = vrot.slane %v11825_v19, 2  ;;  %v4405_v7 = vmul.f32 %v10868_v13, %v11582_v60 }
 0x338   : > { %v5631_v61 = vsel %vm5547_vm12, %v5507_v42, %v5591_v0  ;;  %v5508_v51 = vadd.f32 %v10963_v23, %v5464_v30  ;;  %v4406_v18 = vmul.f32 %v10868_v13, %v14030_v50  ;;  %v4489_v21 = vmul.f32 %v10892_v15, %v11582_v60 }
 0x339   : > { %v5742_v31 = vrot.slane %v5631_v61, 4  ;;  %v4268_v25 = vsel %vm852_vm1, %v4266_v22, %v4267_v9  ;;  %v4490_v11 = vmul.f32 %v10892_v15, %v14030_v50  ;;  %v14040_v41 = vrot.slane %v11746_v44, 4 }
 0x33a   : > { %vm5548_vm13 = vcmp.gt.f32.partialorder %v5508_v51, 0.0  ;;  %v5592_v62 = vmul.f32 %v10972_v16, %v5508_v51  ;;  %v4270_v1 = vsel %vm852_vm1, %v4267_v9, %v13909_v20  ;;  %v4361_v28 = vadd.f32 %v4268_v25, %v4127_v14 }
 0x33b   : > { %v5743_v42 = vsel %vm5710_vm3, %v14040_v41, %v5742_v31  ;;  %v4362_v0 = vadd.f32 %v4270_v1, %v4128_v3  ;;  %v11858_v63 = vmul.f32 %v10892_v15, %v11037_v36  ;;  %v4584_v26 = vrot.slane %v4489_v21, 1 }
 0x33c   : > { %8172 = vmatmul.mubr.f32.gmra.mrb[12].mxu1 %v5743_v42  ;;  %v5632_v30 = vsel %vm5548_vm13, %v5508_v51, %v5592_v62  ;;  %v4585_v61 = vrot.slane %v4490_v11, 1  ;;  %v4723_v44 = vmul.f32 %v10895_v40, %v11582_v60  ;;  %v4724_v22 = vmul.f32 %v10895_v40, %v14030_v50 }
 0x33d   : > { %v5744_v41 = vrot.slane %v5632_v30, 4  ;;  %v4445_v27 = vadd.f32 %v4405_v7, %v4361_v28  ;;  %v4446_v33 = vadd.f32 %v4406_v18, %v4362_v0  ;;  %v13908_v9 = vrot.slane %v11858_v63, 1  ;;  %v14041_v28 = vld [vmem:[#allocation43_spill] sm:$0xff] }
 0x33e   : > { %v4586_v14 = vsel %vm523_vm0, %v4584_v26, %v4585_v61  ;;  %v11868_v3 = vmul.f32 %v10895_v40, %v11037_v36  ;;  %v4818_v25 = vrot.slane %v4723_v44, 2  ;;  %v4819_v51 = vrot.slane %v4724_v22, 2 }
 0x33f   : > { %v5745_v21 = vsel %vm5710_vm3, %v5742_v31, %v5744_v41  ;;  %v4588_v11 = vsel %vm523_vm0, %v4585_v61, %v13908_v9  ;;  %v4679_v42 = vadd.f32 %v4586_v14, %v4445_v27  ;;  %v4957_v7 = vmul.f32 %v10901_v32, %v11778_v43 }
 0x340   : > { %8174 = vmatprep.mubr.f32.mxu1 %v5745_v21  ;;  %v4680_v18 = vadd.f32 %v4588_v11, %v4446_v33  ;;  %v4820_v62 = vsel %vm852_vm1, %v4818_v25, %v4819_v51  ;;  %v4821_v1 = vrot.slane %v11868_v3, 2  ;;  %v4958_v0 = vmul.f32 %v10901_v32, %v14041_v28 }
 0x341   : > { %v4913_v26 = vadd.f32 %v4820_v62, %v4679_v42  ;;  %v5041_v31 = vmul.f32 %v10904_v59, %v11778_v43  ;;  %v5042_v30 = vmul.f32 %v10904_v59, %v14041_v28  ;;  %v5043_v27 = vmul.f32 %v10904_v59, %v11214_v17 }
 0x342   : > { %v4822_v61 = vsel %vm852_vm1, %v4819_v51, %v4821_v1  ;;  %v5275_v33 = vmul.f32 %v10913_v57, %v11778_v43  ;;  %v5276_v44 = vmul.f32 %v10913_v57, %v14041_v28  ;;  %v5277_v22 = vmul.f32 %v10913_v57, %v11214_v17 }
 0x343   : > { %v4914_v41 = vadd.f32 %v4822_v61, %v4680_v18  ;;  %v4997_v14 = vadd.f32 %v4957_v7, %v4913_v26  ;;  %v5136_v3 = vrot.slane %v5041_v31, 1  ;;  %v5137_v25 = vrot.slane %v5042_v30, 1 }
 0x344   : > { %v5139_v21 = vrot.slane %v5043_v27, 1  ;;  %v5370_v11 = vrot.slane %v5275_v33, 2  ;;  %v5371_v42 = vrot.slane %v5276_v44, 2  ;;  %v5373_v62 = vrot.slane %v5277_v22, 2 }
 0x345   : > { %v4998_v51 = vadd.f32 %v4958_v0, %v4914_v41  ;;  %v5138_v20 = vsel %vm523_vm0, %v5136_v3, %v5137_v25  ;;  %v3940_v29 = vmul.f32 %v10679_v55, %v14024_v6  ;;  %v3855_v7 = vmul.f32 %v10676_v12, %v10876_v2 }
 0x346   : > { %v5140_v35 = vsel %vm523_vm0, %v5137_v25, %v5139_v21  ;;  %v5231_v37 = vadd.f32 %v5138_v20, %v4997_v14  ;;  %v5372_v18 = vsel %vm852_vm1, %v5370_v11, %v5371_v42  ;;  %v5374_v31 = vsel %vm852_vm1, %v5371_v42, %v5373_v62 }
 0x347   : > { %v5232_v26 = vadd.f32 %v5140_v35, %v4998_v51  ;;  %v4037_v30 = vrot.slane %v3940_v29, 1  ;;  %v4174_v0 = vmul.f32 %v10685_v5, %v14024_v6  ;;  %v4407_v61 = vmul.f32 %v10868_v13, %v11037_v36 }
 0x348   : > { %v5465_v27 = vadd.f32 %v5372_v18, %v5231_v37  ;;  %v11908_v33 = vmul.f32 %v10892_v15, %v11039_v53  ;;  %v11912_v20 = vmul.f32 %v10895_v40, %v11039_v53  ;;  %v14042_v35 = vrot.slane %v11794_v34, 1 }
 0x349   : > { %v5466_v44 = vadd.f32 %v5374_v31, %v5232_v26  ;;  %v4271_v22 = vrot.slane %v4174_v0, 2  ;;  %v11919_v37 = vmul.f32 %v10904_v59, %v11241_v54  ;;  %v14043_v42 = vrot.slane %v11825_v19, 2 }
 0x34a   : > { %v4038_v29 = vsel %vm523_vm0, %v14042_v35, %v4037_v30  ;;  %v5509_v41 = vadd.f32 %v10963_v23, %v5465_v27  ;;  %v4589_v3 = vrot.slane %v11908_v33, 1  ;;  %v4823_v25 = vrot.slane %v11912_v20, 2 }
 0x34b   : > { %v4129_v14 = vadd.f32 %v4038_v29, %v3855_v7  ;;  %v5510_v11 = vadd.f32 %v10963_v23, %v5466_v44  ;;  %v4272_v34 = vsel %vm852_vm1, %v14043_v42, %v4271_v22  ;;  %v5141_v51 = vrot.slane %v11919_v37, 1 }
 0x34c   : > { %v11931_v18 = vmul.f32 %v10913_v57, %v11241_v54  ;;  %vm5549_vm14 = vcmp.gt.f32.partialorder %v5509_v41, 0.0  ;;  %v5593_v26 = vmul.f32 %v10972_v16, %v5509_v41  ;;  %v4959_v31 = vmul.f32 %v10901_v32, %v11214_v17 }
 0x34d   : > { %v4363_v7 = vadd.f32 %v4272_v34, %v4129_v14  ;;  %vm5550_vm15 = vcmp.gt.f32.partialorder %v5510_v11, 0.0  ;;  %v5594_v0 = vmul.f32 %v10972_v16, %v5510_v11  ;;  %v14044_v19 = vrot.slane %v11858_v63, 1 }
 0x34e   : > { %v4824_v33 = vsel %vm852_vm1, %v4821_v1, %v4823_v25  ;;  %v5633_v20 = vsel %vm5549_vm14, %v5509_v41, %v5593_v26  ;;  %v13914_v35 = vrot.slane %v11931_v18, 2  ;;  %v3140_v29 = vadd.f32 %v10658_v48, %v11767_v45 }
 0x34f   : > { %v4590_v27 = vsel %vm523_vm0, %v14044_v19, %v4589_v3  ;;  %v4447_v44 = vadd.f32 %v4407_v61, %v4363_v7  ;;  %v11944_v14 = vsel %vm5550_vm15, %v5510_v11, %v5594_v0  ;;  %v5746_v42 = vrot.slane %v5633_v20, 4  ;;  %v8505_v7 = vld [vmem:[#allocation2 + $0x168] sm:$0xff] }
 0x350   : > { %v5142_v34 = vsel %vm523_vm0, %v5139_v21, %v5141_v51  ;;  %v3856_v63 = vmul.f32 %v10676_v12, %v14024_v6  ;;  %v13913_v19 = vrot.slane %v11944_v14, 4  ;;  %vm3188_vm2 = vcmp.gt.f32.partialorder %v3140_v29, 0.0  ;;  %v8508_v6 = vld [vmem:[#allocation2 + $0x190] sm:$0xff] }
 0x351   : > { %v4681_v1 = vadd.f32 %v4590_v27, %v4447_v44  ;;  %v4408_v61 = vmul.f32 %v10868_v13, %v11039_v53  ;;  %v5376_v48 = vsel %vm852_vm1, %v5373_v62, %v13914_v35  ;;  %v3240_v45 = vmul.f32 %v8999_v38, %v3140_v29 }
 0x352   : > { %v4130_v41 = vadd.f32 %v4037_v30, %v3856_v63  ;;  %v4960_v21 = vmul.f32 %v10901_v32, %v11241_v54  ;;  %v5748_v11 = vsel %vm5710_vm3, %v5746_v42, %v13913_v19  ;;  %v11964_v0 = vadd.f32 %v8505_v7, %v10682_v24 }
 0x353   : > { %v4915_v26 = vadd.f32 %v4824_v33, %v4681_v1  ;;  %v3857_v27 = vmul.f32 %v10676_v12, %v11582_v60  ;;  %8175 = vmatmul.mubr.f32.gmra.mrb[14].mxu1 %v5748_v11  ;;  %v3288_v62 = vsel %vm3188_vm2, %v3140_v29, %v3240_v45  ;;  %v3941_v30 = vmul.f32 %v10679_v55, %v11582_v60 }
 0x354   : > { %v4364_v20 = vadd.f32 %v4271_v22, %v4130_v41  ;;  %v3942_v44 = vmul.f32 %v10679_v55, %v14030_v50  ;;  %v3594_v33 = vsel %vm11773_vm11, %v3288_v62, 0.0  ;;  %v3858_v42 = vmul.f32 %v10676_v12, %v14030_v50 }
 0x355   : > { %v4999_v63 = vadd.f32 %v4959_v31, %v4915_v26  ;;  %v11978_v1 = vmul.f32 %v10679_v55, %v11037_v36  ;;  %v3725_v11 = vrot.slane %v3594_v33, 7  ;;  %v4039_v22 = vrot.slane %v3941_v30, 1  ;;  %v8506_v30 = vld [vmem:[#allocation2 + $0x1f0] sm:$0xff] }
 0x356   : > { %v4448_v29 = vadd.f32 %v4408_v61, %v4364_v20  ;;  %v4040_v45 = vrot.slane %v3942_v44, 1  ;;  %v4175_v31 = vmul.f32 %v10685_v5, %v11582_v60  ;;  %v4176_v49 = vmul.f32 %v10685_v5, %v14030_v50  ;;  %v8507_v44 = vld [vmem:[#allocation2 + $0x1f8] sm:$0xff] }
 0x357   : > { %v5233_v41 = vadd.f32 %v5142_v34, %v4999_v63  ;;  %v13917_v7 = vrot.slane %v11978_v1, 1  ;;  %v3726_v26 = vsel %vm3644_vm8, %v11788_v10, %v3725_v11  ;;  %v3728_v62 = vsel %vm3644_vm8, %v3725_v11, %v10682_v24 }
 0x358   : > { %v4682_v9 = vadd.f32 %v4589_v3, %v4448_v29  ;;  %v4041_v61 = vsel %vm523_vm0, %v4039_v22, %v4040_v45  ;;  %v3823_v34 = vadd.f32 %v8506_v30, %v3726_v26  ;;  %v11990_v63 = vadd.f32 %v8507_v44, %v3728_v62 }
 0x359   : > { %v5467_v20 = vadd.f32 %v5376_v48, %v5233_v41  ;;  %v4043_v60 = vsel %vm523_vm0, %v4040_v45, %v13917_v7  ;;  %v4131_v19 = vadd.f32 %v4041_v61, %v3857_v27  ;;  %v11997_v10 = vmul.f32 %v10685_v5, %v11037_v36 }
 0x35a   : > { %v4916_v33 = vadd.f32 %v4823_v25, %v4682_v9  ;;  %v4132_v35 = vadd.f32 %v4043_v60, %v3858_v42  ;;  %v12001_v48 = vmul.f32 %v10901_v32, %v3823_v34  ;;  %v12004_v11 = vmul.f32 %v10904_v59, %v3823_v34 }
 0x35b   : > { %v5511_v3 = vadd.f32 %v10963_v23, %v5467_v20  ;;  %v4273_v29 = vrot.slane %v4175_v31, 2  ;;  %v12008_v22 = vmul.f32 %v10904_v59, %v11990_v63  ;;  %v12011_v9 = vmul.f32 %v10913_v57, %v3823_v34 }
 0x35c   : > { %14045 = vst [vmem:[#allocation52_spill] sm:$0xff] %v12001_v48  ;;  %v12015_v25 = vmul.f32 %v10913_v57, %v11990_v63  ;;  %v5000_v27 = vadd.f32 %v4960_v21, %v4916_v33  ;;  %v4274_v41 = vrot.slane %v4176_v49, 2  ;;  %v13916_v21 = vrot.slane %v11997_v10, 2 }
 0x35d   : > { %vm5551_vm8 = vcmp.gt.f32.partialorder %v5511_v3, 0.0  ;;  %v5595_v42 = vmul.f32 %v10972_v16, %v5511_v3  ;;  %v4409_v34 = vmul.f32 %v10868_v13, %v11778_v43  ;;  %v14046_v49 = vrot.slane %v11931_v18, 2 }
 0x35e   : > { %v5234_v61 = vadd.f32 %v5141_v51, %v5000_v27  ;;  %v4275_v30 = vsel %vm852_vm1, %v4273_v29, %v4274_v41  ;;  %v4410_v31 = vmul.f32 %v10868_v13, %v14041_v28  ;;  %v4277_v37 = vsel %vm852_vm1, %v4274_v41, %v13916_v21 }
 0x35f   : > { %v5635_v20 = vsel %vm5551_vm8, %v5511_v3, %v5595_v42  ;;  %v4365_v33 = vadd.f32 %v4275_v30, %v4131_v19  ;;  %v4493_v51 = vmul.f32 %v10892_v15, %v11778_v43  ;;  %v4494_v3 = vmul.f32 %v10892_v15, %v14041_v28 }
 0x360   : > { %v5749_v44 = vrot.slane %v5635_v20, 4  ;;  %v5468_v60 = vadd.f32 %v14046_v49, %v5234_v61  ;;  %v12041_v29 = vmul.f32 %v10892_v15, %v11214_v17  ;;  %v14047_v18 = vrot.slane %v11944_v14, 4 }
 0x361   : > { %v4366_v42 = vadd.f32 %v4277_v37, %v4132_v35  ;;  %v4449_v61 = vadd.f32 %v4409_v34, %v4365_v33  ;;  %v4591_v41 = vrot.slane %v4493_v51, 1  ;;  %v4592_v20 = vrot.slane %v4494_v3, 1 }
 0x362   : > { %v5750_v19 = vsel %vm5710_vm3, %v14047_v18, %v5749_v44  ;;  %v5512_v27 = vadd.f32 %v10963_v23, %v5468_v60  ;;  %v13915_v30 = vrot.slane %v12041_v29, 1  ;;  %v4727_v49 = vmul.f32 %v10895_v40, %v11778_v43 }
 0x363   : > { %8177 = vmatprep.mubr.f32.mxu1 %v5750_v19  ;;  %v4450_v26 = vadd.f32 %v4410_v31, %v4366_v42  ;;  %v4728_v14 = vmul.f32 %v10895_v40, %v14041_v28  ;;  %v4593_v18 = vsel %vm523_vm0, %v4591_v41, %v4592_v20  ;;  %v4729_v34 = vmul.f32 %v10895_v40, %v11214_v17 }
 0x364   : > { %vm5552_vm4 = vcmp.gt.f32.partialorder %v5512_v27, 0.0  ;;  %v5596_v62 = vmul.f32 %v10972_v16, %v5512_v27  ;;  %v4595_v35 = vsel %vm523_vm0, %v4592_v20, %v13915_v30  ;;  %v4825_v60 = vrot.slane %v4727_v49, 2 }
 0x365   : > { %v4683_v37 = vadd.f32 %v4593_v18, %v4449_v61  ;;  %v4684_v51 = vadd.f32 %v4595_v35, %v4450_v26  ;;  %v4826_v3 = vrot.slane %v4728_v14, 2  ;;  %v4828_v45 = vrot.slane %v4729_v34, 2 }
 0x366   : > { %v5636_v33 = vsel %vm5552_vm4, %v5512_v27, %v5596_v62  ;;  %v4961_v31 = vmul.f32 %v10901_v32, %v11964_v0  ;;  %v4962_v42 = vmul.f32 %v10901_v32, %v11312_v46  ;;  %v5045_v20 = vmul.f32 %v10904_v59, %v11964_v0 }
 0x367   : > { %v5751_v19 = vrot.slane %v5636_v33, 4  ;;  %v4827_v41 = vsel %vm852_vm1, %v4825_v60, %v4826_v3  ;;  %v5046_v49 = vmul.f32 %v10904_v59, %v11312_v46  ;;  %v5047_v26 = vmul.f32 %v10904_v59, %v11420_v4 }
 0x368   : > { %v4829_v27 = vsel %vm852_vm1, %v4826_v3, %v4828_v45  ;;  %v4917_v61 = vadd.f32 %v4827_v41, %v4683_v37  ;;  %v5279_v14 = vmul.f32 %v10913_v57, %v11964_v0  ;;  %v5143_v35 = vrot.slane %v5045_v20, 1 }
 0x369   : > { %v5752_v62 = vsel %vm5710_vm3, %v5749_v44, %v5751_v19  ;;  %v4918_v18 = vadd.f32 %v4829_v27, %v4684_v51  ;;  %v5144_v34 = vrot.slane %v5046_v49, 1  ;;  %v5146_v60 = vrot.slane %v5047_v26, 1 }
 0x36a   : > { %8178 = vmatmul.mubr.f32.gmra.mrb[16].mxu1 %v5752_v62  ;;  %v5001_v33 = vadd.f32 %v4961_v31, %v4917_v61  ;;  %v5280_v30 = vmul.f32 %v10913_v57, %v11312_v46  ;;  %v5281_v21 = vmul.f32 %v10913_v57, %v11420_v4  ;;  %v5377_v7 = vrot.slane %v5279_v14, 2 }
 0x36b   : > { %v5002_v44 = vadd.f32 %v4962_v42, %v4918_v18  ;;  %v5145_v3 = vsel %vm523_vm0, %v5143_v35, %v5144_v34  ;;  %v5147_v37 = vsel %vm523_vm0, %v5144_v34, %v5146_v60  ;;  %v3859_v19 = vmul.f32 %v10676_v12, %v11037_v36 }
 0x36c   : > { %v5235_v51 = vadd.f32 %v5145_v3, %v5001_v33  ;;  %v5378_v41 = vrot.slane %v5280_v30, 2  ;;  %v5380_v20 = vrot.slane %v5281_v21, 2  ;;  %v3944_v31 = vmul.f32 %v10679_v55, %v11039_v53 }
 0x36d   : > { %v5236_v49 = vadd.f32 %v5147_v37, %v5002_v44  ;;  %v4178_v26 = vmul.f32 %v10685_v5, %v11039_v53  ;;  %v4411_v42 = vmul.f32 %v10868_v13, %v11214_v17  ;;  %v12090_v62 = vmul.f32 %v10892_v15, %v11241_v54 }
 0x36e   : > { %v5379_v27 = vsel %vm852_vm1, %v5377_v7, %v5378_v41  ;;  %v5381_v61 = vsel %vm852_vm1, %v5378_v41, %v5380_v20  ;;  %v4044_v30 = vrot.slane %v3944_v31, 1  ;;  %v12096_v21 = vmul.f32 %v10895_v40, %v11241_v54  ;;  %v12109_v41 = vpop.f32.mrb[0].mxu1 }
 0x36f   : > { %v5469_v14 = vadd.f32 %v5379_v27, %v5235_v51  ;;  %v5470_v18 = vadd.f32 %v5381_v61, %v5236_v49  ;;  %v4278_v35 = vrot.slane %v4178_v26, 2  ;;  %v4596_v34 = vrot.slane %v12090_v62, 1  ;;  %v12116_v62 = vpop.f32.mrb[1].mxu1 }
 0x370   : > { %v14048_v33 = vrot.slane %v11978_v1, 1  ;;  %v13919_v3 = vrot.slane %v12096_v21, 2  ;;  %v4963_v7 = vmul.f32 %v10901_v32, %v11420_v4  ;;  %v12107_v37 = vmul.f32 %v10904_v59, %v11422_v56 }
 0x371   : > { %v5513_v51 = vadd.f32 %v10963_v23, %v5469_v14  ;;  %v5514_v31 = vadd.f32 %v10963_v23, %v5470_v18  ;;  %v14049_v1 = vrot.slane %v11997_v10, 2  ;;  %v14050_v27 = vrot.slane %v12041_v29, 1 }
 0x372   : > { %v4045_v44 = vsel %vm523_vm0, %v14048_v33, %v4044_v30  ;;  %v4831_v33 = vsel %vm852_vm1, %v4828_v45, %v13919_v3  ;;  %v13922_v36 = vrot.slane %v12107_v37, 1  ;;  %v12127_v14 = vmul.f32 %v10913_v57, %v11422_v56 }
 0x373   : > { %v4133_v49 = vadd.f32 %v4045_v44, %v3859_v19  ;;  %v4279_v26 = vsel %vm852_vm1, %v14049_v1, %v4278_v35  ;;  %v4597_v61 = vsel %vm523_vm0, %v14050_v27, %v4596_v34  ;;  %vm5553_vm5 = vcmp.gt.f32.partialorder %v5513_v51, 0.0 }
 0x374   : > { %vm5554_vm6 = vcmp.gt.f32.partialorder %v5514_v31, 0.0  ;;  %v5597_v10 = vmul.f32 %v10972_v16, %v5513_v51  ;;  %v5598_v19 = vmul.f32 %v10972_v16, %v5514_v31  ;;  %v5149_v29 = vsel %vm523_vm0, %v5146_v60, %v13922_v36 }
 0x375   : > { %v4367_v18 = vadd.f32 %v4279_v26, %v4133_v49  ;;  %v13925_v44 = vrot.slane %v12127_v14, 2  ;;  %v3860_v45 = vmul.f32 %v10676_v12, %v11039_v53  ;;  %v4412_v3 = vmul.f32 %v10868_v13, %v11241_v54 }
 0x376   : > { %v5637_v1 = vsel %vm5553_vm5, %v5513_v51, %v5597_v10  ;;  %v12137_v27 = vsel %vm5554_vm6, %v5514_v31, %v5598_v19  ;;  %v4964_v50 = vmul.f32 %v10901_v32, %v11422_v56  ;;  %v12148_v51 = vadd.f32 %v8508_v6, %v10682_v24 }
 0x377   : > { %v5753_v2 = vrot.slane %v5637_v1, 4  ;;  %v13924_v49 = vrot.slane %v12137_v27, 4  ;;  %v4451_v26 = vadd.f32 %v4411_v42, %v4367_v18  ;;  %v5383_v60 = vsel %vm852_vm1, %v5380_v20, %v13925_v44 }
 0x378   : > { %v4134_v36 = vadd.f32 %v4044_v30, %v3860_v45  ;;  %v3861_v31 = vmul.f32 %v10676_v12, %v11778_v43  ;;  %v3862_v10 = vmul.f32 %v10676_v12, %v14041_v28  ;;  %v3945_v18 = vmul.f32 %v10679_v55, %v11778_v43 }
 0x379   : > { %v5755_v19 = vsel %vm5710_vm3, %v5753_v2, %v13924_v49  ;;  %v4685_v42 = vadd.f32 %v4597_v61, %v4451_v26  ;;  %v3946_v20 = vmul.f32 %v10679_v55, %v14041_v28  ;;  %v12163_v30 = vmul.f32 %v10679_v55, %v11214_v17 }
 0x37a   : > { %8180 = vmatprep.mubr.f32.mxu1 %v5755_v19  ;;  %v4368_v6 = vadd.f32 %v4278_v35, %v4134_v36  ;;  %v4179_v45 = vmul.f32 %v10685_v5, %v11778_v43  ;;  %v4180_v1 = vmul.f32 %v10685_v5, %v14041_v28  ;;  %v4046_v61 = vrot.slane %v3945_v18, 1 }
 0x37b   : > { %v4919_v2 = vadd.f32 %v4831_v33, %v4685_v42  ;;  %v4047_v26 = vrot.slane %v3946_v20, 1  ;;  %v12171_v49 = vmul.f32 %v10685_v5, %v11214_v17  ;;  %v4049_v36 = vrot.slane %v12163_v30, 1 }
 0x37c   : > { %v4452_v44 = vadd.f32 %v4412_v3, %v4368_v6  ;;  %v4280_v35 = vrot.slane %v4179_v45, 2  ;;  %v4281_v19 = vrot.slane %v4180_v1, 2  ;;  %v4413_v28 = vmul.f32 %v10868_v13, %v11964_v0 }
 0x37d   : > { %v5003_v53 = vadd.f32 %v4963_v7, %v4919_v2  ;;  %v4048_v48 = vsel %vm523_vm0, %v4046_v61, %v4047_v26  ;;  %v4283_v43 = vrot.slane %v12171_v49, 2  ;;  %v4050_v42 = vsel %vm523_vm0, %v4047_v26, %v4049_v36 }
 0x37e   : > { %v4686_v33 = vadd.f32 %v4596_v34, %v4452_v44  ;;  %v4135_v18 = vadd.f32 %v4048_v48, %v3861_v31  ;;  %v4282_v3 = vsel %vm852_vm1, %v4280_v35, %v4281_v19  ;;  %v4136_v6 = vadd.f32 %v4050_v42, %v3862_v10 }
 0x37f   : > { %v5237_v20 = vadd.f32 %v5149_v29, %v5003_v53  ;;  %v4284_v7 = vsel %vm852_vm1, %v4281_v19, %v4283_v43  ;;  %v4414_v45 = vmul.f32 %v10868_v13, %v11312_v46  ;;  %v14051_v1 = vrot.slane %v12096_v21, 2 }
 0x380   : > { %v4369_v34 = vadd.f32 %v4282_v3, %v4135_v18  ;;  %v4497_v44 = vmul.f32 %v10892_v15, %v11964_v0  ;;  %v4498_v48 = vmul.f32 %v10892_v15, %v11312_v46  ;;  %v4370_v53 = vadd.f32 %v4284_v7, %v4136_v6 }
 0x381   : > { %v4920_v2 = vadd.f32 %v14051_v1, %v4686_v33  ;;  %v5471_v31 = vadd.f32 %v5383_v60, %v5237_v20  ;;  %v12195_v29 = vmul.f32 %v10892_v15, %v11420_v4  ;;  %v4731_v10 = vmul.f32 %v10895_v40, %v11964_v0 }
 0x382   : > { %v4453_v26 = vadd.f32 %v4413_v28, %v4369_v34  ;;  %v4598_v21 = vrot.slane %v4497_v44, 1  ;;  %v4599_v35 = vrot.slane %v4498_v48, 1  ;;  %v4454_v33 = vadd.f32 %v4414_v45, %v4370_v53  ;;  %v14054_v53 = vld [vmem:[#allocation47_spill] sm:$0xff] }
 0x383   : > { %v5004_v61 = vadd.f32 %v4964_v50, %v4920_v2  ;;  %v5515_v19 = vadd.f32 %v10963_v23, %v5471_v31  ;;  %v4601_v42 = vrot.slane %v12195_v29, 1  ;;  %v4732_v60 = vmul.f32 %v10895_v40, %v11312_v46 }
 0x384   : > { %v14052_v18 = vrot.slane %v12107_v37, 1  ;;  %v4600_v20 = vsel %vm523_vm0, %v4598_v21, %v4599_v35  ;;  %v12208_v6 = vmul.f32 %v10895_v40, %v11420_v4  ;;  %v4832_v50 = vrot.slane %v4731_v10, 2 }
 0x385   : > { %vm5555_vm7 = vcmp.gt.f32.partialorder %v5515_v19, 0.0  ;;  %v5599_v28 = vmul.f32 %v10972_v16, %v5515_v19  ;;  %v4602_v7 = vsel %vm523_vm0, %v4599_v35, %v4601_v42  ;;  %v4687_v45 = vadd.f32 %v4600_v20, %v4453_v26 }
 0x386   : > { %v5238_v3 = vadd.f32 %v14052_v18, %v5004_v61  ;;  %v14053_v1 = vrot.slane %v12127_v14, 2  ;;  %v4688_v37 = vadd.f32 %v4602_v7, %v4454_v33  ;;  %v4833_v34 = vrot.slane %v4732_v60, 2 }
 0x387   : > { %v4835_v44 = vrot.slane %v12208_v6, 2  ;;  %v5639_v48 = vsel %vm5555_vm7, %v5515_v19, %v5599_v28  ;;  %v4965_v31 = vmul.f32 %v10901_v32, %v12148_v51  ;;  %v4966_v10 = vmul.f32 %v10901_v32, %v14054_v53 }
 0x388   : > { %v5472_v2 = vadd.f32 %v14053_v1, %v5238_v3  ;;  %v5049_v61 = vmul.f32 %v10904_v59, %v12148_v51  ;;  %v5756_v21 = vrot.slane %v5639_v48, 4  ;;  %v4834_v14 = vsel %vm852_vm1, %v4832_v50, %v4833_v34 }
 0x389   : > { %v4836_v35 = vsel %vm852_vm1, %v4833_v34, %v4835_v44  ;;  %v4921_v33 = vadd.f32 %v4834_v14, %v4687_v45  ;;  %v5050_v19 = vmul.f32 %v10904_v59, %v14054_v53  ;;  %v5051_v18 = vmul.f32 %v10904_v59, %v11596_v39 }
 0x38a   : > { %v5516_v26 = vadd.f32 %v10963_v23, %v5472_v2  ;;  %v4922_v60 = vadd.f32 %v4836_v35, %v4688_v37  ;;  %v14055_v3 = vrot.slane %v12137_v27, 4  ;;  %v5150_v28 = vrot.slane %v5049_v61, 1  ;;  %v12234_v2 = vpop.f32.mrb[2].mxu1 }
 0x38b   : > { %v5005_v50 = vadd.f32 %v4965_v31, %v4921_v33  ;;  %v5151_v1 = vrot.slane %v5050_v19, 1  ;;  %v5153_v45 = vrot.slane %v5051_v18, 1  ;;  %v5283_v34 = vmul.f32 %v10913_v57, %v12148_v51  ;;  %v12242_v14 = vpop.f32.mrb[3].mxu1 }
 0x38c   : > { %v5757_v20 = vsel %vm5710_vm3, %v14055_v3, %v5756_v21  ;;  %vm5556_vm9 = vcmp.gt.f32.partialorder %v5516_v26, 0.0  ;;  %v5600_v6 = vmul.f32 %v10972_v16, %v5516_v26  ;;  %v5006_v7 = vadd.f32 %v4966_v10, %v4922_v60 }
 0x38d   : > { %8181 = vmatmul.mubr.f32.gmra.mrb[18].mxu1 %v5757_v20  ;;  %v5284_v27 = vmul.f32 %v10913_v57, %v14054_v53  ;;  %v5285_v48 = vmul.f32 %v10913_v57, %v11596_v39  ;;  %v5152_v31 = vsel %vm523_vm0, %v5150_v28, %v5151_v1  ;;  %v5154_v10 = vsel %vm523_vm0, %v5151_v1, %v5153_v45 }
 0x38e   : > { %v5640_v37 = vsel %vm5556_vm9, %v5516_v26, %v5600_v6  ;;  %v3863_v35 = vmul.f32 %v10676_v12, %v11214_v17  ;;  %v5239_v26 = vadd.f32 %v5152_v31, %v5005_v50  ;;  %v5240_v33 = vadd.f32 %v5154_v10, %v5006_v7 }
 0x38f   : > { %v5758_v61 = vrot.slane %v5640_v37, 4  ;;  %v5384_v60 = vrot.slane %v5283_v34, 2  ;;  %v5385_v19 = vrot.slane %v5284_v27, 2  ;;  %v5387_v3 = vrot.slane %v5285_v48, 2 }
 0x390   : > { %v3948_v20 = vmul.f32 %v10679_v55, %v11241_v54  ;;  %v4182_v6 = vmul.f32 %v10685_v5, %v11241_v54  ;;  %v4415_v1 = vmul.f32 %v10868_v13, %v11420_v4  ;;  %v4500_v50 = vmul.f32 %v10892_v15, %v11422_v56 }
 0x391   : > { %v5759_v18 = vsel %vm5710_vm3, %v5756_v21, %v5758_v61  ;;  %v5386_v28 = vsel %vm852_vm1, %v5384_v60, %v5385_v19  ;;  %v12260_v7 = vmul.f32 %v10895_v40, %v11422_v56  ;;  %v5388_v21 = vsel %vm852_vm1, %v5385_v19, %v5387_v3 }
 0x392   : > { %8183 = vmatprep.mubr.f32.mxu1 %v5759_v18  ;;  %v5473_v37 = vadd.f32 %v5386_v28, %v5239_v26  ;;  %v4051_v34 = vrot.slane %v3948_v20, 1  ;;  %v4285_v27 = vrot.slane %v4182_v6, 2  ;;  %v5474_v48 = vadd.f32 %v5388_v21, %v5240_v33 }
 0x393   : > { %v4603_v61 = vrot.slane %v4500_v50, 1  ;;  %v4837_v31 = vrot.slane %v12260_v7, 2  ;;  %v4967_v10 = vmul.f32 %v10901_v32, %v11596_v39  ;;  %v12275_v26 = vmul.f32 %v10904_v59, %v11618_v47 }
 0x394   : > { %v5517_v60 = vadd.f32 %v10963_v23, %v5473_v37  ;;  %v4052_v18 = vsel %vm523_vm0, %v4049_v36, %v4051_v34  ;;  %v4286_v19 = vsel %vm852_vm1, %v4283_v43, %v4285_v27  ;;  %v5518_v33 = vadd.f32 %v10963_v23, %v5474_v48 }
 0x395   : > { %v4137_v20 = vadd.f32 %v4052_v18, %v3863_v35  ;;  %v4604_v6 = vsel %vm523_vm0, %v4601_v42, %v4603_v61  ;;  %v4838_v28 = vsel %vm852_vm1, %v4835_v44, %v4837_v31  ;;  %v13928_v49 = vrot.slane %v12275_v26, 1 }
 0x396   : > { %vm5557_vm10 = vcmp.gt.f32.partialorder %v5517_v60, 0.0  ;;  %v5601_v30 = vmul.f32 %v10972_v16, %v5517_v60  ;;  %v12286_v36 = vmul.f32 %v10913_v57, %v11618_v47  ;;  %vm5558_vm11 = vcmp.gt.f32.partialorder %v5518_v33, 0.0 }
 0x397   : > { %v5602_v43 = vmul.f32 %v10972_v16, %v5518_v33  ;;  %v4371_v50 = vadd.f32 %v4286_v19, %v4137_v20  ;;  %v3864_v29 = vmul.f32 %v10676_v12, %v11241_v54  ;;  %v5156_v42 = vsel %vm523_vm0, %v5153_v45, %v13928_v49  ;;  %v8509_v45 = vld [vmem:[#allocation2 + $0x1b8] sm:$0xff] }
 0x398   : > { %v5641_v35 = vsel %vm5557_vm10, %v5517_v60, %v5601_v30  ;;  %v13931_v44 = vrot.slane %v12286_v36, 2  ;;  %v4416_v7 = vmul.f32 %v10868_v13, %v11422_v56  ;;  %v4968_v20 = vmul.f32 %v10901_v32, %v11618_v47 }
 0x399   : > { %v12297_v21 = vsel %vm5558_vm11, %v5518_v33, %v5602_v43  ;;  %v5760_v37 = vrot.slane %v5641_v35, 4  ;;  %v4455_v48 = vadd.f32 %v4415_v1, %v4371_v50  ;;  %v4138_v18 = vadd.f32 %v4051_v34, %v3864_v29 }
 0x39a   : > { %v13930_v19 = vrot.slane %v12297_v21, 4  ;;  %v5390_v60 = vsel %vm852_vm1, %v5387_v3, %v13931_v44  ;;  %v12306_v30 = vadd.f32 %v8509_v45, %v10682_v24  ;;  %v3865_v33 = vmul.f32 %v10676_v12, %v11964_v0 }
 0x39b   : > { %v4689_v49 = vadd.f32 %v4604_v6, %v4455_v48  ;;  %v4372_v17 = vadd.f32 %v4285_v27, %v4138_v18  ;;  %v3866_v1 = vmul.f32 %v10676_v12, %v11312_v46  ;;  %v3949_v3 = vmul.f32 %v10679_v55, %v11964_v0 }
 0x39c   : > { %v5762_v34 = vsel %vm5710_vm3, %v5760_v37, %v13930_v19  ;;  %v3950_v43 = vmul.f32 %v10679_v55, %v11312_v46  ;;  %v12321_v6 = vmul.f32 %v10679_v55, %v11420_v4  ;;  %v4183_v29 = vmul.f32 %v10685_v5, %v11964_v0 }
 0x39d   : > { %8184 = vmatmul.mubr.f32.gmra.mrb[20].mxu1 %v5762_v34  ;;  %v4923_v27 = vadd.f32 %v4838_v28, %v4689_v49  ;;  %v4456_v50 = vadd.f32 %v4416_v7, %v4372_v17  ;;  %v4184_v35 = vmul.f32 %v10685_v5, %v11312_v46  ;;  %v4053_v37 = vrot.slane %v3949_v3, 1 }
 0x39e   : > { %v4054_v48 = vrot.slane %v3950_v43, 1  ;;  %v4056_v18 = vrot.slane %v12321_v6, 1  ;;  %v12330_v45 = vmul.f32 %v10685_v5, %v11420_v4  ;;  %v4287_v54 = vrot.slane %v4183_v29, 2 }
 0x39f   : > { %v5007_v19 = vadd.f32 %v4967_v10, %v4923_v27  ;;  %v4690_v44 = vadd.f32 %v4603_v61, %v4456_v50  ;;  %v4288_v34 = vrot.slane %v4184_v35, 2  ;;  %v4417_v49 = vmul.f32 %v10868_v13, %v12148_v51  ;;  %v12347_v29 = vpop.f32.mrb[4].mxu1 }
 0x3a0   : > { %v4055_v17 = vsel %vm523_vm0, %v4053_v37, %v4054_v48  ;;  %v4057_v0 = vsel %vm523_vm0, %v4054_v48, %v4056_v18  ;;  %v13934_v28 = vrot.slane %v12330_v45, 2  ;;  %v4418_v27 = vmul.f32 %v10868_v13, %v14054_v53 }
 0x3a1   : > { %v5241_v7 = vadd.f32 %v5156_v42, %v5007_v19  ;;  %v4924_v3 = vadd.f32 %v4837_v31, %v4690_v44  ;;  %v4139_v43 = vadd.f32 %v4055_v17, %v3865_v33  ;;  %v4140_v46 = vadd.f32 %v4057_v0, %v3866_v1  ;;  %v12349_v44 = vpop.f32.mrb[5].mxu1 }
 0x3a2   : > { %v4289_v10 = vsel %vm852_vm1, %v4287_v54, %v4288_v34  ;;  %v4291_v61 = vsel %vm852_vm1, %v4288_v34, %v13934_v28  ;;  %v4501_v50 = vmul.f32 %v10892_v15, %v12148_v51  ;;  %v4502_v54 = vmul.f32 %v10892_v15, %v14054_v53 }
 0x3a3   : > { %v5475_v35 = vadd.f32 %v5390_v60, %v5241_v7  ;;  %v5008_v37 = vadd.f32 %v4968_v20, %v4924_v3  ;;  %v4373_v42 = vadd.f32 %v4289_v10, %v4139_v43  ;;  %v4374_v31 = vadd.f32 %v4291_v61, %v4140_v46 }
 0x3a4   : > { %v12355_v19 = vmul.f32 %v10892_v15, %v11596_v39  ;;  %v4605_v33 = vrot.slane %v4501_v50, 1  ;;  %v4735_v1 = vmul.f32 %v10895_v40, %v12148_v51  ;;  %v14056_v60 = vrot.slane %v12275_v26, 1 }
 0x3a5   : > { %v5519_v48 = vadd.f32 %v10963_v23, %v5475_v35  ;;  %v4457_v34 = vadd.f32 %v4417_v49, %v4373_v42  ;;  %v4458_v46 = vadd.f32 %v4418_v27, %v4374_v31  ;;  %v4606_v17 = vrot.slane %v4502_v54, 1 }
 0x3a6   : > { %v5242_v20 = vadd.f32 %v14056_v60, %v5008_v37  ;;  %v4608_v0 = vrot.slane %v12355_v19, 1  ;;  %v4736_v7 = vmul.f32 %v10895_v40, %v14054_v53  ;;  %v12367_v3 = vmul.f32 %v10895_v40, %v11596_v39 }
 0x3a7   : > { %vm5559_vm12 = vcmp.gt.f32.partialorder %v5519_v48, 0.0  ;;  %v5603_v43 = vmul.f32 %v10972_v16, %v5519_v48  ;;  %v14057_v10 = vrot.slane %v12286_v36, 2  ;;  %v4839_v26 = vrot.slane %v4735_v1, 2 }
 0x3a8   : > { %v4607_v49 = vsel %vm523_vm0, %v4605_v33, %v4606_v17  ;;  %v4609_v27 = vsel %vm523_vm0, %v4606_v17, %v4608_v0  ;;  %v4840_v50 = vrot.slane %v4736_v7, 2  ;;  %v4842_v35 = vrot.slane %v12367_v3, 2 }
 0x3a9   : > { %v5476_v61 = vadd.f32 %v14057_v10, %v5242_v20  ;;  %v5643_v37 = vsel %vm5559_vm12, %v5519_v48, %v5603_v43  ;;  %v4691_v31 = vadd.f32 %v4607_v49, %v4457_v34  ;;  %v4692_v54 = vadd.f32 %v4609_v27, %v4458_v46 }
 0x3aa   : > { %v5763_v60 = vrot.slane %v5643_v37, 4  ;;  %v4841_v28 = vsel %vm852_vm1, %v4839_v26, %v4840_v50  ;;  %v4843_v36 = vsel %vm852_vm1, %v4840_v50, %v4842_v35  ;;  %v4969_v33 = vmul.f32 %v10901_v32, %v12306_v30 }
 0x3ab   : > { %v5520_v42 = vadd.f32 %v10963_v23, %v5476_v61  ;;  %v4925_v20 = vadd.f32 %v4841_v28, %v4691_v31  ;;  %v4926_v17 = vadd.f32 %v4843_v36, %v4692_v54  ;;  %v14058_v7 = vrot.slane %v12297_v21, 4 }
 0x3ac   : > { %v4970_v34 = vmul.f32 %v10901_v32, %v11696_v58  ;;  %v5053_v46 = vmul.f32 %v10904_v59, %v12306_v30  ;;  %v5054_v3 = vmul.f32 %v10904_v59, %v11696_v58  ;;  %v5055_v28 = vmul.f32 %v10904_v59, %v11802_v8 }
 0x3ad   : > { %vm5560_vm13 = vcmp.gt.f32.partialorder %v5520_v42, 0.0  ;;  %v5604_v1 = vmul.f32 %v10972_v16, %v5520_v42  ;;  %v5764_v48 = vsel %vm5710_vm3, %v14058_v7, %v5763_v60  ;;  %v5009_v10 = vadd.f32 %v4969_v33, %v4925_v20 }
 0x3ae   : > { %8186 = vmatprep.mubr.f32.mxu1 %v5764_v48  ;;  %v5287_v21 = vmul.f32 %v10913_v57, %v12306_v30  ;;  %v5010_v26 = vadd.f32 %v4970_v34, %v4926_v17  ;;  %v5157_v49 = vrot.slane %v5053_v46, 1  ;;  %v5158_v27 = vrot.slane %v5054_v3, 1 }
 0x3af   : > { %v5644_v43 = vsel %vm5560_vm13, %v5520_v42, %v5604_v1  ;;  %v5160_v50 = vrot.slane %v5055_v28, 1  ;;  %v5288_v37 = vmul.f32 %v10913_v57, %v11696_v58  ;;  %v5289_v31 = vmul.f32 %v10913_v57, %v11802_v8 }
 0x3b0   : > { %v5765_v61 = vrot.slane %v5644_v43, 4  ;;  %v5391_v54 = vrot.slane %v5287_v21, 2  ;;  %v5159_v36 = vsel %vm523_vm0, %v5157_v49, %v5158_v27  ;;  %v3867_v33 = vmul.f32 %v10676_v12, %v11420_v4 }
 0x3b1   : > { %v3952_v1 = vmul.f32 %v10679_v55, %v11422_v56  ;;  %v5161_v20 = vsel %vm523_vm0, %v5158_v27, %v5160_v50  ;;  %v5243_v17 = vadd.f32 %v5159_v36, %v5009_v10  ;;  %v5392_v7 = vrot.slane %v5288_v37, 2 }
 0x3b2   : > { %v5766_v42 = vsel %vm5710_vm3, %v5763_v60, %v5765_v61  ;;  %v5394_v48 = vrot.slane %v5289_v31, 2  ;;  %v5244_v34 = vadd.f32 %v5161_v20, %v5010_v26  ;;  %v4186_v3 = vmul.f32 %v10685_v5, %v11422_v56 }
 0x3b3   : > { %8187 = vmatmul.mubr.f32.gmra.mrb[22].mxu1 %v5766_v42  ;;  %v4058_v46 = vrot.slane %v3952_v1, 1  ;;  %v4419_v60 = vmul.f32 %v10868_v13, %v11596_v39  ;;  %v5393_v43 = vsel %vm852_vm1, %v5391_v54, %v5392_v7  ;;  %v4504_v21 = vmul.f32 %v10892_v15, %v11618_v47 }
 0x3b4   : > { %v5395_v28 = vsel %vm852_vm1, %v5392_v7, %v5394_v48  ;;  %v12417_v10 = vmul.f32 %v10895_v40, %v11618_v47  ;;  %v5477_v61 = vadd.f32 %v5393_v43, %v5243_v17  ;;  %v4292_v27 = vrot.slane %v4186_v3, 2  ;;  %v14060_v7 = vld [vmem:[#allocation49_spill] sm:$0xff] }
 0x3b5   : > { %v5478_v26 = vadd.f32 %v5395_v28, %v5244_v34  ;;  %v4059_v49 = vsel %vm523_vm0, %v4056_v18, %v4058_v46  ;;  %v4610_v31 = vrot.slane %v4504_v21, 1  ;;  %v4971_v42 = vmul.f32 %v10901_v32, %v11802_v8 }
 0x3b6   : > { %v4141_v37 = vadd.f32 %v4059_v49, %v3867_v33  ;;  %v4844_v54 = vrot.slane %v12417_v10, 2  ;;  %v5521_v36 = vadd.f32 %v10963_v23, %v5477_v61  ;;  %v14059_v20 = vrot.slane %v12330_v45, 2 }
 0x3b7   : > { %v5522_v1 = vadd.f32 %v10963_v23, %v5478_v26  ;;  %v12432_v6 = vmul.f32 %v10904_v59, %v14060_v7  ;;  %v4611_v33 = vsel %vm523_vm0, %v4608_v0, %v4610_v31  ;;  %v12440_v3 = vmul.f32 %v10913_v57, %v14060_v7 }
 0x3b8   : > { %v4293_v17 = vsel %vm852_vm1, %v14059_v20, %v4292_v27  ;;  %v4845_v34 = vsel %vm852_vm1, %v4842_v35, %v4844_v54  ;;  %vm5561_vm14 = vcmp.gt.f32.partialorder %v5521_v36, 0.0  ;;  %v5605_v45 = vmul.f32 %v10972_v16, %v5521_v36 }
 0x3b9   : > { %v4375_v18 = vadd.f32 %v4293_v17, %v4141_v37  ;;  %vm5562_vm15 = vcmp.gt.f32.partialorder %v5522_v1, 0.0  ;;  %v5606_v43 = vmul.f32 %v10972_v16, %v5522_v1  ;;  %v13937_v21 = vrot.slane %v12432_v6, 1  ;;  %v8510_v17 = vld [vmem:[#allocation2 + $0x1e0] sm:$0xff] }
 0x3ba   : > { %v13936_v10 = vrot.slane %v12440_v3, 2  ;;  %v3868_v19 = vmul.f32 %v10676_v12, %v11422_v56  ;;  %v5645_v0 = vsel %vm5561_vm14, %v5521_v36, %v5605_v45  ;;  %v4420_v61 = vmul.f32 %v10868_v13, %v11618_v47 }
 0x3bb   : > { %v4459_v28 = vadd.f32 %v4419_v60, %v4375_v18  ;;  %v12448_v35 = vsel %vm5562_vm15, %v5522_v1, %v5606_v43  ;;  %v4972_v26 = vmul.f32 %v10901_v32, %v14060_v7  ;;  %v5767_v49 = vrot.slane %v5645_v0, 4 }
 0x3bc   : > { %v13935_v37 = vrot.slane %v12448_v35, 4  ;;  %v5163_v20 = vsel %vm523_vm0, %v5160_v50, %v13937_v21  ;;  %v5397_v36 = vsel %vm852_vm1, %v5394_v48, %v13936_v10  ;;  %v4142_v1 = vadd.f32 %v4058_v46, %v3868_v19 }
 0x3bd   : > { %v4693_v60 = vadd.f32 %v4611_v33, %v4459_v28  ;;  %v12462_v18 = vadd.f32 %v8510_v17, %v10682_v24  ;;  %v3869_v45 = vmul.f32 %v10676_v12, %v12148_v51  ;;  %v3870_v50 = vmul.f32 %v10676_v12, %v14054_v53 }
 0x3be   : > { %v5769_v33 = vsel %vm5710_vm3, %v5767_v49, %v13935_v37  ;;  %v3953_v28 = vmul.f32 %v10679_v55, %v12148_v51  ;;  %v4376_v48 = vadd.f32 %v4292_v27, %v4142_v1  ;;  %v3954_v24 = vmul.f32 %v10679_v55, %v14054_v53 }
 0x3bf   : > { %v4927_v43 = vadd.f32 %v4845_v34, %v4693_v60  ;;  %8189 = vmatprep.mubr.f32.mxu1 %v5769_v33  ;;  %v12477_v46 = vmul.f32 %v10679_v55, %v11596_v39  ;;  %v4187_v19 = vmul.f32 %v10685_v5, %v12148_v51  ;;  %v4188_v49 = vmul.f32 %v10685_v5, %v14054_v53 }
 0x3c0   : > { %v4060_v34 = vrot.slane %v3953_v28, 1  ;;  %v12485_v60 = vmul.f32 %v10685_v5, %v11596_v39  ;;  %v4460_v27 = vadd.f32 %v4420_v61, %v4376_v48  ;;  %v4061_v1 = vrot.slane %v3954_v24, 1 }
 0x3c1   : > { %v5011_v0 = vadd.f32 %v4971_v42, %v4927_v43  ;;  %v13939_v17 = vrot.slane %v12477_v46, 1  ;;  %v4294_v33 = vrot.slane %v4187_v19, 2  ;;  %v4295_v10 = vrot.slane %v4188_v49, 2 }
 0x3c2   : > { %v13938_v21 = vrot.slane %v12485_v60, 2  ;;  %v4421_v51 = vmul.f32 %v10868_v13, %v12306_v30  ;;  %v4694_v42 = vadd.f32 %v4610_v31, %v4460_v27  ;;  %v4062_v43 = vsel %vm523_vm0, %v4060_v34, %v4061_v1 }
 0x3c3   : > { %v5245_v37 = vadd.f32 %v5163_v20, %v5011_v0  ;;  %v4064_v28 = vsel %vm523_vm0, %v4061_v1, %v13939_v17  ;;  %v4422_v61 = vmul.f32 %v10868_v13, %v11696_v58  ;;  %v4143_v24 = vadd.f32 %v4062_v43, %v3869_v45  ;;  %v12498_v0 = vpop.f32.mrb[6].mxu1 }
 0x3c4   : > { %v4144_v19 = vadd.f32 %v4064_v28, %v3870_v50  ;;  %v4296_v20 = vsel %vm852_vm1, %v4294_v33, %v4295_v10  ;;  %v4928_v49 = vadd.f32 %v4844_v54, %v4694_v42  ;;  %v4298_v31 = vsel %vm852_vm1, %v4295_v10, %v13938_v21  ;;  %v12507_v1 = vpop.f32.mrb[7].mxu1 }
 0x3c5   : > { %v5479_v48 = vadd.f32 %v5397_v36, %v5245_v37  ;;  %v4505_v34 = vmul.f32 %v10892_v15, %v12306_v30  ;;  %v4506_v27 = vmul.f32 %v10892_v15, %v11696_v58  ;;  %v4377_v36 = vadd.f32 %v4296_v20, %v4143_v24 }
 0x3c6   : > { %v4378_v45 = vadd.f32 %v4298_v31, %v4144_v19  ;;  %v12512_v50 = vmul.f32 %v10892_v15, %v11802_v8  ;;  %v5012_v54 = vadd.f32 %v4972_v26, %v4928_v49  ;;  %v4739_v10 = vmul.f32 %v10895_v40, %v12306_v30 }
 0x3c7   : > { %v5523_v37 = vadd.f32 %v10963_v23, %v5479_v48  ;;  %v4612_v33 = vrot.slane %v4505_v34, 1  ;;  %v4613_v42 = vrot.slane %v4506_v27, 1  ;;  %v4461_v28 = vadd.f32 %v4421_v51, %v4377_v36 }
 0x3c8   : > { %v4462_v21 = vadd.f32 %v4422_v61, %v4378_v45  ;;  %v14061_v17 = vrot.slane %v12432_v6, 1  ;;  %v4615_v19 = vrot.slane %v12512_v50, 1  ;;  %v4740_v26 = vmul.f32 %v10895_v40, %v11696_v58 }
 0x3c9   : > { %vm5563_vm2 = vcmp.gt.f32.partialorder %v5523_v37, 0.0  ;;  %v5607_v43 = vmul.f32 %v10972_v16, %v5523_v37  ;;  %v4614_v24 = vsel %vm523_vm0, %v4612_v33, %v4613_v42  ;;  %v4741_v30 = vmul.f32 %v10895_v40, %v11802_v8 }
 0x3ca   : > { %v5246_v48 = vadd.f32 %v14061_v17, %v5012_v54  ;;  %v4695_v49 = vadd.f32 %v4614_v24, %v4461_v28  ;;  %v4846_v31 = vrot.slane %v4739_v10, 2  ;;  %v14062_v51 = vrot.slane %v12440_v3, 2 }
 0x3cb   : > { %v5647_v20 = vsel %vm5563_vm2, %v5523_v37, %v5607_v43  ;;  %v4616_v6 = vsel %vm523_vm0, %v4613_v42, %v4615_v19  ;;  %v4847_v17 = vrot.slane %v4740_v26, 2  ;;  %v4849_v36 = vrot.slane %v4741_v30, 2  ;;  %v14065_v42 = vld [vmem:[#allocation51_spill] sm:$0xff] }
 0x3cc   : > { %v5770_v34 = vrot.slane %v5647_v20, 4  ;;  %v5480_v61 = vadd.f32 %v14062_v51, %v5246_v48  ;;  %v4696_v27 = vadd.f32 %v4616_v6, %v4462_v21  ;;  %v4973_v45 = vmul.f32 %v10901_v32, %v12462_v18 }
 0x3cd   : > { %v5057_v37 = vmul.f32 %v10904_v59, %v12462_v18  ;;  %v14063_v50 = vrot.slane %v12448_v35, 4  ;;  %v4848_v3 = vsel %vm852_vm1, %v4846_v31, %v4847_v17  ;;  %v14064_v10 = vrot.slane %v12004_v11, 1 }
 0x3ce   : > { %v5524_v33 = vadd.f32 %v10963_v23, %v5480_v61  ;;  %v14066_v43 = vrot.slane %v14065_v42, 1  ;;  %v4850_v28 = vsel %vm852_vm1, %v4847_v17, %v4849_v36  ;;  %v4929_v48 = vadd.f32 %v4848_v3, %v4695_v49 }
 0x3cf   : > { %v5771_v54 = vsel %vm5710_vm3, %v14063_v50, %v5770_v34  ;;  %v5164_v24 = vrot.slane %v5057_v37, 1  ;;  %v5291_v59 = vmul.f32 %v10913_v57, %v12462_v18  ;;  %v4930_v26 = vadd.f32 %v4850_v28, %v4696_v27  ;;  %v14070_v18 = vld [vmem:[#allocation50_spill] sm:$0xff] }
 0x3d0   : > { %v5168_v21 = vsel %vm523_vm0, %v14066_v43, %v14064_v10  ;;  %8190 = vmatmul.mubr.f32.gmra.mrb[24].mxu1 %v5771_v54  ;;  %vm5564_vm8 = vcmp.gt.f32.partialorder %v5524_v33, 0.0  ;;  %v5608_v35 = vmul.f32 %v10972_v16, %v5524_v33  ;;  %v14067_v20 = vrot.slane %v12011_v9, 2 }
 0x3d1   : > { %v14068_v30 = vrot.slane %v11836_v52, 2  ;;  %v5013_v51 = vadd.f32 %v4973_v45, %v4929_v48  ;;  %v14069_v61 = vmov %v14066_v43  ;;  %v5398_v49 = vrot.slane %v5291_v59, 2 }
 0x3d2   : > { %v5166_v6 = vsel %vm523_vm0, %v5164_v24, %v14069_v61  ;;  %v3871_v17 = vmul.f32 %v10676_v12, %v11596_v39  ;;  %v5648_v57 = vsel %vm5564_vm8, %v5524_v33, %v5608_v35  ;;  %v5014_v37 = vadd.f32 %v14070_v18, %v4930_v26 }
 0x3d3   : > { %v5402_v31 = vsel %vm852_vm1, %v14068_v30, %v14067_v20  ;;  %v3956_v27 = vmul.f32 %v10679_v55, %v11618_v47  ;;  %v4190_v50 = vmul.f32 %v10685_v5, %v11618_v47  ;;  %v5772_v54 = vrot.slane %v5648_v57, 4 }
 0x3d4   : > { %v5247_v3 = vadd.f32 %v5166_v6, %v5013_v51  ;;  %v14071_v45 = vmov %v14068_v30  ;;  %v4423_v42 = vmul.f32 %v10868_v13, %v11802_v8  ;;  %v5248_v43 = vadd.f32 %v5168_v21, %v5014_v37 }
 0x3d5   : > { %v5400_v10 = vsel %vm852_vm1, %v5398_v49, %v14071_v45  ;;  %v4065_v28 = vrot.slane %v3956_v27, 1  ;;  %v4299_v33 = vrot.slane %v4190_v50, 2  ;;  %v4508_v48 = vmul.f32 %v10892_v15, %v14060_v7  ;;  %v14078_v50 = vld [vmem:[#allocation21_spill] sm:$0xff] }
 0x3d6   : > { %v5773_v55 = vsel %vm5710_vm3, %v5770_v34, %v5772_v54  ;;  %v5481_v24 = vadd.f32 %v5400_v10, %v5247_v3  ;;  %v4742_v5 = vmul.f32 %v10895_v40, %v14060_v7  ;;  %v14072_v52 = vrot.slane %v12008_v22, 1  ;;  %v12605_v45 = vpop.f32.mrb[8].mxu1 }
 0x3d7   : > { %v14073_v59 = vrot.slane %v12004_v11, 1  ;;  %8192 = vmatprep.mubr.f32.mxu1 %v5773_v55  ;;  %v5482_v21 = vadd.f32 %v5402_v31, %v5248_v43  ;;  %v14074_v26 = vrot.slane %v12477_v46, 1  ;;  %v14075_v15 = vrot.slane %v12485_v60, 2 }
 0x3d8   : > { %v4617_v30 = vrot.slane %v4508_v48, 1  ;;  %v5525_v51 = vadd.f32 %v10963_v23, %v5481_v24  ;;  %v4851_v61 = vrot.slane %v4742_v5, 2  ;;  %v14076_v6 = vrot.slane %v12015_v25, 2 }
 0x3d9   : > { %v5170_v35 = vsel %vm523_vm0, %v14073_v59, %v14072_v52  ;;  %v4066_v20 = vsel %vm523_vm0, %v14074_v26, %v4065_v28  ;;  %v4300_v34 = vsel %vm852_vm1, %v14075_v15, %v4299_v33  ;;  %v14077_v11 = vrot.slane %v12011_v9, 2 }
 0x3da   : > { %v4145_v40 = vadd.f32 %v4066_v20, %v3871_v17  ;;  %v5526_v31 = vadd.f32 %v10963_v23, %v5482_v21  ;;  %v4618_v46 = vsel %vm523_vm0, %v4615_v19, %v4617_v30  ;;  %v3872_v60 = vmul.f32 %v10676_v12, %v11618_v47 }
 0x3db   : > { %v5404_v49 = vsel %vm852_vm1, %v14077_v11, %v14076_v6  ;;  %v4424_v57 = vmul.f32 %v10868_v13, %v14060_v7  ;;  %vm5565_vm4 = vcmp.gt.f32.partialorder %v5525_v51, 0.0  ;;  %v5609_v17 = vmul.f32 %v10972_v16, %v5525_v51 }
 0x3dc   : > { %v4379_v18 = vadd.f32 %v4300_v34, %v4145_v40  ;;  %v4852_v9 = vsel %vm852_vm1, %v4849_v36, %v4851_v61  ;;  %vm5566_vm5 = vcmp.gt.f32.partialorder %v5526_v31, 0.0  ;;  %v5610_v37 = vmul.f32 %v10972_v16, %v5526_v31  ;;  %v12609_v36 = vld [vmem:[#allocation9] sm:$0xff]  ;;  %v14081_v34 = vld [vmem:[#allocation52_spill] sm:$0xff] }
 0x3dd   : > { %v4146_v27 = vadd.f32 %v4065_v28, %v3872_v60  ;;  %v6028_v19 = vsub.s32 5, %v14078_v50  ;;  %v5649_v54 = vsel %vm5565_vm4, %v5525_v51, %v5609_v17  ;;  %v12600_v12 = vstv %s6150_s24  ;;  %v12614_v28 = vpop.f32.mrb[9].mxu1 }
 0x3de   : > { %v4463_v3 = vadd.f32 %v4423_v42, %v4379_v18  ;;  %v12603_v13 = vadd.s32 4294967292, %v14078_v50  ;;  %v12607_v10 = vsel %vm5566_vm5, %v5526_v31, %v5610_v37  ;;  %v5774_v43 = vrot.slane %v5649_v54, 4  ;;  %v6492_v54 = vld [vmem:[#allocation4 + $0x18] sm:$0x7] }
 0x3df   : > { %v4380_v48 = vadd.f32 %v4299_v33, %v4146_v27  ;;  %v12612_v55 = vrot.slane %v12609_v36, %v6028_v19  ;;  %v5775_v42 = vrot.slane %v12607_v10, 4  ;;  %vm6164_vm6 = vcmp.ge.s32.totalorder %v12600_v12, 0  ;;  %v12754_v33 = vld [vmem:[#allocation4 + $0x1c] sm:$0x7] }
 0x3e0   : > { %v4697_v24 = vadd.f32 %v4618_v46, %v4463_v3  ;;  %vm6174_vm7 = vcmp.lt.s32.totalorder %v12600_v12, 16  ;;  %vm6194_vm10 = vcmp.ge.s32.totalorder %v12603_v13, 0  ;;  %v4976_v21 = vmul.f32 %v10901_v32, %v11990_v63 }
 0x3e1   : > { %v4464_v5 = vadd.f32 %v4424_v57, %v4380_v48  ;;  %v6031_v52 = vadd.f32 %v12109_v41, %v12612_v55  ;;  %vm12621_vm9 = vmand %vm6164_vm6, %vm6174_vm7  ;;  %v6030_v59 = vadd.f32 %v12612_v55, %v12116_v62  ;;  %v5776_v26 = vsel %vm5710_vm3, %v5774_v43, %v5775_v42 }
 0x3e2   : > { %v4931_v20 = vadd.f32 %v4852_v9, %v4697_v24  ;;  %8193 = vmatmul.mubr.f32.gmra.mrb[26].mxu1 %v5776_v26  ;;  %vm6197_vm13 = vmand %vm12621_vm9, %vm6194_vm10  ;;  %v6152_v40 = vadd.s32 1, %v12600_v12  ;;  %v3293_v31 = vadd.s32 16, %v14078_v50  ;;  %vm6380_vm14 = vcmask 1044480  }
 0x3e3   : > { %v4698_v15 = vadd.f32 %v4617_v30, %v4464_v5  ;;  %vm6061_vm11 = vcmp.gt.f32.partialorder %v6031_v52, 0.0  ;;  %v6091_v41 = vmul.f32 %v6031_v52, %v8999_v38  ;;  %vm6060_vm12 = vcmp.gt.f32.partialorder %v6030_v59, 0.0  ;;  %v14084_v5 = vld [vmem:[#allocation23_spill] sm:$0xff] }
 0x3e4   : > { %v5015_v51 = vadd.f32 %v14081_v34, %v4931_v20  ;;  %v6090_v62 = vmul.f32 %v6030_v59, %v8999_v38  ;;  %v14082_v9 = vrot.slane %v12008_v22, 1  ;;  %v12648_v27 = vadd.s32 4294967292, %v3293_v31 }
 0x3e5   : > { %v4932_v32 = vadd.f32 %v4851_v61, %v4698_v15  ;;  %v6121_v63 = vsel %vm6061_vm11, %v6031_v52, %v6091_v41  ;;  %v6032_v61 = vadd.f32 %v12612_v55, %v12242_v14  ;;  %v6033_v3 = vadd.f32 %v12234_v2, %v12612_v55 }
 0x3e6   : > { %v5249_v6 = vadd.f32 %v5170_v35, %v5015_v51  ;;  %v6321_v30 = vsel %vm12621_vm9, %v6121_v63, 0.0  ;;  %v6120_v11 = vsel %vm6060_vm12, %v6030_v59, %v6090_v62  ;;  %vm6165_vm15 = vcmp.ge.s32.totalorder %v6152_v40, 0  ;;  %v14087_v59 = vld [vmem:[#allocation28_spill] sm:$0xff] }
 0x3e7   : > { %v5016_v46 = vadd.f32 %v4976_v21, %v4932_v32  ;;  %v6382_v60 = vrot.slane %v6321_v30, 3  ;;  %v6320_v57 = vsel %vm6197_vm13, %v6120_v11, 0.0  ;;  %vm6175_vm2 = vcmp.lt.s32.totalorder %v6152_v40, 16  ;;  %v14090_v62 = vld [vmem:[#allocation24_spill] sm:$0xff]  ;;  %v14093_v11 = vld [vmem:[#allocation25_spill] sm:$0xff] }
 0x3e8   : > { %v5483_v17 = vadd.f32 %v5404_v49, %v5249_v6  ;;  %v6381_v18 = vrot.slane %v6320_v57, 3  ;;  %v14083_v49 = vrot.slane %v12015_v25, 2  ;;  %vm6062_vm8 = vcmp.gt.f32.partialorder %v6032_v61, 0.0  ;;  %vm12680_vm12 = vmand %vm6165_vm15, %vm6175_vm2 }
 0x3e9   : > { %v5250_v37 = vadd.f32 %v14082_v9, %v5016_v46  ;;  %v6092_v22 = vmul.f32 %v6032_v61, %v8999_v38  ;;  %vm6229_vm5 = vcmp.lt.s32.totalorder %v12648_v27, 16  ;;  %v6035_v48 = vadd.f32 %v12347_v29, %v12612_v55  ;;  %vm12699_vm13 = vmand %vm12680_vm12, %vm6194_vm10  ;;  %v14096_v9 = vld [vmem:[#allocation22_spill] sm:$0xff] }
 0x3ea   : > { %v5527_v35 = vadd.f32 %v10963_v23, %v5483_v17  ;;  %v6383_v19 = vsel %vm6380_vm14, %v6381_v18, %v6382_v60  ;;  %v12663_v2 = vrot.slane %v6492_v54, %v14084_v5  ;;  %vm12669_vm6 = vmand %vm12621_vm9, %vm6229_vm5  ;;  %v6093_v26 = vmul.f32 %v6033_v3, %v8999_v38 }
 0x3eb   : > { %v5484_v43 = vadd.f32 %v14083_v49, %v5250_v37  ;;  %v12674_v21 = vadd.f32 %v6383_v19, %v14087_v59  ;;  %v6122_v29 = vsel %vm6062_vm8, %v6032_v61, %v6092_v22  ;;  %vm6063_vm11 = vcmp.gt.f32.partialorder %v6033_v3, 0.0  ;;  %vm12711_vm15 = vmand %vm12680_vm12, %vm6229_vm5 }
 0x3ec   : > { %vm5567_vm4 = vcmp.gt.f32.partialorder %v5527_v35, 0.0  ;;  %v5611_v14 = vmul.f32 %v10972_v16, %v5527_v35  ;;  %v6322_v15 = vsel %vm12669_vm6, %v6122_v29, 0.0  ;;  %vm6065_vm9 = vcmp.gt.f32.partialorder %v6035_v48, 0.0 }
 0x3ed   : > { %v5528_v24 = vadd.f32 %v10963_v23, %v5484_v43  ;;  %v6095_v41 = vmul.f32 %v6035_v48, %v8999_v38  ;;  %v6384_v32 = vrot.slane %v6322_v15, 3  ;;  %v6535_v40 = vmul.f32 %v12663_v2, %v12674_v21  ;;  %v12722_v61 = vpop.f32.mrb[10].mxu1  ;;  %v7420_v15 = vld [vmem:[#allocation7 + $0x100] sm:$0xff] }
 0x3ee   : > { %v5651_v52 = vsel %vm5567_vm4, %v5527_v35, %v5611_v14  ;;  %v6123_v6 = vsel %vm6063_vm11, %v6033_v3, %v6093_v26  ;;  %v6034_v10 = vadd.f32 %v12612_v55, %v12349_v44  ;;  %v6037_v17 = vadd.f32 %v12498_v0, %v12612_v55  ;;  %v12729_v49 = vpop.f32.mrb[11].mxu1 }
 0x3ef   : > { %v5777_v20 = vrot.slane %v5651_v52, 4  ;;  %vm5568_vm7 = vcmp.gt.f32.partialorder %v5528_v24, 0.0  ;;  %v5612_v23 = vmul.f32 %v10972_v16, %v5528_v24  ;;  %v12691_v16 = vrot.slane %v6492_v54, %v14090_v62 }
 0x3f0   : > { %v6463_v31 = vadd.f32 %v6384_v32, %v14093_v11  ;;  %v6125_v46 = vsel %vm6065_vm9, %v6035_v48, %v6095_v41  ;;  %v12719_v44 = vrot.slane %v6492_v54, %v14096_v9  ;;  %vm6064_vm2 = vcmp.gt.f32.partialorder %v6034_v10, 0.0  ;;  %v7421_v41 = vld [vmem:[#allocation7 + $0x108] sm:$0xff]  ;;  %v7423_v11 = vld [vmem:[#allocation7 + $0x118] sm:$0xff] }
 0x3f1   : > { %v5778_v34 = vsel %vm5710_vm3, %v5775_v42, %v5777_v20  ;;  %v5652_v51 = vsel %vm5568_vm7, %v5528_v24, %v5612_v23  ;;  %v6385_v42 = vsel %vm6380_vm14, %v6382_v60, %v6384_v32  ;;  %v14097_v60 = vld [vmem:[#allocation29_spill] sm:$0xff]  ;;  %v6323_v35 = vsel %vm12699_vm13, %v6123_v6, 0.0 }
 0x3f2   : > { %8195 = vmatprep.mubr.f32.mxu1 %v5778_v34  ;;  %v5779_v63 = vrot.slane %v5652_v51, 4  ;;  %v6462_v37 = vadd.f32 %v6385_v42, %v14097_v60  ;;  %v6537_v19 = vmul.f32 %v12663_v2, %v6463_v31  ;;  %v6661_v3 = vmul.f32 %v12691_v16, %v6463_v31  ;;  %v7422_v42 = vld [vmem:[#allocation7 + $0x110] sm:$0xff] }
 0x3f3   : > { %v6094_v0 = vmul.f32 %v6034_v10, %v8999_v38  ;;  %v6583_v43 = vrot.slane %v6535_v40, 1  ;;  %v6325_v14 = vsel %vm12711_vm15, %v6125_v46, 0.0  ;;  %v6097_v52 = vmul.f32 %v6037_v17, %v8999_v38 }
 0x3f4   : > { %v5780_v18 = vsel %vm5710_vm3, %v5777_v20, %v5779_v63  ;;  %v6536_v54 = vmul.f32 %v12663_v2, %v6462_v37  ;;  %v12733_v22 = vmul.f32 %v12691_v16, %v6462_v37  ;;  %v6586_v48 = vrot.slane %v6537_v19, 1 }
 0x3f5   : > { %8196 = vmatmul.mubr.f32.gmra.mrb[28].mxu1 %v5780_v18  ;;  %v6710_v24 = vrot.slane %v6661_v3, 2  ;;  %v6124_v25 = vsel %vm6064_vm2, %v6034_v10, %v6094_v0  ;;  %vm6067_vm3 = vcmp.gt.f32.partialorder %v6037_v17, 0.0  ;;  %v6153_v29 = vadd.s32 2, %v12600_v12 }
 0x3f6   : > { %v6584_v59 = vrot.slane %v6536_v54, 1  ;;  %v6708_v26 = vrot.slane %v12733_v22, 2  ;;  %v6500_v20 = vmul.f32 %v12719_v44, %v6462_v37  ;;  %v6324_v23 = vsel %vm12680_vm12, %v6124_v25, 0.0  ;;  %v7425_v54 = vld [vmem:[#allocation7 + $0x128] sm:$0xff] }
 0x3f7   : > { %v6389_v63 = vrot.slane %v6325_v14, 3  ;;  %v12752_v40 = vmul.f32 %v12691_v16, %v12674_v21  ;;  %v6386_v6 = vrot.slane %v6323_v35, 3  ;;  %v6127_v10 = vsel %vm6067_vm3, %v6037_v17, %v6097_v52 }
 0x3f8   : > { %v12744_v34 = vsel %vm523_vm0, %v6583_v43, %v6584_v59  ;;  %v6587_v51 = vsel %vm523_vm0, %v6584_v59, %v6586_v48  ;;  %v6711_v32 = vsel %vm852_vm1, %v6708_v26, %v6710_v24  ;;  %v6387_v31 = vrot.slane %v6324_v23, 3  ;;  %v7424_v43 = vld [vmem:[#allocation7 + $0x120] sm:$0xff] }
 0x3f9   : > { %v6640_v30 = vadd.f32 %v6587_v51, %v6500_v20  ;;  %vm6166_vm8 = vcmp.ge.s32.totalorder %v6153_v29, 0  ;;  %vm6176_vm4 = vcmp.lt.s32.totalorder %v6153_v29, 16  ;;  %v8318_v46 = vpack.c.bf16 %v7421_v41, %v7420_v15  ;;  %v7426_v15 = vld [vmem:[#allocation7 + $0x130] sm:$0xff]  ;;  %v7427_v41 = vld [vmem:[#allocation7 + $0x138] sm:$0xff] }
 0x3fa   : > { %vm12758_vm6 = vmand %vm6166_vm8, %vm6176_vm4  ;;  %v6036_v60 = vadd.f32 %v12612_v55, %v12507_v1  ;;  %v6039_v37 = vadd.f32 %v12605_v45, %v12612_v55  ;;  %v6154_v17 = vadd.s32 3, %v12600_v12  ;;  %v12769_v35 = vrot.slane %v12754_v33, %v14084_v5  ;;  %v14100_v1 = vld [vmem:[#allocation30_spill] sm:$0xff] }
 0x3fb   : > { %v12756_v57 = vadd.f32 %v6711_v32, %v6640_v30  ;;  %v12772_v19 = vsel %vm6380_vm14, %v6386_v6, %v6387_v31  ;;  %v12775_v3 = vsel %vm6380_vm14, %v6387_v31, %v6389_v63  ;;  %8319 = vmatprep.subr.bf16.mxu1 %v8318_v46  ;;  %v8322_v0 = vpack.c.bf16 %v7423_v11, %v7422_v42  ;;  %vm12789_vm11 = vmand %vm12758_vm6, %vm6194_vm10 }
 0x3fc   : > { %v6466_v14 = vadd.f32 %v6389_v63, %v14100_v1  ;;  %v12780_v45 = vrot.slane %v12754_v33, %v14090_v62  ;;  %v6327_v48 = vsel %vm12758_vm6, %v6127_v10, 0.0  ;;  %vm6066_vm7 = vcmp.gt.f32.partialorder %v6036_v60, 0.0  ;;  %8321 = vmatpush3.bf16.msra.mxu1 %v8318_v46  ;;  %vm12800_vm15 = vmand %vm12758_vm6, %vm6229_vm5 }
 0x3fd   : > { %v6096_v24 = vmul.f32 %v6036_v60, %v8999_v38  ;;  %vm6069_vm12 = vcmp.gt.f32.partialorder %v6039_v37, 0.0  ;;  %v6099_v52 = vmul.f32 %v6039_v37, %v8999_v38  ;;  %vm6167_vm9 = vcmp.ge.s32.totalorder %v6154_v17, 0  ;;  %8323 = vmatprep.subr.bf16.mxu1 %v8322_v0 }
 0x3fe   : > { %vm6177_vm13 = vcmp.lt.s32.totalorder %v6154_v17, 16  ;;  %v6038_v59 = vadd.f32 %v12612_v55, %v12614_v28  ;;  %v6041_v20 = vadd.f32 %v12722_v61, %v12612_v55  ;;  %v8326_v23 = vpack.c.bf16 %v7425_v54, %v7424_v43  ;;  %v7428_v17 = vld [vmem:[#allocation7 + $0x140] sm:$0xff]  ;;  %v14111_v28 = vld [vmem:[#allocation26_spill] sm:$0xff] }
 0x3ff   : > { %v6392_v51 = vrot.slane %v6327_v48, 3  ;;  %v6126_v32 = vsel %vm6066_vm7, %v6036_v60, %v6096_v24  ;;  %v6129_v63 = vsel %vm6069_vm12, %v6039_v37, %v6099_v52  ;;  %vm12807_vm2 = vmand %vm6167_vm9, %vm6177_vm13  ;;  %v6040_v6 = vadd.f32 %v12612_v55, %v12729_v49 }
 0x400   : > { %v6326_v30 = vsel %vm12789_vm11, %v6126_v32, 0.0  ;;  %vm12819_vm3 = vmand %vm12807_vm2, %vm6194_vm10  ;;  %vm6068_vm8 = vcmp.gt.f32.partialorder %v6038_v59, 0.0  ;;  %v6098_v10 = vmul.f32 %v6038_v59, %v8999_v38  ;;  %8325 = vmatpush3.bf16.msra.mxu1 %v8322_v0  ;;  %vm6071_vm4 = vcmp.gt.f32.partialorder %v6041_v20, 0.0  ;;  %v7429_v0 = vld [vmem:[#allocation7 + $0x148] sm:$0xff] }
 0x401   : > { %v6391_v42 = vrot.slane %v6326_v30, 3  ;;  %v6101_v11 = vmul.f32 %v6041_v20, %v8999_v38  ;;  %vm12829_vm6 = vmand %vm12807_vm2, %vm6229_vm5  ;;  %8327 = vmatprep.subr.bf16.mxu1 %v8326_v23  ;;  %vm6070_vm7 = vcmp.gt.f32.partialorder %v6040_v6, 0.0  ;;  %v8330_v31 = vpack.c.bf16 %v7427_v41, %v7426_v15 }
 0x402   : > { %v12834_v46 = vmul.f32 %v12663_v2, %v6466_v14  ;;  %v12837_v18 = vmul.f32 %v12691_v16, %v6466_v14  ;;  %v6128_v60 = vsel %vm6068_vm8, %v6038_v59, %v6098_v10  ;;  %v6100_v37 = vmul.f32 %v6040_v6, %v8999_v38  ;;  %v7430_v10 = vld [vmem:[#allocation7 + $0x150] sm:$0xff] }
 0x403   : > { %v6393_v43 = vsel %vm6380_vm14, %v6391_v42, %v6392_v51  ;;  %v6329_v54 = vsel %vm12819_vm3, %v6129_v63, 0.0  ;;  %v6328_v1 = vsel %vm12800_vm15, %v6128_v60, 0.0  ;;  %v6131_v48 = vsel %vm6071_vm4, %v6041_v20, %v6101_v11 }
 0x404   : > { %v12847_v24 = vmul.f32 %v12769_v35, %v6466_v14  ;;  %v6394_v25 = vrot.slane %v6328_v1, 3  ;;  %v6331_v52 = vsel %vm12829_vm6, %v6131_v48, 0.0  ;;  %v6130_v59 = vsel %vm6070_vm7, %v6040_v6, %v6100_v37  ;;  %8329 = vmatpush3.bf16.msra.mxu1 %v8326_v23  ;;  %v7431_v6 = vld [vmem:[#allocation7 + $0x158] sm:$0xff]  ;;  %v7434_v48 = vld [vmem:[#allocation7 + $0x170] sm:$0xff] }
 0x405   : > { %v12852_v15 = vmul.f32 %v12780_v45, %v6466_v14  ;;  %v12854_v41 = vrot.slane %v6331_v52, 3  ;;  %v6330_v29 = vsel %vm12807_vm2, %v6130_v59, 0.0  ;;  %8331 = vmatprep.subr.bf16.mxu1 %v8330_v31  ;;  %v8334_v32 = vpack.c.bf16 %v7429_v0, %v7428_v17  ;;  %v14113_v0 = vld [vmem:[#allocation31_spill] sm:$0xff]  ;;  %v7435_v52 = vld [vmem:[#allocation7 + $0x178] sm:$0xff]  ;;  %v14114_v59 = vld [vmem:[#allocation33_spill] sm:$0xff] }
 0x406   : > { %v6396_v20 = vrot.slane %v6329_v54, 3  ;;  %v6395_v63 = vsel %vm6380_vm14, %v6392_v51, %v6394_v25  ;;  %v6397_v30 = vrot.slane %v6330_v29, 3  ;;  %v12860_v61 = vadd.s32 4, %v12600_v12  ;;  %v14112_v51 = vld [vmem:[#allocation27_spill] sm:$0xff] }
 0x407   : > { %v6499_v14 = vmul.f32 %v12719_v44, %v12674_v21  ;;  %v6707_v23 = vrot.slane %v12752_v40, 2  ;;  %v12868_v11 = vadd.f32 %v12772_v19, %v14111_v28  ;;  %v12873_v60 = vadd.f32 %v12775_v3, %v14112_v51  ;;  %v7432_v40 = vld [vmem:[#allocation7 + $0x160] sm:$0xff]  ;;  %v7433_v3 = vld [vmem:[#allocation7 + $0x168] sm:$0xff]  ;;  %v6494_v28 = vld [vmem:[#allocation4 + $0x20] sm:$0x7] }
 0x408   : > { %v12876_v37 = vsel %vm6380_vm14, %v6396_v20, %v6397_v30  ;;  %v12880_v21 = vsel %vm6380_vm14, %v6397_v30, %v12854_v41  ;;  %8333 = vmatpush3.bf16.msra.mxu1 %v8330_v31  ;;  %v6870_v17 = vrot.slane %v12847_v24, 1  ;;  %v6994_v19 = vrot.slane %v12852_v15, 2  ;;  %v14115_v20 = vld [vmem:[#allocation32_spill] sm:$0xff] }
 0x409   : > { %v12885_v54 = vadd.f32 %v6393_v43, %v14113_v0  ;;  %8335 = vmatprep.subr.bf16.mxu1 %v8334_v32  ;;  %v8338_v1 = vpack.c.bf16 %v7431_v6, %v7430_v10  ;;  %v12888_v29 = vadd.f32 %v6394_v25, %v14114_v59  ;;  %vm6168_vm11 = vcmp.ge.s32.totalorder %v12860_v61, 0 }
 0x40a   : > { %vm6178_vm12 = vcmp.lt.s32.totalorder %v12860_v61, 16  ;;  %v6639_v31 = vadd.f32 %v12744_v34, %v6499_v14  ;;  %v12894_v30 = vadd.f32 %v6395_v63, %v14115_v20  ;;  %v6709_v43 = vsel %vm852_vm1, %v6707_v23, %v6708_v26 }
 0x40b   : > { %v12901_v10 = vrot.slane %v12754_v33, %v14096_v9  ;;  %v6819_v25 = vmul.f32 %v12769_v35, %v12868_v11  ;;  %v8342_v6 = vpack.c.bf16 %v7433_v3, %v7432_v40  ;;  %v8346_v51 = vpack.c.bf16 %v7435_v52, %v7434_v48  ;;  %vm12944_vm9 = vmand %vm6168_vm11, %vm6178_vm12 }
 0x40c   : > { %8337 = vmatpush3.bf16.msra.mxu1 %v8334_v32  ;;  %v6763_v0 = vadd.f32 %v6709_v43, %v6639_v31  ;;  %v6820_v34 = vmul.f32 %v12769_v35, %v12873_v60  ;;  %v6943_v26 = vmul.f32 %v12780_v45, %v12868_v11  ;;  %v6944_v33 = vmul.f32 %v12780_v45, %v12873_v60  ;;  %vm12962_vm2 = vmand %vm12944_vm9, %vm6194_vm10 }
 0x40d   : > { %8339 = vmatprep.subr.bf16.mxu1 %v8338_v1  ;;  %v6783_v22 = vmul.f32 %v12901_v10, %v12868_v11  ;;  %v6867_v63 = vrot.slane %v6819_v25, 1  ;;  %v12914_v32 = vrot.slane %v6494_v28, %v14096_v9  ;;  %v12917_v23 = vrot.slane %v6494_v28, %v14084_v5 }
 0x40e   : > { %v6868_v14 = vrot.slane %v6820_v34, 1  ;;  %v12920_v40 = vrot.slane %v6494_v28, %v14090_v62  ;;  %v6991_v48 = vrot.slane %v6943_v26, 2  ;;  %v6992_v52 = vrot.slane %v6944_v33, 2 }
 0x40f   : > { %v6799_v3 = vadd.f32 %v6783_v22, %v6763_v0  ;;  %v7349_v59 = vsub.s32 6, %v14078_v50  ;;  %v7067_v20 = vmul.f32 %v12914_v32, %v12885_v54  ;;  %v7103_v43 = vmul.f32 %v12917_v23, %v12885_v54  ;;  %v8173_v0 = vpop.f32.mrb[12].mxu1 }
 0x410   : > { %8341 = vmatpush3.bf16.msra.mxu1 %v8338_v1  ;;  %v6869_v31 = vsel %vm523_vm0, %v6867_v63, %v6868_v14  ;;  %v7104_v5 = vmul.f32 %v12917_v23, %v12894_v30  ;;  %v6993_v28 = vsel %vm852_vm1, %v6991_v48, %v6992_v52  ;;  %v7227_v25 = vmul.f32 %v12920_v40, %v12885_v54  ;;  %v5937_v48 = vpop.f32.mrb[13].mxu1 }
 0x411   : > { %8343 = vmatprep.subr.bf16.mxu1 %v8342_v6  ;;  %v6923_v62 = vadd.f32 %v6869_v31, %v6799_v3  ;;  %v7228_v1 = vmul.f32 %v12920_v40, %v12894_v30  ;;  %v7151_v34 = vrot.slane %v7103_v43, 1  ;;  %v12936_v63 = vrot.slane %v12609_v36, %v7349_v59 }
 0x412   : > { %v7152_v22 = vrot.slane %v7104_v5, 1  ;;  %v7385_v26 = vsub.s32 7, %v14078_v50  ;;  %v6043_v33 = vadd.f32 %v8173_v0, %v12612_v55  ;;  %v7275_v49 = vrot.slane %v7227_v25, 2 }
 0x413   : > { %v7047_v31 = vadd.f32 %v6993_v28, %v6923_v62  ;;  %v7276_v43 = vrot.slane %v7228_v1, 2  ;;  %v6042_v5 = vadd.f32 %v12612_v55, %v5937_v48  ;;  %v6784_v0 = vmul.f32 %v12901_v10, %v12873_v60 }
 0x414   : > { %8345 = vmatpush3.bf16.msra.mxu1 %v8342_v6  ;;  %v7153_v59 = vsel %vm523_vm0, %v7151_v34, %v7152_v22  ;;  %v12951_v50 = vrot.slane %v12609_v36, %v7385_v26  ;;  %vm6073_vm13 = vcmp.gt.f32.partialorder %v6043_v33, 0.0  ;;  %v6103_v61 = vmul.f32 %v6043_v33, %v8999_v38 }
 0x415   : > { %8347 = vmatprep.subr.bf16.mxu1 %v8346_v51  ;;  %v7083_v42 = vadd.f32 %v7067_v20, %v7047_v31  ;;  %v7277_v62 = vsel %vm852_vm1, %v7275_v49, %v7276_v43  ;;  %vm6072_vm15 = vcmp.gt.f32.partialorder %v6042_v5, 0.0  ;;  %v6102_v28 = vmul.f32 %v6042_v5, %v8999_v38 }
 0x416   : > { %v6800_v6 = vadd.f32 %v6784_v0, %v12756_v57  ;;  %v6871_v25 = vsel %vm523_vm0, %v6868_v14, %v6870_v17  ;;  %v6133_v20 = vsel %vm6073_vm13, %v6043_v33, %v6103_v61  ;;  %v6995_v49 = vsel %vm852_vm1, %v6992_v52, %v6994_v19 }
 0x417   : > { %v7207_v1 = vadd.f32 %v7153_v59, %v7083_v42  ;;  %v7068_v34 = vmul.f32 %v12914_v32, %v12894_v30  ;;  %v6333_v26 = vsel %vm12944_vm9, %v6133_v20, 0.0  ;;  %v6132_v48 = vsel %vm6072_vm15, %v6042_v5, %v6102_v28  ;;  %vm13095_vm15 = vmand %vm12944_vm9, %vm6229_vm5 }
 0x418   : > { %8349 = vmatpush3.bf16.msra.mxu1 %v8346_v51  ;;  %v6924_v31 = vadd.f32 %v6871_v25, %v6800_v6  ;;  %v7105_v57 = vmul.f32 %v12917_v23, %v12888_v29  ;;  %v12979_v24 = vrot.slane %v6333_v26, 3  ;;  %v6332_v42 = vsel %vm12962_vm2, %v6132_v48, 0.0  ;;  %v14120_v51 = vld [vmem:[#allocation36_spill] sm:$0xff]  ;;  %v14121_v25 = vld [vmem:[#allocation34_spill] sm:$0xff] }
 0x419   : > { %v7331_v15 = vadd.f32 %v7277_v62, %v7207_v1  ;;  %v7229_v17 = vmul.f32 %v12920_v40, %v12888_v29  ;;  %v6401_v19 = vrot.slane %v6332_v42, 3  ;;  %v12986_v14 = vadd.s32 5, %v12600_v12 }
 0x41a   : > { %v7048_v52 = vadd.f32 %v6995_v49, %v6924_v31  ;;  %v7154_v33 = vrot.slane %v7105_v57, 1  ;;  %v12990_v5 = vadd.f32 %v12854_v41, %v14120_v51  ;;  %v6538_v61 = vmul.f32 %v12663_v2, %v12868_v11  ;;  %v14122_v49 = vld [vmem:[#allocation35_spill] sm:$0xff] }
 0x41b   : > { %v7351_v59 = vadd.f32 %v12936_v63, %v7331_v15  ;;  %v7278_v0 = vrot.slane %v7229_v17, 2  ;;  %v12997_v62 = vmul.f32 %v12663_v2, %v12888_v29  ;;  %v13001_v28 = vsel %vm6380_vm14, %v6401_v19, %v12979_v24 }
 0x41c   : > { %v7084_v36 = vadd.f32 %v7068_v34, %v7048_v52  ;;  %v7155_v6 = vsel %vm523_vm0, %v7152_v22, %v7154_v33  ;;  %v13006_v41 = vadd.f32 %v12876_v37, %v14121_v25  ;;  %v13012_v26 = vadd.f32 %v12880_v21, %v14122_v49 }
 0x41d   : > { %vm7367_vm3 = vcmp.gt.f32.partialorder %v7351_v59, 0.0  ;;  %v7387_v20 = vmul.f32 %v12951_v50, %v7351_v59  ;;  %v7279_v1 = vsel %vm852_vm1, %v7276_v43, %v7278_v0  ;;  %v6539_v31 = vmul.f32 %v12663_v2, %v12873_v60 }
 0x41e   : > { %v7208_v48 = vadd.f32 %v7155_v6, %v7084_v36  ;;  %v6588_v34 = vrot.slane %v6538_v61, 1  ;;  %vm6169_vm8 = vcmp.ge.s32.totalorder %v12986_v14, 0  ;;  %vm6179_vm4 = vcmp.lt.s32.totalorder %v12986_v14, 16 }
 0x41f   : > { %v7403_v37 = vsel %vm7367_vm3, %v7351_v59, %v7387_v20  ;;  %v6501_v22 = vmul.f32 %v12719_v44, %v12868_v11  ;;  %v6662_v43 = vmul.f32 %v12691_v16, %v12868_v11  ;;  %v6663_v21 = vmul.f32 %v12691_v16, %v12873_v60  ;;  %vm13065_vm7 = vmand %vm6169_vm8, %vm6179_vm4 }
 0x420   : > { %8230 = vmatprep.mubr.f32.mxu1 %v7403_v37  ;;  %v7332_v57 = vadd.f32 %v7279_v1, %v7208_v48  ;;  %v6589_v42 = vrot.slane %v6539_v31, 1  ;;  %v6822_v15 = vmul.f32 %v12769_v35, %v12885_v54  ;;  %v6823_v17 = vmul.f32 %v12769_v35, %v12894_v30  ;;  %vm13085_vm12 = vmand %vm13065_vm7, %vm6194_vm10 }
 0x421   : > { %v6712_v19 = vrot.slane %v6662_v43, 2  ;;  %v6713_v52 = vrot.slane %v6663_v21, 2  ;;  %v6946_v33 = vmul.f32 %v12780_v45, %v12885_v54  ;;  %v6947_v11 = vmul.f32 %v12780_v45, %v12894_v30  ;;  %vm6247_vm8 = vmand %vm13065_vm7, %vm6229_vm5 }
 0x422   : > { %v7352_v51 = vadd.f32 %v12936_v63, %v7332_v57  ;;  %v6590_v59 = vsel %vm523_vm0, %v6588_v34, %v6589_v42  ;;  %v6872_v0 = vrot.slane %v6822_v15, 1  ;;  %v6873_v61 = vrot.slane %v6823_v17, 1 }
 0x423   : > { %v6641_v36 = vadd.f32 %v6590_v59, %v6501_v22  ;;  %v6714_v6 = vsel %vm852_vm1, %v6712_v19, %v6713_v52  ;;  %v6996_v25 = vrot.slane %v6946_v33, 2  ;;  %v6997_v20 = vrot.slane %v6947_v11, 2 }
 0x424   : > { %vm7368_vm6 = vcmp.gt.f32.partialorder %v7352_v51, 0.0  ;;  %v7388_v1 = vmul.f32 %v12951_v50, %v7352_v51  ;;  %v6785_v49 = vmul.f32 %v12901_v10, %v12885_v54  ;;  %v6874_v48 = vsel %vm523_vm0, %v6872_v0, %v6873_v61 }
 0x425   : > { %v6765_v31 = vadd.f32 %v6714_v6, %v6641_v36  ;;  %v6998_v37 = vsel %vm852_vm1, %v6996_v25, %v6997_v20  ;;  %v7106_v34 = vmul.f32 %v12917_v23, %v13006_v41  ;;  %v7107_v22 = vmul.f32 %v12917_v23, %v13012_v26 }
 0x426   : > { %v7404_v43 = vsel %vm7368_vm6, %v7352_v51, %v7388_v1  ;;  %v7230_v21 = vmul.f32 %v12920_v40, %v13006_v41  ;;  %v7231_v57 = vmul.f32 %v12920_v40, %v13012_v26  ;;  %v6502_v15 = vmul.f32 %v12719_v44, %v12873_v60 }
 0x427   : > { %8231 = vmatmul.mubr.f32.vlgmr.msra.gmra.mrb[30].mxu1 %v7404_v43  ;;  %v6801_v17 = vadd.f32 %v6785_v49, %v6765_v31  ;;  %v7156_v19 = vrot.slane %v7106_v34, 1  ;;  %v7157_v33 = vrot.slane %v7107_v22, 1  ;;  %v14123_v11 = vrot.slane %v12834_v46, 1  ;;  %v8176_v31 = vpop.f32.mrb[14].mxu1 }
 0x428   : > { %v7280_v0 = vrot.slane %v7230_v21, 2  ;;  %v7281_v36 = vrot.slane %v7231_v57, 2  ;;  %v14124_v6 = vrot.slane %v12837_v18, 2  ;;  %v6786_v60 = vmul.f32 %v12901_v10, %v12894_v30  ;;  %v5947_v22 = vpop.f32.mrb[15].mxu1 }
 0x429   : > { %v6592_v59 = vsel %vm523_vm0, %v6589_v42, %v14123_v11  ;;  %v6925_v1 = vadd.f32 %v6874_v48, %v6801_v17  ;;  %v7158_v9 = vsel %vm523_vm0, %v7156_v19, %v7157_v33  ;;  %v6824_v49 = vmul.f32 %v12769_v35, %v12888_v29 }
 0x42a   : > { %v6642_v51 = vadd.f32 %v6592_v59, %v6502_v15  ;;  %v6716_v25 = vsel %vm852_vm1, %v6713_v52, %v14124_v6  ;;  %v7069_v18 = vmul.f32 %v12914_v32, %v13006_v41  ;;  %v7282_v42 = vsel %vm852_vm1, %v7280_v0, %v7281_v36 }
 0x42b   : > { %v6948_v48 = vmul.f32 %v12780_v45, %v12888_v29  ;;  %v6045_v34 = vadd.f32 %v8176_v31, %v12612_v55  ;;  %v7049_v43 = vadd.f32 %v6998_v37, %v6925_v1  ;;  %v6875_v21 = vrot.slane %v6824_v49, 1 }
 0x42c   : > { %v6766_v52 = vadd.f32 %v6716_v25, %v6642_v51  ;;  %v7108_v14 = vmul.f32 %v12917_v23, %v12990_v5  ;;  %v6044_v57 = vadd.f32 %v12612_v55, %v5947_v22  ;;  %v7232_v19 = vmul.f32 %v12920_v40, %v12990_v5 }
 0x42d   : > { %v6999_v17 = vrot.slane %v6948_v48, 2  ;;  %vm6075_vm11 = vcmp.gt.f32.partialorder %v6045_v34, 0.0  ;;  %v6105_v11 = vmul.f32 %v6045_v34, %v8999_v38  ;;  %v7085_v59 = vadd.f32 %v7069_v18, %v7049_v43 }
 0x42e   : > { %v6802_v15 = vadd.f32 %v6786_v60, %v6766_v52  ;;  %v6876_v0 = vsel %vm523_vm0, %v6873_v61, %v6875_v21  ;;  %vm6074_vm13 = vcmp.gt.f32.partialorder %v6044_v57, 0.0  ;;  %v6104_v51 = vmul.f32 %v6044_v57, %v8999_v38 }
 0x42f   : > { %v7000_v1 = vsel %vm852_vm1, %v6997_v20, %v6999_v17  ;;  %v6135_v60 = vsel %vm6075_vm11, %v6045_v34, %v6105_v11  ;;  %v7209_v49 = vadd.f32 %v7158_v9, %v7085_v59  ;;  %v7070_v31 = vmul.f32 %v12914_v32, %v13012_v26  ;;  %v14131_v17 = vld [vmem:[#allocation37_spill] sm:$0xff] }
 0x430   : > { %v6926_v25 = vadd.f32 %v6876_v0, %v6802_v15  ;;  %v7159_v61 = vrot.slane %v7108_v14, 1  ;;  %v6335_v18 = vsel %vm13085_vm12, %v6135_v60, 0.0  ;;  %v6134_v52 = vsel %vm6074_vm13, %v6044_v57, %v6104_v51  ;;  %v14133_v0 = vld [vmem:[#allocation38_spill] sm:$0xff] }
 0x431   : > { %v7283_v22 = vrot.slane %v7232_v19, 2  ;;  %v13106_v3 = vmul.f32 %v12663_v2, %v12990_v5  ;;  %v6334_v43 = vsel %vm13095_vm15, %v6134_v52, 0.0  ;;  %v7333_v20 = vadd.f32 %v7282_v42, %v7209_v49  ;;  %v14132_v42 = vld [vmem:[#allocation39_spill] sm:$0xff] }
 0x432   : > { %v7050_v48 = vadd.f32 %v7000_v1, %v6926_v25  ;;  %v7160_v9 = vsel %vm523_vm0, %v7157_v33, %v7159_v61  ;;  %v6596_v34 = vrot.slane %v12997_v62, 1  ;;  %v6404_v21 = vrot.slane %v6334_v43, 3 }
 0x433   : > { %v7284_v15 = vsel %vm852_vm1, %v7281_v36, %v7283_v22  ;;  %v13115_v57 = vadd.f32 %v13001_v28, %v14131_v17  ;;  %v13117_v19 = vrot.slane %v6335_v18, 3  ;;  %v7353_v11 = vadd.f32 %v12936_v63, %v7333_v20 }
 0x434   : > { %v7086_v14 = vadd.f32 %v7070_v31, %v7050_v48  ;;  %v6541_v37 = vmul.f32 %v12663_v2, %v12885_v54  ;;  %v6405_v33 = vsel %vm6380_vm14, %v12979_v24, %v6404_v21  ;;  %v13125_v62 = vadd.f32 %v6404_v21, %v14132_v42 }
 0x435   : > { %v6542_v36 = vmul.f32 %v12663_v2, %v12894_v30  ;;  %v13130_v28 = vadd.f32 %v6405_v33, %v14133_v0  ;;  %vm7369_vm9 = vcmp.gt.f32.partialorder %v7353_v11, 0.0  ;;  %v7389_v51 = vmul.f32 %v12951_v50, %v7353_v11 }
 0x436   : > { %v7210_v59 = vadd.f32 %v7160_v9, %v7086_v14  ;;  %v6503_v6 = vmul.f32 %v12719_v44, %v12885_v54  ;;  %v6593_v1 = vrot.slane %v6541_v37, 1  ;;  %v6665_v24 = vmul.f32 %v12691_v16, %v12885_v54 }
 0x437   : > { %v6594_v60 = vrot.slane %v6542_v36, 1  ;;  %v13139_v49 = vmul.f32 %v12663_v2, %v13125_v62  ;;  %v7405_v31 = vsel %vm7369_vm9, %v7353_v11, %v7389_v51  ;;  %v6666_v61 = vmul.f32 %v12691_v16, %v12894_v30 }
 0x438   : > { %v7334_v25 = vadd.f32 %v7284_v15, %v7210_v59  ;;  %v6825_v18 = vmul.f32 %v12769_v35, %v13006_v41  ;;  %8233 = vmatprep.mubr.f32.mxu1 %v7405_v31  ;;  %v6717_v22 = vrot.slane %v6665_v24, 2  ;;  %v6787_v54 = vmul.f32 %v12901_v10, %v13006_v41 }
 0x439   : > { %v6595_v48 = vsel %vm523_vm0, %v6593_v1, %v6594_v60  ;;  %v6718_v20 = vrot.slane %v6666_v61, 2  ;;  %v6826_v9 = vmul.f32 %v12769_v35, %v13012_v26  ;;  %v6949_v15 = vmul.f32 %v12780_v45, %v13006_v41 }
 0x43a   : > { %v7354_v52 = vadd.f32 %v12936_v63, %v7334_v25  ;;  %v6643_v43 = vadd.f32 %v6595_v48, %v6503_v6  ;;  %v6877_v21 = vrot.slane %v6825_v18, 1  ;;  %v6950_v17 = vmul.f32 %v12780_v45, %v13012_v26 }
 0x43b   : > { %v6719_v11 = vsel %vm852_vm1, %v6717_v22, %v6718_v20  ;;  %v6878_v37 = vrot.slane %v6826_v9, 1  ;;  %v7071_v33 = vmul.f32 %v12914_v32, %v13115_v57  ;;  %v7109_v42 = vmul.f32 %v12917_v23, %v13115_v57 }
 0x43c   : > { %vm7370_vm2 = vcmp.gt.f32.partialorder %v7354_v52, 0.0  ;;  %v7390_v14 = vmul.f32 %v12951_v50, %v7354_v52  ;;  %v6767_v36 = vadd.f32 %v6719_v11, %v6643_v43  ;;  %v7001_v0 = vrot.slane %v6949_v15, 2 }
 0x43d   : > { %v7002_v51 = vrot.slane %v6950_v17, 2  ;;  %v6879_v6 = vsel %vm523_vm0, %v6877_v21, %v6878_v37  ;;  %v7110_v25 = vmul.f32 %v12917_v23, %v13130_v28  ;;  %v7161_v1 = vrot.slane %v7109_v42, 1  ;;  %v8179_v21 = vpop.f32.mrb[16].mxu1 }
 0x43e   : > { %v7406_v59 = vsel %vm7370_vm2, %v7354_v52, %v7390_v14  ;;  %v7233_v24 = vmul.f32 %v12920_v40, %v13115_v57  ;;  %v6803_v31 = vadd.f32 %v6787_v54, %v6767_v36  ;;  %v13169_v18 = vmul.f32 %v12920_v40, %v13130_v28  ;;  %v5957_v42 = vpop.f32.mrb[17].mxu1 }
 0x43f   : > { %8234 = vmatmul.mubr.f32.gmra.mrb[32].mxu1 %v7406_v59  ;;  %v7003_v61 = vsel %vm852_vm1, %v7001_v0, %v7002_v51  ;;  %v6504_v52 = vmul.f32 %v12719_v44, %v12894_v30  ;;  %v7162_v48 = vrot.slane %v7110_v25, 1  ;;  %v6597_v43 = vsel %vm523_vm0, %v6594_v60, %v6596_v34 }
 0x440   : > { %v7285_v22 = vrot.slane %v7233_v24, 2  ;;  %v6667_v9 = vmul.f32 %v12691_v16, %v12888_v29  ;;  %v6927_v14 = vadd.f32 %v6879_v6, %v6803_v31  ;;  %v7286_v54 = vrot.slane %v13169_v18, 2 }
 0x441   : > { %v6644_v15 = vadd.f32 %v6597_v43, %v6504_v52  ;;  %v6788_v17 = vmul.f32 %v12901_v10, %v13012_v26  ;;  %v6047_v11 = vadd.f32 %v8179_v21, %v12612_v55  ;;  %v7163_v30 = vsel %vm523_vm0, %v7161_v1, %v7162_v48 }
 0x442   : > { %v6720_v59 = vrot.slane %v6667_v9, 2  ;;  %v6827_v34 = vmul.f32 %v12769_v35, %v12990_v5  ;;  %v6046_v60 = vadd.f32 %v12612_v55, %v5957_v42  ;;  %v7051_v29 = vadd.f32 %v7003_v61, %v6927_v14 }
 0x443   : > { %v7287_v36 = vsel %vm852_vm1, %v7285_v22, %v7286_v54  ;;  %v6951_v0 = vmul.f32 %v12780_v45, %v12990_v5  ;;  %vm6077_vm3 = vcmp.gt.f32.partialorder %v6047_v11, 0.0  ;;  %v6107_v6 = vmul.f32 %v6047_v11, %v8999_v38 }
 0x444   : > { %v6721_v25 = vsel %vm852_vm1, %v6718_v20, %v6720_v59  ;;  %v6880_v1 = vrot.slane %v6827_v34, 1  ;;  %vm6076_vm4 = vcmp.gt.f32.partialorder %v6046_v60, 0.0  ;;  %v6106_v24 = vmul.f32 %v6046_v60, %v8999_v38 }
 0x445   : > { %v7087_v31 = vadd.f32 %v7071_v33, %v7051_v29  ;;  %v6768_v61 = vadd.f32 %v6721_v25, %v6644_v15  ;;  %v6137_v18 = vsel %vm6077_vm3, %v6047_v11, %v6107_v6  ;;  %v7004_v22 = vrot.slane %v6951_v0, 2 }
 0x446   : > { %v6881_v52 = vsel %vm523_vm0, %v6878_v37, %v6880_v1  ;;  %v7072_v43 = vmul.f32 %v12914_v32, %v13130_v28  ;;  %v6337_v9 = vsel %vm6247_vm8, %v6137_v18, 0.0  ;;  %v6136_v21 = vsel %vm6076_vm4, %v6046_v60, %v6106_v24  ;;  %v14134_v60 = vld [vmem:[#allocation42_spill] sm:$0xff] }
 0x447   : > { %v7211_v14 = vadd.f32 %v7163_v30, %v7087_v31  ;;  %v6804_v42 = vadd.f32 %v6788_v17, %v6768_v61  ;;  %v6409_v8 = vrot.slane %v6337_v9, 3  ;;  %v6336_v20 = vsel %vm13065_vm7, %v6136_v21, 0.0  ;;  %v14136_v9 = vld [vmem:[#allocation41_spill] sm:$0xff] }
 0x448   : > { %v7005_v59 = vsel %vm852_vm1, %v7002_v51, %v7004_v22  ;;  %v7111_v33 = vmul.f32 %v12917_v23, %v13125_v62  ;;  %v6407_v15 = vrot.slane %v6336_v20, 3  ;;  %v7235_v34 = vmul.f32 %v12920_v40, %v13125_v62 }
 0x449   : > { %v7335_v11 = vadd.f32 %v7287_v36, %v7211_v14  ;;  %v6928_v37 = vadd.f32 %v6881_v52, %v6804_v42  ;;  %v6601_v29 = vrot.slane %v13106_v3, 1  ;;  %v13206_v30 = vadd.f32 %v6409_v8, %v14134_v60  ;;  %v14135_v52 = vld [vmem:[#allocation40_spill] sm:$0xff] }
 0x44a   : > { %v13209_v17 = vadd.s32 6, %v12600_v12  ;;  %v7164_v46 = vrot.slane %v7111_v33, 1  ;;  %v6408_v51 = vsel %vm6380_vm14, %v13117_v19, %v6407_v15  ;;  %v6410_v0 = vsel %vm6380_vm14, %v6407_v15, %v6409_v8 }
 0x44b   : > { %v7355_v36 = vadd.f32 %v12936_v63, %v7335_v11  ;;  %v7052_v6 = vadd.f32 %v7005_v59, %v6928_v37  ;;  %v6606_v25 = vrot.slane %v13139_v49, 1  ;;  %v13217_v1 = vadd.s32 7, %v12600_v12 }
 0x44c   : > { %v7165_v24 = vsel %vm523_vm0, %v7162_v48, %v7164_v46  ;;  %v6505_v31 = vmul.f32 %v12719_v44, %v13006_v41  ;;  %v7288_v19 = vrot.slane %v7235_v34, 2  ;;  %v13225_v8 = vmul.f32 %v12663_v2, %v13206_v30 }
 0x44d   : > { %vm7371_vm6 = vcmp.gt.f32.partialorder %v7355_v36, 0.0  ;;  %v7391_v61 = vmul.f32 %v12951_v50, %v7355_v36  ;;  %v7088_v18 = vadd.f32 %v7072_v43, %v7052_v6  ;;  %v13228_v22 = vadd.f32 %v6408_v51, %v14135_v52 }
 0x44e   : > { %v13231_v21 = vadd.f32 %v6410_v0, %v14136_v9  ;;  %v6544_v48 = vmul.f32 %v12663_v2, %v13006_v41  ;;  %v7289_v20 = vsel %vm852_vm1, %v7286_v54, %v7288_v19  ;;  %v6545_v43 = vmul.f32 %v12663_v2, %v13012_v26 }
 0x44f   : > { %v7407_v14 = vsel %vm7371_vm6, %v7355_v36, %v7391_v61  ;;  %v7212_v42 = vadd.f32 %v7165_v24, %v7088_v18  ;;  %v6668_v33 = vmul.f32 %v12691_v16, %v13006_v41  ;;  %v6669_v15 = vmul.f32 %v12691_v16, %v13012_v26 }
 0x450   : > { %8236 = vmatprep.mubr.f32.mxu1 %v7407_v14  ;;  %v6598_v59 = vrot.slane %v6544_v48, 1  ;;  %v6789_v11 = vmul.f32 %v12901_v10, %v13115_v57  ;;  %v6599_v34 = vrot.slane %v6545_v43, 1  ;;  %v6828_v60 = vmul.f32 %v12769_v35, %v13115_v57 }
 0x451   : > { %v7336_v37 = vadd.f32 %v7289_v20, %v7212_v42  ;;  %v6829_v54 = vmul.f32 %v12769_v35, %v13130_v28  ;;  %v6722_v46 = vrot.slane %v6668_v33, 2  ;;  %v6723_v51 = vrot.slane %v6669_v15, 2 }
 0x452   : > { %v6952_v0 = vmul.f32 %v12780_v45, %v13115_v57  ;;  %v6953_v41 = vmul.f32 %v12780_v45, %v13130_v28  ;;  %v6600_v6 = vsel %vm523_vm0, %v6598_v59, %v6599_v34  ;;  %v6882_v24 = vrot.slane %v6828_v60, 1 }
 0x453   : > { %v7356_v36 = vadd.f32 %v12936_v63, %v7336_v37  ;;  %v6883_v61 = vrot.slane %v6829_v54, 1  ;;  %v6645_v18 = vadd.f32 %v6600_v6, %v6505_v31  ;;  %v6724_v19 = vsel %vm852_vm1, %v6722_v46, %v6723_v51 }
 0x454   : > { %v7006_v52 = vrot.slane %v6952_v0, 2  ;;  %v7007_v9 = vrot.slane %v6953_v41, 2  ;;  %v7073_v42 = vmul.f32 %v12914_v32, %v13228_v22  ;;  %v7112_v59 = vmul.f32 %v12917_v23, %v13228_v22 }
 0x455   : > { %vm7372_vm7 = vcmp.gt.f32.partialorder %v7356_v36, 0.0  ;;  %v7392_v48 = vmul.f32 %v12951_v50, %v7356_v36  ;;  %v6884_v14 = vsel %vm523_vm0, %v6882_v24, %v6883_v61  ;;  %v6769_v20 = vadd.f32 %v6724_v19, %v6645_v18 }
 0x456   : > { %v7008_v43 = vsel %vm852_vm1, %v7006_v52, %v7007_v9  ;;  %v7113_v31 = vmul.f32 %v12917_v23, %v13231_v21  ;;  %v7236_v15 = vmul.f32 %v12920_v40, %v13228_v22  ;;  %v7237_v37 = vmul.f32 %v12920_v40, %v13231_v21 }
 0x457   : > { %v7408_v33 = vsel %vm7372_vm7, %v7356_v36, %v7392_v48  ;;  %v6506_v60 = vmul.f32 %v12719_v44, %v13012_v26  ;;  %vm6170_vm11 = vcmp.ge.s32.totalorder %v13209_v17, 0  ;;  %vm6180_vm12 = vcmp.lt.s32.totalorder %v13209_v17, 16 }
 0x458   : > { %8237 = vmatmul.mubr.f32.gmra.mrb[34].mxu1 %v7408_v33  ;;  %v6805_v54 = vadd.f32 %v6789_v11, %v6769_v20  ;;  %v7166_v46 = vrot.slane %v7112_v59, 1  ;;  %v7167_v0 = vrot.slane %v7113_v31, 1  ;;  %v6602_v41 = vsel %vm523_vm0, %v6599_v34, %v6601_v29  ;;  %vm13317_vm13 = vmand %vm6170_vm11, %vm6180_vm12 }
 0x459   : > { %v7290_v36 = vrot.slane %v7236_v15, 2  ;;  %v7291_v6 = vrot.slane %v7237_v37, 2  ;;  %v6646_v24 = vadd.f32 %v6602_v41, %v6506_v60  ;;  %v6670_v18 = vmul.f32 %v12691_v16, %v12990_v5  ;;  %vm13336_vm2 = vmand %vm13317_vm13, %vm6194_vm10 }
 0x45a   : > { %v6929_v19 = vadd.f32 %v6884_v14, %v6805_v54  ;;  %v7168_v26 = vsel %vm523_vm0, %v7166_v46, %v7167_v0  ;;  %v6790_v52 = vmul.f32 %v12901_v10, %v13130_v28  ;;  %v6830_v11 = vmul.f32 %v12769_v35, %v13125_v62 }
 0x45b   : > { %v7292_v48 = vsel %vm852_vm1, %v7290_v36, %v7291_v6  ;;  %v6725_v3 = vrot.slane %v6670_v18, 2  ;;  %v6954_v29 = vmul.f32 %v12780_v45, %v13125_v62  ;;  %v7074_v34 = vmul.f32 %v12914_v32, %v13231_v21 }
 0x45c   : > { %v7053_v20 = vadd.f32 %v7008_v43, %v6929_v19  ;;  %v6885_v5 = vrot.slane %v6830_v11, 1  ;;  %v7114_v14 = vmul.f32 %v12917_v23, %v13206_v30  ;;  %v7238_v59 = vmul.f32 %v12920_v40, %v13206_v30 }
 0x45d   : > { %v6726_v31 = vsel %vm852_vm1, %v6723_v51, %v6725_v3  ;;  %v7009_v33 = vrot.slane %v6954_v29, 2  ;;  %v6507_v15 = vmul.f32 %v12719_v44, %v13115_v57  ;;  %v6547_v37 = vmul.f32 %v12663_v2, %v13115_v57 }
 0x45e   : > { %v7089_v60 = vadd.f32 %v7073_v42, %v7053_v20  ;;  %v6770_v54 = vadd.f32 %v6726_v31, %v6646_v24  ;;  %v6886_v43 = vsel %vm523_vm0, %v6883_v61, %v6885_v5  ;;  %v7169_v46 = vrot.slane %v7114_v14, 1 }
 0x45f   : > { %v7010_v41 = vsel %vm852_vm1, %v7007_v9, %v7009_v33  ;;  %v7293_v36 = vrot.slane %v7238_v59, 2  ;;  %v6548_v18 = vmul.f32 %v12663_v2, %v13130_v28  ;;  %v6603_v19 = vrot.slane %v6547_v37, 1 }
 0x460   : > { %v7213_v51 = vadd.f32 %v7168_v26, %v7089_v60  ;;  %v6806_v11 = vadd.f32 %v6790_v52, %v6770_v54  ;;  %v7170_v3 = vsel %vm523_vm0, %v7167_v0, %v7169_v46  ;;  %v6671_v29 = vmul.f32 %v12691_v16, %v13115_v57  ;;  %v8182_v20 = vpop.f32.mrb[18].mxu1 }
 0x461   : > { %v7294_v42 = vsel %vm852_vm1, %v7291_v6, %v7293_v36  ;;  %v6604_v24 = vrot.slane %v6548_v18, 1  ;;  %v13306_v61 = vmul.f32 %v12691_v16, %v13130_v28  ;;  %v6791_v9 = vmul.f32 %v12901_v10, %v13228_v22  ;;  %v5967_v6 = vpop.f32.mrb[19].mxu1 }
 0x462   : > { %v7337_v5 = vadd.f32 %v7292_v48, %v7213_v51  ;;  %v6930_v14 = vadd.f32 %v6886_v43, %v6806_v11  ;;  %v6727_v26 = vrot.slane %v6671_v29, 2  ;;  %v6831_v0 = vmul.f32 %v12769_v35, %v13228_v22 }
 0x463   : > { %v6049_v52 = vadd.f32 %v8182_v20, %v12612_v55  ;;  %v6605_v59 = vsel %vm523_vm0, %v6603_v19, %v6604_v24  ;;  %v6728_v48 = vrot.slane %v13306_v61, 2  ;;  %v13325_v31 = vmul.f32 %v12769_v35, %v13231_v21 }
 0x464   : > { %v6048_v33 = vadd.f32 %v12612_v55, %v5967_v6  ;;  %v7357_v37 = vadd.f32 %v12936_v63, %v7337_v5  ;;  %v7054_v60 = vadd.f32 %v7010_v41, %v6930_v14  ;;  %v6647_v54 = vadd.f32 %v6605_v59, %v6507_v15 }
 0x465   : > { %vm6079_vm15 = vcmp.gt.f32.partialorder %v6049_v52, 0.0  ;;  %v6109_v17 = vmul.f32 %v6049_v52, %v8999_v38  ;;  %v6729_v43 = vsel %vm852_vm1, %v6727_v26, %v6728_v48  ;;  %v6887_v46 = vrot.slane %v6831_v0, 1 }
 0x466   : > { %vm6078_vm9 = vcmp.gt.f32.partialorder %v6048_v33, 0.0  ;;  %v6108_v36 = vmul.f32 %v6048_v33, %v8999_v38  ;;  %vm7373_vm3 = vcmp.gt.f32.partialorder %v7357_v37, 0.0  ;;  %v7393_v15 = vmul.f32 %v12951_v50, %v7357_v37 }
 0x467   : > { %v6139_v41 = vsel %vm6079_vm15, %v6049_v52, %v6109_v17  ;;  %v7090_v19 = vadd.f32 %v7074_v34, %v7054_v60  ;;  %v6771_v51 = vadd.f32 %v6729_v43, %v6647_v54  ;;  %v6888_v11 = vrot.slane %v13325_v31, 1  ;;  %v14141_v43 = vld [vmem:[#allocation43_spill] sm:$0xff] }
 0x468   : > { %v6339_v29 = vsel %vm13317_vm13, %v6139_v41, 0.0  ;;  %v6138_v61 = vsel %vm6078_vm9, %v6048_v33, %v6108_v36  ;;  %vm6171_vm8 = vcmp.ge.s32.totalorder %v13217_v1, 0  ;;  %v7409_v20 = vsel %vm7373_vm3, %v7357_v37, %v7393_v15  ;;  %vm6250_vm9 = vmand %vm13317_vm13, %vm6229_vm5 }
 0x469   : > { %v6955_v5 = vmul.f32 %v12780_v45, %v13228_v22  ;;  %v13347_v14 = vrot.slane %v6339_v29, 3  ;;  %v6338_v26 = vsel %vm13336_vm2, %v6138_v61, 0.0  ;;  %8239 = vmatprep.mubr.f32.mxu1 %v7409_v20  ;;  %v7214_v34 = vadd.f32 %v7170_v3, %v7090_v19 }
 0x46a   : > { %v6807_v0 = vadd.f32 %v6791_v9, %v6771_v51  ;;  %v6411_v52 = vrot.slane %v6338_v26, 3  ;;  %v6889_v6 = vsel %vm523_vm0, %v6887_v46, %v6888_v11  ;;  %v6956_v59 = vmul.f32 %v12780_v45, %v13231_v21 }
 0x46b   : > { %v7011_v31 = vrot.slane %v6955_v5, 2  ;;  %v7338_v33 = vadd.f32 %v7294_v42, %v7214_v34  ;;  %v6508_v60 = vmul.f32 %v12719_v44, %v13130_v28  ;;  %v6607_v54 = vsel %vm523_vm0, %v6604_v24, %v6606_v25 }
 0x46c   : > { %v6931_v37 = vadd.f32 %v6889_v6, %v6807_v0  ;;  %v6413_v3 = vsel %vm6380_vm14, %v6411_v52, %v13347_v14  ;;  %vm6181_vm4 = vcmp.lt.s32.totalorder %v13217_v1, 16  ;;  %v7012_v9 = vrot.slane %v6956_v59, 2 }
 0x46d   : > { %v6673_v17 = vmul.f32 %v12691_v16, %v13125_v62  ;;  %v13365_v46 = vadd.f32 %v6413_v3, %v14141_v43  ;;  %v7358_v42 = vadd.f32 %v12936_v63, %v7338_v33  ;;  %v6648_v36 = vadd.f32 %v6607_v54, %v6508_v60  ;;  %vm13399_vm7 = vmand %vm6171_vm8, %vm6181_vm4 }
 0x46e   : > { %v6833_v28 = vmul.f32 %v12769_v35, %v13206_v30  ;;  %v6611_v49 = vrot.slane %v13225_v8, 1  ;;  %v7013_v25 = vsel %vm852_vm1, %v7011_v31, %v7012_v9  ;;  %v6957_v18 = vmul.f32 %v12780_v45, %v13206_v30  ;;  %vm13418_vm12 = vmand %vm13399_vm7, %vm6194_vm10 }
 0x46f   : > { %v6730_v24 = vrot.slane %v6673_v17, 2  ;;  %vm7374_vm6 = vcmp.gt.f32.partialorder %v7358_v42, 0.0  ;;  %v7394_v62 = vmul.f32 %v12951_v50, %v7358_v42  ;;  %v7055_v15 = vadd.f32 %v7013_v25, %v6931_v37  ;;  %vm6253_vm2 = vmand %vm13399_vm7, %vm6229_vm5 }
 0x470   : > { %v7075_v41 = vmul.f32 %v12914_v32, %v13365_v46  ;;  %v13379_v19 = vmul.f32 %v12917_v23, %v13365_v46  ;;  %v6792_v8 = vmul.f32 %v12901_v10, %v13231_v21  ;;  %v6890_v29 = vrot.slane %v6833_v28, 1  ;;  %v8185_v6 = vpop.f32.mrb[20].mxu1 }
 0x471   : > { %v6731_v51 = vsel %vm852_vm1, %v6728_v48, %v6730_v24  ;;  %v7410_v61 = vsel %vm7374_vm6, %v7358_v42, %v7394_v62  ;;  %v7014_v26 = vrot.slane %v6957_v18, 2  ;;  %v13388_v34 = vmul.f32 %v12920_v40, %v13365_v46  ;;  %v5977_v54 = vpop.f32.mrb[21].mxu1 }
 0x472   : > { %v13384_v20 = vadd.f32 %v7075_v41, %v7055_v15  ;;  %v6772_v5 = vadd.f32 %v6731_v51, %v6648_v36  ;;  %8240 = vmatmul.mubr.f32.gmra.mrb[36].mxu1 %v7410_v61  ;;  %v6891_v0 = vsel %vm523_vm0, %v6888_v11, %v6890_v29  ;;  %v6509_v52 = vmul.f32 %v12719_v44, %v13228_v22 }
 0x473   : > { %v6550_v48 = vmul.f32 %v12663_v2, %v13228_v22  ;;  %v7015_v33 = vsel %vm852_vm1, %v7012_v9, %v7014_v26  ;;  %v6551_v11 = vmul.f32 %v12663_v2, %v13231_v21  ;;  %v6674_v37 = vmul.f32 %v12691_v16, %v13228_v22 }
 0x474   : > { %v6808_v31 = vadd.f32 %v6792_v8, %v6772_v5  ;;  %v6051_v60 = vadd.f32 %v8185_v6, %v12612_v55  ;;  %v7171_v3 = vrot.slane %v13379_v19, 1  ;;  %v6675_v1 = vmul.f32 %v12691_v16, %v13231_v21 }
 0x475   : > { %v6608_v17 = vrot.slane %v6550_v48, 1  ;;  %v6050_v43 = vadd.f32 %v12612_v55, %v5977_v54  ;;  %v6609_v36 = vrot.slane %v6551_v11, 1  ;;  %v6732_v9 = vrot.slane %v6674_v37, 2 }
 0x476   : > { %v6932_v42 = vadd.f32 %v6891_v0, %v6808_v31  ;;  %vm6081_vm11 = vcmp.gt.f32.partialorder %v6051_v60, 0.0  ;;  %v6111_v28 = vmul.f32 %v6051_v60, %v8999_v38  ;;  %v6733_v25 = vrot.slane %v6675_v1, 2 }
 0x477   : > { %v6834_v24 = vmul.f32 %v12769_v35, %v13365_v46  ;;  %vm6080_vm15 = vcmp.gt.f32.partialorder %v6050_v43, 0.0  ;;  %v6110_v18 = vmul.f32 %v6050_v43, %v8999_v38  ;;  %v6610_v15 = vsel %vm523_vm0, %v6608_v17, %v6609_v36  ;;  %v14146_v17 = vld [vmem:[#allocation45_spill] sm:$0xff] }
 0x478   : > { %v7056_v62 = vadd.f32 %v7015_v33, %v6932_v42  ;;  %v6141_v41 = vsel %vm6081_vm11, %v6051_v60, %v6111_v28  ;;  %v7295_v51 = vrot.slane %v13388_v34, 2  ;;  %v6649_v8 = vadd.f32 %v6610_v15, %v6509_v52 }
 0x479   : > { %v6734_v29 = vsel %vm852_vm1, %v6732_v9, %v6733_v25  ;;  %v6341_v61 = vsel %vm13418_vm12, %v6141_v41, 0.0  ;;  %v6140_v5 = vsel %vm6080_vm15, %v6050_v43, %v6110_v18  ;;  %v6958_v26 = vmul.f32 %v12780_v45, %v13365_v46 }
 0x47a   : > { %v6510_v57 = vmul.f32 %v12719_v44, %v13231_v21  ;;  %v6340_v0 = vsel %vm6250_vm9, %v6140_v5, 0.0  ;;  %v6773_v48 = vadd.f32 %v6734_v29, %v6649_v8  ;;  %v6793_v6 = vmul.f32 %v12901_v10, %v13365_v46 }
 0x47b   : > { %v6612_v34 = vsel %vm523_vm0, %v6609_v36, %v6611_v49  ;;  %v6414_v52 = vrot.slane %v6340_v0, 3  ;;  %v6892_v31 = vrot.slane %v6834_v24, 1  ;;  %v6676_v11 = vmul.f32 %v12691_v16, %v13206_v30  ;;  %v14147_v30 = vld [vmem:[#allocation44_spill] sm:$0xff] }
 0x47c   : > { %v6650_v33 = vadd.f32 %v6612_v34, %v6510_v57  ;;  %v13443_v37 = vrot.slane %v6341_v61, 3  ;;  %v6809_v60 = vadd.f32 %v6793_v6, %v6773_v48  ;;  %v13447_v54 = vmul.f32 %v12663_v2, %v13365_v46 }
 0x47d   : > { %v13451_v21 = vmul.f32 %v12691_v16, %v13365_v46  ;;  %v6415_v49 = vsel %vm6380_vm14, %v13347_v14, %v6414_v52  ;;  %v13456_v1 = vadd.f32 %v6414_v52, %v14146_v17  ;;  %v7016_v43 = vrot.slane %v6958_v26, 2 }
 0x47e   : > { %v6735_v42 = vrot.slane %v6676_v11, 2  ;;  %v13459_v36 = vadd.f32 %v6415_v49, %v14147_v30  ;;  %v13463_v9 = vmul.f32 %v12719_v44, %v13365_v46  ;;  %v6613_v28 = vrot.slane %v13447_v54, 1 }
 0x47f   : > { %v6737_v22 = vrot.slane %v13451_v21, 2  ;;  %v13469_v24 = vmul.f32 %v12663_v2, %v13456_v1  ;;  %v7117_v14 = vmul.f32 %v12917_v23, %v13456_v1  ;;  %v7241_v18 = vmul.f32 %v12920_v40, %v13456_v1 }
 0x480   : > { %v6736_v15 = vsel %vm852_vm1, %v6733_v25, %v6735_v42  ;;  %v7116_v46 = vmul.f32 %v12917_v23, %v13459_v36  ;;  %v7240_v41 = vmul.f32 %v12920_v40, %v13459_v36  ;;  %v7076_v8 = vmul.f32 %v12914_v32, %v13459_v36 }
 0x481   : > { %v6835_v29 = vmul.f32 %v12769_v35, %v13459_v36  ;;  %v6616_v61 = vrot.slane %v13469_v24, 1  ;;  %v7174_v5 = vrot.slane %v7117_v14, 1  ;;  %v7298_v26 = vrot.slane %v7241_v18, 2 }
 0x482   : > { %v6959_v57 = vmul.f32 %v12780_v45, %v13459_v36  ;;  %v7172_v25 = vrot.slane %v7116_v46, 1  ;;  %v7296_v0 = vrot.slane %v7240_v41, 2  ;;  %v7092_v48 = vadd.f32 %v7076_v8, %v7056_v62 }
 0x483   : > { %v6893_v6 = vrot.slane %v6835_v29, 1  ;;  %v6774_v52 = vadd.f32 %v6736_v15, %v6650_v33  ;;  %v6794_v11 = vmul.f32 %v12901_v10, %v13459_v36  ;;  %v6836_v49 = vmul.f32 %v12769_v35, %v13456_v1 }
 0x484   : > { %v7017_v34 = vrot.slane %v6959_v57, 2  ;;  %v7173_v17 = vsel %vm523_vm0, %v7171_v3, %v7172_v25  ;;  %v7297_v42 = vsel %vm852_vm1, %v7295_v51, %v7296_v0  ;;  %v7175_v30 = vsel %vm523_vm0, %v7172_v25, %v7174_v5 }
 0x485   : > { %v7299_v14 = vsel %vm852_vm1, %v7296_v0, %v7298_v26  ;;  %v7215_v62 = vadd.f32 %v7173_v17, %v13384_v20  ;;  %v7216_v18 = vadd.f32 %v7175_v30, %v7092_v48  ;;  %v6894_v33 = vsel %vm523_vm0, %v6892_v31, %v6893_v6 }
 0x486   : > { %v7018_v15 = vsel %vm852_vm1, %v7016_v43, %v7017_v34  ;;  %v6933_v46 = vadd.f32 %v6894_v33, %v6809_v60  ;;  %v6810_v41 = vadd.f32 %v6794_v11, %v6774_v52  ;;  %v6895_v8 = vrot.slane %v6836_v49, 1  ;;  %v8188_v3 = vpop.f32.mrb[22].mxu1 }
 0x487   : > { %v6960_v19 = vmul.f32 %v12780_v45, %v13456_v1  ;;  %v7339_v29 = vadd.f32 %v7297_v42, %v7215_v62  ;;  %v7340_v51 = vadd.f32 %v7299_v14, %v7216_v18  ;;  %v6554_v5 = vmul.f32 %v12663_v2, %v13459_v36  ;;  %v5987_v26 = vpop.f32.mrb[23].mxu1 }
 0x488   : > { %v13506_v20 = vmul.f32 %v12691_v16, %v13459_v36  ;;  %v6053_v31 = vadd.f32 %v8188_v3, %v12612_v55  ;;  %v7057_v43 = vadd.f32 %v7018_v15, %v6933_v46  ;;  %v6896_v60 = vsel %vm523_vm0, %v6893_v6, %v6895_v8 }
 0x489   : > { %v7019_v57 = vrot.slane %v6960_v19, 2  ;;  %v6052_v25 = vadd.f32 %v12612_v55, %v5987_v26  ;;  %v7359_v0 = vadd.f32 %v12936_v63, %v7339_v29  ;;  %v7360_v48 = vadd.f32 %v12936_v63, %v7340_v51 }
 0x48a   : > { %v6934_v52 = vadd.f32 %v6896_v60, %v6810_v41  ;;  %vm6083_vm13 = vcmp.gt.f32.partialorder %v6053_v31, 0.0  ;;  %v6113_v11 = vmul.f32 %v6053_v31, %v8999_v38  ;;  %v6614_v17 = vrot.slane %v6554_v5, 1 }
 0x48b   : > { %v7020_v49 = vsel %vm852_vm1, %v7017_v34, %v7019_v57  ;;  %vm6082_vm3 = vcmp.gt.f32.partialorder %v6052_v25, 0.0  ;;  %v6112_v6 = vmul.f32 %v6052_v25, %v8999_v38  ;;  %vm7375_vm8 = vcmp.gt.f32.partialorder %v7359_v0, 0.0 }
 0x48c   : > { %v7395_v42 = vmul.f32 %v12951_v50, %v7359_v0  ;;  %v6143_v30 = vsel %vm6083_vm13, %v6053_v31, %v6113_v11  ;;  %vm7376_vm4 = vcmp.gt.f32.partialorder %v7360_v48, 0.0  ;;  %v7396_v14 = vmul.f32 %v12951_v50, %v7360_v48  ;;  %v14148_v31 = vld [vmem:[#allocation46_spill] sm:$0xff] }
 0x48d   : > { %v7058_v62 = vadd.f32 %v7020_v49, %v6934_v52  ;;  %v6343_v18 = vsel %vm6253_vm2, %v6143_v30, 0.0  ;;  %v6142_v33 = vsel %vm6082_vm3, %v6052_v25, %v6112_v6  ;;  %v6615_v46 = vsel %vm523_vm0, %v6613_v28, %v6614_v17 }
 0x48e   : > { %v7411_v15 = vsel %vm7375_vm8, %v7359_v0, %v7395_v42  ;;  %v6419_v34 = vrot.slane %v6343_v18, 3  ;;  %v6342_v41 = vsel %vm13399_vm7, %v6142_v33, 0.0  ;;  %v7412_v8 = vsel %vm7376_vm4, %v7360_v48, %v7396_v14 }
 0x48f   : > { %8242 = vmatprep.mubr.f32.mxu1 %v7411_v15  ;;  %v6651_v19 = vadd.f32 %v6615_v46, %v13463_v9  ;;  %v6417_v3 = vrot.slane %v6342_v41, 3  ;;  %v6738_v29 = vrot.slane %v13506_v20, 2  ;;  %v6512_v51 = vmul.f32 %v12719_v44, %v13459_v36 }
 0x490   : > { %8243 = vmatmul.mubr.f32.gmra.mrb[38].mxu1 %v7412_v8  ;;  %v6617_v54 = vsel %vm523_vm0, %v6614_v17, %v6616_v61  ;;  %v13535_v28 = vadd.f32 %v6419_v34, %v11422_v56  ;;  %v6679_v59 = vmul.f32 %v12691_v16, %v13456_v1  ;;  %v13554_v1 = vadd.s32 8, %v12600_v12 }
 0x491   : > { %v6418_v9 = vsel %vm6380_vm14, %v13443_v37, %v6417_v3  ;;  %v6420_v5 = vsel %vm6380_vm14, %v6417_v3, %v6419_v34  ;;  %v6739_v20 = vsel %vm852_vm1, %v6737_v22, %v6738_v29  ;;  %v6652_v36 = vadd.f32 %v6617_v54, %v6512_v51 }
 0x492   : > { %v13546_v24 = vadd.f32 %v6418_v9, %v14148_v31  ;;  %v13549_v61 = vadd.f32 %v6420_v5, %v11420_v4  ;;  %v7120_v56 = vmul.f32 %v12917_v23, %v13535_v28  ;;  %v7244_v37 = vmul.f32 %v12920_v40, %v13535_v28 }
 0x493   : > { %v6775_v26 = vadd.f32 %v6739_v20, %v6651_v19  ;;  %v6740_v21 = vrot.slane %v6679_v59, 2  ;;  %v6839_v57 = vmul.f32 %v12769_v35, %v13535_v28  ;;  %vm6172_vm6 = vcmp.ge.s32.totalorder %v13554_v1, 0 }
 0x494   : > { %v7077_v22 = vmul.f32 %v12914_v32, %v13546_v24  ;;  %v7118_v60 = vmul.f32 %v12917_v23, %v13546_v24  ;;  %v7119_v4 = vmul.f32 %v12917_v23, %v13549_v61  ;;  %v7242_v25 = vmul.f32 %v12920_v40, %v13546_v24 }
 0x495   : > { %v7243_v0 = vmul.f32 %v12920_v40, %v13549_v61  ;;  %v7078_v48 = vmul.f32 %v12914_v32, %v13549_v61  ;;  %v7179_v52 = vrot.slane %v7120_v56, 1  ;;  %v7303_v6 = vrot.slane %v7244_v37, 2 }
 0x496   : > { %v7093_v11 = vadd.f32 %v7077_v22, %v7057_v43  ;;  %v7176_v49 = vrot.slane %v7118_v60, 1  ;;  %v7177_v17 = vrot.slane %v7119_v4, 1  ;;  %v7300_v42 = vrot.slane %v7242_v25, 2 }
 0x497   : > { %v7301_v30 = vrot.slane %v7243_v0, 2  ;;  %v7094_v14 = vadd.f32 %v7078_v48, %v7058_v62  ;;  %v6795_v18 = vmul.f32 %v12901_v10, %v13546_v24  ;;  %v6837_v46 = vmul.f32 %v12769_v35, %v13546_v24 }
 0x498   : > { %v7178_v33 = vsel %vm523_vm0, %v7176_v49, %v7177_v17  ;;  %v7180_v15 = vsel %vm523_vm0, %v7177_v17, %v7179_v52  ;;  %v6838_v34 = vmul.f32 %v12769_v35, %v13549_v61  ;;  %vm6182_vm7 = vcmp.lt.s32.totalorder %v13554_v1, 16 }
 0x499   : > { %v7217_v43 = vadd.f32 %v7178_v33, %v7093_v11  ;;  %v7302_v62 = vsel %vm852_vm1, %v7300_v42, %v7301_v30  ;;  %v7218_v41 = vadd.f32 %v7180_v15, %v7094_v14  ;;  %v7304_v8 = vsel %vm852_vm1, %v7301_v30, %v7303_v6  ;;  %vm13620_vm15 = vmand %vm6172_vm6, %vm6182_vm7 }
 0x49a   : > { %v6811_v19 = vadd.f32 %v6795_v18, %v6775_v26  ;;  %v6897_v3 = vrot.slane %v6837_v46, 1  ;;  %v6898_v51 = vrot.slane %v6838_v34, 1  ;;  %v6961_v54 = vmul.f32 %v12780_v45, %v13546_v24  ;;  %vm6221_vm2 = vmand %vm13620_vm15, %vm6194_vm10 }
 0x49b   : > { %v7341_v59 = vadd.f32 %v7302_v62, %v7217_v43  ;;  %v7342_v9 = vadd.f32 %v7304_v8, %v7218_v41  ;;  %v6962_v5 = vmul.f32 %v12780_v45, %v13549_v61  ;;  %v6741_v20 = vsel %vm852_vm1, %v6738_v29, %v6740_v21  ;;  %vm6256_vm8 = vmand %vm13620_vm15, %vm6229_vm5 }
 0x49c   : > { %v6899_v31 = vsel %vm523_vm0, %v6897_v3, %v6898_v51  ;;  %v7021_v56 = vrot.slane %v6961_v54, 2  ;;  %v6776_v37 = vadd.f32 %v6741_v20, %v6652_v36  ;;  %v6796_v22 = vmul.f32 %v12901_v10, %v13549_v61 }
 0x49d   : > { %v7361_v26 = vadd.f32 %v12936_v63, %v7341_v59  ;;  %v7362_v60 = vadd.f32 %v12936_v63, %v7342_v9  ;;  %v6935_v4 = vadd.f32 %v6899_v31, %v6811_v19  ;;  %v7022_v25 = vrot.slane %v6962_v5, 2 }
 0x49e   : > { %v6558_v0 = vmul.f32 %v12663_v2, %v13535_v28  ;;  %v6812_v48 = vadd.f32 %v6796_v22, %v6776_v37  ;;  %v6900_v52 = vrot.slane %v6839_v57, 1  ;;  %v6963_v29 = vmul.f32 %v12780_v45, %v13535_v28 }
 0x49f   : > { %vm7377_vm11 = vcmp.gt.f32.partialorder %v7361_v26, 0.0  ;;  %v7397_v36 = vmul.f32 %v12951_v50, %v7361_v26  ;;  %vm7378_vm12 = vcmp.gt.f32.partialorder %v7362_v60, 0.0  ;;  %v7398_v21 = vmul.f32 %v12951_v50, %v7362_v60 }
 0x4a0   : > { %v7023_v11 = vsel %vm852_vm1, %v7021_v56, %v7022_v25  ;;  %v6901_v49 = vsel %vm523_vm0, %v6898_v51, %v6900_v52  ;;  %v7024_v17 = vrot.slane %v6963_v29, 2  ;;  %v6556_v6 = vmul.f32 %v12663_v2, %v13546_v24 }
 0x4a1   : > { %v7413_v42 = vsel %vm7377_vm11, %v7361_v26, %v7397_v36  ;;  %v7414_v30 = vsel %vm7378_vm12, %v7362_v60, %v7398_v21  ;;  %v7059_v57 = vadd.f32 %v7023_v11, %v6935_v4  ;;  %v6936_v14 = vadd.f32 %v6901_v49, %v6812_v48 }
 0x4a2   : > { %8245 = vmatprep.mubr.f32.mxu1 %v7413_v42  ;;  %v7025_v18 = vsel %vm852_vm1, %v7022_v25, %v7024_v17  ;;  %v6557_v33 = vmul.f32 %v12663_v2, %v13549_v61  ;;  %v6618_v15 = vrot.slane %v6556_v6, 1  ;;  %v6680_v46 = vmul.f32 %v12691_v16, %v13546_v24 }
 0x4a3   : > { %v6621_v34 = vrot.slane %v6558_v0, 1  ;;  %v8191_v43 = vpop.f32.mrb[24].mxu1  ;;  %8246 = vmatmul.mubr.f32.gmra.mrb[40].mxu1 %v7414_v30  ;;  %v13609_v62 = vadd.f32 %v7025_v18, %v6936_v14  ;;  %v6681_v41 = vmul.f32 %v12691_v16, %v13549_v61  ;;  %v6682_v8 = vmul.f32 %v12691_v16, %v13535_v28 }
 0x4a4   : > { %v6055_v19 = vadd.f32 %v8191_v43, %v12612_v55  ;;  %v5997_v3 = vpop.f32.mrb[25].mxu1  ;;  %v6513_v51 = vmul.f32 %v12719_v44, %v13546_v24  ;;  %v6619_v54 = vrot.slane %v6557_v33, 1  ;;  %v6742_v59 = vrot.slane %v6680_v46, 2 }
 0x4a5   : > { %v6054_v9 = vadd.f32 %v12612_v55, %v5997_v3  ;;  %v6743_v5 = vrot.slane %v6681_v41, 2  ;;  %v6514_v16 = vmul.f32 %v12719_v44, %v13549_v61  ;;  %v6745_v28 = vrot.slane %v6682_v8, 2 }
 0x4a6   : > { %vm6085_vm9 = vcmp.gt.f32.partialorder %v6055_v19, 0.0  ;;  %v6115_v1 = vmul.f32 %v6055_v19, %v8999_v38  ;;  %v6620_v20 = vsel %vm523_vm0, %v6618_v15, %v6619_v54  ;;  %v6622_v31 = vsel %vm523_vm0, %v6619_v54, %v6621_v34 }
 0x4a7   : > { %vm6084_vm13 = vcmp.gt.f32.partialorder %v6054_v9, 0.0  ;;  %v6114_v56 = vmul.f32 %v6054_v9, %v8999_v38  ;;  %v6653_v24 = vadd.f32 %v6620_v20, %v6513_v51  ;;  %v6744_v37 = vsel %vm852_vm1, %v6742_v59, %v6743_v5 }
 0x4a8   : > { %v6145_v44 = vsel %vm6085_vm9, %v6055_v19, %v6115_v1  ;;  %v6654_v61 = vadd.f32 %v6622_v31, %v6514_v16  ;;  %v6746_v22 = vsel %vm852_vm1, %v6743_v5, %v6745_v28 }
 0x4a9   : > { %v6345_v26 = vsel %vm13620_vm15, %v6145_v44, 0.0  ;;  %v6144_v60 = vsel %vm6084_vm13, %v6054_v9, %v6114_v56  ;;  %v6777_v4 = vadd.f32 %v6744_v37, %v6653_v24 }
 0x4aa   : > { %v6422_v25 = vrot.slane %v6345_v26, 3  ;;  %v6344_v0 = vsel %vm6221_vm2, %v6144_v60, 0.0  ;;  %v13641_v48 = vadd.f32 %v6746_v22, %v6654_v61 }
 0x4ab   : > { %v6421_v52 = vrot.slane %v6344_v0, 3 }
 0x4ad   : > { %v6423_v29 = vsel %vm6380_vm14, %v6421_v52, %v6422_v25 }
 0x4ae   : > { %v6485_v36 = vadd.f32 %v6423_v29, %v14054_v53  ;;  %v6160_v53 = vadd.s32 9, %v12600_v12 }
 0x4b0   : > { %v7079_v21 = vmul.f32 %v12914_v32, %v6485_v36  ;;  %v6797_v11 = vmul.f32 %v12901_v10, %v6485_v36  ;;  %v7121_v33 = vmul.f32 %v12917_v23, %v6485_v36  ;;  %v6840_v34 = vmul.f32 %v12769_v35, %v6485_v36 }
 0x4b1   : > { %vm6173_vm4 = vcmp.ge.s32.totalorder %v6160_v53, 0  ;;  %vm6183_vm6 = vcmp.lt.s32.totalorder %v6160_v53, 16  ;;  %v6964_v41 = vmul.f32 %v12780_v45, %v6485_v36 }
 0x4b2   : > { %v7095_v49 = vadd.f32 %v7079_v21, %v7059_v57  ;;  %v6813_v17 = vadd.f32 %v6797_v11, %v6777_v4  ;;  %v7245_v57 = vmul.f32 %v12920_v40, %v6485_v36  ;;  %v7181_v12 = vrot.slane %v7121_v33, 1  ;;  %vm13677_vm11 = vmand %vm6173_vm4, %vm6183_vm6 }
 0x4b3   : > { %v6902_v54 = vrot.slane %v6840_v34, 1  ;;  %v7026_v24 = vrot.slane %v6964_v41, 2  ;;  %vm13693_vm12 = vmand %vm13677_vm11, %vm6194_vm10 }
 0x4b4   : > { %v7305_v2 = vrot.slane %v7245_v57, 2  ;;  %vm6259_vm9 = vmand %vm13677_vm11, %vm6229_vm5 }
 0x4b5   : > { %v8194_v6 = vpop.f32.mrb[26].mxu1 }
 0x4b6   : > { %v6007_v42 = vpop.f32.mrb[27].mxu1  ;;  %v6057_v15 = vadd.f32 %v8194_v6, %v12612_v55 }
 0x4b7   : > { %v6056_v30 = vadd.f32 %v12612_v55, %v6007_v42 }
 0x4b8   : > { %vm6087_vm7 = vcmp.gt.f32.partialorder %v6057_v15, 0.0  ;;  %v6117_v3 = vmul.f32 %v6057_v15, %v8999_v38 }
 0x4b9   : > { %vm6086_vm3 = vcmp.gt.f32.partialorder %v6056_v30, 0.0  ;;  %v6116_v14 = vmul.f32 %v6056_v30, %v8999_v38 }
 0x4ba   : > { %v6147_v26 = vsel %vm6087_vm7, %v6057_v15, %v6117_v3 }
 0x4bb   : > { %v6146_v18 = vsel %vm6086_vm3, %v6056_v30, %v6116_v14 }
 0x4bc   : > { %v6346_v46 = vsel %vm6256_vm8, %v6146_v18, 0.0  ;;  %v14156_v18 = vld [vmem:[#allocation22_spill] sm:$0xff] }
 0x4bd   : > { %v6424_v43 = vrot.slane %v6346_v46, 3 }
 0x4bf   : > { %v6425_v8 = vsel %vm6380_vm14, %v6422_v25, %v6424_v43  ;;  %v6487_v19 = vadd.f32 %v6424_v43, %v11618_v47  ;;  %v6347_v43 = vsel %vm13693_vm12, %v6147_v26, 0.0 }
 0x4c0   : > { %v6486_v51 = vadd.f32 %v6425_v8, %v11596_v39 }
 0x4c1   : > { %v6842_v59 = vmul.f32 %v12769_v35, %v6487_v19  ;;  %v6966_v9 = vmul.f32 %v12780_v45, %v6487_v19  ;;  %v7123_v5 = vmul.f32 %v12917_v23, %v6487_v19  ;;  %v7247_v16 = vmul.f32 %v12920_v40, %v6487_v19 }
 0x4c2   : > { %v7122_v28 = vmul.f32 %v12917_v23, %v6486_v51  ;;  %v7246_v47 = vmul.f32 %v12920_v40, %v6486_v51  ;;  %v7080_v1 = vmul.f32 %v12914_v32, %v6486_v51  ;;  %v6841_v20 = vmul.f32 %v12769_v35, %v6486_v51 }
 0x4c3   : > { %v6905_v31 = vrot.slane %v6842_v59, 1  ;;  %v7184_v56 = vrot.slane %v7123_v5, 1  ;;  %v7308_v39 = vrot.slane %v7247_v16, 2  ;;  %v7029_v60 = vrot.slane %v6966_v9, 2 }
 0x4c4   : > { %v7182_v37 = vrot.slane %v7122_v28, 1  ;;  %v7306_v44 = vrot.slane %v7246_v47, 2  ;;  %v7096_v61 = vadd.f32 %v7080_v1, %v13609_v62  ;;  %v6903_v22 = vrot.slane %v6841_v20, 1 }
 0x4c5   : > { %v6965_v4 = vmul.f32 %v12780_v45, %v6486_v51  ;;  %v6798_v25 = vmul.f32 %v12901_v10, %v6486_v51  ;;  %v6426_v51 = vrot.slane %v6347_v43, 3 }
 0x4c6   : > { %v7183_v0 = vsel %vm523_vm0, %v7181_v12, %v7182_v37  ;;  %v7307_v52 = vsel %vm852_vm1, %v7305_v2, %v7306_v44  ;;  %v7185_v62 = vsel %vm523_vm0, %v7182_v37, %v7184_v56  ;;  %v7309_v29 = vsel %vm852_vm1, %v7306_v44, %v7308_v39  ;;  %v14155_v56 = vld [vmem:[#allocation48_spill] sm:$0xff] }
 0x4c7   : > { %v7219_v21 = vadd.f32 %v7183_v0, %v7095_v49  ;;  %v7220_v11 = vadd.f32 %v7185_v62, %v7096_v61  ;;  %v6904_v45 = vsel %vm523_vm0, %v6902_v54, %v6903_v22  ;;  %v7027_v10 = vrot.slane %v6965_v4, 2 }
 0x4c8   : > { %v8197_v36 = vpop.f32.mrb[28].mxu1  ;;  %v6937_v30 = vadd.f32 %v6904_v45, %v6813_v17  ;;  %v6814_v14 = vadd.f32 %v6798_v25, %v13641_v48  ;;  %v6906_v53 = vsel %vm523_vm0, %v6903_v22, %v6905_v31 }
 0x4c9   : > { %v6059_v6 = vadd.f32 %v8197_v36, %v12612_v55  ;;  %v6017_v42 = vpop.f32.mrb[29].mxu1  ;;  %v7343_v33 = vadd.f32 %v7307_v52, %v7219_v21  ;;  %v7344_v57 = vadd.f32 %v7309_v29, %v7220_v11  ;;  %v7028_v15 = vsel %vm852_vm1, %v7026_v24, %v7027_v10 }
 0x4ca   : > { %v6058_v49 = vadd.f32 %v12612_v55, %v6017_v42  ;;  %v7061_v13 = vadd.f32 %v7028_v15, %v6937_v30  ;;  %v6938_v48 = vadd.f32 %v6906_v53, %v6814_v14  ;;  %v7030_v8 = vsel %vm852_vm1, %v7027_v10, %v7029_v60  ;;  %v8512_v53 = vld [vmem:[#allocation9 + $0x8] sm:$0x3]  ;;  %v8514_v15 = vld [vmem:[#allocation2 + $0x90] sm:$0xff] }
 0x4cb   : > { %vm6089_vm15 = vcmp.gt.f32.partialorder %v6059_v6, 0.0  ;;  %v6119_v17 = vmul.f32 %v6059_v6, %v8999_v38  ;;  %v7363_v34 = vadd.f32 %v12936_v63, %v7343_v33  ;;  %v7364_v55 = vadd.f32 %v12936_v63, %v7344_v57  ;;  %v8513_v33 = vld [vmem:[#allocation2 + $0x88] sm:$0xff] }
 0x4cc   : > { %vm6088_vm10 = vcmp.gt.f32.partialorder %v6058_v49, 0.0  ;;  %v6118_v46 = vmul.f32 %v6058_v49, %v8999_v38  ;;  %v7062_v9 = vadd.f32 %v7030_v8, %v6938_v48  ;;  %v7642_v57 = vrot.slane %v8513_v33, 1 }
 0x4cd   : > { %v6149_v41 = vsel %vm6089_vm15, %v6059_v6, %v6119_v17  ;;  %vm7379_vm13 = vcmp.gt.f32.partialorder %v7363_v34, 0.0  ;;  %v7399_v12 = vmul.f32 %v12951_v50, %v7363_v34  ;;  %vm7380_vm5 = vcmp.gt.f32.partialorder %v7364_v55, 0.0  ;;  %v8515_v17 = vld [vmem:[#allocation2 + $0x80] sm:$0xff] }
 0x4ce   : > { %v6349_v19 = vsel %vm6259_vm9, %v6149_v41, 0.0  ;;  %v6148_v27 = vsel %vm6088_vm10, %v6058_v49, %v6118_v46  ;;  %v7400_v38 = vmul.f32 %v12951_v50, %v7364_v55  ;;  %v13736_v49 = vrot.slane %v8512_v53, %v14156_v18 }
 0x4cf   : > { %v6429_v2 = vrot.slane %v6349_v19, 3  ;;  %v6348_v3 = vsel %vm13677_vm11, %v6148_v27, 0.0  ;;  %v7415_v59 = vsel %vm7379_vm13, %v7363_v34, %v7399_v12  ;;  %v8516_v12 = vld [vmem:[#allocation2 + $0xb0] sm:$0xff] }
 0x4d0   : > { %v6427_v54 = vrot.slane %v6348_v3, 3  ;;  %8248 = vmatprep.mubr.f32.mxu1 %v7415_v59  ;;  %v7416_v16 = vsel %vm7380_vm5, %v7364_v55, %v7400_v38  ;;  %v8517_v3 = vld [vmem:[#allocation2 + $0xb8] sm:$0xff] }
 0x4d1   : > { %v6490_v5 = vadd.f32 %v6429_v2, %v14060_v7  ;;  %8249 = vmatmul.mubr.f32.gmra.mrb[42].mxu1 %v7416_v16  ;;  %v7649_v38 = vrot.slane %v8517_v3, 1 }
 0x4d2   : > { %v6428_v28 = vsel %vm6380_vm14, %v6426_v51, %v6427_v54  ;;  %v6430_v47 = vsel %vm6380_vm14, %v6427_v54, %v6429_v2  ;;  %v7647_v2 = vrot.slane %v8516_v12, 1  ;;  %v8518_v51 = vld [vmem:[#allocation2 + $0xa8] sm:$0xff] }
 0x4d3   : > { %v7126_v1 = vmul.f32 %v12917_v23, %v6490_v5  ;;  %v7250_v20 = vmul.f32 %v12920_v40, %v6490_v5  ;;  %v6488_v31 = vadd.f32 %v6428_v28, %v11696_v58  ;;  %v6489_v39 = vadd.f32 %v6430_v47, %v14155_v56 }
 0x4d4   : > { %v7646_v54 = vrot.slane %v8518_v51, 1  ;;  %v7650_v16 = vsel %vm523_vm0, %v7647_v2, %v7649_v38  ;;  %v8529_v38 = vld [vmem:[#allocation2 + $0x158] sm:$0xff] }
 0x4d5   : > { %v7081_v24 = vmul.f32 %v12914_v32, %v6488_v31  ;;  %v7124_v37 = vmul.f32 %v12917_v23, %v6488_v31  ;;  %v7125_v7 = vmul.f32 %v12917_v23, %v6489_v39  ;;  %v7248_v44 = vmul.f32 %v12920_v40, %v6488_v31 }
 0x4d6   : > { %v7249_v61 = vmul.f32 %v12920_v40, %v6489_v39  ;;  %v7082_v22 = vmul.f32 %v12914_v32, %v6489_v39  ;;  %v7189_v26 = vrot.slane %v7126_v1, 1  ;;  %v7313_v60 = vrot.slane %v7250_v20, 2  ;;  %v8519_v39 = vld [vmem:[#allocation2 + $0xd8] sm:$0xff] }
 0x4d7   : > { %v7097_v4 = vadd.f32 %v7081_v24, %v7061_v13  ;;  %v7186_v25 = vrot.slane %v7124_v37, 1  ;;  %v7187_v35 = vrot.slane %v7125_v7, 1  ;;  %v7310_v58 = vrot.slane %v7248_v44, 2  ;;  %v8520_v37 = vld [vmem:[#allocation2 + $0xe0] sm:$0xff]  ;;  %v8521_v44 = vld [vmem:[#allocation2 + $0xd0] sm:$0xff] }
 0x4d8   : > { %v7311_v0 = vrot.slane %v7249_v61, 2  ;;  %v7098_v52 = vadd.f32 %v7082_v22, %v7062_v9  ;;  %v7641_v13 = vrot.slane %v8515_v17, 1  ;;  %v7648_v1 = vsel %vm523_vm0, %v7646_v54, %v7647_v2  ;;  %v8528_v2 = vld [vmem:[#allocation2 + $0x150] sm:$0xff]  ;;  %v8530_v54 = vld [vmem:[#allocation2 + $0x148] sm:$0xff] }
 0x4d9   : > { %v7188_v62 = vsel %vm523_vm0, %v7186_v25, %v7187_v35  ;;  %v7190_v23 = vsel %vm523_vm0, %v7187_v35, %v7189_v26  ;;  %v7652_v24 = vrot.slane %v8519_v39, 1  ;;  %v7654_v7 = vrot.slane %v8520_v37, 1 }
 0x4da   : > { %v7312_v29 = vsel %vm852_vm1, %v7310_v58, %v7311_v0  ;;  %v7314_v36 = vsel %vm852_vm1, %v7311_v0, %v7313_v60  ;;  %v7221_v21 = vadd.f32 %v7188_v62, %v7097_v4  ;;  %v7222_v40 = vadd.f32 %v7190_v23, %v7098_v52 }
 0x4db   : > { %v7643_v41 = vsel %vm523_vm0, %v7641_v13, %v7642_v57  ;;  %v7651_v61 = vrot.slane %v8521_v44, 1  ;;  %v7655_v4 = vsel %vm523_vm0, %v7652_v24, %v7654_v7  ;;  %v8527_v13 = vld [vmem:[#allocation2 + $0x120] sm:$0xff]  ;;  %v7667_v3 = vrot.slane %v8528_v2, 1 }
 0x4dc   : > { %v7345_v11 = vadd.f32 %v7312_v29, %v7221_v21  ;;  %v7346_v32 = vadd.f32 %v7314_v36, %v7222_v40  ;;  %v8522_v29 = vld [vmem:[#allocation2 + $0x100] sm:$0xff]  ;;  %v8523_v36 = vld [vmem:[#allocation2 + $0x108] sm:$0xff]  ;;  %v8524_v40 = vld [vmem:[#allocation2 + $0xf8] sm:$0xff]  ;;  %v7669_v51 = vrot.slane %v8529_v38, 1 }
 0x4dd   : > { %v7653_v58 = vsel %vm523_vm0, %v7651_v61, %v7652_v24  ;;  %v7657_v23 = vrot.slane %v8522_v29, 1  ;;  %v7659_v21 = vrot.slane %v8523_v36, 1  ;;  %v8531_v24 = vld [vmem:[#allocation2 + $0x178] sm:$0xff]  ;;  %v8532_v7 = vld [vmem:[#allocation2 + $0x180] sm:$0xff]  ;;  %v8533_v61 = vld [vmem:[#allocation2 + $0x170] sm:$0xff] }
 0x4de   : > { %v7365_v45 = vadd.f32 %v12936_v63, %v7345_v11  ;;  %v7366_v10 = vadd.f32 %v12936_v63, %v7346_v32  ;;  %v7644_v63 = vrot.slane %v8514_v15, 1  ;;  %v7656_v11 = vrot.slane %v8524_v40, 1 }
 0x4df   : > { %v7672_v37 = vrot.slane %v8531_v24, 1  ;;  %v7674_v44 = vrot.slane %v8532_v7, 1 }
 0x4e0   : > { %vm7381_vm14 = vcmp.gt.f32.partialorder %v7365_v45, 0.0  ;;  %v7401_v6 = vmul.f32 %v12951_v50, %v7365_v45  ;;  %vm7382_vm2 = vcmp.gt.f32.partialorder %v7366_v10, 0.0  ;;  %v7402_v42 = vmul.f32 %v12951_v50, %v7366_v10 }
 0x4e1   : > { %v7645_v34 = vsel %vm523_vm0, %v7642_v57, %v7644_v63  ;;  %v8525_v57 = vld [vmem:[#allocation2 + $0x128] sm:$0xff]  ;;  %v8526_v63 = vld [vmem:[#allocation2 + $0x130] sm:$0xff] }
 0x4e2   : > { %v7417_v30 = vsel %vm7381_vm14, %v7365_v45, %v7401_v6  ;;  %v7418_v14 = vsel %vm7382_vm2, %v7366_v10, %v7402_v42  ;;  %v7660_v6 = vsel %vm523_vm0, %v7657_v23, %v7659_v21  ;;  %v7662_v15 = vrot.slane %v8525_v57, 1  ;;  %v8535_v21 = vld [vmem:[#allocation2 + $0x1a8] sm:$0xff] }
 0x4e3   : > { %8251 = vmatprep.mubr.f32.mxu1 %v7417_v30  ;;  %v7664_v17 = vrot.slane %v8526_v63, 1  ;;  %v7679_v40 = vrot.slane %v8535_v21, 1 }
 0x4e4   : > { %8252 = vmatmul.mubr.f32.gmra.mrb[44].mxu1 %v7418_v14  ;;  %v7658_v14 = vsel %vm523_vm0, %v7656_v11, %v7657_v23  ;;  %v8534_v23 = vld [vmem:[#allocation2 + $0x1a0] sm:$0xff]  ;;  %v8536_v11 = vld [vmem:[#allocation2 + $0x198] sm:$0xff] }
 0x4e5   : > { %v7677_v36 = vrot.slane %v8534_v23, 1 }
 0x4fa   : > { %v8232_v48 = vpop.f32.mrb[30].mxu1 }
 0x4fb   : > { %v7586_v46 = vadd.f32 %v8232_v48, %v13736_v49  ;;  %v7502_v50 = vpop.f32.mrb[31].mxu1  ;;  %v7661_v48 = vrot.slane %v8527_v13, 1 }
 0x4fc   : > { %v7585_v55 = vadd.f32 %v13736_v49, %v7502_v50 }
 0x4fd   : > { %v7602_v43 = vmul.f32 0.2, %v7586_v46 }
 0x4fe   : > { %v7601_v8 = vmul.f32 0.2, %v7585_v55  ;;  %v7665_v55 = vsel %vm523_vm0, %v7662_v15, %v7664_v17 }
 0x4ff   : > { %v7698_v19 = vadd.f32 %v7645_v34, %v7602_v43 }
 0x500   : > { %v7697_v27 = vadd.f32 %v7643_v41, %v7601_v8  ;;  %v7663_v8 = vsel %vm523_vm0, %v7661_v48, %v7662_v15 }
 0x501   : > { %7714 = vst [vmem:[%s8971_s28 + $0x8] sm:$0xff] %v7698_v19 }
 0x502   : > { %7713 = vst [vmem:[%s8971_s28] sm:$0xff] %v7697_v27 }
 0x512   : > { %v8235_v59 = vpop.f32.mrb[32].mxu1 }
 0x513   : > { %v7588_v9 = vadd.f32 %v8235_v59, %v13736_v49  ;;  %v7512_v5 = vpop.f32.mrb[33].mxu1  ;;  %v7666_v59 = vrot.slane %v8530_v54, 1 }
 0x514   : > { %v7587_v28 = vadd.f32 %v13736_v49, %v7512_v5 }
 0x515   : > { %v7604_v47 = vmul.f32 0.2, %v7588_v9 }
 0x516   : > { %v7603_v20 = vmul.f32 0.2, %v7587_v28  ;;  %v7670_v28 = vsel %vm523_vm0, %v7667_v3, %v7669_v51 }
 0x517   : > { %v7700_v31 = vadd.f32 %v7650_v16, %v7604_v47 }
 0x518   : > { %v7699_v56 = vadd.f32 %v7648_v1, %v7603_v20  ;;  %v7668_v20 = vsel %vm523_vm0, %v7666_v59, %v7667_v3 }
 0x519   : > { %7716 = vst [vmem:[%s8971_s28 + $0x18] sm:$0xff] %v7700_v31 }
 0x51a   : > { %7715 = vst [vmem:[%s8971_s28 + $0x10] sm:$0xff] %v7699_v56 }
 0x52b   : > { %v8238_v22 = vpop.f32.mrb[34].mxu1 }
 0x52c   : > { %v7590_v26 = vadd.f32 %v8238_v22, %v13736_v49  ;;  %v7522_v60 = vpop.f32.mrb[35].mxu1  ;;  %v7671_v22 = vrot.slane %v8533_v61, 1 }
 0x52d   : > { %v7589_v25 = vadd.f32 %v13736_v49, %v7522_v60 }
 0x52e   : > { %v7606_v35 = vmul.f32 0.2, %v7590_v26 }
 0x52f   : > { %v7605_v0 = vmul.f32 0.2, %v7589_v25  ;;  %v7675_v25 = vsel %vm523_vm0, %v7672_v37, %v7674_v44 }
 0x530   : > { %v7702_v52 = vadd.f32 %v7655_v4, %v7606_v35 }
 0x531   : > { %v7701_v62 = vadd.f32 %v7653_v58, %v7605_v0  ;;  %v7673_v0 = vsel %vm523_vm0, %v7671_v22, %v7672_v37 }
 0x532   : > { %7718 = vst [vmem:[%s8971_s28 + $0x28] sm:$0xff] %v7702_v52 }
 0x533   : > { %7717 = vst [vmem:[%s8971_s28 + $0x20] sm:$0xff] %v7701_v62 }
 0x545   : > { %v8241_v32 = vpop.f32.mrb[36].mxu1 }
 0x546   : > { %v7592_v45 = vadd.f32 %v8241_v32, %v13736_v49  ;;  %v7532_v10 = vpop.f32.mrb[37].mxu1  ;;  %v7676_v32 = vrot.slane %v8536_v11, 1 }
 0x547   : > { %v7591_v42 = vadd.f32 %v13736_v49, %v7532_v10 }
 0x548   : > { %v7608_v30 = vmul.f32 0.2, %v7592_v45 }
 0x549   : > { %v7607_v53 = vmul.f32 0.2, %v7591_v42  ;;  %v7680_v42 = vsel %vm523_vm0, %v7677_v36, %v7679_v40 }
 0x54a   : > { %v7704_v18 = vadd.f32 %v7660_v6, %v7608_v30 }
 0x54b   : > { %v7703_v33 = vadd.f32 %v7658_v14, %v7607_v53  ;;  %v7678_v53 = vsel %vm523_vm0, %v7676_v32, %v7677_v36 }
 0x54c   : > { %7720 = vst [vmem:[%s8971_s28 + $0x38] sm:$0xff] %v7704_v18 }
 0x54d   : > { %7719 = vst [vmem:[%s8971_s28 + $0x30] sm:$0xff] %v7703_v33 }
 0x563   : > { %v8244_v46 = vpop.f32.mrb[38].mxu1 }
 0x564   : > { %v7594_v50 = vadd.f32 %v8244_v46, %v13736_v49  ;;  %v7542_v34 = vpop.f32.mrb[39].mxu1 }
 0x565   : > { %v7593_v43 = vadd.f32 %v13736_v49, %v7542_v34 }
 0x566   : > { %v7610_v41 = vmul.f32 0.2, %v7594_v50 }
 0x567   : > { %v7609_v19 = vmul.f32 0.2, %v7593_v43 }
 0x568   : > { %v7706_v27 = vadd.f32 %v7665_v55, %v7610_v41 }
 0x569   : > { %v7705_v12 = vadd.f32 %v7663_v8, %v7609_v19 }
 0x56a   : > { %7722 = vst [vmem:[%s8971_s28 + $0x48] sm:$0xff] %v7706_v27 }
 0x56b   : > { %7721 = vst [vmem:[%s8971_s28 + $0x40] sm:$0xff] %v7705_v12 }
 0x576   : > { %v8247_v9 = vpop.f32.mrb[40].mxu1 }
 0x577   : > { %v7596_v5 = vadd.f32 %v8247_v9, %v13736_v49  ;;  %v7552_v16 = vpop.f32.mrb[41].mxu1 }
 0x578   : > { %v7595_v47 = vadd.f32 %v13736_v49, %v7552_v16 }
 0x579   : > { %v7612_v1 = vmul.f32 0.2, %v7596_v5 }
 0x57a   : > { %v7611_v31 = vmul.f32 0.2, %v7595_v47 }
 0x57b   : > { %v7708_v56 = vadd.f32 %v7670_v28, %v7612_v1 }
 0x57c   : > { %v7707_v39 = vadd.f32 %v7668_v20, %v7611_v31 }
 0x57d   : > { %7724 = vst [vmem:[%s8971_s28 + $0x58] sm:$0xff] %v7708_v56 }
 0x57e   : > { %7723 = vst [vmem:[%s8971_s28 + $0x50] sm:$0xff] %v7707_v39 }
 0x5a4   : > { %v8250_v26 = vpop.f32.mrb[42].mxu1 }
 0x5a5   : > { %v7598_v60 = vadd.f32 %v8250_v26, %v13736_v49  ;;  %v7562_v4 = vpop.f32.mrb[43].mxu1 }
 0x5a6   : > { %v7597_v35 = vadd.f32 %v13736_v49, %v7562_v4 }
 0x5a7   : > { %v7614_v58 = vmul.f32 0.2, %v7598_v60 }
 0x5a8   : > { %v7613_v52 = vmul.f32 0.2, %v7597_v35 }
 0x5a9   : > { %v7710_v62 = vadd.f32 %v7675_v25, %v7614_v58 }
 0x5aa   : > { %v7709_v29 = vadd.f32 %v7673_v0, %v7613_v52 }
 0x5ab   : > { %7726 = vst [vmem:[%s8971_s28 + $0x68] sm:$0xff] %v7710_v62 }
 0x5ac   : > { %7725 = vst [vmem:[%s8971_s28 + $0x60] sm:$0xff] %v7709_v29 }
 0x5b7   : > { %v8253_v45 = vpop.f32.mrb[44].mxu1 }
 0x5b8   : > { %v7600_v10 = vadd.f32 %v8253_v45, %v13736_v49  ;;  %v7572_v6 = vpop.f32.mrb[45].mxu1 }
 0x5b9   : > { %v7599_v30 = vadd.f32 %v13736_v49, %v7572_v6 }
 0x5ba   : > { %v7616_v14 = vmul.f32 0.2, %v7600_v10 }
 0x5bb   : > { %v7615_v18 = vmul.f32 0.2, %v7599_v30 }
 0x5bc   : > { %v7712_v33 = vadd.f32 %v7680_v42, %v7616_v14 }
 0x5bd   : > { %v7711_v57 = vadd.f32 %v7678_v53, %v7615_v18 }
 0x5be   : > { %7728 = vst [vmem:[%s8971_s28 + $0x78] sm:$0xff] %v7712_v33 }
 0x5bf   : > { %7727 = vst [vmem:[%s8971_s28 + $0x70] sm:$0xff] %v7711_v57 }
 0x5c0   : > { %8658 = shalt.err (!%p8655_p4)
}
 0x5c1   : > { %s8659_s10 = scalar_lea.hbm %s13792_s5, 2048  ;;  %s8663_s23 = scalar_lea.hbm %s13854_s4, 8192 }
 0x5c2   : > { %p8660_p5 = scmp.ne.s32.totalorder %s13792_s5, %s8659_s10  ;;  %p8664_p9 = scmp.lt.u32.totalorder %s13792_s5, %s13854_s4 }
 0x5c3   : > { %p8665_p11 = scmp.lt.u32.totalorder %s8663_s23, %s8659_s10  ;;  %p8667_p3 = scmp.lt.u32.totalorder %s8659_s10, %s13792_s5 }
 0x5c4   : > { %p8661_p6 = pnand %p8660_p5, %p14157_p2 }
 0x5c5   : > { %p8666_p13 = por %p8665_p11, %p8664_p9 }
 0x5c6   : > { %p8662_p7 = pneg %p8661_p6 }
 0x5c7   : > { %p8668_p0 = por %p8667_p3, %p8666_p13 }
 0x5c9   : > { %p8669_p8 = pnand %p8668_p0, %p8662_p7 }
 0x5cb   : > { %8672 = shalt.err (!%p8669_p8)
}
 0x5cc   : > { %s8763_s24 = smov 128   ;;  %s8764_s7 = smov 8  }
 0x5cd   : > { %8362 = dma.vmem_to_hbm [thread:$0]  (%p14157_p2), %s13787_s18, 2048, %s13792_s5, %s13798_s21, %s8763_s24, %s8763_s24, %s8764_s7  }
 0x5ce PF: > { %p8384_p10 = scmp.ge.s32.totalorder %s8749_s22, 2  ;;  %s7761_s6 = sand.u32 1, %s8721_s15  }
 0x5cf   : > { %p14158_p12 = scmp.ne.s32.totalorder %s13947_s30, 0  ;;  %s7762_s8 = scalar_lea.sflag [#allocation6], %s7761_s6 }
 0x5d1   : > { %p8375_p1 = pnand %p8384_p10, %p14158_p12 }
 0x5d3   : > { %8716 = dma.done.wait (!%p8375_p1), %s7762_s8, 2048  }
 0x5d4   : > { %8718 = vsyncadd (!%p8375_p1), %s7762_s8, 4294965248  ;;  %s19_s22 = sadd.s32 1, %s8749_s22   ;;  %s14159_s19 = sld [smem:[#allocation20_spill]] }
 0x5d5   : > { %p16_p4 = scmp.ge.s32.totalorder %s19_s22, 6   ;;  %s14160_s18 = sld [smem:[#allocation16_spill]] }
 0x5d6   : > { %s14161_s29 = sld [smem:[#allocation17_spill]]  ;;  %s14162_s20 = sld [smem:[#allocation18_spill]] }
 0x5d7   : > { %s14163_s21 = sld [smem:[#allocation19_spill]]  ;;  %s14164_s15 = smov %s8725_s16 }
 0x5d8   : > { %s14165_s16 = smov %s8729_s17  ;;  %18 = sbr.rel (!%p16_p4) target bundleno = 7 (0x7), region = 82 }
 0x5da   : > { %s14166_s17 = smov %s14159_s19 }
 0x5dc   : > { %s14167_s19 = smov %s14161_s29 }
 0x5df   :  { %7767 = vsyncpa [#allocation5], 1 }
 0x5e0   :  { %7769 = vsyncpa [#allocation5 + $0x1], 1 }
 0x5e1   :  { %7770 = vsyncpa [#allocation8], 1 }
 0x5e2   :  { %7771 = vsyncpa [#allocation6], 1 }
 0x5e3   :  { %7773 = vsyncpa [#allocation6 + $0x1], 1 }
 0x5e4   :  { %7774 = vsyncmov [#allocation3] }
 0x5e7   :  { %s7775_s30 = vpop.sfrf %7774 }
 0x5e8   :  { %p7873_p2 = scmp.ne.s32.totalorder %s7775_s30, 0 }
 0x5ea   :  { %7779 = shalt.err (%p7873_p2)  }

</bundles_post_ra>
